<compile_context>
chip_gen: v7x
topology: tpu7x:2x2x1
jax: 0.10.0
libtpu: 0.0.40
codegen_flags: <defaults>
</compile_context>

<pallas_src>
from functools import partial

import numpy as np
import jax
import jax.numpy as jnp
from jax.experimental import pallas as pl
from jax.experimental.pallas import tpu as pltpu

LEAK = 0.2
EPS = 1e-5


def _leaky(v):
    return jnp.where(v >= 0, v, LEAK * v)


# ------------------------------ fused kernel -------------------------------- #

def _make_fused_kernel(batch_norm: bool):
    def kernel(p1_ref, w1_ref, b1_ref,
               s_ref, w2_ref, b2_ref, g1_ref, be1_ref,
               wf_ref, bf_ref, g2_ref, be2_ref,
               w3_ref, b3_ref,
               o_ref, h2_ref):
        f32 = jnp.float32
        n_kpos = s_ref.shape[0]          # 16 kernel positions of c2 (4x4)
        n_rows = s_ref.shape[1]          # B * OH2 * OW2 rows of h2 (order: spatial, batch)
        n_sp = wf_ref.shape[0]           # OH2 * OW2 spatial positions
        batch = o_ref.shape[0]
        oc2 = w2_ref.shape[2]            # 128

        # ---- c1: im2col matmul + bias + leaky_relu ----
        h1 = jnp.dot(p1_ref[...], w1_ref[...], preferred_element_type=f32) + b1_ref[...]
        h1 = _leaky(h1)                  # (B*OH1*OW1, 64), channels-last rows

        # ---- c2: direct conv as sum over kernel positions; padding + stride
        #      are folded into the 0/1 selection matrices (pure MXU, no gather).
        acc = jnp.zeros((n_rows, oc2), f32)
        for g in range(n_kpos):
            rows = jnp.dot(s_ref[g], h1, preferred_element_type=f32)          # (n_rows, 64)
            acc = acc + jnp.dot(rows, w2_ref[g], preferred_element_type=f32)  # (n_rows, 128)
        y = acc + b2_ref[...]

        if batch_norm:  # BatchNorm2d, training-mode batch stats over (B, OH, OW)
            m = jnp.mean(y, axis=0, keepdims=True)
            v = jnp.mean((y - m) ** 2, axis=0, keepdims=True)
            y = (y - m) * jax.lax.rsqrt(v + EPS) * g1_ref[...] + be1_ref[...]
        h2_ref[...] = _leaky(y)          # keep h2 resident in VMEM

        # ---- flatten (PyTorch NCHW order baked into wf on the host) + fc1 ----
        f = jnp.zeros((batch, wf_ref.shape[2]), f32)
        for sp in range(n_sp):
            f = f + jnp.dot(h2_ref[sp * batch:(sp + 1) * batch, :], wf_ref[sp],
                            preferred_element_type=f32)
        f = f + bf_ref[...]

        if batch_norm:  # BatchNorm1d over batch rows
            m = jnp.mean(f, axis=0, keepdims=True)
            v = jnp.mean((f - m) ** 2, axis=0, keepdims=True)
            f = (f - m) * jax.lax.rsqrt(v + EPS) * g2_ref[...] + be2_ref[...]
        f = _leaky(f)

        # ---- fc2 as a VPU/XLU row-reduction (avoid an N=1 MXU matmul) ----
        o_ref[...] = jnp.sum(f * w3_ref[...], axis=-1, keepdims=True) + b3_ref[...]

    return kernel


# ------------------------------ host-side prep ------------------------------ #

def _im2col_c1(x, k=4, st=2, p=1):
    """c1 im2col via static strided slices: (B,C,H,W) -> (B*OH*OW, C*k*k)."""
    B, C, H, W = x.shape
    xp = jnp.pad(x, ((0, 0), (0, 0), (p, p), (p, p)))
    oh = (H + 2 * p - k) // st + 1
    ow = (W + 2 * p - k) // st + 1
    cols = [xp[:, :, kh:kh + st * oh:st, kw:kw + st * ow:st]   # (B, C, oh, ow)
            for kh in range(k) for kw in range(k)]
    pat = jnp.stack(cols, axis=2)                              # (B, C, k*k, oh, ow)
    pat = pat.transpose(0, 3, 4, 1, 2)                         # (B, oh, ow, C, k*k)
    return pat.reshape(B * oh * ow, C * k * k)                 # cols ordered (c, kh, kw)


def prepare_params(params, color_channels, dim, batch):
    """One-time weight reordering + selection-mask construction (outside hot path)."""
    k, st, p = 4, 2, 1
    oh1 = ow1 = dim // 2
    oh2 = ow2 = dim // 4
    n_sp = oh2 * ow2
    fc_hidden = params["fc1_w"].shape[0]

    # c1 weight: (64, C, 4, 4) -> (C*16, 64); matches p1 column order (c, kh, kw)
    w1 = params["c1_w"].reshape(64, color_channels * k * k).T
    # c2 weight per kernel position: (16, 64, 128)  [ic, oc]
    w2 = jnp.transpose(params["c2_w"], (2, 3, 1, 0)).reshape(k * k, 64, 128)
    # 0/1 selection masks implementing pad=1 / stride=2 patch extraction for c2.
    # Rows of h2 are ordered (spatial, batch); columns index h1 rows (b, ih, iw).
    S = np.zeros((k * k, n_sp * batch, batch * oh1 * ow1), np.float32)
    for kh in range(k):
        for kw in range(k):
            g = kh * k + kw
            for r2 in range(oh2):
                for c2 in range(ow2):
                    ih = st * r2 - p + kh
                    iw = st * c2 - p + kw
                    if 0 <= ih < oh1 and 0 <= iw < ow1:
                        for b in range(batch):
                            S[g, (r2 * ow2 + c2) * batch + b,
                              b * oh1 * ow1 + ih * ow1 + iw] = 1.0
    # fc1 weight: (1024, 128*n_sp) with NCHW-flatten columns -> (n_sp, 128, 1024)
    wf = params["fc1_w"].T.reshape(128, n_sp, fc_hidden).transpose(1, 0, 2)

    return dict(
        w1=w1, b1=params["c1_b"].reshape(1, 64),
        S=jnp.asarray(S), w2=w2, b2=params["c2_b"].reshape(1, 128),
        g1=params.get("bn1_g", jnp.ones((128,), jnp.float32)).reshape(1, 128),
        be1=params.get("bn1_b", jnp.zeros((128,), jnp.float32)).reshape(1, 128),
        wf=wf, bf=params["fc1_b"].reshape(1, -1),
        g2=params.get("bn2_g", jnp.ones((fc_hidden,), jnp.float32)).reshape(1, -1),
        be2=params.get("bn2_b", jnp.zeros((fc_hidden,), jnp.float32)).reshape(1, -1),
        w3=params["fc2_w"].reshape(1, -1), b3=params["fc2_b"].reshape(1, 1),
    )


@partial(jax.jit, static_argnames=("batch_norm",))
def discriminator_forward(x, prep, batch_norm=True):
    B = x.shape[0]
    p1 = _im2col_c1(x)                                   # (B*OH1*OW1, C*16)

    args = (p1, prep["w1"], prep["b1"],
            prep["S"], prep["w2"], prep["b2"], prep["g1"], prep["be1"],
            prep["wf"], prep["bf"], prep["g2"], prep["be2"],
            prep["w3"], prep["b3"])

    n_kpos, n_rows, n_h1 = prep["S"].shape
    n_sp, _, fc_hidden = prep["wf"].shape
    flops = 2 * (p1.shape[0] * p1.shape[1] * prep["w1"].shape[1]           # c1
                 + n_kpos * (n_rows * n_h1 * 64 + n_rows * 64 * 128)       # c2
                 + n_sp * B * 128 * fc_hidden                              # fc1
                 + B * fc_hidden)                                          # fc2
    bytes_accessed = sum(a.size * a.dtype.itemsize for a in args) + B * 4
    transcendentals = (128 + fc_hidden) if batch_norm else 0

    return pl.pallas_call(
        _make_fused_kernel(batch_norm),
        out_shape=jax.ShapeDtypeStruct((B, 1), jnp.float32),
        in_specs=[pl.BlockSpec(memory_space=pltpu.MemorySpace.VMEM)] * len(args),
        out_specs=pl.BlockSpec(memory_space=pltpu.MemorySpace.VMEM),
        scratch_shapes=[pltpu.VMEM((n_rows, 128), jnp.float32)],
        compiler_params=pltpu.CompilerParams(vmem_limit_bytes=32 * 1024 * 1024),
        cost_estimate=pl.CostEstimate(flops=int(flops),
                                      transcendentals=int(transcendentals),
                                      bytes_accessed=int(bytes_accessed)),
    )(*args)


# --------------------------- pure-JAX reference ----------------------------- #

def reference_forward(x, params, batch_norm=True):
    def lrelu(v):
        return jnp.where(v >= 0, v, LEAK * v)
    dn = ("NCHW", "OIHW", "NCHW")
    y = jax.lax.conv_general_dilated(x, params["c1_w"], (2, 2), ((1, 1), (1, 1)),
                                     dimension_numbers=dn)
    y = lrelu(y + params["c1_b"][None, :, None, None])
    y = jax.lax.conv_general_dilated(y, params["c2_w"], (2, 2), ((1, 1), (1, 1)),
                                     dimension_numbers=dn)
    y = y + params["c2_b"][None, :, None, None]
    if batch_norm:
        m = y.mean(axis=(0, 2, 3), keepdims=True)
        v = ((y - m) ** 2).mean(axis=(0, 2, 3), keepdims=True)
        y = (y - m) * jax.lax.rsqrt(v + EPS)
        y = y * params["bn1_g"][None, :, None, None] + params["bn1_b"][None, :, None, None]
    y = lrelu(y)
    y = y.reshape(x.shape[0], -1)
    y = y @ params["fc1_w"].T + params["fc1_b"]
    if batch_norm:
        m = y.mean(axis=0, keepdims=True)
        v = ((y - m) ** 2).mean(axis=0, keepdims=True)
        y = (y - m) * jax.lax.rsqrt(v + EPS) * params["bn2_g"] + params["bn2_b"]
    y = lrelu(y)
    return y @ params["fc2_w"].T + params["fc2_b"]


# ----------------------------------- main ----------------------------------- #

if __name__ == "__main__":
    B, C, DIM = 2, 4, 16            # args.color_channels=4, args.dim=16, batch=2
    BATCH_NORM = True               # args.batch_norm
    # TODO(synk): spectral_norm only re-parameterizes weights (identity on this
    # synthetic forward with fresh weights); not modeled.
    FC_IN = 128 * (DIM // 4) ** 2   # 2048

    key = jax.random.PRNGKey(0)
    ks = jax.random.split(key, 12)
    s = 0.05
    params = {
        "c1_w": s * jax.random.normal(ks[0], (64, C, 4, 4), jnp.float32),
        "c1_b": s * jax.random.normal(ks[1], (64,), jnp.float32),
        "c2_w": s * jax.random.normal(ks[2], (128, 64, 4, 4), jnp.float32),
        "c2_b": s * jax.random.normal(ks[3], (128,), jnp.float32),
        "bn1_g": 1.0 + 0.1 * jax.random.normal(ks[4], (128,), jnp.float32),
        "bn1_b": 0.1 * jax.random.normal(ks[5], (128,), jnp.float32),
        "fc1_w": s * jax.random.normal(ks[6], (1024, FC_IN), jnp.float32),
        "fc1_b": s * jax.random.normal(ks[7], (1024,), jnp.float32),
        "bn2_g": 1.0 + 0.1 * jax.random.normal(ks[8], (1024,), jnp.float32),
        "bn2_b": 0.1 * jax.random.normal(ks[9], (1024,), jnp.float32),
        "fc2_w": s * jax.random.normal(ks[10], (1, 1024), jnp.float32),
        "fc2_b": jnp.zeros((1,), jnp.float32),
    }
    x = jax.random.normal(ks[11], (B, C, DIM, DIM), jnp.float32)

    prep = prepare_params(params, C, DIM, B)            # one-time weight reorder
    out = discriminator_forward(x, prep, batch_norm=BATCH_NORM)
    out = jax.block_until_ready(out)
    assert out.shape == (B, 1), out.shape

    ref = reference_forward(x, params, batch_norm=BATCH_NORM)
    assert jnp.allclose(out, ref, rtol=1e-3, atol=1e-3), (out, ref)

    print("KERNEL_OK")
</pallas_src>

<mosaic_0001>
module attributes {stable_mosaic.version = 11 : i64} {
  func.func @kernel(%arg0: memref<128x64xf32, #tpu.memory_space<vmem>>, %arg1: memref<64x64xf32, #tpu.memory_space<vmem>>, %arg2: memref<1x64xf32, #tpu.memory_space<vmem>>, %arg3: memref<16x32x128xf32, #tpu.memory_space<vmem>>, %arg4: memref<16x64x128xf32, #tpu.memory_space<vmem>>, %arg5: memref<1x128xf32, #tpu.memory_space<vmem>>, %arg6: memref<1x128xf32, #tpu.memory_space<vmem>>, %arg7: memref<1x128xf32, #tpu.memory_space<vmem>>, %arg8: memref<16x128x1024xf32, #tpu.memory_space<vmem>>, %arg9: memref<1x1024xf32, #tpu.memory_space<vmem>>, %arg10: memref<1x1024xf32, #tpu.memory_space<vmem>>, %arg11: memref<1x1024xf32, #tpu.memory_space<vmem>>, %arg12: memref<1x1024xf32, #tpu.memory_space<vmem>>, %arg13: memref<1x1xf32, #tpu.memory_space<vmem>>, %arg14: memref<2x1xf32, #tpu.memory_space<vmem>>, %arg15: memref<32x128xf32, #tpu.memory_space<vmem>>) attributes {dimension_semantics = [], scalar_prefetch = 0 : i64, scratch_operands = 1 : i64, tpu.core_type = #tpu.core_type<tc>} {
    %c0 = arith.constant 0 : index
    %c0_0 = arith.constant 0 : index
    %0 = vector.load %arg0[%c0, %c0_0] : memref<128x64xf32, #tpu.memory_space<vmem>>, vector<128x64xf32>
    %c0_1 = arith.constant 0 : index
    %c0_2 = arith.constant 0 : index
    %1 = vector.load %arg1[%c0_1, %c0_2] : memref<64x64xf32, #tpu.memory_space<vmem>>, vector<64x64xf32>
    %cst = arith.constant dense<0.000000e+00> : vector<128x64xf32>
    %2 = tpu.matmul %0, %1, %cst {dimension_numbers = #tpu.dot_dimension_numbers<[1], [0], [0], [1], [0, 0, 1, 1], [], []>} : vector<128x64xf32>, vector<64x64xf32>, vector<128x64xf32> -> vector<128x64xf32>
    %c0_3 = arith.constant 0 : index
    %c0_4 = arith.constant 0 : index
    %3 = vector.load %arg2[%c0_3, %c0_4] : memref<1x64xf32, #tpu.memory_space<vmem>>, vector<1x64xf32>
    %4 = vector.broadcast %3 : vector<1x64xf32> to vector<128x64xf32>
    %5 = arith.addf %2, %4 : vector<128x64xf32>
    %cst_5 = arith.constant 0.000000e+00 : f32
    %6 = vector.broadcast %cst_5 : f32 to vector<128x64xf32>
    %7 = arith.cmpf oge, %5, %6 : vector<128x64xf32>
    %cst_6 = arith.constant 2.000000e-01 : f32
    %8 = vector.broadcast %cst_6 : f32 to vector<128x64xf32>
    %9 = arith.mulf %8, %5 : vector<128x64xf32>
    %10 = arith.select %7, %5, %9 : vector<128x64xi1>, vector<128x64xf32>
    %cst_7 = arith.constant 0.000000e+00 : f32
    %11 = vector.broadcast %cst_7 : f32 to vector<32x128xf32>
    %c0_8 = arith.constant 0 : index
    %c0_9 = arith.constant 0 : index
    %c0_10 = arith.constant 0 : index
    %12 = vector.load %arg3[%c0_8, %c0_9, %c0_10] : memref<16x32x128xf32, #tpu.memory_space<vmem>>, vector<1x32x128xf32>
    %13 = vector.shape_cast %12 : vector<1x32x128xf32> to vector<32x128xf32>
    %cst_11 = arith.constant dense<0.000000e+00> : vector<32x64xf32>
    %14 = tpu.matmul %13, %10, %cst_11 {dimension_numbers = #tpu.dot_dimension_numbers<[1], [0], [0], [1], [0, 0, 1, 1], [], []>} : vector<32x128xf32>, vector<128x64xf32>, vector<32x64xf32> -> vector<32x64xf32>
    %c0_12 = arith.constant 0 : index
    %c0_13 = arith.constant 0 : index
    %c0_14 = arith.constant 0 : index
    %15 = vector.load %arg4[%c0_12, %c0_13, %c0_14] : memref<16x64x128xf32, #tpu.memory_space<vmem>>, vector<1x64x128xf32>
    %16 = vector.shape_cast %15 : vector<1x64x128xf32> to vector<64x128xf32>
    %cst_15 = arith.constant dense<0.000000e+00> : vector<32x128xf32>
    %17 = tpu.matmul %14, %16, %cst_15 {dimension_numbers = #tpu.dot_dimension_numbers<[1], [0], [0], [1], [0, 0, 1, 1], [], []>} : vector<32x64xf32>, vector<64x128xf32>, vector<32x128xf32> -> vector<32x128xf32>
    %18 = arith.addf %11, %17 : vector<32x128xf32>
    %c1 = arith.constant 1 : index
    %c0_16 = arith.constant 0 : index
    %c0_17 = arith.constant 0 : index
    %19 = vector.load %arg3[%c1, %c0_16, %c0_17] : memref<16x32x128xf32, #tpu.memory_space<vmem>>, vector<1x32x128xf32>
    %20 = vector.shape_cast %19 : vector<1x32x128xf32> to vector<32x128xf32>
    %cst_18 = arith.constant dense<0.000000e+00> : vector<32x64xf32>
    %21 = tpu.matmul %20, %10, %cst_18 {dimension_numbers = #tpu.dot_dimension_numbers<[1], [0], [0], [1], [0, 0, 1, 1], [], []>} : vector<32x128xf32>, vector<128x64xf32>, vector<32x64xf32> -> vector<32x64xf32>
    %c1_19 = arith.constant 1 : index
    %c0_20 = arith.constant 0 : index
    %c0_21 = arith.constant 0 : index
    %22 = vector.load %arg4[%c1_19, %c0_20, %c0_21] : memref<16x64x128xf32, #tpu.memory_space<vmem>>, vector<1x64x128xf32>
    %23 = vector.shape_cast %22 : vector<1x64x128xf32> to vector<64x128xf32>
    %cst_22 = arith.constant dense<0.000000e+00> : vector<32x128xf32>
    %24 = tpu.matmul %21, %23, %cst_22 {dimension_numbers = #tpu.dot_dimension_numbers<[1], [0], [0], [1], [0, 0, 1, 1], [], []>} : vector<32x64xf32>, vector<64x128xf32>, vector<32x128xf32> -> vector<32x128xf32>
    %25 = arith.addf %18, %24 : vector<32x128xf32>
    %c2 = arith.constant 2 : index
    %c0_23 = arith.constant 0 : index
    %c0_24 = arith.constant 0 : index
    %26 = vector.load %arg3[%c2, %c0_23, %c0_24] : memref<16x32x128xf32, #tpu.memory_space<vmem>>, vector<1x32x128xf32>
    %27 = vector.shape_cast %26 : vector<1x32x128xf32> to vector<32x128xf32>
    %cst_25 = arith.constant dense<0.000000e+00> : vector<32x64xf32>
    %28 = tpu.matmul %27, %10, %cst_25 {dimension_numbers = #tpu.dot_dimension_numbers<[1], [0], [0], [1], [0, 0, 1, 1], [], []>} : vector<32x128xf32>, vector<128x64xf32>, vector<32x64xf32> -> vector<32x64xf32>
    %c2_26 = arith.constant 2 : index
    %c0_27 = arith.constant 0 : index
    %c0_28 = arith.constant 0 : index
    %29 = vector.load %arg4[%c2_26, %c0_27, %c0_28] : memref<16x64x128xf32, #tpu.memory_space<vmem>>, vector<1x64x128xf32>
    %30 = vector.shape_cast %29 : vector<1x64x128xf32> to vector<64x128xf32>
    %cst_29 = arith.constant dense<0.000000e+00> : vector<32x128xf32>
    %31 = tpu.matmul %28, %30, %cst_29 {dimension_numbers = #tpu.dot_dimension_numbers<[1], [0], [0], [1], [0, 0, 1, 1], [], []>} : vector<32x64xf32>, vector<64x128xf32>, vector<32x128xf32> -> vector<32x128xf32>
    %32 = arith.addf %25, %31 : vector<32x128xf32>
    %c3 = arith.constant 3 : index
    %c0_30 = arith.constant 0 : index
    %c0_31 = arith.constant 0 : index
    %33 = vector.load %arg3[%c3, %c0_30, %c0_31] : memref<16x32x128xf32, #tpu.memory_space<vmem>>, vector<1x32x128xf32>
    %34 = vector.shape_cast %33 : vector<1x32x128xf32> to vector<32x128xf32>
    %cst_32 = arith.constant dense<0.000000e+00> : vector<32x64xf32>
    %35 = tpu.matmul %34, %10, %cst_32 {dimension_numbers = #tpu.dot_dimension_numbers<[1], [0], [0], [1], [0, 0, 1, 1], [], []>} : vector<32x128xf32>, vector<128x64xf32>, vector<32x64xf32> -> vector<32x64xf32>
    %c3_33 = arith.constant 3 : index
    %c0_34 = arith.constant 0 : index
    %c0_35 = arith.constant 0 : index
    %36 = vector.load %arg4[%c3_33, %c0_34, %c0_35] : memref<16x64x128xf32, #tpu.memory_space<vmem>>, vector<1x64x128xf32>
    %37 = vector.shape_cast %36 : vector<1x64x128xf32> to vector<64x128xf32>
    %cst_36 = arith.constant dense<0.000000e+00> : vector<32x128xf32>
    %38 = tpu.matmul %35, %37, %cst_36 {dimension_numbers = #tpu.dot_dimension_numbers<[1], [0], [0], [1], [0, 0, 1, 1], [], []>} : vector<32x64xf32>, vector<64x128xf32>, vector<32x128xf32> -> vector<32x128xf32>
    %39 = arith.addf %32, %38 : vector<32x128xf32>
    %c4 = arith.constant 4 : index
    %c0_37 = arith.constant 0 : index
    %c0_38 = arith.constant 0 : index
    %40 = vector.load %arg3[%c4, %c0_37, %c0_38] : memref<16x32x128xf32, #tpu.memory_space<vmem>>, vector<1x32x128xf32>
    %41 = vector.shape_cast %40 : vector<1x32x128xf32> to vector<32x128xf32>
    %cst_39 = arith.constant dense<0.000000e+00> : vector<32x64xf32>
    %42 = tpu.matmul %41, %10, %cst_39 {dimension_numbers = #tpu.dot_dimension_numbers<[1], [0], [0], [1], [0, 0, 1, 1], [], []>} : vector<32x128xf32>, vector<128x64xf32>, vector<32x64xf32> -> vector<32x64xf32>
    %c4_40 = arith.constant 4 : index
    %c0_41 = arith.constant 0 : index
    %c0_42 = arith.constant 0 : index
    %43 = vector.load %arg4[%c4_40, %c0_41, %c0_42] : memref<16x64x128xf32, #tpu.memory_space<vmem>>, vector<1x64x128xf32>
    %44 = vector.shape_cast %43 : vector<1x64x128xf32> to vector<64x128xf32>
    %cst_43 = arith.constant dense<0.000000e+00> : vector<32x128xf32>
    %45 = tpu.matmul %42, %44, %cst_43 {dimension_numbers = #tpu.dot_dimension_numbers<[1], [0], [0], [1], [0, 0, 1, 1], [], []>} : vector<32x64xf32>, vector<64x128xf32>, vector<32x128xf32> -> vector<32x128xf32>
    %46 = arith.addf %39, %45 : vector<32x128xf32>
    %c5 = arith.constant 5 : index
    %c0_44 = arith.constant 0 : index
    %c0_45 = arith.constant 0 : index
    %47 = vector.load %arg3[%c5, %c0_44, %c0_45] : memref<16x32x128xf32, #tpu.memory_space<vmem>>, vector<1x32x128xf32>
    %48 = vector.shape_cast %47 : vector<1x32x128xf32> to vector<32x128xf32>
    %cst_46 = arith.constant dense<0.000000e+00> : vector<32x64xf32>
    %49 = tpu.matmul %48, %10, %cst_46 {dimension_numbers = #tpu.dot_dimension_numbers<[1], [0], [0], [1], [0, 0, 1, 1], [], []>} : vector<32x128xf32>, vector<128x64xf32>, vector<32x64xf32> -> vector<32x64xf32>
    %c5_47 = arith.constant 5 : index
    %c0_48 = arith.constant 0 : index
    %c0_49 = arith.constant 0 : index
    %50 = vector.load %arg4[%c5_47, %c0_48, %c0_49] : memref<16x64x128xf32, #tpu.memory_space<vmem>>, vector<1x64x128xf32>
    %51 = vector.shape_cast %50 : vector<1x64x128xf32> to vector<64x128xf32>
    %cst_50 = arith.constant dense<0.000000e+00> : vector<32x128xf32>
    %52 = tpu.matmul %49, %51, %cst_50 {dimension_numbers = #tpu.dot_dimension_numbers<[1], [0], [0], [1], [0, 0, 1, 1], [], []>} : vector<32x64xf32>, vector<64x128xf32>, vector<32x128xf32> -> vector<32x128xf32>
    %53 = arith.addf %46, %52 : vector<32x128xf32>
    %c6 = arith.constant 6 : index
    %c0_51 = arith.constant 0 : index
    %c0_52 = arith.constant 0 : index
    %54 = vector.load %arg3[%c6, %c0_51, %c0_52] : memref<16x32x128xf32, #tpu.memory_space<vmem>>, vector<1x32x128xf32>
    %55 = vector.shape_cast %54 : vector<1x32x128xf32> to vector<32x128xf32>
    %cst_53 = arith.constant dense<0.000000e+00> : vector<32x64xf32>
    %56 = tpu.matmul %55, %10, %cst_53 {dimension_numbers = #tpu.dot_dimension_numbers<[1], [0], [0], [1], [0, 0, 1, 1], [], []>} : vector<32x128xf32>, vector<128x64xf32>, vector<32x64xf32> -> vector<32x64xf32>
    %c6_54 = arith.constant 6 : index
    %c0_55 = arith.constant 0 : index
    %c0_56 = arith.constant 0 : index
    %57 = vector.load %arg4[%c6_54, %c0_55, %c0_56] : memref<16x64x128xf32, #tpu.memory_space<vmem>>, vector<1x64x128xf32>
    %58 = vector.shape_cast %57 : vector<1x64x128xf32> to vector<64x128xf32>
    %cst_57 = arith.constant dense<0.000000e+00> : vector<32x128xf32>
    %59 = tpu.matmul %56, %58, %cst_57 {dimension_numbers = #tpu.dot_dimension_numbers<[1], [0], [0], [1], [0, 0, 1, 1], [], []>} : vector<32x64xf32>, vector<64x128xf32>, vector<32x128xf32> -> vector<32x128xf32>
    %60 = arith.addf %53, %59 : vector<32x128xf32>
    %c7 = arith.constant 7 : index
    %c0_58 = arith.constant 0 : index
    %c0_59 = arith.constant 0 : index
    %61 = vector.load %arg3[%c7, %c0_58, %c0_59] : memref<16x32x128xf32, #tpu.memory_space<vmem>>, vector<1x32x128xf32>
    %62 = vector.shape_cast %61 : vector<1x32x128xf32> to vector<32x128xf32>
    %cst_60 = arith.constant dense<0.000000e+00> : vector<32x64xf32>
    %63 = tpu.matmul %62, %10, %cst_60 {dimension_numbers = #tpu.dot_dimension_numbers<[1], [0], [0], [1], [0, 0, 1, 1], [], []>} : vector<32x128xf32>, vector<128x64xf32>, vector<32x64xf32> -> vector<32x64xf32>
    %c7_61 = arith.constant 7 : index
    %c0_62 = arith.constant 0 : index
    %c0_63 = arith.constant 0 : index
    %64 = vector.load %arg4[%c7_61, %c0_62, %c0_63] : memref<16x64x128xf32, #tpu.memory_space<vmem>>, vector<1x64x128xf32>
    %65 = vector.shape_cast %64 : vector<1x64x128xf32> to vector<64x128xf32>
    %cst_64 = arith.constant dense<0.000000e+00> : vector<32x128xf32>
    %66 = tpu.matmul %63, %65, %cst_64 {dimension_numbers = #tpu.dot_dimension_numbers<[1], [0], [0], [1], [0, 0, 1, 1], [], []>} : vector<32x64xf32>, vector<64x128xf32>, vector<32x128xf32> -> vector<32x128xf32>
    %67 = arith.addf %60, %66 : vector<32x128xf32>
    %c8 = arith.constant 8 : index
    %c0_65 = arith.constant 0 : index
    %c0_66 = arith.constant 0 : index
    %68 = vector.load %arg3[%c8, %c0_65, %c0_66] : memref<16x32x128xf32, #tpu.memory_space<vmem>>, vector<1x32x128xf32>
    %69 = vector.shape_cast %68 : vector<1x32x128xf32> to vector<32x128xf32>
    %cst_67 = arith.constant dense<0.000000e+00> : vector<32x64xf32>
    %70 = tpu.matmul %69, %10, %cst_67 {dimension_numbers = #tpu.dot_dimension_numbers<[1], [0], [0], [1], [0, 0, 1, 1], [], []>} : vector<32x128xf32>, vector<128x64xf32>, vector<32x64xf32> -> vector<32x64xf32>
    %c8_68 = arith.constant 8 : index
    %c0_69 = arith.constant 0 : index
    %c0_70 = arith.constant 0 : index
    %71 = vector.load %arg4[%c8_68, %c0_69, %c0_70] : memref<16x64x128xf32, #tpu.memory_space<vmem>>, vector<1x64x128xf32>
    %72 = vector.shape_cast %71 : vector<1x64x128xf32> to vector<64x128xf32>
    %cst_71 = arith.constant dense<0.000000e+00> : vector<32x128xf32>
    %73 = tpu.matmul %70, %72, %cst_71 {dimension_numbers = #tpu.dot_dimension_numbers<[1], [0], [0], [1], [0, 0, 1, 1], [], []>} : vector<32x64xf32>, vector<64x128xf32>, vector<32x128xf32> -> vector<32x128xf32>
    %74 = arith.addf %67, %73 : vector<32x128xf32>
    %c9 = arith.constant 9 : index
    %c0_72 = arith.constant 0 : index
    %c0_73 = arith.constant 0 : index
    %75 = vector.load %arg3[%c9, %c0_72, %c0_73] : memref<16x32x128xf32, #tpu.memory_space<vmem>>, vector<1x32x128xf32>
    %76 = vector.shape_cast %75 : vector<1x32x128xf32> to vector<32x128xf32>
    %cst_74 = arith.constant dense<0.000000e+00> : vector<32x64xf32>
    %77 = tpu.matmul %76, %10, %cst_74 {dimension_numbers = #tpu.dot_dimension_numbers<[1], [0], [0], [1], [0, 0, 1, 1], [], []>} : vector<32x128xf32>, vector<128x64xf32>, vector<32x64xf32> -> vector<32x64xf32>
    %c9_75 = arith.constant 9 : index
    %c0_76 = arith.constant 0 : index
    %c0_77 = arith.constant 0 : index
    %78 = vector.load %arg4[%c9_75, %c0_76, %c0_77] : memref<16x64x128xf32, #tpu.memory_space<vmem>>, vector<1x64x128xf32>
    %79 = vector.shape_cast %78 : vector<1x64x128xf32> to vector<64x128xf32>
    %cst_78 = arith.constant dense<0.000000e+00> : vector<32x128xf32>
    %80 = tpu.matmul %77, %79, %cst_78 {dimension_numbers = #tpu.dot_dimension_numbers<[1], [0], [0], [1], [0, 0, 1, 1], [], []>} : vector<32x64xf32>, vector<64x128xf32>, vector<32x128xf32> -> vector<32x128xf32>
    %81 = arith.addf %74, %80 : vector<32x128xf32>
    %c10 = arith.constant 10 : index
    %c0_79 = arith.constant 0 : index
    %c0_80 = arith.constant 0 : index
    %82 = vector.load %arg3[%c10, %c0_79, %c0_80] : memref<16x32x128xf32, #tpu.memory_space<vmem>>, vector<1x32x128xf32>
    %83 = vector.shape_cast %82 : vector<1x32x128xf32> to vector<32x128xf32>
    %cst_81 = arith.constant dense<0.000000e+00> : vector<32x64xf32>
    %84 = tpu.matmul %83, %10, %cst_81 {dimension_numbers = #tpu.dot_dimension_numbers<[1], [0], [0], [1], [0, 0, 1, 1], [], []>} : vector<32x128xf32>, vector<128x64xf32>, vector<32x64xf32> -> vector<32x64xf32>
    %c10_82 = arith.constant 10 : index
    %c0_83 = arith.constant 0 : index
    %c0_84 = arith.constant 0 : index
    %85 = vector.load %arg4[%c10_82, %c0_83, %c0_84] : memref<16x64x128xf32, #tpu.memory_space<vmem>>, vector<1x64x128xf32>
    %86 = vector.shape_cast %85 : vector<1x64x128xf32> to vector<64x128xf32>
    %cst_85 = arith.constant dense<0.000000e+00> : vector<32x128xf32>
    %87 = tpu.matmul %84, %86, %cst_85 {dimension_numbers = #tpu.dot_dimension_numbers<[1], [0], [0], [1], [0, 0, 1, 1], [], []>} : vector<32x64xf32>, vector<64x128xf32>, vector<32x128xf32> -> vector<32x128xf32>
    %88 = arith.addf %81, %87 : vector<32x128xf32>
    %c11 = arith.constant 11 : index
    %c0_86 = arith.constant 0 : index
    %c0_87 = arith.constant 0 : index
    %89 = vector.load %arg3[%c11, %c0_86, %c0_87] : memref<16x32x128xf32, #tpu.memory_space<vmem>>, vector<1x32x128xf32>
    %90 = vector.shape_cast %89 : vector<1x32x128xf32> to vector<32x128xf32>
    %cst_88 = arith.constant dense<0.000000e+00> : vector<32x64xf32>
    %91 = tpu.matmul %90, %10, %cst_88 {dimension_numbers = #tpu.dot_dimension_numbers<[1], [0], [0], [1], [0, 0, 1, 1], [], []>} : vector<32x128xf32>, vector<128x64xf32>, vector<32x64xf32> -> vector<32x64xf32>
    %c11_89 = arith.constant 11 : index
    %c0_90 = arith.constant 0 : index
    %c0_91 = arith.constant 0 : index
    %92 = vector.load %arg4[%c11_89, %c0_90, %c0_91] : memref<16x64x128xf32, #tpu.memory_space<vmem>>, vector<1x64x128xf32>
    %93 = vector.shape_cast %92 : vector<1x64x128xf32> to vector<64x128xf32>
    %cst_92 = arith.constant dense<0.000000e+00> : vector<32x128xf32>
    %94 = tpu.matmul %91, %93, %cst_92 {dimension_numbers = #tpu.dot_dimension_numbers<[1], [0], [0], [1], [0, 0, 1, 1], [], []>} : vector<32x64xf32>, vector<64x128xf32>, vector<32x128xf32> -> vector<32x128xf32>
    %95 = arith.addf %88, %94 : vector<32x128xf32>
    %c12 = arith.constant 12 : index
    %c0_93 = arith.constant 0 : index
    %c0_94 = arith.constant 0 : index
    %96 = vector.load %arg3[%c12, %c0_93, %c0_94] : memref<16x32x128xf32, #tpu.memory_space<vmem>>, vector<1x32x128xf32>
    %97 = vector.shape_cast %96 : vector<1x32x128xf32> to vector<32x128xf32>
    %cst_95 = arith.constant dense<0.000000e+00> : vector<32x64xf32>
    %98 = tpu.matmul %97, %10, %cst_95 {dimension_numbers = #tpu.dot_dimension_numbers<[1], [0], [0], [1], [0, 0, 1, 1], [], []>} : vector<32x128xf32>, vector<128x64xf32>, vector<32x64xf32> -> vector<32x64xf32>
    %c12_96 = arith.constant 12 : index
    %c0_97 = arith.constant 0 : index
    %c0_98 = arith.constant 0 : index
    %99 = vector.load %arg4[%c12_96, %c0_97, %c0_98] : memref<16x64x128xf32, #tpu.memory_space<vmem>>, vector<1x64x128xf32>
    %100 = vector.shape_cast %99 : vector<1x64x128xf32> to vector<64x128xf32>
    %cst_99 = arith.constant dense<0.000000e+00> : vector<32x128xf32>
    %101 = tpu.matmul %98, %100, %cst_99 {dimension_numbers = #tpu.dot_dimension_numbers<[1], [0], [0], [1], [0, 0, 1, 1], [], []>} : vector<32x64xf32>, vector<64x128xf32>, vector<32x128xf32> -> vector<32x128xf32>
    %102 = arith.addf %95, %101 : vector<32x128xf32>
    %c13 = arith.constant 13 : index
    %c0_100 = arith.constant 0 : index
    %c0_101 = arith.constant 0 : index
    %103 = vector.load %arg3[%c13, %c0_100, %c0_101] : memref<16x32x128xf32, #tpu.memory_space<vmem>>, vector<1x32x128xf32>
    %104 = vector.shape_cast %103 : vector<1x32x128xf32> to vector<32x128xf32>
    %cst_102 = arith.constant dense<0.000000e+00> : vector<32x64xf32>
    %105 = tpu.matmul %104, %10, %cst_102 {dimension_numbers = #tpu.dot_dimension_numbers<[1], [0], [0], [1], [0, 0, 1, 1], [], []>} : vector<32x128xf32>, vector<128x64xf32>, vector<32x64xf32> -> vector<32x64xf32>
    %c13_103 = arith.constant 13 : index
    %c0_104 = arith.constant 0 : index
    %c0_105 = arith.constant 0 : index
    %106 = vector.load %arg4[%c13_103, %c0_104, %c0_105] : memref<16x64x128xf32, #tpu.memory_space<vmem>>, vector<1x64x128xf32>
    %107 = vector.shape_cast %106 : vector<1x64x128xf32> to vector<64x128xf32>
    %cst_106 = arith.constant dense<0.000000e+00> : vector<32x128xf32>
    %108 = tpu.matmul %105, %107, %cst_106 {dimension_numbers = #tpu.dot_dimension_numbers<[1], [0], [0], [1], [0, 0, 1, 1], [], []>} : vector<32x64xf32>, vector<64x128xf32>, vector<32x128xf32> -> vector<32x128xf32>
    %109 = arith.addf %102, %108 : vector<32x128xf32>
    %c14 = arith.constant 14 : index
    %c0_107 = arith.constant 0 : index
    %c0_108 = arith.constant 0 : index
    %110 = vector.load %arg3[%c14, %c0_107, %c0_108] : memref<16x32x128xf32, #tpu.memory_space<vmem>>, vector<1x32x128xf32>
    %111 = vector.shape_cast %110 : vector<1x32x128xf32> to vector<32x128xf32>
    %cst_109 = arith.constant dense<0.000000e+00> : vector<32x64xf32>
    %112 = tpu.matmul %111, %10, %cst_109 {dimension_numbers = #tpu.dot_dimension_numbers<[1], [0], [0], [1], [0, 0, 1, 1], [], []>} : vector<32x128xf32>, vector<128x64xf32>, vector<32x64xf32> -> vector<32x64xf32>
    %c14_110 = arith.constant 14 : index
    %c0_111 = arith.constant 0 : index
    %c0_112 = arith.constant 0 : index
    %113 = vector.load %arg4[%c14_110, %c0_111, %c0_112] : memref<16x64x128xf32, #tpu.memory_space<vmem>>, vector<1x64x128xf32>
    %114 = vector.shape_cast %113 : vector<1x64x128xf32> to vector<64x128xf32>
    %cst_113 = arith.constant dense<0.000000e+00> : vector<32x128xf32>
    %115 = tpu.matmul %112, %114, %cst_113 {dimension_numbers = #tpu.dot_dimension_numbers<[1], [0], [0], [1], [0, 0, 1, 1], [], []>} : vector<32x64xf32>, vector<64x128xf32>, vector<32x128xf32> -> vector<32x128xf32>
    %116 = arith.addf %109, %115 : vector<32x128xf32>
    %c15 = arith.constant 15 : index
    %c0_114 = arith.constant 0 : index
    %c0_115 = arith.constant 0 : index
    %117 = vector.load %arg3[%c15, %c0_114, %c0_115] : memref<16x32x128xf32, #tpu.memory_space<vmem>>, vector<1x32x128xf32>
    %118 = vector.shape_cast %117 : vector<1x32x128xf32> to vector<32x128xf32>
    %cst_116 = arith.constant dense<0.000000e+00> : vector<32x64xf32>
    %119 = tpu.matmul %118, %10, %cst_116 {dimension_numbers = #tpu.dot_dimension_numbers<[1], [0], [0], [1], [0, 0, 1, 1], [], []>} : vector<32x128xf32>, vector<128x64xf32>, vector<32x64xf32> -> vector<32x64xf32>
    %c15_117 = arith.constant 15 : index
    %c0_118 = arith.constant 0 : index
    %c0_119 = arith.constant 0 : index
    %120 = vector.load %arg4[%c15_117, %c0_118, %c0_119] : memref<16x64x128xf32, #tpu.memory_space<vmem>>, vector<1x64x128xf32>
    %121 = vector.shape_cast %120 : vector<1x64x128xf32> to vector<64x128xf32>
    %cst_120 = arith.constant dense<0.000000e+00> : vector<32x128xf32>
    %122 = tpu.matmul %119, %121, %cst_120 {dimension_numbers = #tpu.dot_dimension_numbers<[1], [0], [0], [1], [0, 0, 1, 1], [], []>} : vector<32x64xf32>, vector<64x128xf32>, vector<32x128xf32> -> vector<32x128xf32>
    %123 = arith.addf %116, %122 : vector<32x128xf32>
    %c0_121 = arith.constant 0 : index
    %c0_122 = arith.constant 0 : index
    %124 = vector.load %arg5[%c0_121, %c0_122] : memref<1x128xf32, #tpu.memory_space<vmem>>, vector<1x128xf32>
    %125 = vector.broadcast %124 : vector<1x128xf32> to vector<32x128xf32>
    %126 = arith.addf %123, %125 : vector<32x128xf32>
    %cst_123 = arith.constant dense<0.000000e+00> : vector<128xf32>
    %127 = vector.multi_reduction <add>, %126, %cst_123 [0] : vector<32x128xf32> to vector<128xf32>
    %128 = vector.shape_cast %127 : vector<128xf32> to vector<1x128xf32>
    %cst_124 = arith.constant 3.200000e+01 : f32
    %129 = vector.broadcast %cst_124 : f32 to vector<1x128xf32>
    %130 = arith.divf %128, %129 : vector<1x128xf32>
    %131 = vector.broadcast %130 : vector<1x128xf32> to vector<32x128xf32>
    %132 = arith.subf %126, %131 : vector<32x128xf32>
    %133 = arith.mulf %132, %132 : vector<32x128xf32>
    %cst_125 = arith.constant dense<0.000000e+00> : vector<128xf32>
    %134 = vector.multi_reduction <add>, %133, %cst_125 [0] : vector<32x128xf32> to vector<128xf32>
    %135 = vector.shape_cast %134 : vector<128xf32> to vector<1x128xf32>
    %cst_126 = arith.constant 3.200000e+01 : f32
    %136 = vector.broadcast %cst_126 : f32 to vector<1x128xf32>
    %137 = arith.divf %135, %136 : vector<1x128xf32>
    %138 = vector.broadcast %130 : vector<1x128xf32> to vector<32x128xf32>
    %139 = arith.subf %126, %138 : vector<32x128xf32>
    %cst_127 = arith.constant 9.99999974E-6 : f32
    %140 = vector.broadcast %cst_127 : f32 to vector<1x128xf32>
    %141 = arith.addf %137, %140 : vector<1x128xf32>
    %142 = math.rsqrt %141 : vector<1x128xf32>
    %143 = vector.broadcast %142 : vector<1x128xf32> to vector<32x128xf32>
    %144 = arith.mulf %139, %143 : vector<32x128xf32>
    %c0_128 = arith.constant 0 : index
    %c0_129 = arith.constant 0 : index
    %145 = vector.load %arg6[%c0_128, %c0_129] : memref<1x128xf32, #tpu.memory_space<vmem>>, vector<1x128xf32>
    %146 = vector.broadcast %145 : vector<1x128xf32> to vector<32x128xf32>
    %147 = arith.mulf %144, %146 : vector<32x128xf32>
    %c0_130 = arith.constant 0 : index
    %c0_131 = arith.constant 0 : index
    %148 = vector.load %arg7[%c0_130, %c0_131] : memref<1x128xf32, #tpu.memory_space<vmem>>, vector<1x128xf32>
    %149 = vector.broadcast %148 : vector<1x128xf32> to vector<32x128xf32>
    %150 = arith.addf %147, %149 : vector<32x128xf32>
    %cst_132 = arith.constant 0.000000e+00 : f32
    %151 = vector.broadcast %cst_132 : f32 to vector<32x128xf32>
    %152 = arith.cmpf oge, %150, %151 : vector<32x128xf32>
    %cst_133 = arith.constant 2.000000e-01 : f32
    %153 = vector.broadcast %cst_133 : f32 to vector<32x128xf32>
    %154 = arith.mulf %153, %150 : vector<32x128xf32>
    %155 = arith.select %152, %150, %154 : vector<32x128xi1>, vector<32x128xf32>
    %c0_134 = arith.constant 0 : index
    %c0_135 = arith.constant 0 : index
    %156 = vector.load %arg15[%c0_134, %c0_135] : memref<32x128xf32, #tpu.memory_space<vmem>>, vector<32x128xf32>
    tpu.vector_store %arg15[%c0_134, %c0_135], %155 {strides = array<i32>} : memref<32x128xf32, #tpu.memory_space<vmem>>, vector<32x128xf32>,
    %cst_136 = arith.constant 0.000000e+00 : f32
    %157 = vector.broadcast %cst_136 : f32 to vector<2x1024xf32>
    %c0_137 = arith.constant 0 : index
    %c0_138 = arith.constant 0 : index
    %158 = vector.load %arg15[%c0_137, %c0_138] : memref<32x128xf32, #tpu.memory_space<vmem>>, vector<2x128xf32>
    %c0_139 = arith.constant 0 : index
    %c0_140 = arith.constant 0 : index
    %c0_141 = arith.constant 0 : index
    %159 = vector.load %arg8[%c0_139, %c0_140, %c0_141] : memref<16x128x1024xf32, #tpu.memory_space<vmem>>, vector<1x128x1024xf32>
    %160 = vector.shape_cast %159 : vector<1x128x1024xf32> to vector<128x1024xf32>
    %cst_142 = arith.constant dense<0.000000e+00> : vector<2x1024xf32>
    %161 = tpu.matmul %158, %160, %cst_142 {dimension_numbers = #tpu.dot_dimension_numbers<[1], [0], [0], [1], [0, 0, 1, 1], [], []>} : vector<2x128xf32>, vector<128x1024xf32>, vector<2x1024xf32> -> vector<2x1024xf32>
    %162 = arith.addf %157, %161 : vector<2x1024xf32>
    %c2_143 = arith.constant 2 : index
    %c0_144 = arith.constant 0 : index
    %163 = vector.load %arg15[%c2_143, %c0_144] : memref<32x128xf32, #tpu.memory_space<vmem>>, vector<2x128xf32>
    %c1_145 = arith.constant 1 : index
    %c0_146 = arith.constant 0 : index
    %c0_147 = arith.constant 0 : index
    %164 = vector.load %arg8[%c1_145, %c0_146, %c0_147] : memref<16x128x1024xf32, #tpu.memory_space<vmem>>, vector<1x128x1024xf32>
    %165 = vector.shape_cast %164 : vector<1x128x1024xf32> to vector<128x1024xf32>
    %cst_148 = arith.constant dense<0.000000e+00> : vector<2x1024xf32>
    %166 = tpu.matmul %163, %165, %cst_148 {dimension_numbers = #tpu.dot_dimension_numbers<[1], [0], [0], [1], [0, 0, 1, 1], [], []>} : vector<2x128xf32>, vector<128x1024xf32>, vector<2x1024xf32> -> vector<2x1024xf32>
    %167 = arith.addf %162, %166 : vector<2x1024xf32>
    %c4_149 = arith.constant 4 : index
    %c0_150 = arith.constant 0 : index
    %168 = vector.load %arg15[%c4_149, %c0_150] : memref<32x128xf32, #tpu.memory_space<vmem>>, vector<2x128xf32>
    %c2_151 = arith.constant 2 : index
    %c0_152 = arith.constant 0 : index
    %c0_153 = arith.constant 0 : index
    %169 = vector.load %arg8[%c2_151, %c0_152, %c0_153] : memref<16x128x1024xf32, #tpu.memory_space<vmem>>, vector<1x128x1024xf32>
    %170 = vector.shape_cast %169 : vector<1x128x1024xf32> to vector<128x1024xf32>
    %cst_154 = arith.constant dense<0.000000e+00> : vector<2x1024xf32>
    %171 = tpu.matmul %168, %170, %cst_154 {dimension_numbers = #tpu.dot_dimension_numbers<[1], [0], [0], [1], [0, 0, 1, 1], [], []>} : vector<2x128xf32>, vector<128x1024xf32>, vector<2x1024xf32> -> vector<2x1024xf32>
    %172 = arith.addf %167, %171 : vector<2x1024xf32>
    %c6_155 = arith.constant 6 : index
    %c0_156 = arith.constant 0 : index
    %173 = vector.load %arg15[%c6_155, %c0_156] : memref<32x128xf32, #tpu.memory_space<vmem>>, vector<2x128xf32>
    %c3_157 = arith.constant 3 : index
    %c0_158 = arith.constant 0 : index
    %c0_159 = arith.constant 0 : index
    %174 = vector.load %arg8[%c3_157, %c0_158, %c0_159] : memref<16x128x1024xf32, #tpu.memory_space<vmem>>, vector<1x128x1024xf32>
    %175 = vector.shape_cast %174 : vector<1x128x1024xf32> to vector<128x1024xf32>
    %cst_160 = arith.constant dense<0.000000e+00> : vector<2x1024xf32>
    %176 = tpu.matmul %173, %175, %cst_160 {dimension_numbers = #tpu.dot_dimension_numbers<[1], [0], [0], [1], [0, 0, 1, 1], [], []>} : vector<2x128xf32>, vector<128x1024xf32>, vector<2x1024xf32> -> vector<2x1024xf32>
    %177 = arith.addf %172, %176 : vector<2x1024xf32>
    %c8_161 = arith.constant 8 : index
    %c0_162 = arith.constant 0 : index
    %178 = vector.load %arg15[%c8_161, %c0_162] : memref<32x128xf32, #tpu.memory_space<vmem>>, vector<2x128xf32>
    %c4_163 = arith.constant 4 : index
    %c0_164 = arith.constant 0 : index
    %c0_165 = arith.constant 0 : index
    %179 = vector.load %arg8[%c4_163, %c0_164, %c0_165] : memref<16x128x1024xf32, #tpu.memory_space<vmem>>, vector<1x128x1024xf32>
    %180 = vector.shape_cast %179 : vector<1x128x1024xf32> to vector<128x1024xf32>
    %cst_166 = arith.constant dense<0.000000e+00> : vector<2x1024xf32>
    %181 = tpu.matmul %178, %180, %cst_166 {dimension_numbers = #tpu.dot_dimension_numbers<[1], [0], [0], [1], [0, 0, 1, 1], [], []>} : vector<2x128xf32>, vector<128x1024xf32>, vector<2x1024xf32> -> vector<2x1024xf32>
    %182 = arith.addf %177, %181 : vector<2x1024xf32>
    %c10_167 = arith.constant 10 : index
    %c0_168 = arith.constant 0 : index
    %183 = vector.load %arg15[%c10_167, %c0_168] : memref<32x128xf32, #tpu.memory_space<vmem>>, vector<2x128xf32>
    %c5_169 = arith.constant 5 : index
    %c0_170 = arith.constant 0 : index
    %c0_171 = arith.constant 0 : index
    %184 = vector.load %arg8[%c5_169, %c0_170, %c0_171] : memref<16x128x1024xf32, #tpu.memory_space<vmem>>, vector<1x128x1024xf32>
    %185 = vector.shape_cast %184 : vector<1x128x1024xf32> to vector<128x1024xf32>
    %cst_172 = arith.constant dense<0.000000e+00> : vector<2x1024xf32>
    %186 = tpu.matmul %183, %185, %cst_172 {dimension_numbers = #tpu.dot_dimension_numbers<[1], [0], [0], [1], [0, 0, 1, 1], [], []>} : vector<2x128xf32>, vector<128x1024xf32>, vector<2x1024xf32> -> vector<2x1024xf32>
    %187 = arith.addf %182, %186 : vector<2x1024xf32>
    %c12_173 = arith.constant 12 : index
    %c0_174 = arith.constant 0 : index
    %188 = vector.load %arg15[%c12_173, %c0_174] : memref<32x128xf32, #tpu.memory_space<vmem>>, vector<2x128xf32>
    %c6_175 = arith.constant 6 : index
    %c0_176 = arith.constant 0 : index
    %c0_177 = arith.constant 0 : index
    %189 = vector.load %arg8[%c6_175, %c0_176, %c0_177] : memref<16x128x1024xf32, #tpu.memory_space<vmem>>, vector<1x128x1024xf32>
    %190 = vector.shape_cast %189 : vector<1x128x1024xf32> to vector<128x1024xf32>
    %cst_178 = arith.constant dense<0.000000e+00> : vector<2x1024xf32>
    %191 = tpu.matmul %188, %190, %cst_178 {dimension_numbers = #tpu.dot_dimension_numbers<[1], [0], [0], [1], [0, 0, 1, 1], [], []>} : vector<2x128xf32>, vector<128x1024xf32>, vector<2x1024xf32> -> vector<2x1024xf32>
    %192 = arith.addf %187, %191 : vector<2x1024xf32>
    %c14_179 = arith.constant 14 : index
    %c0_180 = arith.constant 0 : index
    %193 = vector.load %arg15[%c14_179, %c0_180] : memref<32x128xf32, #tpu.memory_space<vmem>>, vector<2x128xf32>
    %c7_181 = arith.constant 7 : index
    %c0_182 = arith.constant 0 : index
    %c0_183 = arith.constant 0 : index
    %194 = vector.load %arg8[%c7_181, %c0_182, %c0_183] : memref<16x128x1024xf32, #tpu.memory_space<vmem>>, vector<1x128x1024xf32>
    %195 = vector.shape_cast %194 : vector<1x128x1024xf32> to vector<128x1024xf32>
    %cst_184 = arith.constant dense<0.000000e+00> : vector<2x1024xf32>
    %196 = tpu.matmul %193, %195, %cst_184 {dimension_numbers = #tpu.dot_dimension_numbers<[1], [0], [0], [1], [0, 0, 1, 1], [], []>} : vector<2x128xf32>, vector<128x1024xf32>, vector<2x1024xf32> -> vector<2x1024xf32>
    %197 = arith.addf %192, %196 : vector<2x1024xf32>
    %c16 = arith.constant 16 : index
    %c0_185 = arith.constant 0 : index
    %198 = vector.load %arg15[%c16, %c0_185] : memref<32x128xf32, #tpu.memory_space<vmem>>, vector<2x128xf32>
    %c8_186 = arith.constant 8 : index
    %c0_187 = arith.constant 0 : index
    %c0_188 = arith.constant 0 : index
    %199 = vector.load %arg8[%c8_186, %c0_187, %c0_188] : memref<16x128x1024xf32, #tpu.memory_space<vmem>>, vector<1x128x1024xf32>
    %200 = vector.shape_cast %199 : vector<1x128x1024xf32> to vector<128x1024xf32>
    %cst_189 = arith.constant dense<0.000000e+00> : vector<2x1024xf32>
    %201 = tpu.matmul %198, %200, %cst_189 {dimension_numbers = #tpu.dot_dimension_numbers<[1], [0], [0], [1], [0, 0, 1, 1], [], []>} : vector<2x128xf32>, vector<128x1024xf32>, vector<2x1024xf32> -> vector<2x1024xf32>
    %202 = arith.addf %197, %201 : vector<2x1024xf32>
    %c18 = arith.constant 18 : index
    %c0_190 = arith.constant 0 : index
    %203 = vector.load %arg15[%c18, %c0_190] : memref<32x128xf32, #tpu.memory_space<vmem>>, vector<2x128xf32>
    %c9_191 = arith.constant 9 : index
    %c0_192 = arith.constant 0 : index
    %c0_193 = arith.constant 0 : index
    %204 = vector.load %arg8[%c9_191, %c0_192, %c0_193] : memref<16x128x1024xf32, #tpu.memory_space<vmem>>, vector<1x128x1024xf32>
    %205 = vector.shape_cast %204 : vector<1x128x1024xf32> to vector<128x1024xf32>
    %cst_194 = arith.constant dense<0.000000e+00> : vector<2x1024xf32>
    %206 = tpu.matmul %203, %205, %cst_194 {dimension_numbers = #tpu.dot_dimension_numbers<[1], [0], [0], [1], [0, 0, 1, 1], [], []>} : vector<2x128xf32>, vector<128x1024xf32>, vector<2x1024xf32> -> vector<2x1024xf32>
    %207 = arith.addf %202, %206 : vector<2x1024xf32>
    %c20 = arith.constant 20 : index
    %c0_195 = arith.constant 0 : index
    %208 = vector.load %arg15[%c20, %c0_195] : memref<32x128xf32, #tpu.memory_space<vmem>>, vector<2x128xf32>
    %c10_196 = arith.constant 10 : index
    %c0_197 = arith.constant 0 : index
    %c0_198 = arith.constant 0 : index
    %209 = vector.load %arg8[%c10_196, %c0_197, %c0_198] : memref<16x128x1024xf32, #tpu.memory_space<vmem>>, vector<1x128x1024xf32>
    %210 = vector.shape_cast %209 : vector<1x128x1024xf32> to vector<128x1024xf32>
    %cst_199 = arith.constant dense<0.000000e+00> : vector<2x1024xf32>
    %211 = tpu.matmul %208, %210, %cst_199 {dimension_numbers = #tpu.dot_dimension_numbers<[1], [0], [0], [1], [0, 0, 1, 1], [], []>} : vector<2x128xf32>, vector<128x1024xf32>, vector<2x1024xf32> -> vector<2x1024xf32>
    %212 = arith.addf %207, %211 : vector<2x1024xf32>
    %c22 = arith.constant 22 : index
    %c0_200 = arith.constant 0 : index
    %213 = vector.load %arg15[%c22, %c0_200] : memref<32x128xf32, #tpu.memory_space<vmem>>, vector<2x128xf32>
    %c11_201 = arith.constant 11 : index
    %c0_202 = arith.constant 0 : index
    %c0_203 = arith.constant 0 : index
    %214 = vector.load %arg8[%c11_201, %c0_202, %c0_203] : memref<16x128x1024xf32, #tpu.memory_space<vmem>>, vector<1x128x1024xf32>
    %215 = vector.shape_cast %214 : vector<1x128x1024xf32> to vector<128x1024xf32>
    %cst_204 = arith.constant dense<0.000000e+00> : vector<2x1024xf32>
    %216 = tpu.matmul %213, %215, %cst_204 {dimension_numbers = #tpu.dot_dimension_numbers<[1], [0], [0], [1], [0, 0, 1, 1], [], []>} : vector<2x128xf32>, vector<128x1024xf32>, vector<2x1024xf32> -> vector<2x1024xf32>
    %217 = arith.addf %212, %216 : vector<2x1024xf32>
    %c24 = arith.constant 24 : index
    %c0_205 = arith.constant 0 : index
    %218 = vector.load %arg15[%c24, %c0_205] : memref<32x128xf32, #tpu.memory_space<vmem>>, vector<2x128xf32>
    %c12_206 = arith.constant 12 : index
    %c0_207 = arith.constant 0 : index
    %c0_208 = arith.constant 0 : index
    %219 = vector.load %arg8[%c12_206, %c0_207, %c0_208] : memref<16x128x1024xf32, #tpu.memory_space<vmem>>, vector<1x128x1024xf32>
    %220 = vector.shape_cast %219 : vector<1x128x1024xf32> to vector<128x1024xf32>
    %cst_209 = arith.constant dense<0.000000e+00> : vector<2x1024xf32>
    %221 = tpu.matmul %218, %220, %cst_209 {dimension_numbers = #tpu.dot_dimension_numbers<[1], [0], [0], [1], [0, 0, 1, 1], [], []>} : vector<2x128xf32>, vector<128x1024xf32>, vector<2x1024xf32> -> vector<2x1024xf32>
    %222 = arith.addf %217, %221 : vector<2x1024xf32>
    %c26 = arith.constant 26 : index
    %c0_210 = arith.constant 0 : index
    %223 = vector.load %arg15[%c26, %c0_210] : memref<32x128xf32, #tpu.memory_space<vmem>>, vector<2x128xf32>
    %c13_211 = arith.constant 13 : index
    %c0_212 = arith.constant 0 : index
    %c0_213 = arith.constant 0 : index
    %224 = vector.load %arg8[%c13_211, %c0_212, %c0_213] : memref<16x128x1024xf32, #tpu.memory_space<vmem>>, vector<1x128x1024xf32>
    %225 = vector.shape_cast %224 : vector<1x128x1024xf32> to vector<128x1024xf32>
    %cst_214 = arith.constant dense<0.000000e+00> : vector<2x1024xf32>
    %226 = tpu.matmul %223, %225, %cst_214 {dimension_numbers = #tpu.dot_dimension_numbers<[1], [0], [0], [1], [0, 0, 1, 1], [], []>} : vector<2x128xf32>, vector<128x1024xf32>, vector<2x1024xf32> -> vector<2x1024xf32>
    %227 = arith.addf %222, %226 : vector<2x1024xf32>
    %c28 = arith.constant 28 : index
    %c0_215 = arith.constant 0 : index
    %228 = vector.load %arg15[%c28, %c0_215] : memref<32x128xf32, #tpu.memory_space<vmem>>, vector<2x128xf32>
    %c14_216 = arith.constant 14 : index
    %c0_217 = arith.constant 0 : index
    %c0_218 = arith.constant 0 : index
    %229 = vector.load %arg8[%c14_216, %c0_217, %c0_218] : memref<16x128x1024xf32, #tpu.memory_space<vmem>>, vector<1x128x1024xf32>
    %230 = vector.shape_cast %229 : vector<1x128x1024xf32> to vector<128x1024xf32>
    %cst_219 = arith.constant dense<0.000000e+00> : vector<2x1024xf32>
    %231 = tpu.matmul %228, %230, %cst_219 {dimension_numbers = #tpu.dot_dimension_numbers<[1], [0], [0], [1], [0, 0, 1, 1], [], []>} : vector<2x128xf32>, vector<128x1024xf32>, vector<2x1024xf32> -> vector<2x1024xf32>
    %232 = arith.addf %227, %231 : vector<2x1024xf32>
    %c30 = arith.constant 30 : index
    %c0_220 = arith.constant 0 : index
    %233 = vector.load %arg15[%c30, %c0_220] : memref<32x128xf32, #tpu.memory_space<vmem>>, vector<2x128xf32>
    %c15_221 = arith.constant 15 : index
    %c0_222 = arith.constant 0 : index
    %c0_223 = arith.constant 0 : index
    %234 = vector.load %arg8[%c15_221, %c0_222, %c0_223] : memref<16x128x1024xf32, #tpu.memory_space<vmem>>, vector<1x128x1024xf32>
    %235 = vector.shape_cast %234 : vector<1x128x1024xf32> to vector<128x1024xf32>
    %cst_224 = arith.constant dense<0.000000e+00> : vector<2x1024xf32>
    %236 = tpu.matmul %233, %235, %cst_224 {dimension_numbers = #tpu.dot_dimension_numbers<[1], [0], [0], [1], [0, 0, 1, 1], [], []>} : vector<2x128xf32>, vector<128x1024xf32>, vector<2x1024xf32> -> vector<2x1024xf32>
    %237 = arith.addf %232, %236 : vector<2x1024xf32>
    %c0_225 = arith.constant 0 : index
    %c0_226 = arith.constant 0 : index
    %238 = vector.load %arg9[%c0_225, %c0_226] : memref<1x1024xf32, #tpu.memory_space<vmem>>, vector<1x1024xf32>
    %239 = vector.broadcast %238 : vector<1x1024xf32> to vector<2x1024xf32>
    %240 = arith.addf %237, %239 : vector<2x1024xf32>
    %cst_227 = arith.constant dense<0.000000e+00> : vector<1024xf32>
    %241 = vector.multi_reduction <add>, %240, %cst_227 [0] : vector<2x1024xf32> to vector<1024xf32>
    %242 = vector.shape_cast %241 : vector<1024xf32> to vector<1x1024xf32>
    %cst_228 = arith.constant 2.000000e+00 : f32
    %243 = vector.broadcast %cst_228 : f32 to vector<1x1024xf32>
    %244 = arith.divf %242, %243 : vector<1x1024xf32>
    %245 = vector.broadcast %244 : vector<1x1024xf32> to vector<2x1024xf32>
    %246 = arith.subf %240, %245 : vector<2x1024xf32>
    %247 = arith.mulf %246, %246 : vector<2x1024xf32>
    %cst_229 = arith.constant dense<0.000000e+00> : vector<1024xf32>
    %248 = vector.multi_reduction <add>, %247, %cst_229 [0] : vector<2x1024xf32> to vector<1024xf32>
    %249 = vector.shape_cast %248 : vector<1024xf32> to vector<1x1024xf32>
    %cst_230 = arith.constant 2.000000e+00 : f32
    %250 = vector.broadcast %cst_230 : f32 to vector<1x1024xf32>
    %251 = arith.divf %249, %250 : vector<1x1024xf32>
    %252 = vector.broadcast %244 : vector<1x1024xf32> to vector<2x1024xf32>
    %253 = arith.subf %240, %252 : vector<2x1024xf32>
    %cst_231 = arith.constant 9.99999974E-6 : f32
    %254 = vector.broadcast %cst_231 : f32 to vector<1x1024xf32>
    %255 = arith.addf %251, %254 : vector<1x1024xf32>
    %256 = math.rsqrt %255 : vector<1x1024xf32>
    %257 = vector.broadcast %256 : vector<1x1024xf32> to vector<2x1024xf32>
    %258 = arith.mulf %253, %257 : vector<2x1024xf32>
    %c0_232 = arith.constant 0 : index
    %c0_233 = arith.constant 0 : index
    %259 = vector.load %arg10[%c0_232, %c0_233] : memref<1x1024xf32, #tpu.memory_space<vmem>>, vector<1x1024xf32>
    %260 = vector.broadcast %259 : vector<1x1024xf32> to vector<2x1024xf32>
    %261 = arith.mulf %258, %260 : vector<2x1024xf32>
    %c0_234 = arith.constant 0 : index
    %c0_235 = arith.constant 0 : index
    %262 = vector.load %arg11[%c0_234, %c0_235] : memref<1x1024xf32, #tpu.memory_space<vmem>>, vector<1x1024xf32>
    %263 = vector.broadcast %262 : vector<1x1024xf32> to vector<2x1024xf32>
    %264 = arith.addf %261, %263 : vector<2x1024xf32>
    %cst_236 = arith.constant 0.000000e+00 : f32
    %265 = vector.broadcast %cst_236 : f32 to vector<2x1024xf32>
    %266 = arith.cmpf oge, %264, %265 : vector<2x1024xf32>
    %cst_237 = arith.constant 2.000000e-01 : f32
    %267 = vector.broadcast %cst_237 : f32 to vector<2x1024xf32>
    %268 = arith.mulf %267, %264 : vector<2x1024xf32>
    %269 = arith.select %266, %264, %268 : vector<2x1024xi1>, vector<2x1024xf32>
    %c0_238 = arith.constant 0 : index
    %c0_239 = arith.constant 0 : index
    %270 = vector.load %arg12[%c0_238, %c0_239] : memref<1x1024xf32, #tpu.memory_space<vmem>>, vector<1x1024xf32>
    %271 = vector.broadcast %270 : vector<1x1024xf32> to vector<2x1024xf32>
    %272 = arith.mulf %269, %271 : vector<2x1024xf32>
    %cst_240 = arith.constant dense<0.000000e+00> : vector<2xf32>
    %273 = vector.multi_reduction <add>, %272, %cst_240 [1] : vector<2x1024xf32> to vector<2xf32>
    %274 = vector.shape_cast %273 : vector<2xf32> to vector<2x1xf32>
    %c0_241 = arith.constant 0 : index
    %c0_242 = arith.constant 0 : index
    %275 = vector.load %arg13[%c0_241, %c0_242] : memref<1x1xf32, #tpu.memory_space<vmem>>, vector<1x1xf32>
    %276 = vector.broadcast %275 : vector<1x1xf32> to vector<2x1xf32>
    %277 = arith.addf %274, %276 : vector<2x1xf32>
    %c0_243 = arith.constant 0 : index
    %c0_244 = arith.constant 0 : index
    %278 = vector.load %arg14[%c0_243, %c0_244] : memref<2x1xf32, #tpu.memory_space<vmem>>, vector<2x1xf32>
    tpu.vector_store %arg14[%c0_243, %c0_244], %277 {strides = array<i32>} : memref<2x1xf32, #tpu.memory_space<vmem>>, vector<2x1xf32>,
    return
  }
}

</mosaic_0001>

<bundles_post_ra>
// kernel: discriminator_forward.1
= control target key start
LH: loop header
LB: loop body
LE: loop exit
PB: predicated region body
PF: predicated region fallthrough
CT: control target
= control target key end

     0   :  { %s16961_s0 = inlined_call_operand.vmem [shape: f32[128,64], index: 0, kind: input, shape index: {}]   ;;  %s16962_s1 = inlined_call_operand.hbm [shape: f32[64,64], index: 1, kind: input, shape index: {}]   ;;  %s16963_s2 = inlined_call_operand.hbm [shape: f32[1,64], index: 2, kind: input, shape index: {}]   ;;  %s16964_s3 = inlined_call_operand.hbm [shape: f32[16,32,128], index: 3, kind: input, shape index: {}]   ;;  %s16965_s4 = inlined_call_operand.hbm [shape: f32[16,64,128], index: 4, kind: input, shape index: {}]   ;;  %s16966_s5 = inlined_call_operand.hbm [shape: f32[1,128], index: 5, kind: input, shape index: {}]   ;;  %s16967_s6 = inlined_call_operand.hbm [shape: f32[1,128], index: 6, kind: input, shape index: {}]   ;;  %s16968_s7 = inlined_call_operand.hbm [shape: f32[1,128], index: 7, kind: input, shape index: {}]   ;;  %s16969_s8 = inlined_call_operand.hbm [shape: f32[16,128,1024], index: 8, kind: input, shape index: {}]   ;;  %s16970_s9 = inlined_call_operand.hbm [shape: f32[1,1024], index: 9, kind: input, shape index: {}]   ;;  %s16971_s10 = inlined_call_operand.hbm [shape: f32[1,1024], index: 10, kind: input, shape index: {}]   ;;  %s16972_s11 = inlined_call_operand.hbm [shape: f32[1,1024], index: 11, kind: input, shape index: {}]   ;;  %s16973_s12 = inlined_call_operand.hbm [shape: f32[1,1024], index: 12, kind: input, shape index: {}]   ;;  %s16974_s13 = inlined_call_operand.<no memory space> [shape: f32[1,1], index: 13, kind: input, shape index: {}]   ;;  %s16975_s14 = inlined_call_operand.vmem [shape: f32[2,1], index: 14, kind: output, shape index: {}]  }
   0x1   :  { %v19_v0 = vstv %s16974_s13 }
   0x2   :  { %20 = vst [vmem:[#allocation3] sm:$0x1] %v19_v0 }
   0x3   :  { %21 = vsyncpa [#allocation5], 0 }
   0x4   :  { %22 = vsyncpa [#allocation7], 0 }
   0x5   :  { %23 = vsyncpa [#allocation10], 0 }
   0x6   :  { %24 = vsyncpa [#allocation13], 0 }
   0x7   :  { %25 = vsyncpa [#allocation16], 0 }
   0x8   :  { %26 = vsyncpa [#allocation19], 0 }
   0x9   :  { %27 = vsyncpa [#allocation22], 0  ;;  %s15856_s15 = smov [#allocation6]   ;;  %s15578_s19 = scalar_lea.hbm %s16963_s2, 16 }
   0xa   :  { %s48_s16 = sshll.u32 %s15856_s15, 4  ;;  %p15579_p0 = scmp.ne.s32.totalorder %s16963_s2, %s15578_s19  ;;  %s49_s16 = int_to_ptr.vmem [resolvable:$true] %s48_s16 }
   0xb   :  { %p15582_p1 = scmp.lt.u32.totalorder %s15578_s19, %s16963_s2 }
   0xd   :  { %p15584_p2 = pnand %p15582_p1, %p15579_p0 }
   0xf   :  { %15587 = shalt.err (!%p15584_p2)
}
  0x10   :  { %s15588_s23 = scalar_lea.vmem %s49_s16, 16  ;;  %s15592_s24 = scalar_lea.vmem %s49_s16, 32 }
  0x11   :  { %p15589_p3 = scmp.ne.s32.totalorder %s49_s16, %s15588_s23  ;;  %p15593_p4 = scmp.lt.s32.totalorder %s49_s16, %s49_s16 }
  0x12   :  { %p15594_p5 = scmp.lt.s32.totalorder %s15592_s24, %s15588_s23 }
  0x14   :  { %p15595_p6 = por %p15594_p5, %p15593_p4 }
  0x16   :  { %p15596_p7 = pnand %p15595_p6, %p15589_p3 }
  0x18   :  { %15599 = shalt.err (!%p15596_p7)
}
  0x19   :  { %51 = dma.hbm_to_vmem [thread:$0]  %s16963_s2, 16, %s49_s16, [#allocation7]  }
  0x1a   :  { %s15857_s27 = smov [#allocation9]   ;;  %s15858_s29 = smov [#allocation12]  }
  0x1b   :  { %s69_s28 = sshll.u32 %s15857_s27, 4  ;;  %s92_s30 = sshll.u32 %s15858_s29, 4  ;;  %s70_s28 = int_to_ptr.vmem [resolvable:$true] %s69_s28  ;;  %s93_s30 = int_to_ptr.vmem [resolvable:$true] %s92_s30 }
  0x1c   :  { %s15600_s18 = scalar_lea.hbm %s16965_s4, 16384 }
  0x1d   :  { %p15601_p8 = scmp.ne.s32.totalorder %s16965_s4, %s15600_s18  ;;  %p15604_p9 = scmp.lt.u32.totalorder %s15600_s18, %s16965_s4 }
  0x1f   :  { %p15606_p10 = pnand %p15604_p9, %p15601_p8 }
  0x21   :  { %15609 = shalt.err (!%p15606_p10)
}
  0x22   :  { %s15610_s2 = scalar_lea.vmem %s70_s28, 16384  ;;  %p15615_p12 = scmp.lt.s32.totalorder %s70_s28, %s70_s28 }
  0x23   :  { %p15611_p11 = scmp.ne.s32.totalorder %s70_s28, %s15610_s2  ;;  %p15616_p13 = scmp.lt.s32.totalorder %s15610_s2, %s15610_s2 }
  0x25   :  { %p15617_p0 = por %p15616_p13, %p15615_p12 }
  0x27   :  { %p15618_p1 = pnand %p15617_p0, %p15611_p11 }
  0x29   :  { %15621 = shalt.err (!%p15618_p1)
}
  0x2a   :  { %s15859_s16 = smov 128   ;;  %s15860_s22 = smov 8  }
  0x2b   :  { %75 = dma.hbm_to_vmem [thread:$0]  %s16965_s4, 16384, %s70_s28, [#allocation10], %s15859_s16, %s15859_s16, %s15860_s22  }
  0x2c   :  { %s15622_s27 = scalar_lea.hbm %s16967_s6, 16 }
  0x2d   :  { %p15623_p2 = scmp.ne.s32.totalorder %s16967_s6, %s15622_s27  ;;  %p15626_p3 = scmp.lt.u32.totalorder %s15622_s27, %s16967_s6 }
  0x2f   :  { %p15628_p4 = pnand %p15626_p3, %p15623_p2 }
  0x31   :  { %15631 = shalt.err (!%p15628_p4)
}
  0x32   :  { %s15632_s19 = scalar_lea.vmem %s93_s30, 16  ;;  %s15636_s20 = scalar_lea.vmem %s93_s30, 32 }
  0x33   :  { %p15633_p5 = scmp.ne.s32.totalorder %s93_s30, %s15632_s19  ;;  %p15637_p6 = scmp.lt.s32.totalorder %s93_s30, %s93_s30 }
  0x34   :  { %p15638_p7 = scmp.lt.s32.totalorder %s15636_s20, %s15632_s19 }
  0x36   :  { %p15639_p8 = por %p15638_p7, %p15637_p6 }
  0x38   :  { %p15640_p9 = pnand %p15639_p8, %p15633_p5 }
  0x3a   :  { %15643 = shalt.err (!%p15640_p9)
}
  0x3b   :  { %95 = dma.hbm_to_vmem [thread:$0]  %s16967_s6, 16, %s93_s30, [#allocation13]  }
  0x3c   :  { %s15861_s21 = smov [#allocation15]   ;;  %s15644_s24 = scalar_lea.hbm %s16969_s8, 262144 }
  0x3d   :  { %s111_s13 = sshll.u32 %s15861_s21, 4  ;;  %p15645_p10 = scmp.ne.s32.totalorder %s16969_s8, %s15644_s24  ;;  %s112_s13 = int_to_ptr.vmem [resolvable:$true] %s111_s13 }
  0x3e   :  { %p15648_p11 = scmp.lt.u32.totalorder %s15644_s24, %s16969_s8 }
  0x40   :  { %p15650_p12 = pnand %p15648_p11, %p15645_p10 }
  0x42   :  { %15653 = shalt.err (!%p15650_p12)
}
  0x43   :  { %s15654_s15 = scalar_lea.vmem %s112_s13, 262144  ;;  %p15659_p0 = scmp.lt.s32.totalorder %s112_s13, %s112_s13 }
  0x44   :  { %p15655_p13 = scmp.ne.s32.totalorder %s112_s13, %s15654_s15  ;;  %p15660_p1 = scmp.lt.s32.totalorder %s15654_s15, %s15654_s15 }
  0x46   :  { %p15661_p2 = por %p15660_p1, %p15659_p0 }
  0x48   :  { %p15662_p3 = pnand %p15661_p2, %p15655_p13 }
  0x4a   :  { %15665 = shalt.err (!%p15662_p3)
}
  0x4b   :  { %s15862_s6 = smov 1024   ;;  %s15863_s30 = smov 64  }
  0x4c   :  { %117 = dma.hbm_to_vmem [thread:$0]  %s16969_s8, 262144, %s112_s13, [#allocation16], %s15862_s6, %s15862_s6, %s15863_s30  }
  0x4d   :  { %s15864_s19 = smov [#allocation18]   ;;  %s15865_s4 = smov [#allocation4]  }
  0x4e   :  { %s134_s20 = sshll.u32 %s15864_s19, 4  ;;  %s35_s28 = sshll.u32 %s15865_s4, 4  ;;  %s135_s20 = int_to_ptr.vmem [resolvable:$true] %s134_s20  ;;  %s16002_s28 = int_to_ptr.vmem [resolvable:$true] %s35_s28 }
  0x4f   :  { %s15666_s23 = scalar_lea.hbm %s16971_s10, 128 }
  0x50   :  { %p15667_p4 = scmp.ne.s32.totalorder %s16971_s10, %s15666_s23  ;;  %p15670_p5 = scmp.lt.u32.totalorder %s15666_s23, %s16971_s10 }
  0x52   :  { %p15672_p6 = pnand %p15670_p5, %p15667_p4 }
  0x54   :  { %15675 = shalt.err (!%p15672_p6)
}
  0x55   :  { %s15676_s8 = scalar_lea.vmem %s135_s20, 128  ;;  %p15681_p8 = scmp.lt.s32.totalorder %s135_s20, %s135_s20 }
  0x56   :  { %p15677_p7 = scmp.ne.s32.totalorder %s135_s20, %s15676_s8  ;;  %p15682_p9 = scmp.lt.s32.totalorder %s15676_s8, %s15676_s8 }
  0x58   :  { %p15683_p10 = por %p15682_p9, %p15681_p8 }
  0x5a   :  { %p15684_p11 = pnand %p15683_p10, %p15677_p7 }
  0x5c   :  { %15687 = shalt.err (!%p15684_p11)
}
  0x5d   :  { %137 = dma.hbm_to_vmem [thread:$0]  %s16971_s10, 128, %s135_s20, [#allocation19]  }
  0x5e   :  { %s15688_s30 = scalar_lea.hbm %s16962_s1, 1024 }
  0x5f   :  { %p15689_p12 = scmp.ne.s32.totalorder %s16962_s1, %s15688_s30  ;;  %p15692_p13 = scmp.lt.u32.totalorder %s15688_s30, %s16962_s1 }
  0x61   :  { %p15694_p0 = pnand %p15692_p13, %p15689_p12 }
  0x63   :  { %15697 = shalt.err (!%p15694_p0)
}
  0x64   :  { %s15698_s21 = scalar_lea.vmem %s16002_s28, 1024  ;;  %p15703_p2 = scmp.lt.s32.totalorder %s16002_s28, %s16002_s28 }
  0x65   :  { %p15699_p1 = scmp.ne.s32.totalorder %s16002_s28, %s15698_s21  ;;  %p15704_p3 = scmp.lt.s32.totalorder %s15698_s21, %s15698_s21 }
  0x67   :  { %p15705_p4 = por %p15704_p3, %p15703_p2 }
  0x69   :  { %p15706_p5 = pnand %p15705_p4, %p15699_p1 }
  0x6b   :  { %15709 = shalt.err (!%p15706_p5)
}
  0x6c   :  { %41 = dma.hbm_to_vmem [thread:$0]  %s16962_s1, 1024, %s16002_s28, [#allocation5], %s15859_s16, %s15859_s16, %s15860_s22  }
  0x6d   :  { %s15866_s2 = smov [#allocation8]   ;;  %s15867_s24 = smov [#allocation11]  }
  0x6e   :  { %s57_s23 = sshll.u32 %s15866_s2, 4  ;;  %s82_s25 = sshll.u32 %s15867_s24, 4  ;;  %s58_s23 = int_to_ptr.vmem [resolvable:$true] %s57_s23  ;;  %s83_s25 = int_to_ptr.vmem [resolvable:$true] %s82_s25 }
  0x6f   :  { %s15710_s8 = scalar_lea.hbm %s16964_s3, 8192 }
  0x70   :  { %p15711_p6 = scmp.ne.s32.totalorder %s16964_s3, %s15710_s8  ;;  %p15714_p7 = scmp.lt.u32.totalorder %s15710_s8, %s16964_s3 }
  0x72   :  { %p15716_p8 = pnand %p15714_p7, %p15711_p6 }
  0x74   :  { %15719 = shalt.err (!%p15716_p8)
}
  0x75   :  { %s15720_s1 = scalar_lea.vmem %s58_s23, 8192  ;;  %p15725_p10 = scmp.lt.s32.totalorder %s58_s23, %s58_s23 }
  0x76   :  { %p15721_p9 = scmp.ne.s32.totalorder %s58_s23, %s15720_s1  ;;  %p15726_p11 = scmp.lt.s32.totalorder %s15720_s1, %s15720_s1 }
  0x78   :  { %p15727_p12 = por %p15726_p11, %p15725_p10 }
  0x7a   :  { %p15728_p13 = pnand %p15727_p12, %p15721_p9 }
  0x7c   :  { %15731 = shalt.err (!%p15728_p13)
}
  0x7d   :  { %63 = dma.hbm_to_vmem [thread:$0]  %s16964_s3, 8192, %s58_s23, [#allocation7], %s15859_s16, %s15859_s16, %s15860_s22  }
  0x7e   :  { %s15732_s19 = scalar_lea.hbm %s16966_s5, 16 }
  0x7f   :  { %p15733_p0 = scmp.ne.s32.totalorder %s16966_s5, %s15732_s19  ;;  %p15736_p1 = scmp.lt.u32.totalorder %s15732_s19, %s16966_s5 }
  0x81   :  { %p15738_p2 = pnand %p15736_p1, %p15733_p0 }
  0x83   :  { %15741 = shalt.err (!%p15738_p2)
}
  0x84   :  { %s15742_s2 = scalar_lea.vmem %s83_s25, 16  ;;  %s15746_s24 = scalar_lea.vmem %s83_s25, 32 }
  0x85   :  { %p15743_p3 = scmp.ne.s32.totalorder %s83_s25, %s15742_s2  ;;  %p15747_p4 = scmp.lt.s32.totalorder %s83_s25, %s83_s25 }
  0x86   :  { %p15748_p5 = scmp.lt.s32.totalorder %s15746_s24, %s15742_s2 }
  0x88   :  { %p15749_p6 = por %p15748_p5, %p15747_p4 }
  0x8a   :  { %p15750_p7 = pnand %p15749_p6, %p15743_p3 }
  0x8c   :  { %15753 = shalt.err (!%p15750_p7)
}
  0x8d   :  { %85 = dma.hbm_to_vmem [thread:$0]  %s16966_s5, 16, %s83_s25, [#allocation10]  }
  0x8e   :  { %s15868_s22 = smov [#allocation14]   ;;  %s15869_s26 = smov [#allocation17]  }
  0x8f   :  { %s102_s23 = sshll.u32 %s15868_s22, 4  ;;  %s124_s27 = sshll.u32 %s15869_s26, 4  ;;  %s103_s23 = int_to_ptr.vmem [resolvable:$true] %s102_s23  ;;  %s125_s27 = int_to_ptr.vmem [resolvable:$true] %s124_s27 }
  0x90   :  { %s15754_s29 = scalar_lea.hbm %s16968_s7, 16 }
  0x91   :  { %p15755_p8 = scmp.ne.s32.totalorder %s16968_s7, %s15754_s29  ;;  %p15758_p9 = scmp.lt.u32.totalorder %s15754_s29, %s16968_s7 }
  0x93   :  { %p15760_p10 = pnand %p15758_p9, %p15755_p8 }
  0x95   :  { %15763 = shalt.err (!%p15760_p10)
}
  0x96   :  { %s15764_s5 = scalar_lea.vmem %s103_s23, 16  ;;  %s15768_s25 = scalar_lea.vmem %s103_s23, 32 }
  0x97   :  { %p15765_p11 = scmp.ne.s32.totalorder %s103_s23, %s15764_s5  ;;  %p15769_p12 = scmp.lt.s32.totalorder %s103_s23, %s103_s23 }
  0x98   :  { %p15770_p13 = scmp.lt.s32.totalorder %s15768_s25, %s15764_s5 }
  0x9a   :  { %p15771_p0 = por %p15770_p13, %p15769_p12 }
  0x9c   :  { %p15772_p1 = pnand %p15771_p0, %p15765_p11 }
  0x9e   :  { %15775 = shalt.err (!%p15772_p1)
}
  0x9f   :  { %105 = dma.hbm_to_vmem [thread:$0]  %s16968_s7, 16, %s103_s23, [#allocation13]  }
  0xa0   :  { %s15776_s4 = scalar_lea.hbm %s16970_s9, 128 }
  0xa1   :  { %p15777_p2 = scmp.ne.s32.totalorder %s16970_s9, %s15776_s4  ;;  %p15780_p3 = scmp.lt.u32.totalorder %s15776_s4, %s16970_s9 }
  0xa3   :  { %p15782_p4 = pnand %p15780_p3, %p15777_p2 }
  0xa5   :  { %15785 = shalt.err (!%p15782_p4)
}
  0xa6   :  { %s15786_s24 = scalar_lea.vmem %s125_s27, 128  ;;  %p15791_p6 = scmp.lt.s32.totalorder %s125_s27, %s125_s27 }
  0xa7   :  { %p15787_p5 = scmp.ne.s32.totalorder %s125_s27, %s15786_s24  ;;  %p15792_p7 = scmp.lt.s32.totalorder %s15786_s24, %s15786_s24 }
  0xa9   :  { %p15793_p8 = por %p15792_p7, %p15791_p6 }
  0xab   :  { %p15794_p9 = pnand %p15793_p8, %p15787_p5 }
  0xad   :  { %15797 = shalt.err (!%p15794_p9)
}
  0xae   :  { %127 = dma.hbm_to_vmem [thread:$0]  %s16970_s9, 128, %s125_s27, [#allocation16]  }
  0xaf   :  { %s15870_s16 = smov [#allocation20]   ;;  %s15871_s23 = smov [#allocation21]  }
  0xb0   :  { %s144_s22 = sshll.u32 %s15870_s16, 4  ;;  %s154_s26 = sshll.u32 %s15871_s23, 4  ;;  %s145_s22 = int_to_ptr.vmem [resolvable:$true] %s144_s22  ;;  %s155_s26 = int_to_ptr.vmem [resolvable:$true] %s154_s26 }
  0xb1   :  { %s15798_s29 = scalar_lea.hbm %s16972_s11, 128 }
  0xb2   :  { %p15799_p10 = scmp.ne.s32.totalorder %s16972_s11, %s15798_s29  ;;  %p15802_p11 = scmp.lt.u32.totalorder %s15798_s29, %s16972_s11 }
  0xb4   :  { %p15804_p12 = pnand %p15802_p11, %p15799_p10 }
  0xb6   :  { %15807 = shalt.err (!%p15804_p12)
}
  0xb7   :  { %s15808_s9 = scalar_lea.vmem %s145_s22, 128  ;;  %p15813_p0 = scmp.lt.s32.totalorder %s145_s22, %s145_s22 }
  0xb8   :  { %p15809_p13 = scmp.ne.s32.totalorder %s145_s22, %s15808_s9  ;;  %p15814_p1 = scmp.lt.s32.totalorder %s15808_s9, %s15808_s9 }
  0xba   :  { %p15815_p2 = por %p15814_p1, %p15813_p0 }
  0xbc   :  { %p15816_p3 = pnand %p15815_p2, %p15809_p13 }
  0xbe   :  { %15819 = shalt.err (!%p15816_p3)
}
  0xbf   :  { %147 = dma.hbm_to_vmem [thread:$0]  %s16972_s11, 128, %s145_s22, [#allocation19]  }
  0xc0   :  { %s15820_s17 = scalar_lea.hbm %s16973_s12, 128 }
  0xc1   :  { %p15821_p4 = scmp.ne.s32.totalorder %s16973_s12, %s15820_s17  ;;  %p15824_p5 = scmp.lt.u32.totalorder %s15820_s17, %s16973_s12 }
  0xc3   :  { %p15826_p6 = pnand %p15824_p5, %p15821_p4 }
  0xc5   :  { %15829 = shalt.err (!%p15826_p6)
}
  0xc6   :  { %s15830_s10 = scalar_lea.vmem %s155_s26, 128  ;;  %p15835_p8 = scmp.lt.s32.totalorder %s155_s26, %s155_s26 }
  0xc7   :  { %p15831_p7 = scmp.ne.s32.totalorder %s155_s26, %s15830_s10  ;;  %p15836_p9 = scmp.lt.s32.totalorder %s15830_s10, %s15830_s10 }
  0xc9   :  { %p15837_p10 = por %p15836_p9, %p15835_p8 }
  0xcb   :  { %p15838_p11 = pnand %p15837_p10, %p15831_p7 }
  0xcd   :  { %15841 = shalt.err (!%p15838_p11)
}
  0xce   :  { %157 = dma.hbm_to_vmem [thread:$0]  %s16973_s12, 128, %s155_s26, [#allocation22]  }
  0xcf   :  { %15842 = dma.done.wait [#allocation5], 1024  }
  0xd0   :  { %15843 = vsyncadd [#allocation5], 4294966272 }
  0xd1   :  { %15844 = dma.done.wait [#allocation7], 8208  }
  0xd2   :  { %15845 = vsyncadd [#allocation7], 4294959088 }
  0xd3   :  { %15846 = dma.done.wait [#allocation10], 16400  }
  0xd4   :  { %15847 = vsyncadd [#allocation10], 4294950896 }
  0xd5   :  { %15848 = dma.done.wait [#allocation13], 32  }
  0xd6   :  { %15849 = vsyncadd [#allocation13], 4294967264 }
  0xd7   :  { %15850 = dma.done.wait [#allocation16], 262272  }
  0xd8   :  { %15851 = vsyncadd [#allocation16], 4294705024 }
  0xd9   :  { %15852 = dma.done.wait [#allocation19], 256  }
  0xda   :  { %15853 = vsyncadd [#allocation19], 4294967040 }
  0xdb   :  { %15854 = dma.done.wait [#allocation22], 128  }
  0xdc   :  { %15855 = vsyncadd [#allocation22], 4294967168  ;;  %v212_v1 = vld [vmem:[#allocation4] sm:$0xff]  ;;  %v213_v2 = vld [vmem:[#allocation4 + $0x8] sm:$0xff]  ;;  %vm227_vm0 = vcmask 523264  }
  0xdd   :  { %v214_v3 = vld [vmem:[#allocation4 + $0x10] sm:$0xff]  ;;  %v12531_v4 = vpack.c.bf16 %v213_v2, %v212_v1  ;;  %v215_v5 = vld [vmem:[#allocation4 + $0x18] sm:$0xff]  ;;  %v216_v7 = vld [vmem:[#allocation4 + $0x20] sm:$0xff] }
  0xde   :  { %v12535_v6 = vpack.c.bf16 %v215_v5, %v214_v3  ;;  %v217_v8 = vld [vmem:[#allocation4 + $0x28] sm:$0xff]  ;;  %v196_v9 = vld [vmem:[%s16961_s0] sm:$0xff]  ;;  %v218_v11 = vld [vmem:[#allocation4 + $0x30] sm:$0xff] }
  0xdf   :  { %12532 = vmatprep.subr.bf16.mxu0 %v12531_v4  ;;  %11547 = vmatprep.mubr.msk.f32.mxu0 %vm227_vm0, %v196_v9  ;;  %v12539_v10 = vpack.c.bf16 %v217_v8, %v216_v7  ;;  %v219_v12 = vld [vmem:[#allocation4 + $0x38] sm:$0xff]  ;;  %v197_v14 = vld [vmem:[%s16961_s0 + $0x8] sm:$0xff]  ;;  %v198_v15 = vld [vmem:[%s16961_s0 + $0x10] sm:$0xff] }
  0xe0   :  { %12534 = vmatpush3.bf16.msra.mxu0 %v12531_v4  ;;  %v12543_v13 = vpack.c.bf16 %v219_v12, %v218_v11  ;;  %v199_v16 = vld [vmem:[%s16961_s0 + $0x18] sm:$0xff]  ;;  %v200_v17 = vld [vmem:[%s16961_s0 + $0x20] sm:$0xff]  ;;  %v201_v18 = vld [vmem:[%s16961_s0 + $0x28] sm:$0xff] }
  0xe1   :  { %12536 = vmatprep.subr.bf16.mxu0 %v12535_v6  ;;  %v202_v19 = vld [vmem:[%s16961_s0 + $0x30] sm:$0xff]  ;;  %v203_v20 = vld [vmem:[%s16961_s0 + $0x38] sm:$0xff]  ;;  %v204_v21 = vld [vmem:[%s16961_s0 + $0x40] sm:$0xff] }
  0xe2   :  { %v205_v22 = vld [vmem:[%s16961_s0 + $0x48] sm:$0xff]  ;;  %v206_v23 = vld [vmem:[%s16961_s0 + $0x50] sm:$0xff]  ;;  %v207_v24 = vld [vmem:[%s16961_s0 + $0x58] sm:$0xff] }
  0xe3   :  { %v208_v25 = vld [vmem:[%s16961_s0 + $0x60] sm:$0xff]  ;;  %v209_v26 = vld [vmem:[%s16961_s0 + $0x68] sm:$0xff]  ;;  %v210_v27 = vld [vmem:[%s16961_s0 + $0x70] sm:$0xff] }
  0xe4   :  { %12538 = vmatpush3.bf16.msra.mxu0 %v12535_v6  ;;  %v211_v28 = vld [vmem:[%s16961_s0 + $0x78] sm:$0xff]  ;;  %v567_v29 = vld [vmem:[#allocation8 + $0x20] sm:$0xff]  ;;  %v16175_v31 = vld [vmem:[#allocation6] ss:$0 sm:$0xff] }
  0xe5   :  { %12540 = vmatprep.subr.bf16.mxu0 %v12539_v10  ;;  %v469_v30 = vld [vmem:[#allocation8] sm:$0xff] }
  0xe6   :  { %11603 = vmatprep.mubr.f32.mxu1 %v469_v30 }
  0xe8   :  { %12542 = vmatpush3.bf16.msra.mxu0 %v12539_v10 }
  0xe9   :  { %12544 = vmatprep.subr.bf16.mxu0 %v12543_v13 }
  0xec   :  { %12546 = vmatpush3.bf16.msra.mxu0 %v12543_v13 }
  0xef   :  { %11548 = vmatmul.mubr.msk.f32.vlgmr.msra.gmra.mrb[0].mxu0 %vm227_vm0, %v197_v14 }
  0xf0   :  { %11550 = vmatprep.mubr.msk.f32.mxu0 %vm227_vm0, %v198_v15 }
  0xf3   :  { %11551 = vmatmul.mubr.msk.f32.gmra.mrb[2].mxu0 %vm227_vm0, %v199_v16 }
  0xf4   :  { %11553 = vmatprep.mubr.msk.f32.mxu0 %vm227_vm0, %v200_v17 }
  0xf7   :  { %11554 = vmatmul.mubr.msk.f32.gmra.mrb[4].mxu0 %vm227_vm0, %v201_v18 }
  0xf8   :  { %11556 = vmatprep.mubr.msk.f32.mxu0 %vm227_vm0, %v202_v19 }
  0xfb   :  { %11557 = vmatmul.mubr.msk.f32.gmra.mrb[6].mxu0 %vm227_vm0, %v203_v20 }
  0xfc   :  { %11559 = vmatprep.mubr.msk.f32.mxu0 %vm227_vm0, %v204_v21 }
  0xff   :  { %11560 = vmatmul.mubr.msk.f32.gmra.mrb[8].mxu0 %vm227_vm0, %v205_v22 }
 0x100   :  { %11562 = vmatprep.mubr.msk.f32.mxu0 %vm227_vm0, %v206_v23 }
 0x103   :  { %11563 = vmatmul.mubr.msk.f32.gmra.mrb[10].mxu0 %vm227_vm0, %v207_v24 }
 0x104   :  { %11565 = vmatprep.mubr.msk.f32.mxu0 %vm227_vm0, %v208_v25 }
 0x107   :  { %11566 = vmatmul.mubr.msk.f32.gmra.mrb[12].mxu0 %vm227_vm0, %v209_v26 }
 0x108   :  { %11568 = vmatprep.mubr.msk.f32.mxu0 %vm227_vm0, %v210_v27 }
 0x10b   :  { %11569 = vmatmul.mubr.msk.f32.gmra.mrb[14].mxu0 %vm227_vm0, %v211_v28 }
 0x10c   :  { %11641 = vmatprep.mubr.f32.mxu0 %v567_v29 }
 0x1c2   :  { %v11549_v32 = vpop.f32.mrb[0].mxu0 }
 0x1c3   :  { %v348_v33 = vadd.f32 %v11549_v32, %v16175_v31  ;;  %v342_v34 = vpop.f32.mrb[1].mxu0 }
 0x1c4   :  { %v343_v35 = vadd.f32 %v16175_v31, %v342_v34 }
 0x1c5   :  { %vm422_vm1 = vcmp.ge.f32.partialorder %v348_v33, 0.0  ;;  %v438_v36 = vmul.f32 0.2, %v348_v33 }
 0x1c6   :  { %vm421_vm2 = vcmp.ge.f32.partialorder %v343_v35, 0.0  ;;  %v437_v37 = vmul.f32 0.2, %v343_v35  ;;  %v11552_v38 = vpop.f32.mrb[2].mxu0 }
 0x1c7   :  { %v454_v39 = vsel %vm422_vm1, %v348_v33, %v438_v36  ;;  %v358_v40 = vadd.f32 %v11552_v38, %v16175_v31  ;;  %v352_v41 = vpop.f32.mrb[3].mxu0 }
 0x1c8   :  { %v453_v42 = vsel %vm421_vm2, %v343_v35, %v437_v37  ;;  %v353_v43 = vadd.f32 %v16175_v31, %v352_v41  ;;  %v470_v41 = vld [vmem:[#allocation8 + $0x8] sm:$0xff] }
 0x1c9   :  { %v16181_v44 = vpack.c.bf16 %v454_v39, %v453_v42  ;;  %vm424_vm3 = vcmp.ge.f32.partialorder %v358_v40, 0.0  ;;  %v440_v45 = vmul.f32 0.2, %v358_v40  ;;  %v569_v42 = vld [vmem:[#allocation8 + $0x30] sm:$0xff] }
 0x1ca   :  { %vm423_vm4 = vcmp.ge.f32.partialorder %v353_v43, 0.0  ;;  %v439_v46 = vmul.f32 0.2, %v353_v43  ;;  %v11555_v47 = vpop.f32.mrb[4].mxu0 }
 0x1cb   :  { %v456_v48 = vsel %vm424_vm3, %v358_v40, %v440_v45  ;;  %v368_v49 = vadd.f32 %v11555_v47, %v16175_v31  ;;  %v362_v50 = vpop.f32.mrb[5].mxu0  ;;  %12548 = vmatprep.subr.bf16.mxu1 %v16181_v44  ;;  %12580 = vmatprep.subr.bf16.mxu0 %v16181_v44  ;;  %v568_v40 = vld [vmem:[#allocation8 + $0x28] sm:$0xff]  ;;  %v570_v45 = vld [vmem:[#allocation8 + $0x38] sm:$0xff]  ;;  %v860_v47 = vld [vmem:[#allocation8 + $0x40] sm:$0xff] }
 0x1cc   :  { %v455_v51 = vsel %vm423_vm4, %v353_v43, %v439_v46  ;;  %v363_v52 = vadd.f32 %v16175_v31, %v362_v50  ;;  %12550 = vmatpush3.bf16.msra.mxu1 %v16181_v44  ;;  %12582 = vmatpush3.bf16.msra.mxu0 %v16181_v44  ;;  %v471_v43 = vld [vmem:[#allocation8 + $0x10] sm:$0xff]  ;;  %v472_v46 = vld [vmem:[#allocation8 + $0x18] sm:$0xff] }
 0x1cd   :  { %v16189_v53 = vpack.c.bf16 %v456_v48, %v455_v51  ;;  %vm426_vm5 = vcmp.ge.f32.partialorder %v368_v49, 0.0  ;;  %v442_v54 = vmul.f32 0.2, %v368_v49  ;;  %v861_v48 = vld [vmem:[#allocation8 + $0x48] sm:$0xff]  ;;  %v863_v50 = vld [vmem:[#allocation8 + $0x58] sm:$0xff]  ;;  %v1060_v51 = vld [vmem:[#allocation8 + $0x60] sm:$0xff] }
 0x1ce   :  { %vm425_vm6 = vcmp.ge.f32.partialorder %v363_v52, 0.0  ;;  %v441_v55 = vmul.f32 0.2, %v363_v52  ;;  %v11558_v56 = vpop.f32.mrb[6].mxu0 }
 0x1cf   :  { %v458_v57 = vsel %vm426_vm5, %v368_v49, %v442_v54  ;;  %v378_v58 = vadd.f32 %v11558_v56, %v16175_v31  ;;  %v372_v59 = vpop.f32.mrb[7].mxu0  ;;  %12552 = vmatprep.subr.bf16.mxu1 %v16189_v53  ;;  %12584 = vmatprep.subr.bf16.mxu0 %v16189_v53  ;;  %v862_v49 = vld [vmem:[#allocation8 + $0x50] sm:$0xff]  ;;  %v1460_v56 = vld [vmem:[#allocation8 + $0xa0] sm:$0xff]  ;;  %vm10528_vm5 = vcmask 1041408  }
 0x1d0   :  { %v457_v60 = vsel %vm425_vm6, %v363_v52, %v441_v55  ;;  %v373_v61 = vadd.f32 %v16175_v31, %v372_v59  ;;  %12554 = vmatpush3.bf16.msra.mxu1 %v16189_v53  ;;  %12586 = vmatpush3.bf16.msra.mxu0 %v16189_v53  ;;  %v1061_v52 = vld [vmem:[#allocation8 + $0x68] sm:$0xff]  ;;  %v1062_v54 = vld [vmem:[#allocation8 + $0x70] sm:$0xff]  ;;  %v1063_v55 = vld [vmem:[#allocation8 + $0x78] sm:$0xff] }
 0x1d1   :  { %v16197_v62 = vpack.c.bf16 %v458_v57, %v457_v60  ;;  %vm428_vm7 = vcmp.ge.f32.partialorder %v378_v58, 0.0  ;;  %v444_v63 = vmul.f32 0.2, %v378_v58  ;;  %v657_v57 = vld [vmem:[#allocation9 + $0x40] sm:$0xff]  ;;  %v659_v60 = vld [vmem:[#allocation9 + $0x50] sm:$0xff] }
 0x1d2   :  { %vm427_vm8 = vcmp.ge.f32.partialorder %v373_v61, 0.0  ;;  %v443_v0 = vmul.f32 0.2, %v373_v61  ;;  %v11561_v1 = vpop.f32.mrb[8].mxu0 }
 0x1d3   :  { %v460_v2 = vsel %vm428_vm7, %v378_v58, %v444_v63  ;;  %v388_v3 = vadd.f32 %v11561_v1, %v16175_v31  ;;  %v382_v4 = vpop.f32.mrb[9].mxu0  ;;  %12556 = vmatprep.subr.bf16.mxu1 %v16197_v62  ;;  %12588 = vmatprep.subr.bf16.mxu0 %v16197_v62  ;;  %v658_v58 = vld [vmem:[#allocation9 + $0x48] sm:$0xff] }
 0x1d4   :  { %v459_v5 = vsel %vm427_vm8, %v373_v61, %v443_v0  ;;  %v383_v6 = vadd.f32 %v16175_v31, %v382_v4  ;;  %12558 = vmatpush3.bf16.msra.mxu1 %v16197_v62  ;;  %12590 = vmatpush3.bf16.msra.mxu0 %v16197_v62  ;;  %v12611_v59 = vpack.c.bf16 %v658_v58, %v657_v57  ;;  %v660_v61 = vld [vmem:[#allocation9 + $0x58] sm:$0xff]  ;;  %v661_v0 = vld [vmem:[#allocation9 + $0x60] sm:$0xff]  ;;  %v662_v1 = vld [vmem:[#allocation9 + $0x68] sm:$0xff] }
 0x1d5   :  { %v16205_v7 = vpack.c.bf16 %v460_v2, %v459_v5  ;;  %vm430_vm9 = vcmp.ge.f32.partialorder %v388_v3, 0.0  ;;  %v446_v8 = vmul.f32 0.2, %v388_v3  ;;  %v12615_v63 = vpack.c.bf16 %v660_v61, %v659_v60  ;;  %v664_v4 = vld [vmem:[#allocation9 + $0x78] sm:$0xff]  ;;  %v2660_v57 = vld [vmem:[#allocation8 + $0x160] sm:$0xff]  ;;  %v955_v60 = vld [vmem:[#allocation9 + $0xa8] sm:$0xff] }
 0x1d6   :  { %vm429_vm10 = vcmp.ge.f32.partialorder %v383_v6, 0.0  ;;  %v445_v9 = vmul.f32 0.2, %v383_v6  ;;  %v11564_v10 = vpop.f32.mrb[10].mxu0  ;;  %v12619_v2 = vpack.c.bf16 %v662_v1, %v661_v0  ;;  %v957_v0 = vld [vmem:[#allocation9 + $0xb8] sm:$0xff] }
 0x1d7   :  { %v462_v11 = vsel %vm430_vm9, %v388_v3, %v446_v8  ;;  %v398_v12 = vadd.f32 %v11564_v10, %v16175_v31  ;;  %v392_v13 = vpop.f32.mrb[11].mxu0  ;;  %12560 = vmatprep.subr.bf16.mxu1 %v16205_v7  ;;  %12592 = vmatprep.subr.bf16.mxu0 %v16205_v7  ;;  %v663_v3 = vld [vmem:[#allocation9 + $0x70] sm:$0xff]  ;;  %v559_v8 = vld [vmem:[#allocation9 + $0x8] sm:$0xff] }
 0x1d8   :  { %v461_v14 = vsel %vm429_vm10, %v383_v6, %v445_v9  ;;  %v393_v15 = vadd.f32 %v16175_v31, %v392_v13  ;;  %12562 = vmatpush3.bf16.msra.mxu1 %v16205_v7  ;;  %12594 = vmatpush3.bf16.msra.mxu0 %v16205_v7  ;;  %v12623_v5 = vpack.c.bf16 %v664_v4, %v663_v3  ;;  %v558_v6 = vld [vmem:[#allocation9] sm:$0xff]  ;;  %v1461_v10 = vld [vmem:[#allocation8 + $0xa8] sm:$0xff] }
 0x1d9   :  { %v16213_v16 = vpack.c.bf16 %v462_v11, %v461_v14  ;;  %vm432_vm11 = vcmp.ge.f32.partialorder %v398_v12, 0.0  ;;  %v448_v17 = vmul.f32 0.2, %v398_v12  ;;  %v16284_v9 = vpack.c.bf16 %v559_v8, %v558_v6  ;;  %v1462_v11 = vld [vmem:[#allocation8 + $0xb0] sm:$0xff]  ;;  %v1660_v13 = vld [vmem:[#allocation8 + $0xc0] sm:$0xff]  ;;  %v1661_v14 = vld [vmem:[#allocation8 + $0xc8] sm:$0xff] }
 0x1da   :  { %vm431_vm12 = vcmp.ge.f32.partialorder %v393_v15, 0.0  ;;  %v447_v18 = vmul.f32 0.2, %v393_v15  ;;  %v11567_v19 = vpop.f32.mrb[12].mxu0  ;;  %v1151_v3 = vld [vmem:[#allocation9 + $0xc8] sm:$0xff]  ;;  %v1153_v6 = vld [vmem:[#allocation9 + $0xd8] sm:$0xff] }
 0x1db   :  { %v464_v20 = vsel %vm432_vm11, %v398_v12, %v448_v17  ;;  %v408_v21 = vadd.f32 %v11567_v19, %v16175_v31  ;;  %v402_v22 = vpop.f32.mrb[13].mxu0  ;;  %12564 = vmatprep.subr.bf16.mxu1 %v16213_v16  ;;  %12596 = vmatprep.subr.bf16.mxu0 %v16213_v16  ;;  %v1463_v12 = vld [vmem:[#allocation8 + $0xb8] sm:$0xff]  ;;  %v1861_v19 = vld [vmem:[#allocation8 + $0xe8] sm:$0xff] }
 0x1dc   :  { %v463_v23 = vsel %vm431_vm12, %v393_v15, %v447_v18  ;;  %v403_v24 = vadd.f32 %v16175_v31, %v402_v22  ;;  %12566 = vmatpush3.bf16.msra.mxu1 %v16213_v16  ;;  %12598 = vmatpush3.bf16.msra.mxu0 %v16213_v16  ;;  %v1662_v15 = vld [vmem:[#allocation8 + $0xd0] sm:$0xff]  ;;  %v1663_v17 = vld [vmem:[#allocation8 + $0xd8] sm:$0xff]  ;;  %v1860_v18 = vld [vmem:[#allocation8 + $0xe0] sm:$0xff] }
 0x1dd   :  { %v16221_v25 = vpack.c.bf16 %v464_v20, %v463_v23  ;;  %vm434_vm13 = vcmp.ge.f32.partialorder %v408_v21, 0.0  ;;  %v450_v26 = vmul.f32 0.2, %v408_v21  ;;  %v1862_v20 = vld [vmem:[#allocation8 + $0xf0] sm:$0xff]  ;;  %v2260_v22 = vld [vmem:[#allocation8 + $0x120] sm:$0xff]  ;;  %v2261_v23 = vld [vmem:[#allocation8 + $0x128] sm:$0xff] }
 0x1de   :  { %vm433_vm14 = vcmp.ge.f32.partialorder %v403_v24, 0.0  ;;  %v449_v27 = vmul.f32 0.2, %v403_v24  ;;  %v11570_v28 = vpop.f32.mrb[14].mxu0 }
 0x1df   :  { %v466_v29 = vsel %vm434_vm13, %v408_v21, %v450_v26  ;;  %v418_v30 = vadd.f32 %v11570_v28, %v16175_v31  ;;  %v412_v32 = vpop.f32.mrb[15].mxu0  ;;  %12568 = vmatprep.subr.bf16.mxu1 %v16221_v25  ;;  %12600 = vmatprep.subr.bf16.mxu0 %v16221_v25  ;;  %v1863_v21 = vld [vmem:[#allocation8 + $0xf8] sm:$0xff]  ;;  %v560_v28 = vld [vmem:[#allocation9 + $0x10] sm:$0xff] }
 0x1e0   :  { %v465_v33 = vsel %vm433_vm14, %v403_v24, %v449_v27  ;;  %v413_v34 = vadd.f32 %v16175_v31, %v412_v32  ;;  %12570 = vmatpush3.bf16.msra.mxu1 %v16221_v25  ;;  %12602 = vmatpush3.bf16.msra.mxu0 %v16221_v25  ;;  %v2262_v24 = vld [vmem:[#allocation8 + $0x130] sm:$0xff]  ;;  %v2263_v26 = vld [vmem:[#allocation8 + $0x138] sm:$0xff]  ;;  %v2460_v27 = vld [vmem:[#allocation8 + $0x140] sm:$0xff]  ;;  %vm10897_vm14 = vcmask 1024  }
 0x1e1   :  { %v16229_v35 = vpack.c.bf16 %v466_v29, %v465_v33  ;;  %vm436_vm15 = vcmp.ge.f32.partialorder %v418_v30, 0.0  ;;  %v452_v36 = vmul.f32 0.2, %v418_v30  ;;  %v561_v29 = vld [vmem:[#allocation9 + $0x18] sm:$0xff] }
 0x1e2   :  { %vm435_vm1 = vcmp.ge.f32.partialorder %v413_v34, 0.0  ;;  %v451_v37 = vmul.f32 0.2, %v413_v34 }
 0x1e3   :  { %v468_v38 = vsel %vm436_vm15, %v418_v30, %v452_v36  ;;  %12572 = vmatprep.subr.bf16.mxu1 %v16229_v35  ;;  %12604 = vmatprep.subr.bf16.mxu0 %v16229_v35 }
 0x1e4   :  { %v467_v39 = vsel %vm435_vm1, %v413_v34, %v451_v37  ;;  %12574 = vmatpush3.bf16.msra.mxu1 %v16229_v35  ;;  %12606 = vmatpush3.bf16.msra.mxu0 %v16229_v35  ;;  %v12631_v34 = vpack.c.bf16 %v561_v29, %v560_v28  ;;  %v562_v37 = vld [vmem:[#allocation9 + $0x20] sm:$0xff] }
 0x1e5   :  { %v16235_v31 = vpack.c.bf16 %v468_v38, %v467_v39  ;;  %v563_v38 = vld [vmem:[#allocation9 + $0x28] sm:$0xff]  ;;  %v1260_v29 = vld [vmem:[#allocation8 + $0x80] sm:$0xff] }
 0x1e7   :  { %12576 = vmatprep.subr.bf16.mxu1 %v16235_v31  ;;  %12608 = vmatprep.subr.bf16.mxu0 %v16235_v31 }
 0x1e8   :  { %12578 = vmatpush3.bf16.msra.mxu1 %v16235_v31  ;;  %12610 = vmatpush3.bf16.msra.mxu0 %v16235_v31 }
 0x1e9   :  { %12644 = vmatprep.subr.bf16.mxu0 %v16181_v44  ;;  %12612 = vmatprep.subr.bf16.mxu1 %v12611_v59 }
 0x1eb   :  { %11642 = vmatmul.mubr.f32.vlgmr.msra.gmra.mrb[16].mxu0 %v568_v40  ;;  %11604 = vmatmul.mubr.f32.vlgmr.msra.gmra.mrb[0].mxu1 %v470_v41  ;;  %v12635_v41 = vpack.c.bf16 %v563_v38, %v562_v37  ;;  %v1351_v37 = vld [vmem:[#allocation9 + $0x108] sm:$0xff] }
 0x1ec   :  { %12646 = vmatpush3.bf16.msra.mxu0 %v16181_v44  ;;  %11644 = vmatprep.mubr.f32.mxu0 %v569_v42 }
 0x1ed   :  { %12648 = vmatprep.subr.bf16.mxu0 %v16189_v53  ;;  %11606 = vmatprep.mubr.f32.mxu1 %v471_v43 }
 0x1ee   :  { %12614 = vmatpush3.bf16.msra.mxu1 %v12611_v59  ;;  %v954_v59 = vld [vmem:[#allocation9 + $0xa0] sm:$0xff] }
 0x1ef   :  { %11645 = vmatmul.mubr.f32.gmra.mrb[18].mxu0 %v570_v45  ;;  %11607 = vmatmul.mubr.f32.gmra.mrb[2].mxu1 %v472_v46  ;;  %v564_v45 = vld [vmem:[#allocation9 + $0x30] sm:$0xff]  ;;  %v565_v46 = vld [vmem:[#allocation9 + $0x38] sm:$0xff]  ;;  %v12683_v61 = vpack.c.bf16 %v955_v60, %v954_v59 }
 0x1f0   :  { %12650 = vmatpush3.bf16.msra.mxu0 %v16189_v53  ;;  %11723 = vmatprep.mubr.f32.mxu0 %v860_v47  ;;  %v12639_v47 = vpack.c.bf16 %v565_v46, %v564_v45 }
 0x1f1   :  { %12652 = vmatprep.subr.bf16.mxu0 %v16197_v62  ;;  %12616 = vmatprep.subr.bf16.mxu1 %v12615_v63 }
 0x1f2   :  { %12618 = vmatpush3.bf16.msra.mxu1 %v12615_v63  ;;  %v956_v63 = vld [vmem:[#allocation9 + $0xb0] sm:$0xff] }
 0x1f3   :  { %12620 = vmatprep.subr.bf16.mxu1 %v12619_v2  ;;  %v12687_v1 = vpack.c.bf16 %v957_v0, %v956_v63 }
 0x1f4   :  { %12654 = vmatpush3.bf16.msra.mxu0 %v16197_v62 }
 0x1f5   :  { %12656 = vmatprep.subr.bf16.mxu0 %v16205_v7 }
 0x1f6   :  { %12622 = vmatpush3.bf16.msra.mxu1 %v12619_v2  ;;  %v1150_v2 = vld [vmem:[#allocation9 + $0xc0] sm:$0xff] }
 0x1f7   :  { %12624 = vmatprep.subr.bf16.mxu1 %v12623_v5  ;;  %v12723_v4 = vpack.c.bf16 %v1151_v3, %v1150_v2 }
 0x1f8   :  { %12658 = vmatpush3.bf16.msra.mxu0 %v16205_v7 }
 0x1f9   :  { %12660 = vmatprep.subr.bf16.mxu0 %v16213_v16 }
 0x1fa   :  { %12626 = vmatpush3.bf16.msra.mxu1 %v12623_v5  ;;  %v1152_v5 = vld [vmem:[#allocation9 + $0xd0] sm:$0xff] }
 0x1fb   :  { %12628 = vmatprep.subr.bf16.mxu1 %v16284_v9 }
 0x1fc   :  { %12662 = vmatpush3.bf16.msra.mxu0 %v16213_v16 }
 0x1fd   :  { %12664 = vmatprep.subr.bf16.mxu0 %v16221_v25 }
 0x200   :  { %12666 = vmatpush3.bf16.msra.mxu0 %v16221_v25 }
 0x201   :  { %12668 = vmatprep.subr.bf16.mxu0 %v16229_v35 }
 0x204   :  { %12670 = vmatpush3.bf16.msra.mxu0 %v16229_v35 }
 0x205   :  { %12672 = vmatprep.subr.bf16.mxu0 %v16235_v31 }
 0x208   :  { %12674 = vmatpush3.bf16.msra.mxu0 %v16235_v31 }
 0x209   :  { %12692 = vmatprep.subr.bf16.mxu0 %v16181_v44 }
 0x20b   :  { %11724 = vmatmul.mubr.f32.vlgmr.msra.gmra.mrb[20].mxu0 %v861_v48  ;;  %v2461_v48 = vld [vmem:[#allocation8 + $0x148] sm:$0xff] }
 0x20c   :  { %12694 = vmatpush3.bf16.msra.mxu0 %v16181_v44  ;;  %11726 = vmatprep.mubr.f32.mxu0 %v862_v49  ;;  %v950_v49 = vld [vmem:[#allocation9 + $0x80] sm:$0xff] }
 0x20d   :  { %12696 = vmatprep.subr.bf16.mxu0 %v16189_v53 }
 0x20f   :  { %11727 = vmatmul.mubr.f32.gmra.mrb[22].mxu0 %v863_v50  ;;  %v951_v50 = vld [vmem:[#allocation9 + $0x88] sm:$0xff] }
 0x210   :  { %12698 = vmatpush3.bf16.msra.mxu0 %v16189_v53  ;;  %11783 = vmatprep.mubr.f32.mxu0 %v1060_v51  ;;  %v2462_v51 = vld [vmem:[#allocation8 + $0x150] sm:$0xff] }
 0x211   :  { %12700 = vmatprep.subr.bf16.mxu0 %v16197_v62 }
 0x214   :  { %12702 = vmatpush3.bf16.msra.mxu0 %v16197_v62 }
 0x215   :  { %12704 = vmatprep.subr.bf16.mxu0 %v16205_v7 }
 0x218   :  { %12706 = vmatpush3.bf16.msra.mxu0 %v16205_v7 }
 0x219   :  { %12708 = vmatprep.subr.bf16.mxu0 %v16213_v16 }
 0x21c   :  { %12710 = vmatpush3.bf16.msra.mxu0 %v16213_v16 }
 0x21d   :  { %12712 = vmatprep.subr.bf16.mxu0 %v16221_v25 }
 0x220   :  { %12714 = vmatpush3.bf16.msra.mxu0 %v16221_v25 }
 0x221   :  { %12716 = vmatprep.subr.bf16.mxu0 %v16229_v35 }
 0x224   :  { %12718 = vmatpush3.bf16.msra.mxu0 %v16229_v35 }
 0x225   :  { %12720 = vmatprep.subr.bf16.mxu0 %v16235_v31 }
 0x228   :  { %12722 = vmatpush3.bf16.msra.mxu0 %v16235_v31 }
 0x229   :  { %12788 = vmatprep.subr.bf16.mxu0 %v16181_v44 }
 0x22b   :  { %11784 = vmatmul.mubr.f32.vlgmr.msra.gmra.mrb[24].mxu0 %v1061_v52  ;;  %v12675_v52 = vpack.c.bf16 %v951_v50, %v950_v49  ;;  %v1263_v49 = vld [vmem:[#allocation8 + $0x98] sm:$0xff] }
 0x22c   :  { %12790 = vmatpush3.bf16.msra.mxu0 %v16181_v44  ;;  %11786 = vmatprep.mubr.f32.mxu0 %v1062_v54  ;;  %v952_v54 = vld [vmem:[#allocation9 + $0x90] sm:$0xff] }
 0x22d   :  { %12792 = vmatprep.subr.bf16.mxu0 %v16189_v53 }
 0x22f   :  { %11787 = vmatmul.mubr.f32.gmra.mrb[26].mxu0 %v1063_v55  ;;  %v953_v55 = vld [vmem:[#allocation9 + $0x98] sm:$0xff] }
 0x230   :  { %12794 = vmatpush3.bf16.msra.mxu0 %v16189_v53  ;;  %11903 = vmatprep.mubr.f32.mxu0 %v1460_v56  ;;  %v2463_v56 = vld [vmem:[#allocation8 + $0x158] sm:$0xff]  ;;  %v12679_v58 = vpack.c.bf16 %v953_v55, %v952_v54  ;;  %v3261_v55 = vld [vmem:[#allocation8 + $0x1c8] sm:$0xff] }
 0x231   :  { %12796 = vmatprep.subr.bf16.mxu0 %v16197_v62 }
 0x234   :  { %12798 = vmatpush3.bf16.msra.mxu0 %v16197_v62 }
 0x235   :  { %12800 = vmatprep.subr.bf16.mxu0 %v16205_v7 }
 0x238   :  { %12802 = vmatpush3.bf16.msra.mxu0 %v16205_v7 }
 0x239   :  { %12804 = vmatprep.subr.bf16.mxu0 %v16213_v16 }
 0x23c   :  { %12806 = vmatpush3.bf16.msra.mxu0 %v16213_v16 }
 0x23d   :  { %12808 = vmatprep.subr.bf16.mxu0 %v16221_v25 }
 0x240   :  { %12810 = vmatpush3.bf16.msra.mxu0 %v16221_v25 }
 0x241   :  { %12812 = vmatprep.subr.bf16.mxu0 %v16229_v35 }
 0x244   :  { %12814 = vmatpush3.bf16.msra.mxu0 %v16229_v35 }
 0x245   :  { %12816 = vmatprep.subr.bf16.mxu0 %v16235_v31 }
 0x248   :  { %12818 = vmatpush3.bf16.msra.mxu0 %v16235_v31 }
 0x249   :  { %12836 = vmatprep.subr.bf16.mxu0 %v16181_v44 }
 0x24b   :  { %11904 = vmatmul.mubr.f32.vlgmr.msra.gmra.mrb[28].mxu0 %v1461_v10  ;;  %v12727_v10 = vpack.c.bf16 %v1153_v6, %v1152_v5 }
 0x24c   :  { %12838 = vmatpush3.bf16.msra.mxu0 %v16181_v44  ;;  %11906 = vmatprep.mubr.f32.mxu0 %v1462_v11  ;;  %v1154_v11 = vld [vmem:[#allocation9 + $0xe0] sm:$0xff] }
 0x24d   :  { %12840 = vmatprep.subr.bf16.mxu0 %v16189_v53 }
 0x24f   :  { %11907 = vmatmul.mubr.f32.gmra.mrb[30].mxu0 %v1463_v12  ;;  %v1155_v12 = vld [vmem:[#allocation9 + $0xe8] sm:$0xff] }
 0x250   :  { %12842 = vmatpush3.bf16.msra.mxu0 %v16189_v53  ;;  %11963 = vmatprep.mubr.f32.mxu0 %v1660_v13 }
 0x251   :  { %12844 = vmatprep.subr.bf16.mxu0 %v16197_v62 }
 0x254   :  { %12846 = vmatpush3.bf16.msra.mxu0 %v16197_v62 }
 0x255   :  { %12848 = vmatprep.subr.bf16.mxu0 %v16205_v7 }
 0x258   :  { %12850 = vmatpush3.bf16.msra.mxu0 %v16205_v7 }
 0x259   :  { %12852 = vmatprep.subr.bf16.mxu0 %v16213_v16 }
 0x25c   :  { %12854 = vmatpush3.bf16.msra.mxu0 %v16213_v16 }
 0x25d   :  { %12856 = vmatprep.subr.bf16.mxu0 %v16221_v25 }
 0x260   :  { %12858 = vmatpush3.bf16.msra.mxu0 %v16221_v25 }
 0x261   :  { %12860 = vmatprep.subr.bf16.mxu0 %v16229_v35 }
 0x264   :  { %12862 = vmatpush3.bf16.msra.mxu0 %v16229_v35 }
 0x265   :  { %12864 = vmatprep.subr.bf16.mxu0 %v16235_v31 }
 0x268   :  { %12866 = vmatpush3.bf16.msra.mxu0 %v16235_v31 }
 0x269   :  { %12884 = vmatprep.subr.bf16.mxu0 %v16181_v44 }
 0x26b   :  { %11964 = vmatmul.mubr.f32.vlgmr.msra.gmra.mrb[32].mxu0 %v1661_v14  ;;  %v12731_v14 = vpack.c.bf16 %v1155_v12, %v1154_v11 }
 0x26c   :  { %12886 = vmatpush3.bf16.msra.mxu0 %v16181_v44  ;;  %11966 = vmatprep.mubr.f32.mxu0 %v1662_v15 }
 0x26d   :  { %12888 = vmatprep.subr.bf16.mxu0 %v16189_v53 }
 0x26f   :  { %11967 = vmatmul.mubr.f32.gmra.mrb[34].mxu0 %v1663_v17  ;;  %v1156_v17 = vld [vmem:[#allocation9 + $0xf0] sm:$0xff] }
 0x270   :  { %12890 = vmatpush3.bf16.msra.mxu0 %v16189_v53  ;;  %12023 = vmatprep.mubr.f32.mxu0 %v1860_v18  ;;  %v1157_v18 = vld [vmem:[#allocation9 + $0xf8] sm:$0xff] }
 0x271   :  { %12892 = vmatprep.subr.bf16.mxu0 %v16197_v62 }
 0x274   :  { %12894 = vmatpush3.bf16.msra.mxu0 %v16197_v62 }
 0x275   :  { %12896 = vmatprep.subr.bf16.mxu0 %v16205_v7 }
 0x278   :  { %12898 = vmatpush3.bf16.msra.mxu0 %v16205_v7 }
 0x279   :  { %12900 = vmatprep.subr.bf16.mxu0 %v16213_v16 }
 0x27c   :  { %12902 = vmatpush3.bf16.msra.mxu0 %v16213_v16 }
 0x27d   :  { %12904 = vmatprep.subr.bf16.mxu0 %v16221_v25 }
 0x280   :  { %12906 = vmatpush3.bf16.msra.mxu0 %v16221_v25 }
 0x281   :  { %12908 = vmatprep.subr.bf16.mxu0 %v16229_v35 }
 0x284   :  { %12910 = vmatpush3.bf16.msra.mxu0 %v16229_v35 }
 0x285   :  { %12912 = vmatprep.subr.bf16.mxu0 %v16235_v31 }
 0x288   :  { %12914 = vmatpush3.bf16.msra.mxu0 %v16235_v31 }
 0x289   :  { %12980 = vmatprep.subr.bf16.mxu0 %v16181_v44 }
 0x28b   :  { %12024 = vmatmul.mubr.f32.vlgmr.msra.gmra.mrb[36].mxu0 %v1861_v19  ;;  %v12735_v19 = vpack.c.bf16 %v1157_v18, %v1156_v17 }
 0x28c   :  { %12982 = vmatpush3.bf16.msra.mxu0 %v16181_v44  ;;  %12026 = vmatprep.mubr.f32.mxu0 %v1862_v20  ;;  %v2661_v20 = vld [vmem:[#allocation8 + $0x168] sm:$0xff] }
 0x28d   :  { %12984 = vmatprep.subr.bf16.mxu0 %v16189_v53 }
 0x28f   :  { %12027 = vmatmul.mubr.f32.gmra.mrb[38].mxu0 %v1863_v21  ;;  %v2662_v21 = vld [vmem:[#allocation8 + $0x170] sm:$0xff] }
 0x290   :  { %12986 = vmatpush3.bf16.msra.mxu0 %v16189_v53  ;;  %12143 = vmatprep.mubr.f32.mxu0 %v2260_v22  ;;  %v2663_v22 = vld [vmem:[#allocation8 + $0x178] sm:$0xff] }
 0x291   :  { %12988 = vmatprep.subr.bf16.mxu0 %v16197_v62 }
 0x294   :  { %12990 = vmatpush3.bf16.msra.mxu0 %v16197_v62 }
 0x295   :  { %12992 = vmatprep.subr.bf16.mxu0 %v16205_v7 }
 0x298   :  { %12994 = vmatpush3.bf16.msra.mxu0 %v16205_v7 }
 0x299   :  { %12996 = vmatprep.subr.bf16.mxu0 %v16213_v16 }
 0x29c   :  { %12998 = vmatpush3.bf16.msra.mxu0 %v16213_v16 }
 0x29d   :  { %13000 = vmatprep.subr.bf16.mxu0 %v16221_v25 }
 0x2a0   :  { %13002 = vmatpush3.bf16.msra.mxu0 %v16221_v25 }
 0x2a1   :  { %13004 = vmatprep.subr.bf16.mxu0 %v16229_v35 }
 0x2a4   :  { %13006 = vmatpush3.bf16.msra.mxu0 %v16229_v35 }
 0x2a5   :  { %13008 = vmatprep.subr.bf16.mxu0 %v16235_v31 }
 0x2a8   :  { %13010 = vmatpush3.bf16.msra.mxu0 %v16235_v31 }
 0x2a9   :  { %13028 = vmatprep.subr.bf16.mxu0 %v16181_v44 }
 0x2ab   :  { %12144 = vmatmul.mubr.f32.vlgmr.msra.gmra.mrb[40].mxu0 %v2261_v23  ;;  %v3060_v23 = vld [vmem:[#allocation8 + $0x1a0] sm:$0xff] }
 0x2ac   :  { %13030 = vmatpush3.bf16.msra.mxu0 %v16181_v44  ;;  %12146 = vmatprep.mubr.f32.mxu0 %v2262_v24 }
 0x2ad   :  { %13032 = vmatprep.subr.bf16.mxu0 %v16189_v53 }
 0x2af   :  { %12147 = vmatmul.mubr.f32.gmra.mrb[42].mxu0 %v2263_v26 }
 0x2b0   :  { %13034 = vmatpush3.bf16.msra.mxu0 %v16189_v53  ;;  %12203 = vmatprep.mubr.f32.mxu0 %v2460_v27 }
 0x2b1   :  { %13036 = vmatprep.subr.bf16.mxu0 %v16197_v62 }
 0x2b4   :  { %13038 = vmatpush3.bf16.msra.mxu0 %v16197_v62 }
 0x2b5   :  { %13040 = vmatprep.subr.bf16.mxu0 %v16205_v7 }
 0x2b8   :  { %13042 = vmatpush3.bf16.msra.mxu0 %v16205_v7 }
 0x2b9   :  { %13044 = vmatprep.subr.bf16.mxu0 %v16213_v16 }
 0x2bc   :  { %13046 = vmatpush3.bf16.msra.mxu0 %v16213_v16 }
 0x2bd   :  { %13048 = vmatprep.subr.bf16.mxu0 %v16221_v25 }
 0x2be   :  { %v11643_v30 = vpop.f32.mrb[16].mxu0  ;;  %v11605_v32 = vpop.f32.mrb[0].mxu1 }
 0x2bf   :  { %v637_v33 = vpop.f32.mrb[17].mxu0  ;;  %v539_v36 = vpop.f32.mrb[1].mxu1 }
 0x2c0   :  { %11663 = vmatprep.mubr.msk.f32.mxu1 %vm227_vm0, %v637_v33  ;;  %13050 = vmatpush3.bf16.msra.mxu0 %v16221_v25  ;;  %v3063_v33 = vld [vmem:[#allocation8 + $0x1b8] sm:$0xff] }
 0x2c1   :  { %11664 = vmatmul.mubr.msk.f32.vlgmr.msra.gmra.mrb[4].mxu1 %vm227_vm0, %v11643_v30  ;;  %13052 = vmatprep.subr.bf16.mxu0 %v16229_v35  ;;  %v3061_v30 = vld [vmem:[#allocation8 + $0x1a8] sm:$0xff] }
 0x2c2   :  { %12630 = vmatpush3.bf16.msra.mxu1 %v16284_v9  ;;  %v11646_v39 = vpop.f32.mrb[18].mxu0  ;;  %v11608_v40 = vpop.f32.mrb[2].mxu1 }
 0x2c3   :  { %12632 = vmatprep.subr.bf16.mxu1 %v12631_v34  ;;  %v647_v42 = vpop.f32.mrb[19].mxu0  ;;  %v549_v43 = vpop.f32.mrb[3].mxu1 }
 0x2c4   :  { %13054 = vmatpush3.bf16.msra.mxu0 %v16229_v35  ;;  %11666 = vmatprep.mubr.msk.f32.mxu1 %vm227_vm0, %v647_v42 }
 0x2c5   :  { %13056 = vmatprep.subr.bf16.mxu0 %v16235_v31  ;;  %11667 = vmatmul.mubr.msk.f32.gmra.mrb[6].mxu1 %vm227_vm0, %v11646_v39  ;;  %v1352_v39 = vld [vmem:[#allocation9 + $0x110] sm:$0xff] }
 0x2c6   :  { %12634 = vmatpush3.bf16.msra.mxu1 %v12631_v34  ;;  %11685 = vmatprep.mubr.msk.f32.mxu1 %vm227_vm0, %v539_v36  ;;  %v3260_v34 = vld [vmem:[#allocation8 + $0x1c0] sm:$0xff] }
 0x2c7   :  { %12636 = vmatprep.subr.bf16.mxu1 %v12635_v41  ;;  %v1350_v36 = vld [vmem:[#allocation9 + $0x100] sm:$0xff] }
 0x2c8   :  { %13058 = vmatpush3.bf16.msra.mxu0 %v16235_v31  ;;  %v12771_v38 = vpack.c.bf16 %v1351_v37, %v1350_v36  ;;  %v1757_v36 = vld [vmem:[#allocation9 + $0x1b8] sm:$0xff] }
 0x2c9   :  { %13076 = vmatprep.subr.bf16.mxu0 %v16181_v44 }
 0x2ca   :  { %12638 = vmatpush3.bf16.msra.mxu1 %v12635_v41  ;;  %v1261_v41 = vld [vmem:[#allocation8 + $0x88] sm:$0xff] }
 0x2cb   :  { %12640 = vmatprep.subr.bf16.mxu1 %v12639_v47  ;;  %12204 = vmatmul.mubr.f32.vlgmr.msra.gmra.mrb[44].mxu0 %v2461_v48  ;;  %v1355_v48 = vld [vmem:[#allocation9 + $0x128] sm:$0xff] }
 0x2cc   :  { %13078 = vmatpush3.bf16.msra.mxu0 %v16181_v44  ;;  %12206 = vmatprep.mubr.f32.mxu0 %v2462_v51  ;;  %v1356_v51 = vld [vmem:[#allocation9 + $0x130] sm:$0xff] }
 0x2cd   :  { %13080 = vmatprep.subr.bf16.mxu0 %v16189_v53 }
 0x2ce   :  { %12642 = vmatpush3.bf16.msra.mxu1 %v12639_v47  ;;  %v1354_v47 = vld [vmem:[#allocation9 + $0x120] sm:$0xff] }
 0x2cf   :  { %12676 = vmatprep.subr.bf16.mxu1 %v12675_v52  ;;  %12207 = vmatmul.mubr.f32.gmra.mrb[46].mxu0 %v2463_v56  ;;  %v12779_v50 = vpack.c.bf16 %v1355_v48, %v1354_v47  ;;  %v1550_v56 = vld [vmem:[#allocation9 + $0x140] sm:$0xff]  ;;  %v1956_v48 = vld [vmem:[#allocation9 + $0x1f0] sm:$0xff] }
 0x2d0   :  { %13082 = vmatpush3.bf16.msra.mxu0 %v16189_v53  ;;  %12263 = vmatprep.mubr.f32.mxu0 %v2660_v57  ;;  %v1551_v57 = vld [vmem:[#allocation9 + $0x148] sm:$0xff] }
 0x2d1   :  { %11686 = vmatmul.mubr.msk.f32.vlgmr.msra.gmra.mrb[4].mxu1 %vm227_vm0, %v11605_v32  ;;  %13084 = vmatprep.subr.bf16.mxu0 %v16197_v62  ;;  %v3062_v32 = vld [vmem:[#allocation8 + $0x1b0] sm:$0xff] }
 0x2d2   :  { %12678 = vmatpush3.bf16.msra.mxu1 %v12675_v52  ;;  %11688 = vmatprep.mubr.msk.f32.mxu1 %vm227_vm0, %v549_v43  ;;  %v1262_v43 = vld [vmem:[#allocation8 + $0x90] sm:$0xff]  ;;  %v1357_v52 = vld [vmem:[#allocation9 + $0x138] sm:$0xff] }
 0x2d3   :  { %12680 = vmatprep.subr.bf16.mxu1 %v12679_v58  ;;  %v12783_v54 = vpack.c.bf16 %v1357_v52, %v1356_v51  ;;  %v2060_v51 = vld [vmem:[#allocation8 + $0x100] sm:$0xff] }
 0x2d4   :  { %13086 = vmatpush3.bf16.msra.mxu0 %v16197_v62  ;;  %v2150_v52 = vld [vmem:[#allocation9 + $0x200] sm:$0xff] }
 0x2d5   :  { %13088 = vmatprep.subr.bf16.mxu0 %v16205_v7  ;;  %11689 = vmatmul.mubr.msk.f32.gmra.mrb[6].mxu1 %vm227_vm0, %v11608_v40  ;;  %v1353_v40 = vld [vmem:[#allocation9 + $0x118] sm:$0xff] }
 0x2d6   :  { %12682 = vmatpush3.bf16.msra.mxu1 %v12679_v58  ;;  %v12775_v46 = vpack.c.bf16 %v1353_v40, %v1352_v39  ;;  %v12819_v58 = vpack.c.bf16 %v1551_v57, %v1550_v56  ;;  %v1951_v39 = vld [vmem:[#allocation9 + $0x1c8] sm:$0xff]  ;;  %v2152_v56 = vld [vmem:[#allocation9 + $0x210] sm:$0xff]  ;;  %v2153_v57 = vld [vmem:[#allocation9 + $0x218] sm:$0xff] }
 0x2d7   :  { %12684 = vmatprep.subr.bf16.mxu1 %v12683_v61 }
 0x2d8   :  { %13090 = vmatpush3.bf16.msra.mxu0 %v16205_v7 }
 0x2d9   :  { %13092 = vmatprep.subr.bf16.mxu0 %v16213_v16 }
 0x2da   :  { %12686 = vmatpush3.bf16.msra.mxu1 %v12683_v61 }
 0x2db   :  { %12688 = vmatprep.subr.bf16.mxu1 %v12687_v1 }
 0x2dc   :  { %13094 = vmatpush3.bf16.msra.mxu0 %v16213_v16 }
 0x2dd   :  { %13096 = vmatprep.subr.bf16.mxu0 %v16221_v25 }
 0x2de   :  { %12690 = vmatpush3.bf16.msra.mxu1 %v12687_v1  ;;  %v11725_v8 = vpop.f32.mrb[20].mxu0 }
 0x2df   :  { %v930_v9 = vpop.f32.mrb[21].mxu0  ;;  %12724 = vmatprep.subr.bf16.mxu1 %v12723_v4 }
 0x2e0   :  { %11745 = vmatprep.mubr.msk.f32.mxu1 %vm227_vm0, %v930_v9  ;;  %13098 = vmatpush3.bf16.msra.mxu0 %v16221_v25  ;;  %v1552_v9 = vld [vmem:[#allocation9 + $0x150] sm:$0xff] }
 0x2e1   :  { %11746 = vmatmul.mubr.msk.f32.vlgmr.msra.gmra.mrb[4].mxu1 %vm227_vm0, %v11725_v8  ;;  %13100 = vmatprep.subr.bf16.mxu0 %v16229_v35 }
 0x2e2   :  { %12726 = vmatpush3.bf16.msra.mxu1 %v12723_v4  ;;  %v11728_v13 = vpop.f32.mrb[22].mxu0 }
 0x2e3   :  { %12728 = vmatprep.subr.bf16.mxu1 %v12727_v10  ;;  %v940_v15 = vpop.f32.mrb[23].mxu0 }
 0x2e4   :  { %13102 = vmatpush3.bf16.msra.mxu0 %v16229_v35  ;;  %11748 = vmatprep.mubr.msk.f32.mxu1 %vm227_vm0, %v940_v15  ;;  %v1555_v15 = vld [vmem:[#allocation9 + $0x168] sm:$0xff] }
 0x2e5   :  { %13104 = vmatprep.subr.bf16.mxu0 %v16235_v31  ;;  %11749 = vmatmul.mubr.msk.f32.gmra.mrb[6].mxu1 %vm227_vm0, %v11728_v13 }
 0x2e6   :  { %12730 = vmatpush3.bf16.msra.mxu1 %v12727_v10  ;;  %v1553_v10 = vld [vmem:[#allocation9 + $0x158] sm:$0xff] }
 0x2e7   :  { %12732 = vmatprep.subr.bf16.mxu1 %v12731_v14  ;;  %v12823_v13 = vpack.c.bf16 %v1553_v10, %v1552_v9  ;;  %v2351_v9 = vld [vmem:[#allocation9 + $0x248] sm:$0xff] }
 0x2e8   :  { %13106 = vmatpush3.bf16.msra.mxu0 %v16235_v31 }
 0x2e9   :  { %13172 = vmatprep.subr.bf16.mxu0 %v16181_v44 }
 0x2ea   :  { %12734 = vmatpush3.bf16.msra.mxu1 %v12731_v14  ;;  %v1554_v14 = vld [vmem:[#allocation9 + $0x160] sm:$0xff] }
 0x2eb   :  { %12736 = vmatprep.subr.bf16.mxu1 %v12735_v19  ;;  %12264 = vmatmul.mubr.f32.vlgmr.msra.gmra.mrb[48].mxu0 %v2661_v20  ;;  %v1556_v20 = vld [vmem:[#allocation9 + $0x170] sm:$0xff] }
 0x2ec   :  { %13174 = vmatpush3.bf16.msra.mxu0 %v16181_v44  ;;  %12266 = vmatprep.mubr.f32.mxu0 %v2662_v21  ;;  %v1557_v21 = vld [vmem:[#allocation9 + $0x178] sm:$0xff] }
 0x2ed   :  { %13176 = vmatprep.subr.bf16.mxu0 %v16189_v53 }
 0x2ee   :  { %12738 = vmatpush3.bf16.msra.mxu1 %v12735_v19  ;;  %v12827_v19 = vpack.c.bf16 %v1555_v15, %v1554_v14 }
 0x2ef   :  { %12740 = vmatprep.subr.bf16.mxu1 %v16181_v44  ;;  %12267 = vmatmul.mubr.f32.gmra.mrb[50].mxu0 %v2663_v22  ;;  %v12831_v22 = vpack.c.bf16 %v1557_v21, %v1556_v20 }
 0x2f0   :  { %13178 = vmatpush3.bf16.msra.mxu0 %v16189_v53  ;;  %12383 = vmatprep.mubr.f32.mxu0 %v3060_v23  ;;  %v1750_v23 = vld [vmem:[#allocation9 + $0x180] sm:$0xff] }
 0x2f1   :  { %13180 = vmatprep.subr.bf16.mxu0 %v16197_v62 }
 0x2f4   :  { %13182 = vmatpush3.bf16.msra.mxu0 %v16197_v62 }
 0x2f5   :  { %13184 = vmatprep.subr.bf16.mxu0 %v16205_v7 }
 0x2f8   :  { %13186 = vmatpush3.bf16.msra.mxu0 %v16205_v7 }
 0x2f9   :  { %13188 = vmatprep.subr.bf16.mxu0 %v16213_v16 }
 0x2fc   :  { %13190 = vmatpush3.bf16.msra.mxu0 %v16213_v16 }
 0x2fd   :  { %13192 = vmatprep.subr.bf16.mxu0 %v16221_v25 }
 0x2fe   :  { %v11785_v24 = vpop.f32.mrb[24].mxu0 }
 0x2ff   :  { %v1130_v26 = vpop.f32.mrb[25].mxu0 }
 0x300   :  { %11805 = vmatprep.mubr.msk.f32.mxu1 %vm227_vm0, %v1130_v26  ;;  %13194 = vmatpush3.bf16.msra.mxu0 %v16221_v25 }
 0x301   :  { %11806 = vmatmul.mubr.msk.f32.vlgmr.msra.gmra.mrb[4].mxu1 %vm227_vm0, %v11785_v24  ;;  %13196 = vmatprep.subr.bf16.mxu0 %v16229_v35  ;;  %v1751_v24 = vld [vmem:[#allocation9 + $0x188] sm:$0xff] }
 0x302   :  { %12742 = vmatpush3.bf16.msra.mxu1 %v16181_v44  ;;  %v11788_v27 = vpop.f32.mrb[26].mxu0  ;;  %v12867_v26 = vpack.c.bf16 %v1751_v24, %v1750_v23  ;;  %v3263_v23 = vld [vmem:[#allocation8 + $0x1d8] sm:$0xff]  ;;  %v3460_v24 = vld [vmem:[#allocation8 + $0x1e0] sm:$0xff] }
 0x303   :  { %12744 = vmatprep.subr.bf16.mxu1 %v16189_v53  ;;  %v1140_v28 = vpop.f32.mrb[27].mxu0 }
 0x304   :  { %13198 = vmatpush3.bf16.msra.mxu0 %v16229_v35  ;;  %11808 = vmatprep.mubr.msk.f32.mxu1 %vm227_vm0, %v1140_v28  ;;  %v1753_v28 = vld [vmem:[#allocation9 + $0x198] sm:$0xff] }
 0x305   :  { %13200 = vmatprep.subr.bf16.mxu0 %v16235_v31  ;;  %11809 = vmatmul.mubr.msk.f32.gmra.mrb[6].mxu1 %vm227_vm0, %v11788_v27  ;;  %v1752_v27 = vld [vmem:[#allocation9 + $0x190] sm:$0xff] }
 0x306   :  { %12746 = vmatpush3.bf16.msra.mxu1 %v16189_v53  ;;  %11843 = vmatprep.mubr.f32.mxu1 %v1260_v29  ;;  %v12871_v29 = vpack.c.bf16 %v1753_v28, %v1752_v27  ;;  %v3461_v28 = vld [vmem:[#allocation8 + $0x1e8] sm:$0xff] }
 0x307   :  { %12748 = vmatprep.subr.bf16.mxu1 %v16197_v62 }
 0x308   :  { %13202 = vmatpush3.bf16.msra.mxu0 %v16235_v31 }
 0x309   :  { %13220 = vmatprep.subr.bf16.mxu0 %v16181_v44 }
 0x30a   :  { %12750 = vmatpush3.bf16.msra.mxu1 %v16197_v62 }
 0x30b   :  { %12752 = vmatprep.subr.bf16.mxu1 %v16205_v7  ;;  %12384 = vmatmul.mubr.f32.vlgmr.msra.gmra.mrb[52].mxu0 %v3061_v30  ;;  %v1754_v30 = vld [vmem:[#allocation9 + $0x1a0] sm:$0xff] }
 0x30c   :  { %13222 = vmatpush3.bf16.msra.mxu0 %v16181_v44  ;;  %12386 = vmatprep.mubr.f32.mxu0 %v3062_v32  ;;  %v1755_v32 = vld [vmem:[#allocation9 + $0x1a8] sm:$0xff] }
 0x30d   :  { %13224 = vmatprep.subr.bf16.mxu0 %v16189_v53 }
 0x30e   :  { %12754 = vmatpush3.bf16.msra.mxu1 %v16205_v7 }
 0x30f   :  { %12756 = vmatprep.subr.bf16.mxu1 %v16213_v16  ;;  %12387 = vmatmul.mubr.f32.gmra.mrb[54].mxu0 %v3063_v33  ;;  %v12875_v33 = vpack.c.bf16 %v1755_v32, %v1754_v30  ;;  %v3463_v30 = vld [vmem:[#allocation8 + $0x1f8] sm:$0xff]  ;;  %v2352_v32 = vld [vmem:[#allocation9 + $0x250] sm:$0xff] }
 0x310   :  { %13226 = vmatpush3.bf16.msra.mxu0 %v16189_v53  ;;  %12443 = vmatprep.mubr.f32.mxu0 %v3260_v34  ;;  %v1756_v34 = vld [vmem:[#allocation9 + $0x1b0] sm:$0xff] }
 0x311   :  { %13228 = vmatprep.subr.bf16.mxu0 %v16197_v62  ;;  %v12879_v37 = vpack.c.bf16 %v1757_v36, %v1756_v34 }
 0x312   :  { %12758 = vmatpush3.bf16.msra.mxu1 %v16213_v16 }
 0x313   :  { %12760 = vmatprep.subr.bf16.mxu1 %v16221_v25 }
 0x314   :  { %13230 = vmatpush3.bf16.msra.mxu0 %v16197_v62 }
 0x315   :  { %13232 = vmatprep.subr.bf16.mxu0 %v16205_v7 }
 0x316   :  { %12762 = vmatpush3.bf16.msra.mxu1 %v16221_v25 }
 0x317   :  { %12764 = vmatprep.subr.bf16.mxu1 %v16229_v35 }
 0x318   :  { %13234 = vmatpush3.bf16.msra.mxu0 %v16205_v7 }
 0x319   :  { %13236 = vmatprep.subr.bf16.mxu0 %v16213_v16 }
 0x31a   :  { %12766 = vmatpush3.bf16.msra.mxu1 %v16229_v35 }
 0x31b   :  { %12768 = vmatprep.subr.bf16.mxu1 %v16235_v31 }
 0x31c   :  { %13238 = vmatpush3.bf16.msra.mxu0 %v16213_v16 }
 0x31d   :  { %13240 = vmatprep.subr.bf16.mxu0 %v16221_v25 }
 0x31e   :  { %12770 = vmatpush3.bf16.msra.mxu1 %v16235_v31  ;;  %v16432_v42 = vpop.f32.mrb[28].mxu0 }
 0x31f   :  { %v16434_v45 = vpop.f32.mrb[29].mxu0  ;;  %12772 = vmatprep.subr.bf16.mxu1 %v12771_v38 }
 0x320   :  { %13242 = vmatpush3.bf16.msra.mxu0 %v16221_v25 }
 0x321   :  { %11844 = vmatmul.mubr.f32.vlgmr.msra.gmra.mrb[8].mxu1 %v1261_v41  ;;  %13244 = vmatprep.subr.bf16.mxu0 %v16229_v35  ;;  %v1952_v41 = vld [vmem:[#allocation9 + $0x1d0] sm:$0xff] }
 0x322   :  { %11846 = vmatprep.mubr.f32.mxu1 %v1262_v43  ;;  %12774 = vmatpush3.bf16.msra.mxu1 %v12771_v38  ;;  %v11908_v59 = vpop.f32.mrb[30].mxu0  ;;  %v1950_v38 = vld [vmem:[#allocation9 + $0x1c0] sm:$0xff] }
 0x323   :  { %12776 = vmatprep.subr.bf16.mxu1 %v12775_v46  ;;  %v1540_v60 = vpop.f32.mrb[31].mxu0  ;;  %v12915_v40 = vpack.c.bf16 %v1951_v39, %v1950_v38  ;;  %v2354_v38 = vld [vmem:[#allocation9 + $0x260] sm:$0xff]  ;;  %v2355_v39 = vld [vmem:[#allocation9 + $0x268] sm:$0xff] }
 0x324   :  { %13246 = vmatpush3.bf16.msra.mxu0 %v16229_v35 }
 0x325   :  { %11847 = vmatmul.mubr.f32.gmra.mrb[10].mxu1 %v1263_v49  ;;  %13248 = vmatprep.subr.bf16.mxu0 %v16235_v31  ;;  %v1957_v49 = vld [vmem:[#allocation9 + $0x1f8] sm:$0xff] }
 0x326   :  { %12778 = vmatpush3.bf16.msra.mxu1 %v12775_v46  ;;  %v1955_v46 = vld [vmem:[#allocation9 + $0x1e8] sm:$0xff] }
 0x327   :  { %12780 = vmatprep.subr.bf16.mxu1 %v12779_v50 }
 0x328   :  { %13250 = vmatpush3.bf16.msra.mxu0 %v16235_v31 }
 0x329   :  { %13268 = vmatprep.subr.bf16.mxu0 %v16181_v44 }
 0x32a   :  { %12782 = vmatpush3.bf16.msra.mxu1 %v12779_v50  ;;  %v12927_v50 = vpack.c.bf16 %v1957_v49, %v1956_v48  ;;  %v2551_v48 = vld [vmem:[#allocation9 + $0x288] sm:$0xff] }
 0x32b   :  { %12444 = vmatmul.mubr.f32.vlgmr.msra.gmra.mrb[56].mxu0 %v3261_v55  ;;  %12784 = vmatprep.subr.bf16.mxu1 %v12783_v54 }
 0x32c   :  { %13270 = vmatpush3.bf16.msra.mxu0 %v16181_v44 }
 0x32d   :  { %13272 = vmatprep.subr.bf16.mxu0 %v16189_v53 }
 0x32e   :  { %12786 = vmatpush3.bf16.msra.mxu1 %v12783_v54  ;;  %v2151_v54 = vld [vmem:[#allocation9 + $0x208] sm:$0xff] }
 0x32f   :  { %12820 = vmatprep.subr.bf16.mxu1 %v12819_v58  ;;  %v12963_v55 = vpack.c.bf16 %v2151_v54, %v2150_v52  ;;  %v2554_v54 = vld [vmem:[#allocation9 + $0x2a0] sm:$0xff] }
 0x330   :  { %13274 = vmatpush3.bf16.msra.mxu0 %v16189_v53 }
 0x331   :  { %13276 = vmatprep.subr.bf16.mxu0 %v16197_v62 }
 0x334   :  { %13278 = vmatpush3.bf16.msra.mxu0 %v16197_v62 }
 0x335   :  { %13280 = vmatprep.subr.bf16.mxu0 %v16205_v7 }
 0x338   :  { %13282 = vmatpush3.bf16.msra.mxu0 %v16205_v7 }
 0x339   :  { %13284 = vmatprep.subr.bf16.mxu0 %v16213_v16 }
 0x33c   :  { %13286 = vmatpush3.bf16.msra.mxu0 %v16213_v16 }
 0x33d   :  { %13288 = vmatprep.subr.bf16.mxu0 %v16221_v25 }
 0x33e   :  { %v16457_v61 = vpop.f32.mrb[32].mxu0 }
 0x33f   :  { %v1730_v63 = vpop.f32.mrb[33].mxu0 }
 0x340   :  { %13290 = vmatpush3.bf16.msra.mxu0 %v16221_v25 }
 0x341   :  { %13292 = vmatprep.subr.bf16.mxu0 %v16229_v35 }
 0x342   :  { %v16459_v0 = vpop.f32.mrb[34].mxu0 }
 0x343   :  { %v16461_v1 = vpop.f32.mrb[35].mxu0 }
 0x344   :  { %13294 = vmatpush3.bf16.msra.mxu0 %v16229_v35 }
 0x345   :  { %13296 = vmatprep.subr.bf16.mxu0 %v16235_v31 }
 0x348   :  { %13298 = vmatpush3.bf16.msra.mxu0 %v16235_v31 }
 0x35e   :  { %v16463_v2 = vpop.f32.mrb[36].mxu0 }
 0x35f   :  { %v16465_v3 = vpop.f32.mrb[37].mxu0 }
 0x362   :  { %v16467_v4 = vpop.f32.mrb[38].mxu0 }
 0x363   :  { %v16469_v5 = vpop.f32.mrb[39].mxu0 }
 0x37e   :  { %v16471_v6 = vpop.f32.mrb[40].mxu0 }
 0x37f   :  { %v16473_v8 = vpop.f32.mrb[41].mxu0 }
 0x3f4   :  { %v11845_v11 = vpop.f32.mrb[8].mxu1 }
 0x3f5   :  { %v1330_v12 = vpop.f32.mrb[9].mxu1 }
 0x3f6   :  { %11865 = vmatprep.mubr.msk.f32.mxu1 %vm227_vm0, %v1330_v12 }
 0x3f7   :  { %11866 = vmatmul.mubr.msk.f32.vlgmr.msra.gmra.mrb[4].mxu1 %vm227_vm0, %v11845_v11  ;;  %v16516_v11 = vpop.f32.mrb[42].mxu0 }
 0x3f8   :  { %12822 = vmatpush3.bf16.msra.mxu1 %v12819_v58  ;;  %v11848_v17 = vpop.f32.mrb[10].mxu1  ;;  %v2061_v58 = vld [vmem:[#allocation8 + $0x108] sm:$0xff]  ;;  %v2340_v12 = vpop.f32.mrb[43].mxu0 }
 0x3f9   :  { %v1340_v18 = vpop.f32.mrb[11].mxu1  ;;  %12824 = vmatprep.subr.bf16.mxu1 %v12823_v13 }
 0x3fa   :  { %11868 = vmatprep.mubr.msk.f32.mxu1 %vm227_vm0, %v1340_v18 }
 0x3fb   :  { %11869 = vmatmul.mubr.msk.f32.gmra.mrb[6].mxu1 %vm227_vm0, %v11848_v17 }
 0x3fc   :  { %12826 = vmatpush3.bf16.msra.mxu1 %v12823_v13  ;;  %11925 = vmatprep.mubr.msk.f32.mxu1 %vm227_vm0, %v16434_v45  ;;  %v1954_v45 = vld [vmem:[#allocation9 + $0x1e0] sm:$0xff]  ;;  %v16518_v13 = vpop.f32.mrb[44].mxu0 }
 0x3fd   :  { %12828 = vmatprep.subr.bf16.mxu1 %v12827_v19  ;;  %v12923_v47 = vpack.c.bf16 %v1955_v46, %v1954_v45  ;;  %v16520_v14 = vpop.f32.mrb[45].mxu0  ;;  %v2357_v45 = vld [vmem:[#allocation9 + $0x278] sm:$0xff] }
 0x3fe   :  { %v16522_v15 = vpop.f32.mrb[46].mxu0 }
 0x3ff   :  { %v16524_v17 = vpop.f32.mrb[47].mxu0 }
 0x400   :  { %12830 = vmatpush3.bf16.msra.mxu1 %v12827_v19  ;;  %v16526_v18 = vpop.f32.mrb[48].mxu0 }
 0x401   :  { %12832 = vmatprep.subr.bf16.mxu1 %v12831_v22  ;;  %v16528_v19 = vpop.f32.mrb[49].mxu0 }
 0x402   :  { %v16530_v20 = vpop.f32.mrb[50].mxu0 }
 0x403   :  { %v16532_v21 = vpop.f32.mrb[51].mxu0 }
 0x404   :  { %12834 = vmatpush3.bf16.msra.mxu1 %v12831_v22  ;;  %v3262_v22 = vld [vmem:[#allocation8 + $0x1d0] sm:$0xff] }
 0x405   :  { %12868 = vmatprep.subr.bf16.mxu1 %v12867_v26  ;;  %12446 = vmatprep.mubr.f32.mxu0 %v3262_v22 }
 0x406   :  { %12447 = vmatmul.mubr.f32.gmra.mrb[58].mxu0 %v3263_v23 }
 0x407   :  { %11926 = vmatmul.mubr.msk.f32.vlgmr.msra.gmra.mrb[4].mxu1 %vm227_vm0, %v16432_v42  ;;  %v1953_v42 = vld [vmem:[#allocation9 + $0x1d8] sm:$0xff]  ;;  %12503 = vmatprep.mubr.f32.mxu0 %v3460_v24 }
 0x408   :  { %11928 = vmatprep.mubr.msk.f32.mxu1 %vm227_vm0, %v1540_v60  ;;  %12870 = vmatpush3.bf16.msra.mxu1 %v12867_v26  ;;  %v12919_v43 = vpack.c.bf16 %v1953_v42, %v1952_v41  ;;  %v12967_v60 = vpack.c.bf16 %v2153_v57, %v2152_v56  ;;  %v16534_v26 = vpop.f32.mrb[52].mxu0  ;;  %v13019_v42 = vpack.c.bf16 %v2355_v39, %v2354_v38  ;;  %v2556_v56 = vld [vmem:[#allocation9 + $0x2b0] sm:$0xff]  ;;  %v2557_v57 = vld [vmem:[#allocation9 + $0x2b8] sm:$0xff] }
 0x409   :  { %12872 = vmatprep.subr.bf16.mxu1 %v12871_v29  ;;  %v16536_v27 = vpop.f32.mrb[53].mxu0  ;;  %v3153_v38 = vld [vmem:[#allocation9 + $0x358] sm:$0xff] }
 0x40a   :  { %12504 = vmatmul.mubr.f32.vlgmr.msra.gmra.mrb[60].mxu0 %v3461_v28  ;;  %v12388_v22 = vpop.f32.mrb[54].mxu0 }
 0x40b   :  { %11929 = vmatmul.mubr.msk.f32.gmra.mrb[6].mxu1 %vm227_vm0, %v11908_v59  ;;  %v2062_v59 = vld [vmem:[#allocation8 + $0x110] sm:$0xff]  ;;  %v3140_v23 = vpop.f32.mrb[55].mxu0 }
 0x40c   :  { %12874 = vmatpush3.bf16.msra.mxu1 %v12871_v29  ;;  %11985 = vmatprep.mubr.msk.f32.mxu1 %vm227_vm0, %v1730_v63  ;;  %v2155_v63 = vld [vmem:[#allocation9 + $0x228] sm:$0xff]  ;;  %v3462_v29 = vld [vmem:[#allocation8 + $0x1f0] sm:$0xff]  ;;  %v16581_v24 = vpop.f32.mrb[56].mxu0 }
 0x40d   :  { %12876 = vmatprep.subr.bf16.mxu1 %v12875_v33  ;;  %12506 = vmatprep.mubr.f32.mxu0 %v3462_v29  ;;  %v3330_v28 = vpop.f32.mrb[57].mxu0 }
 0x40e   :  { %12507 = vmatmul.mubr.f32.gmra.mrb[62].mxu0 %v3463_v30 }
 0x410   :  { %12878 = vmatpush3.bf16.msra.mxu1 %v12875_v33  ;;  %v2353_v33 = vld [vmem:[#allocation9 + $0x258] sm:$0xff] }
 0x411   :  { %12880 = vmatprep.subr.bf16.mxu1 %v12879_v37 }
 0x414   :  { %12882 = vmatpush3.bf16.msra.mxu1 %v12879_v37  ;;  %v13015_v37 = vpack.c.bf16 %v2353_v33, %v2352_v32 }
 0x415   :  { %12916 = vmatprep.subr.bf16.mxu1 %v12915_v40 }
 0x417   :  { %11986 = vmatmul.mubr.msk.f32.vlgmr.msra.gmra.mrb[4].mxu1 %vm227_vm0, %v16457_v61  ;;  %v2154_v61 = vld [vmem:[#allocation9 + $0x220] sm:$0xff] }
 0x418   :  { %12918 = vmatpush3.bf16.msra.mxu1 %v12915_v40  ;;  %11988 = vmatprep.mubr.msk.f32.mxu1 %vm227_vm0, %v16461_v1  ;;  %v12971_v1 = vpack.c.bf16 %v2155_v63, %v2154_v61  ;;  %v2752_v61 = vld [vmem:[#allocation9 + $0x2d0] sm:$0xff]  ;;  %v2753_v63 = vld [vmem:[#allocation9 + $0x2d8] sm:$0xff] }
 0x419   :  { %12920 = vmatprep.subr.bf16.mxu1 %v12919_v43 }
 0x41b   :  { %11989 = vmatmul.mubr.msk.f32.gmra.mrb[6].mxu1 %vm227_vm0, %v16459_v0  ;;  %v2063_v0 = vld [vmem:[#allocation8 + $0x118] sm:$0xff] }
 0x41c   :  { %12922 = vmatpush3.bf16.msra.mxu1 %v12919_v43  ;;  %12045 = vmatprep.mubr.msk.f32.mxu1 %vm227_vm0, %v16465_v3  ;;  %v2157_v3 = vld [vmem:[#allocation9 + $0x238] sm:$0xff]  ;;  %v2356_v43 = vld [vmem:[#allocation9 + $0x270] sm:$0xff] }
 0x41d   :  { %12924 = vmatprep.subr.bf16.mxu1 %v12923_v47  ;;  %v13023_v46 = vpack.c.bf16 %v2357_v45, %v2356_v43  ;;  %v3155_v43 = vld [vmem:[#allocation9 + $0x368] sm:$0xff] }
 0x420   :  { %12926 = vmatpush3.bf16.msra.mxu1 %v12923_v47  ;;  %v2550_v47 = vld [vmem:[#allocation9 + $0x280] sm:$0xff] }
 0x421   :  { %12928 = vmatprep.subr.bf16.mxu1 %v12927_v50  ;;  %v13059_v49 = vpack.c.bf16 %v2551_v48, %v2550_v47  ;;  %v3156_v48 = vld [vmem:[#allocation9 + $0x370] sm:$0xff] }
 0x424   :  { %12930 = vmatpush3.bf16.msra.mxu1 %v12927_v50  ;;  %v2552_v50 = vld [vmem:[#allocation9 + $0x290] sm:$0xff] }
 0x425   :  { %12932 = vmatprep.subr.bf16.mxu1 %v16181_v44 }
 0x427   :  { %12046 = vmatmul.mubr.msk.f32.vlgmr.msra.gmra.mrb[4].mxu1 %vm227_vm0, %v16463_v2  ;;  %v2156_v2 = vld [vmem:[#allocation9 + $0x230] sm:$0xff] }
 0x428   :  { %12934 = vmatpush3.bf16.msra.mxu1 %v16181_v44  ;;  %12048 = vmatprep.mubr.msk.f32.mxu1 %vm227_vm0, %v16469_v5  ;;  %v2350_v5 = vld [vmem:[#allocation9 + $0x240] sm:$0xff] }
 0x429   :  { %12936 = vmatprep.subr.bf16.mxu1 %v16189_v53  ;;  %v13011_v10 = vpack.c.bf16 %v2351_v9, %v2350_v5  ;;  %v2757_v5 = vld [vmem:[#allocation9 + $0x2f8] sm:$0xff] }
 0x42b   :  { %12049 = vmatmul.mubr.msk.f32.gmra.mrb[6].mxu1 %vm227_vm0, %v16467_v4  ;;  %v12975_v4 = vpack.c.bf16 %v2157_v3, %v2156_v2  ;;  %v2755_v2 = vld [vmem:[#allocation9 + $0x2e8] sm:$0xff] }
 0x42c   :  { %12938 = vmatpush3.bf16.msra.mxu1 %v16189_v53  ;;  %12083 = vmatprep.mubr.f32.mxu1 %v2060_v51  ;;  %v2553_v51 = vld [vmem:[#allocation9 + $0x298] sm:$0xff] }
 0x42d   :  { %12940 = vmatprep.subr.bf16.mxu1 %v16197_v62  ;;  %v13063_v52 = vpack.c.bf16 %v2553_v51, %v2552_v50  ;;  %v3350_v51 = vld [vmem:[#allocation9 + $0x380] sm:$0xff] }
 0x430   :  { %12942 = vmatpush3.bf16.msra.mxu1 %v16197_v62 }
 0x431   :  { %12944 = vmatprep.subr.bf16.mxu1 %v16205_v7 }
 0x434   :  { %12946 = vmatpush3.bf16.msra.mxu1 %v16205_v7 }
 0x435   :  { %12948 = vmatprep.subr.bf16.mxu1 %v16213_v16 }
 0x438   :  { %12950 = vmatpush3.bf16.msra.mxu1 %v16213_v16 }
 0x439   :  { %12952 = vmatprep.subr.bf16.mxu1 %v16221_v25 }
 0x43c   :  { %12954 = vmatpush3.bf16.msra.mxu1 %v16221_v25 }
 0x43d   :  { %12956 = vmatprep.subr.bf16.mxu1 %v16229_v35 }
 0x440   :  { %12958 = vmatpush3.bf16.msra.mxu1 %v16229_v35 }
 0x441   :  { %12960 = vmatprep.subr.bf16.mxu1 %v16235_v31 }
 0x444   :  { %12962 = vmatpush3.bf16.msra.mxu1 %v16235_v31 }
 0x445   :  { %12964 = vmatprep.subr.bf16.mxu1 %v12963_v55 }
 0x447   :  { %12084 = vmatmul.mubr.f32.vlgmr.msra.gmra.mrb[12].mxu1 %v2061_v58  ;;  %v13071_v58 = vpack.c.bf16 %v2557_v57, %v2556_v56  ;;  %v3354_v57 = vld [vmem:[#allocation9 + $0x3a0] sm:$0xff] }
 0x448   :  { %12086 = vmatprep.mubr.f32.mxu1 %v2062_v59  ;;  %12966 = vmatpush3.bf16.msra.mxu1 %v12963_v55  ;;  %v2555_v55 = vld [vmem:[#allocation9 + $0x2a8] sm:$0xff]  ;;  %v2750_v59 = vld [vmem:[#allocation9 + $0x2c0] sm:$0xff] }
 0x449   :  { %12968 = vmatprep.subr.bf16.mxu1 %v12967_v60 }
 0x44b   :  { %12087 = vmatmul.mubr.f32.gmra.mrb[14].mxu1 %v2063_v0  ;;  %v13111_v0 = vpack.c.bf16 %v2753_v63, %v2752_v61  ;;  %v3550_v61 = vld [vmem:[#allocation9 + $0x3c0] sm:$0xff]  ;;  %v3551_v63 = vld [vmem:[#allocation9 + $0x3c8] sm:$0xff] }
 0x44c   :  { %12970 = vmatpush3.bf16.msra.mxu1 %v12967_v60  ;;  %v2751_v60 = vld [vmem:[#allocation9 + $0x2c8] sm:$0xff] }
 0x44d   :  { %12972 = vmatprep.subr.bf16.mxu1 %v12971_v1 }
 0x450   :  { %12974 = vmatpush3.bf16.msra.mxu1 %v12971_v1  ;;  %v2754_v1 = vld [vmem:[#allocation9 + $0x2e0] sm:$0xff] }
 0x451   :  { %12976 = vmatprep.subr.bf16.mxu1 %v12975_v4  ;;  %v13115_v3 = vpack.c.bf16 %v2755_v2, %v2754_v1  ;;  %v3553_v1 = vld [vmem:[#allocation9 + $0x3d8] sm:$0xff] }
 0x454   :  { %12978 = vmatpush3.bf16.msra.mxu1 %v12975_v4  ;;  %v2756_v4 = vld [vmem:[#allocation9 + $0x2f0] sm:$0xff] }
 0x455   :  { %13012 = vmatprep.subr.bf16.mxu1 %v13011_v10  ;;  %v13119_v9 = vpack.c.bf16 %v2757_v5, %v2756_v4  ;;  %v3555_v4 = vld [vmem:[#allocation9 + $0x3e8] sm:$0xff] }
 0x4d9   :  { %v16583_v29 = vpop.f32.mrb[58].mxu0 }
 0x4da   :  { %v16585_v30 = vpop.f32.mrb[59].mxu0 }
 0x4dd   :  { %v16587_v32 = vpop.f32.mrb[60].mxu0 }
 0x4de   :  { %v16589_v33 = vpop.f32.mrb[61].mxu0 }
 0x51a   :  { %v12085_v34 = vpop.f32.mrb[12].mxu1 }
 0x51b   :  { %v2130_v36 = vpop.f32.mrb[13].mxu1 }
 0x51c   :  { %12105 = vmatprep.mubr.msk.f32.mxu1 %vm227_vm0, %v2130_v36 }
 0x51d   :  { %12106 = vmatmul.mubr.msk.f32.vlgmr.msra.gmra.mrb[4].mxu1 %vm227_vm0, %v12085_v34  ;;  %v16591_v34 = vpop.f32.mrb[62].mxu0 }
 0x51e   :  { %13014 = vmatpush3.bf16.msra.mxu1 %v13011_v10  ;;  %v12088_v40 = vpop.f32.mrb[14].mxu1  ;;  %v2860_v10 = vld [vmem:[#allocation8 + $0x180] sm:$0xff]  ;;  %v16593_v36 = vpop.f32.mrb[63].mxu0 }
 0x51f   :  { %v2140_v41 = vpop.f32.mrb[15].mxu1  ;;  %13016 = vmatprep.subr.bf16.mxu1 %v13015_v37 }
 0x520   :  { %12108 = vmatprep.mubr.msk.f32.mxu1 %vm227_vm0, %v2140_v41 }
 0x521   :  { %12109 = vmatmul.mubr.msk.f32.gmra.mrb[6].mxu1 %vm227_vm0, %v12088_v40 }
 0x522   :  { %13018 = vmatpush3.bf16.msra.mxu1 %v13015_v37  ;;  %12165 = vmatprep.mubr.msk.f32.mxu1 %vm227_vm0, %v16473_v8  ;;  %v13067_v8 = vpack.c.bf16 %v2555_v55, %v2554_v54  ;;  %v3152_v37 = vld [vmem:[#allocation9 + $0x350] sm:$0xff] }
 0x523   :  { %13020 = vmatprep.subr.bf16.mxu1 %v13019_v42  ;;  %v13207_v41 = vpack.c.bf16 %v3153_v38, %v3152_v37  ;;  %v3352_v55 = vld [vmem:[#allocation9 + $0x390] sm:$0xff]  ;;  %v3917_v38 = vld [vmem:[#allocation15 + $0x558] sm:$0xff] }
 0x526   :  { %13022 = vmatpush3.bf16.msra.mxu1 %v13019_v42  ;;  %v3154_v42 = vld [vmem:[#allocation9 + $0x360] sm:$0xff] }
 0x527   :  { %13024 = vmatprep.subr.bf16.mxu1 %v13023_v46  ;;  %v13211_v47 = vpack.c.bf16 %v3155_v43, %v3154_v42  ;;  %v3908_v43 = vld [vmem:[#allocation15 + $0x510] sm:$0xff] }
 0x52a   :  { %13026 = vmatpush3.bf16.msra.mxu1 %v13023_v46 }
 0x52b   :  { %13060 = vmatprep.subr.bf16.mxu1 %v13059_v49 }
 0x52d   :  { %12166 = vmatmul.mubr.msk.f32.vlgmr.msra.gmra.mrb[4].mxu1 %vm227_vm0, %v16471_v6  ;;  %v13107_v6 = vpack.c.bf16 %v2751_v60, %v2750_v59  ;;  %v3356_v59 = vld [vmem:[#allocation9 + $0x3b0] sm:$0xff]  ;;  %v3357_v60 = vld [vmem:[#allocation9 + $0x3b8] sm:$0xff] }
 0x52e   :  { %12168 = vmatprep.mubr.msk.f32.mxu1 %vm227_vm0, %v2340_v12  ;;  %13062 = vmatpush3.bf16.msra.mxu1 %v13059_v49  ;;  %v2953_v12 = vld [vmem:[#allocation9 + $0x318] sm:$0xff] }
 0x52f   :  { %13064 = vmatprep.subr.bf16.mxu1 %v13063_v52  ;;  %v3157_v49 = vld [vmem:[#allocation9 + $0x378] sm:$0xff] }
 0x530   :  { %v13215_v50 = vpack.c.bf16 %v3157_v49, %v3156_v48  ;;  %v3931_v48 = vld [vmem:[#allocation15 + $0x5c8] sm:$0xff]  ;;  %v3925_v49 = vld [vmem:[#allocation15 + $0x598] sm:$0xff] }
 0x531   :  { %12169 = vmatmul.mubr.msk.f32.gmra.mrb[6].mxu1 %vm227_vm0, %v16516_v11  ;;  %v2952_v11 = vld [vmem:[#allocation9 + $0x310] sm:$0xff] }
 0x532   :  { %13066 = vmatpush3.bf16.msra.mxu1 %v13063_v52  ;;  %12225 = vmatprep.mubr.msk.f32.mxu1 %vm227_vm0, %v16520_v14  ;;  %v2954_v14 = vld [vmem:[#allocation9 + $0x320] sm:$0xff]  ;;  %v3351_v52 = vld [vmem:[#allocation9 + $0x388] sm:$0xff] }
 0x533   :  { %13068 = vmatprep.subr.bf16.mxu1 %v13067_v8  ;;  %v13251_v54 = vpack.c.bf16 %v3351_v52, %v3350_v51  ;;  %v3933_v51 = vld [vmem:[#allocation15 + $0x5d8] sm:$0xff]  ;;  %v3922_v52 = vld [vmem:[#allocation15 + $0x580] sm:$0xff] }
 0x536   :  { %13070 = vmatpush3.bf16.msra.mxu1 %v13067_v8  ;;  %v3353_v8 = vld [vmem:[#allocation9 + $0x398] sm:$0xff] }
 0x537   :  { %13072 = vmatprep.subr.bf16.mxu1 %v13071_v58  ;;  %v13255_v56 = vpack.c.bf16 %v3353_v8, %v3352_v55  ;;  %v13359_v55 = vpack.c.bf16 %v3933_v51, %v3925_v49 }
 0x53a   :  { %13074 = vmatpush3.bf16.msra.mxu1 %v13071_v58  ;;  %v3355_v58 = vld [vmem:[#allocation9 + $0x3a8] sm:$0xff] }
 0x53b   :  { %13108 = vmatprep.subr.bf16.mxu1 %v13107_v6 }
 0x53d   :  { %12226 = vmatmul.mubr.msk.f32.vlgmr.msra.gmra.mrb[4].mxu1 %vm227_vm0, %v16518_v13  ;;  %v2862_v13 = vld [vmem:[#allocation8 + $0x190] sm:$0xff] }
 0x53e   :  { %13110 = vmatpush3.bf16.msra.mxu1 %v13107_v6  ;;  %12228 = vmatprep.mubr.msk.f32.mxu1 %vm227_vm0, %v16524_v17  ;;  %v13263_v6 = vpack.c.bf16 %v3357_v60, %v3356_v59  ;;  %v3947_v59 = vld [vmem:[#allocation15 + $0x648] sm:$0xff]  ;;  %v3941_v60 = vld [vmem:[#allocation15 + $0x618] sm:$0xff] }
 0x53f   :  { %13112 = vmatprep.subr.bf16.mxu1 %v13111_v0 }
 0x541   :  { %12229 = vmatmul.mubr.msk.f32.gmra.mrb[6].mxu1 %vm227_vm0, %v16522_v15  ;;  %v2955_v15 = vld [vmem:[#allocation9 + $0x328] sm:$0xff] }
 0x542   :  { %13114 = vmatpush3.bf16.msra.mxu1 %v13111_v0  ;;  %12285 = vmatprep.mubr.msk.f32.mxu1 %vm227_vm0, %v16528_v19  ;;  %v13163_v17 = vpack.c.bf16 %v2955_v15, %v2954_v14  ;;  %v13299_v0 = vpack.c.bf16 %v3551_v63, %v3550_v61  ;;  %v3949_v61 = vld [vmem:[#allocation15 + $0x658] sm:$0xff]  ;;  %v3938_v63 = vld [vmem:[#allocation15 + $0x600] sm:$0xff] }
 0x543   :  { %13116 = vmatprep.subr.bf16.mxu1 %v13115_v3 }
 0x546   :  { %13118 = vmatpush3.bf16.msra.mxu1 %v13115_v3  ;;  %v3554_v3 = vld [vmem:[#allocation9 + $0x3e0] sm:$0xff] }
 0x547   :  { %13120 = vmatprep.subr.bf16.mxu1 %v13119_v9  ;;  %v13307_v5 = vpack.c.bf16 %v3555_v4, %v3554_v3 }
 0x54a   :  { %13122 = vmatpush3.bf16.msra.mxu1 %v13119_v9  ;;  %v3556_v9 = vld [vmem:[#allocation9 + $0x3f0] sm:$0xff] }
 0x54b   :  { %13124 = vmatprep.subr.bf16.mxu1 %v16181_v44 }
 0x54d   :  { %12286 = vmatmul.mubr.msk.f32.vlgmr.msra.gmra.mrb[4].mxu1 %vm227_vm0, %v16526_v18  ;;  %v2957_v18 = vld [vmem:[#allocation9 + $0x338] sm:$0xff] }
 0x54e   :  { %13126 = vmatpush3.bf16.msra.mxu1 %v16181_v44  ;;  %12288 = vmatprep.mubr.msk.f32.mxu1 %vm227_vm0, %v16532_v21  ;;  %v2950_v44 = vld [vmem:[#allocation9 + $0x300] sm:$0xff] }
 0x54f   :  { %13128 = vmatprep.subr.bf16.mxu1 %v16189_v53 }
 0x551   :  { %12289 = vmatmul.mubr.msk.f32.gmra.mrb[6].mxu1 %vm227_vm0, %v16530_v20  ;;  %v3151_v20 = vld [vmem:[#allocation9 + $0x348] sm:$0xff] }
 0x552   :  { %13130 = vmatpush3.bf16.msra.mxu1 %v16189_v53  ;;  %12323 = vmatprep.mubr.f32.mxu1 %v2860_v10  ;;  %v2951_v53 = vld [vmem:[#allocation9 + $0x308] sm:$0xff]  ;;  %v3557_v10 = vld [vmem:[#allocation9 + $0x3f8] sm:$0xff] }
 0x553   :  { %13132 = vmatprep.subr.bf16.mxu1 %v16197_v62 }
 0x556   :  { %13134 = vmatpush3.bf16.msra.mxu1 %v16197_v62  ;;  %v13155_v62 = vpack.c.bf16 %v2951_v53, %v2950_v44  ;;  %v13311_v44 = vpack.c.bf16 %v3557_v10, %v3556_v9  ;;  %v3875_v53 = vld [vmem:[#allocation15 + $0x408] sm:$0xff]  ;;  %v3957_v10 = vld [vmem:[#allocation15 + $0x698] sm:$0xff] }
 0x557   :  { %13136 = vmatprep.subr.bf16.mxu1 %v16205_v7  ;;  %v3963_v9 = vld [vmem:[#allocation15 + $0x6c8] sm:$0xff] }
 0x55a   :  { %13138 = vmatpush3.bf16.msra.mxu1 %v16205_v7  ;;  %v2861_v7 = vld [vmem:[#allocation8 + $0x188] sm:$0xff] }
 0x55b   :  { %13140 = vmatprep.subr.bf16.mxu1 %v16213_v16 }
 0x55e   :  { %13142 = vmatpush3.bf16.msra.mxu1 %v16213_v16  ;;  %v13159_v16 = vpack.c.bf16 %v2953_v12, %v2952_v11  ;;  %v3877_v11 = vld [vmem:[#allocation15 + $0x418] sm:$0xff] }
 0x55f   :  { %13144 = vmatprep.subr.bf16.mxu1 %v16221_v25 }
 0x562   :  { %13146 = vmatpush3.bf16.msra.mxu1 %v16221_v25  ;;  %v2863_v25 = vld [vmem:[#allocation8 + $0x198] sm:$0xff] }
 0x563   :  { %13148 = vmatprep.subr.bf16.mxu1 %v16229_v35 }
 0x566   :  { %13150 = vmatpush3.bf16.msra.mxu1 %v16229_v35  ;;  %v2956_v35 = vld [vmem:[#allocation9 + $0x330] sm:$0xff] }
 0x567   :  { %13152 = vmatprep.subr.bf16.mxu1 %v16235_v31  ;;  %v13167_v19 = vpack.c.bf16 %v2957_v18, %v2956_v35  ;;  %v3891_v18 = vld [vmem:[#allocation15 + $0x488] sm:$0xff] }
 0x56a   :  { %13154 = vmatpush3.bf16.msra.mxu1 %v16235_v31  ;;  %v3150_v31 = vld [vmem:[#allocation9 + $0x340] sm:$0xff] }
 0x56b   :  { %13156 = vmatprep.subr.bf16.mxu1 %v13155_v62  ;;  %v13203_v21 = vpack.c.bf16 %v3151_v20, %v3150_v31  ;;  %v3893_v31 = vld [vmem:[#allocation15 + $0x498] sm:$0xff] }
 0x56d   :  { %12324 = vmatmul.mubr.f32.vlgmr.msra.gmra.mrb[16].mxu1 %v2861_v7  ;;  %v3885_v7 = vld [vmem:[#allocation15 + $0x458] sm:$0xff] }
 0x56e   :  { %12326 = vmatprep.mubr.f32.mxu1 %v2862_v13  ;;  %13158 = vmatpush3.bf16.msra.mxu1 %v13155_v62  ;;  %v3883_v62 = vld [vmem:[#allocation15 + $0x448] sm:$0xff]  ;;  %v3874_v13 = vld [vmem:[#allocation15 + $0x400] sm:$0xff]  ;;  %v13347_v14 = vpack.c.bf16 %v3885_v7, %v3877_v11 }
 0x56f   :  { %13160 = vmatprep.subr.bf16.mxu1 %v13159_v16  ;;  %v13315_v12 = vpack.c.bf16 %v3883_v62, %v3875_v53  ;;  %v3965_v53 = vld [vmem:[#allocation15 + $0x6d8] sm:$0xff]  ;;  %v3954_v62 = vld [vmem:[#allocation15 + $0x680] sm:$0xff] }
 0x570   :  { %13348 = vmatprep.subr.bf16.mxu0 %v13347_v14  ;;  %v3962_v11 = vld [vmem:[#allocation15 + $0x6c0] sm:$0xff] }
 0x571   :  { %12327 = vmatmul.mubr.f32.gmra.mrb[18].mxu1 %v2863_v25  ;;  %v3876_v25 = vld [vmem:[#allocation15 + $0x410] sm:$0xff]  ;;  %v13337_v7 = vpack.c.bf16 %v3962_v11, %v3954_v62 }
 0x572   :  { %13162 = vmatpush3.bf16.msra.mxu1 %v13159_v16  ;;  %v3882_v16 = vld [vmem:[#allocation15 + $0x440] sm:$0xff] }
 0x573   :  { %13164 = vmatprep.subr.bf16.mxu1 %v13163_v17  ;;  %v13317_v15 = vpack.c.bf16 %v3882_v16, %v3874_v13  ;;  %v3956_v13 = vld [vmem:[#allocation15 + $0x690] sm:$0xff] }
 0x574   :  { %v3964_v16 = vld [vmem:[#allocation15 + $0x6d0] sm:$0xff] }
 0x575   :  { %v13369_v14 = vpack.c.bf16 %v3964_v16, %v3956_v13 }
 0x576   :  { %13166 = vmatpush3.bf16.msra.mxu1 %v13163_v17  ;;  %v3884_v17 = vld [vmem:[#allocation15 + $0x450] sm:$0xff] }
 0x577   :  { %13168 = vmatprep.subr.bf16.mxu1 %v13167_v19  ;;  %v13349_v35 = vpack.c.bf16 %v3884_v17, %v3876_v25  ;;  %v3979_v25 = vld [vmem:[#allocation15 + $0x748] sm:$0xff]  ;;  %v3973_v17 = vld [vmem:[#allocation15 + $0x718] sm:$0xff] }
 0x579   :  { %13350 = vmatpush1.bf16.msra.mxu0 %v13349_v35 }
 0x57a   :  { %13170 = vmatpush3.bf16.msra.mxu1 %v13167_v19  ;;  %v3899_v19 = vld [vmem:[#allocation15 + $0x4c8] sm:$0xff] }
 0x57b   :  { %13204 = vmatprep.subr.bf16.mxu1 %v13203_v21  ;;  %v13319_v20 = vpack.c.bf16 %v3899_v19, %v3891_v18  ;;  %v3981_v18 = vld [vmem:[#allocation15 + $0x758] sm:$0xff]  ;;  %v3970_v19 = vld [vmem:[#allocation15 + $0x700] sm:$0xff] }
 0x640   :  { %v12325_v39 = vpop.f32.mrb[16].mxu1 }
 0x641   :  { %v2930_v40 = vpop.f32.mrb[17].mxu1 }
 0x642   :  { %12345 = vmatprep.mubr.msk.f32.mxu1 %vm227_vm0, %v2930_v40  ;;  %v3914_v40 = vld [vmem:[#allocation15 + $0x540] sm:$0xff] }
 0x643   :  { %12346 = vmatmul.mubr.msk.f32.vlgmr.msra.gmra.mrb[4].mxu1 %vm227_vm0, %v12325_v39  ;;  %v3906_v39 = vld [vmem:[#allocation15 + $0x500] sm:$0xff] }
 0x644   :  { %13206 = vmatpush3.bf16.msra.mxu1 %v13203_v21  ;;  %v12328_v45 = vpop.f32.mrb[18].mxu1  ;;  %v3901_v21 = vld [vmem:[#allocation15 + $0x4d8] sm:$0xff]  ;;  %v13325_v42 = vpack.c.bf16 %v3914_v40, %v3906_v39  ;;  %v3988_v39 = vld [vmem:[#allocation15 + $0x790] sm:$0xff] }
 0x645   :  { %v2940_v46 = vpop.f32.mrb[19].mxu1  ;;  %13208 = vmatprep.subr.bf16.mxu1 %v13207_v41  ;;  %v3996_v40 = vld [vmem:[#allocation15 + $0x7d0] sm:$0xff] }
 0x646   :  { %12348 = vmatprep.mubr.msk.f32.mxu1 %vm227_vm0, %v2940_v46 }
 0x647   :  { %12349 = vmatmul.mubr.msk.f32.gmra.mrb[6].mxu1 %vm227_vm0, %v12328_v45  ;;  %v3916_v45 = vld [vmem:[#allocation15 + $0x550] sm:$0xff] }
 0x648   :  { %13210 = vmatpush3.bf16.msra.mxu1 %v13207_v41  ;;  %12405 = vmatprep.mubr.msk.f32.mxu1 %vm227_vm0, %v16536_v27  ;;  %v13259_v27 = vpack.c.bf16 %v3355_v58, %v3354_v57  ;;  %v13357_v46 = vpack.c.bf16 %v3916_v45, %v3908_v43  ;;  %v3932_v57 = vld [vmem:[#allocation15 + $0x5d0] sm:$0xff]  ;;  %v13377_v43 = vpack.c.bf16 %v3996_v40, %v3988_v39  ;;  %v3887_v45 = vld [vmem:[#allocation15 + $0x468] sm:$0xff] }
 0x649   :  { %13212 = vmatprep.subr.bf16.mxu1 %v13211_v47 }
 0x64c   :  { %13214 = vmatpush3.bf16.msra.mxu1 %v13211_v47  ;;  %v3923_v47 = vld [vmem:[#allocation15 + $0x588] sm:$0xff] }
 0x64d   :  { %13216 = vmatprep.subr.bf16.mxu1 %v13215_v50 }
 0x650   :  { %13218 = vmatpush3.bf16.msra.mxu1 %v13215_v50  ;;  %v13327_v50 = vpack.c.bf16 %v3931_v48, %v3923_v47  ;;  %v3889_v47 = vld [vmem:[#allocation15 + $0x478] sm:$0xff] }
 0x651   :  { %13252 = vmatprep.subr.bf16.mxu1 %v13251_v54 }
 0x653   :  { %12406 = vmatmul.mubr.msk.f32.vlgmr.msra.gmra.mrb[4].mxu1 %vm227_vm0, %v16534_v26  ;;  %v3552_v26 = vld [vmem:[#allocation9 + $0x3d0] sm:$0xff] }
 0x654   :  { %12408 = vmatprep.mubr.msk.f32.mxu1 %vm227_vm0, %v3140_v23  ;;  %13254 = vmatpush3.bf16.msra.mxu1 %v13251_v54  ;;  %v13303_v2 = vpack.c.bf16 %v3553_v1, %v3552_v26  ;;  %v3898_v23 = vld [vmem:[#allocation15 + $0x4c0] sm:$0xff]  ;;  %v3940_v1 = vld [vmem:[#allocation15 + $0x610] sm:$0xff] }
 0x655   :  { %13256 = vmatprep.subr.bf16.mxu1 %v13255_v56  ;;  %v3930_v54 = vld [vmem:[#allocation15 + $0x5c0] sm:$0xff] }
 0x656   :  { %v13329_v8 = vpack.c.bf16 %v3930_v54, %v3922_v52  ;;  %v3946_v26 = vld [vmem:[#allocation15 + $0x640] sm:$0xff] }
 0x657   :  { %12409 = vmatmul.mubr.msk.f32.gmra.mrb[6].mxu1 %vm227_vm0, %v12388_v22  ;;  %v3890_v22 = vld [vmem:[#allocation15 + $0x480] sm:$0xff]  ;;  %v13333_v3 = vpack.c.bf16 %v3946_v26, %v3938_v63 }
 0x658   :  { %13258 = vmatpush3.bf16.msra.mxu1 %v13255_v56  ;;  %12465 = vmatprep.mubr.msk.f32.mxu1 %vm227_vm0, %v3330_v28  ;;  %v13321_v28 = vpack.c.bf16 %v3898_v23, %v3890_v22  ;;  %v3924_v56 = vld [vmem:[#allocation15 + $0x590] sm:$0xff] }
 0x659   :  { %13260 = vmatprep.subr.bf16.mxu1 %v13259_v27  ;;  %v13361_v58 = vpack.c.bf16 %v3932_v57, %v3924_v56  ;;  %v3972_v22 = vld [vmem:[#allocation15 + $0x710] sm:$0xff] }
 0x65a   :  { %v3980_v23 = vld [vmem:[#allocation15 + $0x750] sm:$0xff] }
 0x65c   :  { %13262 = vmatpush3.bf16.msra.mxu1 %v13259_v27  ;;  %v3939_v27 = vld [vmem:[#allocation15 + $0x608] sm:$0xff] }
 0x65d   :  { %13264 = vmatprep.subr.bf16.mxu1 %v13263_v6 }
 0x660   :  { %13266 = vmatpush3.bf16.msra.mxu1 %v13263_v6  ;;  %v13331_v6 = vpack.c.bf16 %v3947_v59, %v3939_v27 }
 0x661   :  { %13300 = vmatprep.subr.bf16.mxu1 %v13299_v0 }
 0x663   :  { %12466 = vmatmul.mubr.msk.f32.vlgmr.msra.gmra.mrb[4].mxu1 %vm227_vm0, %v16581_v24  ;;  %v13351_v24 = vpack.c.bf16 %v3901_v21, %v3893_v31  ;;  %v3978_v31 = vld [vmem:[#allocation15 + $0x740] sm:$0xff] }
 0x664   :  { %13302 = vmatpush3.bf16.msra.mxu1 %v13299_v0  ;;  %12468 = vmatprep.mubr.msk.f32.mxu1 %vm227_vm0, %v16585_v30  ;;  %v3900_v30 = vld [vmem:[#allocation15 + $0x4d0] sm:$0xff]  ;;  %v13363_v0 = vpack.c.bf16 %v3949_v61, %v3941_v60  ;;  %v13341_v21 = vpack.c.bf16 %v3978_v31, %v3970_v19  ;;  %v10992_v31 = vld [vmem:[#allocation12] ss:$0 sm:$0xff] }
 0x665   :  { %13304 = vmatprep.subr.bf16.mxu1 %v13303_v2  ;;  %13352 = vmatprep.subr.bf16.mxu0 %v13351_v24  ;;  %v13373_v24 = vpack.c.bf16 %v3980_v23, %v3972_v22 }
 0x667   :  { %12469 = vmatmul.mubr.msk.f32.gmra.mrb[6].mxu1 %vm227_vm0, %v16583_v29  ;;  %v3892_v29 = vld [vmem:[#allocation15 + $0x490] sm:$0xff] }
 0x668   :  { %13306 = vmatpush3.bf16.msra.mxu1 %v13303_v2  ;;  %12525 = vmatprep.mubr.msk.f32.mxu1 %vm227_vm0, %v16589_v33  ;;  %v3907_v33 = vld [vmem:[#allocation15 + $0x508] sm:$0xff]  ;;  %v3948_v2 = vld [vmem:[#allocation15 + $0x650] sm:$0xff] }
 0x669   :  { %13308 = vmatprep.subr.bf16.mxu1 %v13307_v5  ;;  %v13365_v4 = vpack.c.bf16 %v3948_v2, %v3940_v1 }
 0x66c   :  { %13310 = vmatpush3.bf16.msra.mxu1 %v13307_v5  ;;  %v3955_v5 = vld [vmem:[#allocation15 + $0x688] sm:$0xff] }
 0x66d   :  { %13312 = vmatprep.subr.bf16.mxu1 %v13311_v44 }
 0x670   :  { %13314 = vmatpush3.bf16.msra.mxu1 %v13311_v44  ;;  %v13335_v44 = vpack.c.bf16 %v3963_v9, %v3955_v5 }
 0x671   :  { %13316 = vmatprep.subr.bf16.mxu1 %v13315_v12  ;;  %v13367_v12 = vpack.c.bf16 %v3965_v53, %v3957_v10 }
 0x673   :  { %12526 = vmatmul.mubr.msk.f32.vlgmr.msra.gmra.mrb[4].mxu1 %vm227_vm0, %v16587_v32  ;;  %v13353_v32 = vpack.c.bf16 %v3900_v30, %v3892_v29  ;;  %v3995_v29 = vld [vmem:[#allocation15 + $0x7c8] sm:$0xff]  ;;  %v3989_v30 = vld [vmem:[#allocation15 + $0x798] sm:$0xff] }
 0x674   :  { %12528 = vmatprep.mubr.msk.f32.mxu1 %vm227_vm0, %v16593_v36  ;;  %13318 = vmatpush1.bf16.msra.mxu1 %v13317_v15  ;;  %v3909_v36 = vld [vmem:[#allocation15 + $0x518] sm:$0xff]  ;;  %v3971_v15 = vld [vmem:[#allocation15 + $0x708] sm:$0xff] }
 0x675   :  { %13320 = vmatprep.subr.bf16.mxu1 %v13319_v20  ;;  %13354 = vmatpush1.bf16.msra.mxu0 %v13353_v32  ;;  %v13355_v41 = vpack.c.bf16 %v3917_v38, %v3909_v36  ;;  %v13339_v35 = vpack.c.bf16 %v3979_v25, %v3971_v15  ;;  %v13371_v20 = vpack.c.bf16 %v3981_v18, %v3973_v17  ;;  %v3994_v36 = vld [vmem:[#allocation15 + $0x7c0] sm:$0xff] }
 0x677   :  { %12529 = vmatmul.mubr.msk.f32.gmra.mrb[6].mxu1 %vm227_vm0, %v16591_v34  ;;  %v3915_v34 = vld [vmem:[#allocation15 + $0x548] sm:$0xff]  ;;  %13356 = vmatprep.subr.bf16.mxu0 %v13355_v41  ;;  %v15872_v41 = vmov 0.0  }
 0x678   :  { %13322 = vmatpush1.bf16.msra.mxu1 %v13321_v28  ;;  %v13323_v37 = vpack.c.bf16 %v3915_v34, %v3907_v33  ;;  %v3987_v28 = vld [vmem:[#allocation15 + $0x788] sm:$0xff]  ;;  %v3997_v33 = vld [vmem:[#allocation15 + $0x7d8] sm:$0xff]  ;;  %v3986_v34 = vld [vmem:[#allocation15 + $0x780] sm:$0xff]  ;;  %4066 = vmatprep.mubr.f32.mxu1 %v15872_v41 }
 0x679   :  { %13358 = vmatpush1.bf16.msra.mxu0 %v13357_v46  ;;  %v13343_v32 = vpack.c.bf16 %v3995_v29, %v3987_v28  ;;  %v13345_v38 = vpack.c.bf16 %v3994_v36, %v3986_v34  ;;  %4137 = vmatprep.mubr.f32.mxu0 %v15872_v41  ;;  %v3881_v46 = vld [vmem:[#allocation15 + $0x438] sm:$0xff] }
 0x67a   :  { %13324 = vmatprep.subr.bf16.mxu1 %v13323_v37  ;;  %13360 = vmatprep.subr.bf16.mxu0 %v13359_v55  ;;  %v13375_v37 = vpack.c.bf16 %v3997_v33, %v3989_v30  ;;  %v13411_v49 = vpack.c.bf16 %v3889_v47, %v3881_v46 }
 0x67c   :  { %13326 = vmatpush1.bf16.msra.mxu1 %v13325_v42  ;;  %v3879_v42 = vld [vmem:[#allocation15 + $0x428] sm:$0xff] }
 0x67d   :  { %13328 = vmatprep.subr.bf16.mxu1 %v13327_v50  ;;  %13362 = vmatpush1.bf16.msra.mxu0 %v13361_v58  ;;  %v13379_v48 = vpack.c.bf16 %v3887_v45, %v3879_v42  ;;  %v10991_v50 = vld [vmem:[#allocation11] ss:$0 sm:$0xff] }
 0x67e   :  { %13364 = vmatprep.subr.bf16.mxu0 %v13363_v0 }
 0x680   :  { %13330 = vmatpush1.bf16.msra.mxu1 %v13329_v8 }
 0x681   :  { %13332 = vmatprep.subr.bf16.mxu1 %v13331_v6  ;;  %13366 = vmatpush1.bf16.msra.mxu0 %v13365_v4 }
 0x682   :  { %13368 = vmatprep.subr.bf16.mxu0 %v13367_v12 }
 0x684   :  { %13334 = vmatpush1.bf16.msra.mxu1 %v13333_v3 }
 0x685   :  { %13336 = vmatprep.subr.bf16.mxu1 %v13335_v44  ;;  %13370 = vmatpush1.bf16.msra.mxu0 %v13369_v14 }
 0x686   :  { %13372 = vmatprep.subr.bf16.mxu0 %v13371_v20 }
 0x688   :  { %13338 = vmatpush1.bf16.msra.mxu1 %v13337_v7 }
 0x689   :  { %13340 = vmatprep.subr.bf16.mxu1 %v13339_v35  ;;  %13374 = vmatpush1.bf16.msra.mxu0 %v13373_v24  ;;  %v10993_v24 = vld [vmem:[#allocation14] ss:$0 sm:$0xff] }
 0x68a   :  { %13376 = vmatprep.subr.bf16.mxu0 %v13375_v37 }
 0x68c   :  { %13342 = vmatpush1.bf16.msra.mxu1 %v13341_v21 }
 0x68d   :  { %13344 = vmatprep.subr.bf16.mxu1 %v13343_v32  ;;  %13378 = vmatpush1.bf16.msra.mxu0 %v13377_v43 }
 0x68e   :  { %13412 = vmatprep.subr.bf16.mxu0 %v13411_v49  ;;  %v3886_v49 = vld [vmem:[#allocation15 + $0x460] sm:$0xff] }
 0x690   :  { %13346 = vmatpush1.bf16.msra.mxu1 %v13345_v38 }
 0x691   :  { %13380 = vmatprep.subr.bf16.mxu1 %v13379_v48  ;;  %v3878_v48 = vld [vmem:[#allocation15 + $0x420] sm:$0xff] }
 0x746   :  { %v12527_v51 = vpop.f32.mrb[4].mxu1 }
 0x747   :  { %v3667_v52 = vadd.f32 %v12527_v51, %v10991_v50  ;;  %v3636_v54 = vpop.f32.mrb[5].mxu1  ;;  %v3888_v51 = vld [vmem:[#allocation15 + $0x470] sm:$0xff] }
 0x748   :  { %v3666_v55 = vadd.f32 %v10991_v50, %v3636_v54  ;;  %v3903_v54 = vld [vmem:[#allocation15 + $0x4e8] sm:$0xff] }
 0x74a   :  { %v3670_v8 = vadd.f32 %v3667_v52, %v3666_v55  ;;  %v12530_v56 = vpop.f32.mrb[6].mxu1 }
 0x74b   :  { %v3646_v57 = vpop.f32.mrb[7].mxu1  ;;  %v3669_v27 = vadd.f32 %v12530_v56, %v10991_v50  ;;  %v13381_v56 = vpack.c.bf16 %v3886_v49, %v3878_v48  ;;  %v3960_v48 = vld [vmem:[#allocation15 + $0x6b0] sm:$0xff] }
 0x74c   :  { %v3668_v58 = vadd.f32 %v10991_v50, %v3646_v57  ;;  %v3880_v50 = vld [vmem:[#allocation15 + $0x430] sm:$0xff] }
 0x74d   :  { %v13413_v57 = vpack.c.bf16 %v3888_v51, %v3880_v50  ;;  %v3968_v49 = vld [vmem:[#allocation15 + $0x6f0] sm:$0xff]  ;;  %v3975_v50 = vld [vmem:[#allocation15 + $0x728] sm:$0xff] }
 0x74e   :  { %v3671_v59 = vadd.f32 %v3670_v8, %v3668_v58  ;;  %v3905_v8 = vld [vmem:[#allocation15 + $0x4f8] sm:$0xff]  ;;  %v3983_v51 = vld [vmem:[#allocation15 + $0x768] sm:$0xff] }
 0x750   :  { %v3672_v60 = vadd.f32 %v3671_v59, %v3669_v27  ;;  %v3896_v59 = vld [vmem:[#allocation15 + $0x4b0] sm:$0xff] }
 0x752   :  { %v3673_v6 = vrot.slane %v3672_v60, 4 }
 0x754   :  { %v3674_v61 = vadd.f32 %v3673_v6, %v3672_v60 }
 0x756   :  { %v3675_v63 = vrot.slane %v3674_v61, 2 }
 0x758   :  { %v3676_v0 = vadd.f32 %v3675_v63, %v3674_v61  ;;  %v3904_v61 = vld [vmem:[#allocation15 + $0x4f0] sm:$0xff]  ;;  %v3911_v63 = vld [vmem:[#allocation15 + $0x528] sm:$0xff] }
 0x75a   :  { %v3677_v26 = vrot.slane %v3676_v0, 1 }
 0x75c   :  { %v3678_v1 = vadd.f32 %v3677_v26, %v3676_v0  ;;  %v3919_v0 = vld [vmem:[#allocation15 + $0x568] sm:$0xff] }
 0x75e   :  { %v3680_v2 = vmul.f32 0.03125, %v3678_v1  ;;  %v3913_v1 = vld [vmem:[#allocation15 + $0x538] sm:$0xff] }
 0x760   :  { %v3681_v3 = vsub.f32 %v3666_v55, %v3680_v2  ;;  %v3682_v4 = vsub.f32 %v3667_v52, %v3680_v2  ;;  %v3683_v5 = vsub.f32 %v3668_v58, %v3680_v2  ;;  %v3684_v9 = vsub.f32 %v3669_v27, %v3680_v2  ;;  %v3895_v52 = vld [vmem:[#allocation15 + $0x4a8] sm:$0xff]  ;;  %v3897_v55 = vld [vmem:[#allocation15 + $0x4b8] sm:$0xff]  ;;  %v3894_v58 = vld [vmem:[#allocation15 + $0x4a0] sm:$0xff] }
 0x761   :  { %v3902_v27 = vld [vmem:[#allocation15 + $0x4e0] sm:$0xff]  ;;  %v13383_v60 = vpack.c.bf16 %v3903_v54, %v3895_v52  ;;  %v13415_v6 = vpack.c.bf16 %v3905_v8, %v3897_v55  ;;  %v3921_v2 = vld [vmem:[#allocation15 + $0x578] sm:$0xff]  ;;  %v13433_v8 = vpack.c.bf16 %v3968_v49, %v3960_v48  ;;  %v3793_v48 = vld [vmem:[#allocation15 + $0x188] sm:$0xff] }
 0x762   :  { %v3685_v10 = vmul.f32 %v3681_v3, %v3681_v3  ;;  %v3686_v44 = vmul.f32 %v3682_v4, %v3682_v4  ;;  %v3687_v53 = vmul.f32 %v3683_v5, %v3683_v5  ;;  %v3688_v11 = vmul.f32 %v3684_v9, %v3684_v9  ;;  %v3977_v52 = vld [vmem:[#allocation15 + $0x738] sm:$0xff]  ;;  %v3801_v49 = vld [vmem:[#allocation15 + $0x1c8] sm:$0xff] }
 0x763   :  { %v3985_v54 = vld [vmem:[#allocation15 + $0x778] sm:$0xff] }
 0x764   :  { %v3689_v62 = vadd.f32 %v3686_v44, %v3685_v10  ;;  %v13387_v10 = vpack.c.bf16 %v3919_v0, %v3911_v63  ;;  %v13419_v44 = vpack.c.bf16 %v3921_v2, %v3913_v1  ;;  %v3993_v63 = vld [vmem:[#allocation15 + $0x7b8] sm:$0xff] }
 0x765   :  { %v4001_v0 = vld [vmem:[#allocation15 + $0x7f8] sm:$0xff] }
 0x766   :  { %v3690_v12 = vadd.f32 %v3689_v62, %v3687_v53  ;;  %v3912_v53 = vld [vmem:[#allocation15 + $0x530] sm:$0xff] }
 0x767   :  { %v3920_v62 = vld [vmem:[#allocation15 + $0x570] sm:$0xff] }
 0x768   :  { %v3691_v7 = vadd.f32 %v3690_v12, %v3688_v11  ;;  %v3927_v11 = vld [vmem:[#allocation15 + $0x5a8] sm:$0xff] }
 0x769   :  { %v3935_v12 = vld [vmem:[#allocation15 + $0x5e8] sm:$0xff] }
 0x76a   :  { %v3692_v13 = vrot.slane %v3691_v7, 4 }
 0x76c   :  { %v3693_v16 = vadd.f32 %v3692_v13, %v3691_v7  ;;  %v3929_v7 = vld [vmem:[#allocation15 + $0x5b8] sm:$0xff] }
 0x76d   :  { %v3937_v13 = vld [vmem:[#allocation15 + $0x5f8] sm:$0xff] }
 0x76e   :  { %v3694_v14 = vrot.slane %v3693_v16, 2 }
 0x770   :  { %v3695_v15 = vadd.f32 %v3694_v14, %v3693_v16  ;;  %v13421_v14 = vpack.c.bf16 %v3920_v62, %v3912_v53  ;;  %v3745_v53 = vld [vmem:[#allocation15 + $0x8] sm:$0xff] }
 0x771   :  { %v3753_v62 = vld [vmem:[#allocation15 + $0x48] sm:$0xff] }
 0x772   :  { %v3696_v25 = vrot.slane %v3695_v15, 1 }
 0x774   :  { %v3697_v17 = vadd.f32 %v3696_v25, %v3695_v15  ;;  %v3926_v15 = vld [vmem:[#allocation15 + $0x5a0] sm:$0xff] }
 0x775   :  { %v3934_v25 = vld [vmem:[#allocation15 + $0x5e0] sm:$0xff] }
 0x776   :  { %v3698_v35 = vmul.f32 0.03125, %v3697_v17  ;;  %v13391_v17 = vpack.c.bf16 %v3935_v12, %v3927_v11  ;;  %v3747_v11 = vld [vmem:[#allocation15 + $0x18] sm:$0xff] }
 0x777   :  { %v3755_v12 = vld [vmem:[#allocation15 + $0x58] sm:$0xff] }
 0x778   :  { %v3699_v18 = vadd.f32 1e-05, %v3698_v35  ;;  %v13423_v35 = vpack.c.bf16 %v3937_v13, %v3929_v7 }
 0x77a   :  { %15560 = vrsqrt.f32 %v3699_v18  ;;  %v3928_v18 = vld [vmem:[#allocation15 + $0x5b0] sm:$0xff] }
 0x784   :  { %v15561_v19 = vpop.eup %15560 }
 0x785   :  { %v3701_v20 = vmul.f32 %v15561_v19, %v3681_v3  ;;  %v3702_v21 = vmul.f32 %v15561_v19, %v3682_v4  ;;  %v3703_v22 = vmul.f32 %v15561_v19, %v3683_v5  ;;  %v3704_v23 = vmul.f32 %v15561_v19, %v3684_v9  ;;  %v3910_v5 = vld [vmem:[#allocation15 + $0x520] sm:$0xff]  ;;  %v3936_v19 = vld [vmem:[#allocation15 + $0x5f0] sm:$0xff] }
 0x786   :  { %v13385_v3 = vpack.c.bf16 %v3902_v27, %v3894_v58  ;;  %v13417_v4 = vpack.c.bf16 %v3904_v61, %v3896_v59  ;;  %v3918_v9 = vld [vmem:[#allocation15 + $0x560] sm:$0xff]  ;;  %v13403_v58 = vpack.c.bf16 %v3983_v51, %v3975_v50  ;;  %v13435_v27 = vpack.c.bf16 %v3985_v54, %v3977_v52  ;;  %v3976_v59 = vld [vmem:[#allocation15 + $0x730] sm:$0xff]  ;;  %v3999_v61 = vld [vmem:[#allocation15 + $0x7e8] sm:$0xff] }
 0x787   :  { %v3712_v28 = vmul.f32 %v10992_v31, %v3701_v20  ;;  %v3713_v29 = vmul.f32 %v10992_v31, %v3702_v21  ;;  %v3714_v30 = vmul.f32 %v10992_v31, %v3703_v22  ;;  %v3715_v32 = vmul.f32 %v10992_v31, %v3704_v23  ;;  %v3943_v31 = vld [vmem:[#allocation15 + $0x628] sm:$0xff]  ;;  %v3945_v21 = vld [vmem:[#allocation15 + $0x638] sm:$0xff]  ;;  %v3792_v54 = vld [vmem:[#allocation15 + $0x180] sm:$0xff] }
 0x788   :  { %v13389_v16 = vpack.c.bf16 %v3918_v9, %v3910_v5  ;;  %v3951_v20 = vld [vmem:[#allocation15 + $0x668] sm:$0xff]  ;;  %v3953_v22 = vld [vmem:[#allocation15 + $0x678] sm:$0xff]  ;;  %v13393_v23 = vpack.c.bf16 %v3934_v25, %v3926_v15  ;;  %v13439_v9 = vpack.c.bf16 %v4001_v0, %v3993_v63  ;;  %v13443_v15 = vpack.c.bf16 %v3753_v62, %v3745_v53  ;;  %v3808_v0 = vld [vmem:[#allocation15 + $0x200] sm:$0xff] }
 0x789   :  { %v3723_v33 = vadd.f32 %v10993_v24, %v3712_v28  ;;  %v3724_v34 = vadd.f32 %v10993_v24, %v3713_v29  ;;  %v3725_v36 = vadd.f32 %v10993_v24, %v3714_v30  ;;  %v3726_v37 = vadd.f32 %v10993_v24, %v3715_v32  ;;  %v3942_v28 = vld [vmem:[#allocation15 + $0x620] sm:$0xff]  ;;  %v3795_v50 = vld [vmem:[#allocation15 + $0x198] sm:$0xff] }
 0x78a   :  { %v13425_v24 = vpack.c.bf16 %v3936_v19, %v3928_v18  ;;  %v3950_v29 = vld [vmem:[#allocation15 + $0x660] sm:$0xff]  ;;  %v13395_v30 = vpack.c.bf16 %v3951_v20, %v3943_v31  ;;  %v13427_v32 = vpack.c.bf16 %v3953_v22, %v3945_v21  ;;  %v13475_v25 = vpack.c.bf16 %v3755_v12, %v3747_v11  ;;  %v3761_v18 = vld [vmem:[#allocation15 + $0x88] sm:$0xff]  ;;  %v3763_v31 = vld [vmem:[#allocation15 + $0x98] sm:$0xff] }
 0x78b   :  { %vm3727_vm0 = vcmp.ge.f32.partialorder %v3723_v33, 0.0  ;;  %vm3728_vm2 = vcmp.ge.f32.partialorder %v3724_v34, 0.0  ;;  %vm3729_vm3 = vcmp.ge.f32.partialorder %v3725_v36, 0.0  ;;  %vm3730_vm4 = vcmp.ge.f32.partialorder %v3726_v37, 0.0  ;;  %v3769_v19 = vld [vmem:[#allocation15 + $0xc8] sm:$0xff]  ;;  %v3771_v20 = vld [vmem:[#allocation15 + $0xd8] sm:$0xff] }
 0x78c   :  { %v3731_v38 = vmul.f32 0.2, %v3723_v33  ;;  %v3732_v39 = vmul.f32 0.2, %v3724_v34  ;;  %v3733_v40 = vmul.f32 0.2, %v3725_v36 }
 0x78d   :  { %v3734_v42 = vmul.f32 0.2, %v3726_v37  ;;  %v3803_v51 = vld [vmem:[#allocation15 + $0x1d8] sm:$0xff]  ;;  %v3824_v12 = vld [vmem:[#allocation15 + $0x280] sm:$0xff] }
 0x78e   :  { %v3735_v43 = vsel %vm3727_vm0, %v3723_v33, %v3731_v38  ;;  %v3736_v45 = vsel %vm3728_vm2, %v3724_v34, %v3732_v39  ;;  %v3737_v46 = vsel %vm3729_vm3, %v3725_v36, %v3733_v40  ;;  %v3944_v33 = vld [vmem:[#allocation15 + $0x630] sm:$0xff]  ;;  %v3959_v36 = vld [vmem:[#allocation15 + $0x6a8] sm:$0xff]  ;;  %v3961_v38 = vld [vmem:[#allocation15 + $0x6b8] sm:$0xff]  ;;  %v13397_v40 = vpack.c.bf16 %v3950_v29, %v3942_v28 }
 0x78f   :  { %v3738_v47 = vsel %vm3730_vm4, %v3726_v37, %v3734_v42  ;;  %3739 = vst [vmem:[#allocation2] sm:$0xff] %v3735_v43  ;;  %3740 = vst [vmem:[#allocation2 + $0x8] sm:$0xff] %v3736_v45  ;;  %v3952_v34 = vld [vmem:[#allocation15 + $0x670] sm:$0xff]  ;;  %v3967_v37 = vld [vmem:[#allocation15 + $0x6e8] sm:$0xff]  ;;  %v13447_v28 = vpack.c.bf16 %v3769_v19, %v3761_v18  ;;  %v13479_v29 = vpack.c.bf16 %v3771_v20, %v3763_v31 }
 0x790   :  { %3741 = vst [vmem:[#allocation2 + $0x10] sm:$0xff] %v3737_v46  ;;  %3742 = vst [vmem:[#allocation2 + $0x18] sm:$0xff] %v3738_v47  ;;  %v3969_v39 = vld [vmem:[#allocation15 + $0x6f8] sm:$0xff]  ;;  %v13429_v42 = vpack.c.bf16 %v3952_v34, %v3944_v33  ;;  %v3958_v43 = vld [vmem:[#allocation15 + $0x6a0] sm:$0xff]  ;;  %v13399_v46 = vpack.c.bf16 %v3967_v37, %v3959_v36 }
 0x791   :  { %v3966_v45 = vld [vmem:[#allocation15 + $0x6e0] sm:$0xff]  ;;  %v13431_v47 = vpack.c.bf16 %v3969_v39, %v3961_v38  ;;  %v3777_v33 = vld [vmem:[#allocation15 + $0x108] sm:$0xff]  ;;  %v3779_v36 = vld [vmem:[#allocation15 + $0x118] sm:$0xff] }
 0x792   :  { %v13401_v55 = vpack.c.bf16 %v3966_v45, %v3958_v43  ;;  %v3785_v34 = vld [vmem:[#allocation15 + $0x148] sm:$0xff]  ;;  %v3787_v37 = vld [vmem:[#allocation15 + $0x158] sm:$0xff]  ;;  %v3840_v20 = vld [vmem:[#allocation15 + $0x300] sm:$0xff] }
 0x793   :  { %v13451_v43 = vpack.c.bf16 %v3785_v34, %v3777_v33  ;;  %v13483_v45 = vpack.c.bf16 %v3787_v37, %v3779_v36  ;;  %v3835_v53 = vld [vmem:[#allocation15 + $0x2d8] sm:$0xff]  ;;  %v3856_v37 = vld [vmem:[#allocation15 + $0x380] sm:$0xff] }
 0x794   :  { %v3851_v18 = vld [vmem:[#allocation15 + $0x358] sm:$0xff] }
 0x795   :  { %v3867_v33 = vld [vmem:[#allocation15 + $0x3d8] sm:$0xff] }
 0x796   :  { %v16622_v26 = vld [vmem:[#allocation2 + $0x2] sm:$0x3] }
 0x797   :  { %4067 = vmatmul.mubr.f32.vlgmr.msra.gmra.mrb[20].mxu1 %v16622_v26  ;;  %4138 = vmatmul.mubr.f32.vlgmr.msra.gmra.mrb[64].mxu0 %v16622_v26 }
 0x798   :  { %13382 = vmatpush1.bf16.msra.mxu1 %v13381_v56  ;;  %13414 = vmatpush1.bf16.msra.mxu0 %v13413_v57  ;;  %v3974_v56 = vld [vmem:[#allocation15 + $0x720] sm:$0xff] }
 0x799   :  { %13384 = vmatprep.subr.bf16.mxu1 %v13383_v60  ;;  %13416 = vmatprep.subr.bf16.mxu0 %v13415_v6  ;;  %v3982_v57 = vld [vmem:[#allocation15 + $0x760] sm:$0xff]  ;;  %v3984_v60 = vld [vmem:[#allocation15 + $0x770] sm:$0xff]  ;;  %v3991_v6 = vld [vmem:[#allocation15 + $0x7a8] sm:$0xff] }
 0x79a   :  { %4208 = vmatprep.mubr.f32.mxu1 %v15872_v41  ;;  %4279 = vmatprep.mubr.f32.mxu0 %v15872_v41  ;;  %v13405_v1 = vpack.c.bf16 %v3982_v57, %v3974_v56  ;;  %v13437_v2 = vpack.c.bf16 %v3984_v60, %v3976_v59  ;;  %v13407_v5 = vpack.c.bf16 %v3999_v61, %v3991_v6  ;;  %v3794_v57 = vld [vmem:[#allocation15 + $0x190] sm:$0xff]  ;;  %v3817_v59 = vld [vmem:[#allocation15 + $0x248] sm:$0xff]  ;;  %v3811_v60 = vld [vmem:[#allocation15 + $0x218] sm:$0xff] }
 0x79b   :  { %v13487_v56 = vpack.c.bf16 %v3803_v51, %v3795_v50  ;;  %v3819_v6 = vld [vmem:[#allocation15 + $0x258] sm:$0xff]  ;;  %v3748_v51 = vld [vmem:[#allocation15 + $0x20] sm:$0xff] }
 0x79c   :  { %13386 = vmatpush1.bf16.msra.mxu1 %v13385_v3  ;;  %13418 = vmatpush1.bf16.msra.mxu0 %v13417_v4  ;;  %v3990_v3 = vld [vmem:[#allocation15 + $0x7a0] sm:$0xff] }
 0x79d   :  { %13388 = vmatprep.subr.bf16.mxu1 %v13387_v10  ;;  %13420 = vmatprep.subr.bf16.mxu0 %v13419_v44  ;;  %v3998_v4 = vld [vmem:[#allocation15 + $0x7e0] sm:$0xff]  ;;  %v3992_v10 = vld [vmem:[#allocation15 + $0x7b0] sm:$0xff] }
 0x79e   :  { %v4000_v44 = vld [vmem:[#allocation15 + $0x7f0] sm:$0xff]  ;;  %v13409_v7 = vpack.c.bf16 %v3998_v4, %v3990_v3  ;;  %v13491_v3 = vpack.c.bf16 %v3819_v6, %v3811_v60  ;;  %v3764_v6 = vld [vmem:[#allocation15 + $0xa0] sm:$0xff] }
 0x79f   :  { %v13441_v13 = vpack.c.bf16 %v4000_v44, %v3992_v10  ;;  %v3810_v4 = vld [vmem:[#allocation15 + $0x210] sm:$0xff]  ;;  %v3833_v10 = vld [vmem:[#allocation15 + $0x2c8] sm:$0xff]  ;;  %v3827_v44 = vld [vmem:[#allocation15 + $0x298] sm:$0xff] }
 0x7a0   :  { %13390 = vmatpush1.bf16.msra.mxu1 %v13389_v16  ;;  %13422 = vmatpush1.bf16.msra.mxu0 %v13421_v14  ;;  %v3744_v16 = vld [vmem:[#allocation15] sm:$0xff] }
 0x7a1   :  { %13392 = vmatprep.subr.bf16.mxu1 %v13391_v17  ;;  %13424 = vmatprep.subr.bf16.mxu0 %v13423_v35  ;;  %v3752_v14 = vld [vmem:[#allocation15 + $0x40] sm:$0xff]  ;;  %v3746_v17 = vld [vmem:[#allocation15 + $0x10] sm:$0xff] }
 0x7a2   :  { %v3754_v35 = vld [vmem:[#allocation15 + $0x50] sm:$0xff]  ;;  %v13445_v21 = vpack.c.bf16 %v3752_v14, %v3744_v16  ;;  %v13495_v16 = vpack.c.bf16 %v3835_v53, %v3827_v44 }
 0x7a3   :  { %v13477_v22 = vpack.c.bf16 %v3754_v35, %v3746_v17  ;;  %v3826_v14 = vld [vmem:[#allocation15 + $0x290] sm:$0xff]  ;;  %v3849_v17 = vld [vmem:[#allocation15 + $0x348] sm:$0xff]  ;;  %v3843_v35 = vld [vmem:[#allocation15 + $0x318] sm:$0xff] }
 0x7a4   :  { %13394 = vmatpush1.bf16.msra.mxu1 %v13393_v23  ;;  %13426 = vmatpush1.bf16.msra.mxu0 %v13425_v24  ;;  %v3760_v23 = vld [vmem:[#allocation15 + $0x80] sm:$0xff] }
 0x7a5   :  { %13396 = vmatprep.subr.bf16.mxu1 %v13395_v30  ;;  %13428 = vmatprep.subr.bf16.mxu0 %v13427_v32  ;;  %v3768_v24 = vld [vmem:[#allocation15 + $0xc0] sm:$0xff]  ;;  %v3762_v30 = vld [vmem:[#allocation15 + $0x90] sm:$0xff] }
 0x7a6   :  { %v3770_v32 = vld [vmem:[#allocation15 + $0xd0] sm:$0xff]  ;;  %v13449_v38 = vpack.c.bf16 %v3768_v24, %v3760_v23  ;;  %v13499_v23 = vpack.c.bf16 %v3851_v18, %v3843_v35 }
 0x7a7   :  { %v13481_v39 = vpack.c.bf16 %v3770_v32, %v3762_v30  ;;  %v3842_v24 = vld [vmem:[#allocation15 + $0x310] sm:$0xff]  ;;  %v3865_v30 = vld [vmem:[#allocation15 + $0x3c8] sm:$0xff]  ;;  %v3859_v32 = vld [vmem:[#allocation15 + $0x398] sm:$0xff] }
 0x7a8   :  { %13398 = vmatpush1.bf16.msra.mxu1 %v13397_v40  ;;  %13430 = vmatpush1.bf16.msra.mxu0 %v13429_v42  ;;  %v3776_v40 = vld [vmem:[#allocation15 + $0x100] sm:$0xff] }
 0x7a9   :  { %13400 = vmatprep.subr.bf16.mxu1 %v13399_v46  ;;  %13432 = vmatprep.subr.bf16.mxu0 %v13431_v47  ;;  %v3784_v42 = vld [vmem:[#allocation15 + $0x140] sm:$0xff]  ;;  %v3778_v46 = vld [vmem:[#allocation15 + $0x110] sm:$0xff] }
 0x7aa   :  { %v3786_v47 = vld [vmem:[#allocation15 + $0x150] sm:$0xff] }
 0x7ab   :  { %v13485_v52 = vpack.c.bf16 %v3786_v47, %v3778_v46  ;;  %v3757_v46 = vld [vmem:[#allocation15 + $0x68] sm:$0xff]  ;;  %v3751_v47 = vld [vmem:[#allocation15 + $0x38] sm:$0xff] }
 0x7ac   :  { %13402 = vmatpush1.bf16.msra.mxu1 %v13401_v55  ;;  %13434 = vmatpush1.bf16.msra.mxu0 %v13433_v8  ;;  %v3800_v55 = vld [vmem:[#allocation15 + $0x1c0] sm:$0xff]  ;;  %v13455_v8 = vpack.c.bf16 %v3801_v49, %v3793_v48  ;;  %v3759_v48 = vld [vmem:[#allocation15 + $0x78] sm:$0xff] }
 0x7ad   :  { %13404 = vmatprep.subr.bf16.mxu1 %v13403_v58  ;;  %13436 = vmatprep.subr.bf16.mxu0 %v13435_v27  ;;  %v3802_v58 = vld [vmem:[#allocation15 + $0x1d0] sm:$0xff]  ;;  %v3809_v27 = vld [vmem:[#allocation15 + $0x208] sm:$0xff]  ;;  %v13457_v61 = vpack.c.bf16 %v3800_v55, %v3792_v54  ;;  %v13539_v54 = vpack.c.bf16 %v3759_v48, %v3751_v47 }
 0x7ae   :  { %v13489_v63 = vpack.c.bf16 %v3802_v58, %v3794_v57  ;;  %v3750_v55 = vld [vmem:[#allocation15 + $0x30] sm:$0xff]  ;;  %v3773_v57 = vld [vmem:[#allocation15 + $0xe8] sm:$0xff]  ;;  %v3767_v58 = vld [vmem:[#allocation15 + $0xb8] sm:$0xff] }
 0x7b0   :  { %13406 = vmatpush1.bf16.msra.mxu1 %v13405_v1  ;;  %13438 = vmatpush1.bf16.msra.mxu0 %v13437_v2  ;;  %v3816_v1 = vld [vmem:[#allocation15 + $0x240] sm:$0xff]  ;;  %v13459_v2 = vpack.c.bf16 %v3817_v59, %v3809_v27  ;;  %v3775_v27 = vld [vmem:[#allocation15 + $0xf8] sm:$0xff] }
 0x7b1   :  { %13408 = vmatprep.subr.bf16.mxu1 %v13407_v5  ;;  %13440 = vmatprep.subr.bf16.mxu0 %v13439_v9  ;;  %v3818_v5 = vld [vmem:[#allocation15 + $0x250] sm:$0xff]  ;;  %v3825_v9 = vld [vmem:[#allocation15 + $0x288] sm:$0xff]  ;;  %v13461_v62 = vpack.c.bf16 %v3816_v1, %v3808_v0  ;;  %v13543_v1 = vpack.c.bf16 %v3775_v27, %v3767_v58 }
 0x7b2   :  { %v13493_v11 = vpack.c.bf16 %v3818_v5, %v3810_v4  ;;  %v3789_v4 = vld [vmem:[#allocation15 + $0x168] sm:$0xff]  ;;  %v16632_v5 = vld [vmem:[#allocation2] sm:$0x3] }
 0x7b4   :  { %13410 = vmatpush1.bf16.msra.mxu1 %v13409_v7  ;;  %13442 = vmatpush1.bf16.msra.mxu0 %v13441_v13  ;;  %v3832_v7 = vld [vmem:[#allocation15 + $0x2c0] sm:$0xff]  ;;  %v13463_v13 = vpack.c.bf16 %v3833_v10, %v3825_v9  ;;  %v3783_v9 = vld [vmem:[#allocation15 + $0x138] sm:$0xff] }
 0x7b5   :  { %13444 = vmatprep.subr.bf16.mxu1 %v13443_v15  ;;  %13476 = vmatprep.subr.bf16.mxu0 %v13475_v25  ;;  %v3834_v15 = vld [vmem:[#allocation15 + $0x2d0] sm:$0xff]  ;;  %v3841_v25 = vld [vmem:[#allocation15 + $0x308] sm:$0xff]  ;;  %v13465_v19 = vpack.c.bf16 %v3832_v7, %v3824_v12  ;;  %v3791_v10 = vld [vmem:[#allocation15 + $0x178] sm:$0xff] }
 0x7b6   :  { %v13497_v31 = vpack.c.bf16 %v3834_v15, %v3826_v14  ;;  %v13547_v7 = vpack.c.bf16 %v3791_v10, %v3783_v9  ;;  %v3797_v14 = vld [vmem:[#allocation15 + $0x1a8] sm:$0xff] }
 0x7b7   :  { %4209 = vmatmul.mubr.f32.vlgmr.msra.gmra.mrb[22].mxu1 %v16622_v26  ;;  %4280 = vmatmul.mubr.f32.vlgmr.msra.gmra.mrb[66].mxu0 %v16622_v26  ;;  %v13453_v26 = vpack.c.bf16 %v3784_v42, %v3776_v40  ;;  %v13503_v40 = vpack.c.bf16 %v3867_v33, %v3859_v32  ;;  %v3858_v42 = vld [vmem:[#allocation15 + $0x390] sm:$0xff]  ;;  %v3805_v15 = vld [vmem:[#allocation15 + $0x1e8] sm:$0xff] }
 0x7b8   :  { %13446 = vmatpush1.bf16.msra.mxu1 %v13445_v21  ;;  %13478 = vmatpush1.bf16.msra.mxu0 %v13477_v22  ;;  %v3848_v21 = vld [vmem:[#allocation15 + $0x340] sm:$0xff]  ;;  %v13467_v22 = vpack.c.bf16 %v3849_v17, %v3841_v25  ;;  %v3799_v25 = vld [vmem:[#allocation15 + $0x1b8] sm:$0xff] }
 0x7b9   :  { %13448 = vmatprep.subr.bf16.mxu1 %v13447_v28  ;;  %13480 = vmatprep.subr.bf16.mxu0 %v13479_v29  ;;  %v3850_v28 = vld [vmem:[#allocation15 + $0x350] sm:$0xff]  ;;  %v3857_v29 = vld [vmem:[#allocation15 + $0x388] sm:$0xff]  ;;  %v13469_v34 = vpack.c.bf16 %v3848_v21, %v3840_v20  ;;  %v3807_v17 = vld [vmem:[#allocation15 + $0x1f8] sm:$0xff]  ;;  %v13519_v20 = vpack.c.bf16 %v3805_v15, %v3797_v14 }
 0x7ba   :  { %4350 = vmatprep.mubr.f32.mxu1 %v15872_v41  ;;  %4421 = vmatprep.mubr.f32.mxu0 %v15872_v41  ;;  %v13501_v36 = vpack.c.bf16 %v3850_v28, %v3842_v24  ;;  %v13551_v21 = vpack.c.bf16 %v3807_v17, %v3799_v25  ;;  %v3813_v24 = vld [vmem:[#allocation15 + $0x228] sm:$0xff]  ;;  %v4575_v14 = vld [vmem:[#allocation15 + $0x818] sm:$0xff] }
 0x7bb   :  { %v3821_v28 = vld [vmem:[#allocation15 + $0x268] sm:$0xff]  ;;  %v4583_v15 = vld [vmem:[#allocation15 + $0x858] sm:$0xff] }
 0x7bc   :  { %13450 = vmatpush1.bf16.msra.mxu1 %v13449_v38  ;;  %13482 = vmatpush1.bf16.msra.mxu0 %v13481_v39  ;;  %v3864_v38 = vld [vmem:[#allocation15 + $0x3c0] sm:$0xff]  ;;  %v13471_v39 = vpack.c.bf16 %v3865_v30, %v3857_v29  ;;  %v3815_v29 = vld [vmem:[#allocation15 + $0x238] sm:$0xff] }
 0x7bd   :  { %13452 = vmatprep.subr.bf16.mxu1 %v13451_v43  ;;  %13484 = vmatprep.subr.bf16.mxu0 %v13483_v45  ;;  %v3866_v43 = vld [vmem:[#allocation15 + $0x3d0] sm:$0xff]  ;;  %v3749_v45 = vld [vmem:[#allocation15 + $0x28] sm:$0xff]  ;;  %v13473_v49 = vpack.c.bf16 %v3864_v38, %v3856_v37  ;;  %v3823_v30 = vld [vmem:[#allocation15 + $0x278] sm:$0xff]  ;;  %v13523_v37 = vpack.c.bf16 %v3821_v28, %v3813_v24 }
 0x7be   :  { %v13505_v50 = vpack.c.bf16 %v3866_v43, %v3858_v42  ;;  %v13555_v38 = vpack.c.bf16 %v3823_v30, %v3815_v29  ;;  %v3829_v42 = vld [vmem:[#allocation15 + $0x2a8] sm:$0xff]  ;;  %v4591_v24 = vld [vmem:[#allocation15 + $0x898] sm:$0xff] }
 0x7bf   :  { %v3837_v43 = vld [vmem:[#allocation15 + $0x2e8] sm:$0xff]  ;;  %v4599_v28 = vld [vmem:[#allocation15 + $0x8d8] sm:$0xff] }
 0x7c0   :  { %13454 = vmatpush1.bf16.msra.mxu1 %v13453_v26  ;;  %13486 = vmatpush1.bf16.msra.mxu0 %v13485_v52  ;;  %v3756_v26 = vld [vmem:[#allocation15 + $0x60] sm:$0xff]  ;;  %v13507_v52 = vpack.c.bf16 %v3757_v46, %v3749_v45  ;;  %v3831_v45 = vld [vmem:[#allocation15 + $0x2b8] sm:$0xff] }
 0x7c1   :  { %13456 = vmatprep.subr.bf16.mxu1 %v13455_v8  ;;  %13488 = vmatprep.subr.bf16.mxu0 %v13487_v56  ;;  %v3758_v8 = vld [vmem:[#allocation15 + $0x70] sm:$0xff]  ;;  %v3765_v56 = vld [vmem:[#allocation15 + $0xa8] sm:$0xff]  ;;  %v13509_v59 = vpack.c.bf16 %v3756_v26, %v3748_v51  ;;  %v3839_v46 = vld [vmem:[#allocation15 + $0x2f8] sm:$0xff]  ;;  %v13527_v51 = vpack.c.bf16 %v3837_v43, %v3829_v42 }
 0x7c2   :  { %v13541_v60 = vpack.c.bf16 %v3758_v8, %v3750_v55  ;;  %v13511_v0 = vpack.c.bf16 %v3773_v57, %v3765_v56  ;;  %v13559_v26 = vpack.c.bf16 %v3839_v46, %v3831_v45  ;;  %v3845_v55 = vld [vmem:[#allocation15 + $0x328] sm:$0xff]  ;;  %v3847_v56 = vld [vmem:[#allocation15 + $0x338] sm:$0xff] }
 0x7c3   :  { %v3853_v8 = vld [vmem:[#allocation15 + $0x368] sm:$0xff]  ;;  %v3855_v57 = vld [vmem:[#allocation15 + $0x378] sm:$0xff] }
 0x7c4   :  { %13458 = vmatpush1.bf16.msra.mxu1 %v13457_v61  ;;  %13490 = vmatpush1.bf16.msra.mxu0 %v13489_v63  ;;  %v3772_v61 = vld [vmem:[#allocation15 + $0xe0] sm:$0xff]  ;;  %v3766_v63 = vld [vmem:[#allocation15 + $0xb0] sm:$0xff]  ;;  %v4607_v42 = vld [vmem:[#allocation15 + $0x918] sm:$0xff] }
 0x7c5   :  { %13460 = vmatprep.subr.bf16.mxu1 %v13459_v2  ;;  %13492 = vmatprep.subr.bf16.mxu0 %v13491_v3  ;;  %v3774_v2 = vld [vmem:[#allocation15 + $0xf0] sm:$0xff]  ;;  %v3781_v3 = vld [vmem:[#allocation15 + $0x128] sm:$0xff]  ;;  %v13513_v44 = vpack.c.bf16 %v3772_v61, %v3764_v6  ;;  %v13531_v6 = vpack.c.bf16 %v3853_v8, %v3845_v55  ;;  %v13563_v61 = vpack.c.bf16 %v3855_v57, %v3847_v56  ;;  %v4615_v43 = vld [vmem:[#allocation15 + $0x958] sm:$0xff] }
 0x7c6   :  { %v13545_v53 = vpack.c.bf16 %v3774_v2, %v3766_v63  ;;  %v13515_v12 = vpack.c.bf16 %v3789_v4, %v3781_v3  ;;  %v3846_v63 = vld [vmem:[#allocation15 + $0x330] sm:$0xff]  ;;  %v3869_v2 = vld [vmem:[#allocation15 + $0x3e8] sm:$0xff]  ;;  %v3863_v3 = vld [vmem:[#allocation15 + $0x3b8] sm:$0xff] }
 0x7c7   :  { %v3871_v4 = vld [vmem:[#allocation15 + $0x3f8] sm:$0xff]  ;;  %v4620_v57 = vld [vmem:[#allocation15 + $0x980] sm:$0xff] }
 0x7c8   :  { %13462 = vmatpush1.bf16.msra.mxu1 %v13461_v62  ;;  %13494 = vmatpush1.bf16.msra.mxu0 %v13493_v11  ;;  %v3780_v62 = vld [vmem:[#allocation15 + $0x120] sm:$0xff]  ;;  %v4623_v55 = vld [vmem:[#allocation15 + $0x998] sm:$0xff] }
 0x7c9   :  { %13464 = vmatprep.subr.bf16.mxu1 %v13463_v13  ;;  %13496 = vmatprep.subr.bf16.mxu0 %v13495_v16  ;;  %v3788_v11 = vld [vmem:[#allocation15 + $0x160] sm:$0xff]  ;;  %v3782_v13 = vld [vmem:[#allocation15 + $0x130] sm:$0xff]  ;;  %v4631_v8 = vld [vmem:[#allocation15 + $0x9d8] sm:$0xff] }
 0x7ca   :  { %v3790_v16 = vld [vmem:[#allocation15 + $0x170] sm:$0xff]  ;;  %v13517_v35 = vpack.c.bf16 %v3788_v11, %v3780_v62  ;;  %v13567_v11 = vpack.c.bf16 %v3871_v4, %v3863_v3  ;;  %v4636_v4 = vld [vmem:[#allocation15 + $0xa00] sm:$0xff] }
 0x7cb   :  { %v13549_v18 = vpack.c.bf16 %v3790_v16, %v3782_v13  ;;  %v4573_v13 = vld [vmem:[#allocation15 + $0x808] sm:$0xff] }
 0x7cc   :  { %13466 = vmatpush1.bf16.msra.mxu1 %v13465_v19  ;;  %13498 = vmatpush1.bf16.msra.mxu0 %v13497_v31  ;;  %v3796_v19 = vld [vmem:[#allocation15 + $0x1a0] sm:$0xff]  ;;  %v4581_v16 = vld [vmem:[#allocation15 + $0x848] sm:$0xff] }
 0x7cd   :  { %13468 = vmatprep.subr.bf16.mxu1 %v13467_v22  ;;  %13500 = vmatprep.subr.bf16.mxu0 %v13499_v23  ;;  %v3804_v31 = vld [vmem:[#allocation15 + $0x1e0] sm:$0xff]  ;;  %v3798_v22 = vld [vmem:[#allocation15 + $0x1b0] sm:$0xff] }
 0x7ce   :  { %v3806_v23 = vld [vmem:[#allocation15 + $0x1f0] sm:$0xff]  ;;  %v13521_v32 = vpack.c.bf16 %v3804_v31, %v3796_v19  ;;  %v13571_v19 = vpack.c.bf16 %v4581_v16, %v4573_v13  ;;  %v13603_v31 = vpack.c.bf16 %v4583_v15, %v4575_v14  ;;  %v4663_v13 = vld [vmem:[#allocation15 + $0xad8] sm:$0xff]  ;;  %v4652_v15 = vld [vmem:[#allocation15 + $0xa80] sm:$0xff] }
 0x7cf   :  { %v13553_v33 = vpack.c.bf16 %v3806_v23, %v3798_v22  ;;  %v4589_v22 = vld [vmem:[#allocation15 + $0x888] sm:$0xff] }
 0x7d0   :  { %13470 = vmatpush1.bf16.msra.mxu1 %v13469_v34  ;;  %13502 = vmatpush1.bf16.msra.mxu0 %v13501_v36  ;;  %v3812_v34 = vld [vmem:[#allocation15 + $0x220] sm:$0xff]  ;;  %v4597_v23 = vld [vmem:[#allocation15 + $0x8c8] sm:$0xff] }
 0x7d1   :  { %13472 = vmatprep.subr.bf16.mxu1 %v13471_v39  ;;  %13504 = vmatprep.subr.bf16.mxu0 %v13503_v40  ;;  %v3820_v36 = vld [vmem:[#allocation15 + $0x260] sm:$0xff]  ;;  %v3814_v39 = vld [vmem:[#allocation15 + $0x230] sm:$0xff] }
 0x7d2   :  { %v3822_v40 = vld [vmem:[#allocation15 + $0x270] sm:$0xff]  ;;  %v13525_v47 = vpack.c.bf16 %v3820_v36, %v3812_v34  ;;  %v13575_v34 = vpack.c.bf16 %v4597_v23, %v4589_v22  ;;  %v13607_v36 = vpack.c.bf16 %v4599_v28, %v4591_v24  ;;  %v4679_v22 = vld [vmem:[#allocation15 + $0xb58] sm:$0xff]  ;;  %v4668_v28 = vld [vmem:[#allocation15 + $0xb00] sm:$0xff] }
 0x7d3   :  { %v13557_v48 = vpack.c.bf16 %v3822_v40, %v3814_v39  ;;  %v4605_v39 = vld [vmem:[#allocation15 + $0x908] sm:$0xff] }
 0x7d4   :  { %13474 = vmatpush1.bf16.msra.mxu1 %v13473_v49  ;;  %13506 = vmatpush1.bf16.msra.mxu0 %v13505_v50  ;;  %v3828_v49 = vld [vmem:[#allocation15 + $0x2a0] sm:$0xff]  ;;  %v4613_v40 = vld [vmem:[#allocation15 + $0x948] sm:$0xff] }
 0x7d5   :  { %13508 = vmatprep.subr.bf16.mxu1 %v13507_v52  ;;  %13540 = vmatprep.subr.bf16.mxu0 %v13539_v54  ;;  %v3836_v50 = vld [vmem:[#allocation15 + $0x2e0] sm:$0xff]  ;;  %v3830_v52 = vld [vmem:[#allocation15 + $0x2b0] sm:$0xff] }
 0x7d6   :  { %v3838_v54 = vld [vmem:[#allocation15 + $0x2f0] sm:$0xff]  ;;  %v13529_v58 = vpack.c.bf16 %v3836_v50, %v3828_v49  ;;  %v13579_v49 = vpack.c.bf16 %v4613_v40, %v4605_v39  ;;  %v13611_v50 = vpack.c.bf16 %v4615_v43, %v4607_v42  ;;  %v4695_v39 = vld [vmem:[#allocation15 + $0xbd8] sm:$0xff]  ;;  %v4684_v43 = vld [vmem:[#allocation15 + $0xb80] sm:$0xff] }
 0x7d7   :  { %4351 = vmatmul.mubr.f32.vlgmr.msra.gmra.mrb[20].mxu1 %v16632_v5  ;;  %4422 = vmatmul.mubr.f32.vlgmr.msra.gmra.mrb[64].mxu0 %v16632_v5  ;;  %v13561_v27 = vpack.c.bf16 %v3838_v54, %v3830_v52  ;;  %v4621_v52 = vld [vmem:[#allocation15 + $0x988] sm:$0xff] }
 0x7d8   :  { %13510 = vmatpush1.bf16.msra.mxu1 %v13509_v59  ;;  %13542 = vmatpush1.bf16.msra.mxu0 %v13541_v60  ;;  %v3844_v59 = vld [vmem:[#allocation15 + $0x320] sm:$0xff]  ;;  %v4629_v54 = vld [vmem:[#allocation15 + $0x9c8] sm:$0xff] }
 0x7d9   :  { %13512 = vmatprep.subr.bf16.mxu1 %v13511_v0  ;;  %13544 = vmatprep.subr.bf16.mxu0 %v13543_v1  ;;  %v3852_v60 = vld [vmem:[#allocation15 + $0x360] sm:$0xff]  ;;  %v3854_v0 = vld [vmem:[#allocation15 + $0x370] sm:$0xff]  ;;  %v3861_v1 = vld [vmem:[#allocation15 + $0x3a8] sm:$0xff] }
 0x7da   :  { %4492 = vmatprep.mubr.f32.mxu1 %v15872_v41  ;;  %4563 = vmatprep.mubr.f32.mxu0 %v15872_v41  ;;  %v13533_v9 = vpack.c.bf16 %v3852_v60, %v3844_v59  ;;  %v13565_v10 = vpack.c.bf16 %v3854_v0, %v3846_v63  ;;  %v13535_v62 = vpack.c.bf16 %v3869_v2, %v3861_v1  ;;  %v4622_v60 = vld [vmem:[#allocation15 + $0x990] sm:$0xff]  ;;  %v4645_v63 = vld [vmem:[#allocation15 + $0xa48] sm:$0xff]  ;;  %v4639_v0 = vld [vmem:[#allocation15 + $0xa18] sm:$0xff] }
 0x7db   :  { %v13615_v59 = vpack.c.bf16 %v4631_v8, %v4623_v55  ;;  %v4647_v1 = vld [vmem:[#allocation15 + $0xa58] sm:$0xff]  ;;  %v4576_v8 = vld [vmem:[#allocation15 + $0x820] sm:$0xff] }
 0x7dc   :  { %13514 = vmatpush1.bf16.msra.mxu1 %v13513_v44  ;;  %13546 = vmatpush1.bf16.msra.mxu0 %v13545_v53  ;;  %v3860_v44 = vld [vmem:[#allocation15 + $0x3a0] sm:$0xff] }
 0x7dd   :  { %13516 = vmatprep.subr.bf16.mxu1 %v13515_v12  ;;  %13548 = vmatprep.subr.bf16.mxu0 %v13547_v7  ;;  %v3868_v53 = vld [vmem:[#allocation15 + $0x3e0] sm:$0xff]  ;;  %v3862_v12 = vld [vmem:[#allocation15 + $0x3b0] sm:$0xff] }
 0x7de   :  { %v3870_v7 = vld [vmem:[#allocation15 + $0x3f0] sm:$0xff]  ;;  %v13537_v25 = vpack.c.bf16 %v3868_v53, %v3860_v44  ;;  %v13619_v44 = vpack.c.bf16 %v4647_v1, %v4639_v0 }
 0x7df   :  { %v13569_v17 = vpack.c.bf16 %v3870_v7, %v3862_v12  ;;  %v4638_v53 = vld [vmem:[#allocation15 + $0xa10] sm:$0xff]  ;;  %v4661_v12 = vld [vmem:[#allocation15 + $0xac8] sm:$0xff]  ;;  %v4655_v7 = vld [vmem:[#allocation15 + $0xa98] sm:$0xff] }
 0x7e0   :  { %13518 = vmatpush1.bf16.msra.mxu1 %v13517_v35  ;;  %13550 = vmatpush1.bf16.msra.mxu0 %v13549_v18  ;;  %v4572_v35 = vld [vmem:[#allocation15 + $0x800] sm:$0xff] }
 0x7e1   :  { %13520 = vmatprep.subr.bf16.mxu1 %v13519_v20  ;;  %13552 = vmatprep.subr.bf16.mxu0 %v13551_v21  ;;  %v4580_v18 = vld [vmem:[#allocation15 + $0x840] sm:$0xff]  ;;  %v4574_v20 = vld [vmem:[#allocation15 + $0x810] sm:$0xff] }
 0x7e2   :  { %v4582_v21 = vld [vmem:[#allocation15 + $0x850] sm:$0xff]  ;;  %v13573_v29 = vpack.c.bf16 %v4580_v18, %v4572_v35  ;;  %v13623_v35 = vpack.c.bf16 %v4663_v13, %v4655_v7 }
 0x7e3   :  { %v13605_v30 = vpack.c.bf16 %v4582_v21, %v4574_v20  ;;  %v4654_v18 = vld [vmem:[#allocation15 + $0xa90] sm:$0xff]  ;;  %v4677_v20 = vld [vmem:[#allocation15 + $0xb48] sm:$0xff]  ;;  %v4671_v21 = vld [vmem:[#allocation15 + $0xb18] sm:$0xff] }
 0x7e4   :  { %13522 = vmatpush1.bf16.msra.mxu1 %v13521_v32  ;;  %13554 = vmatpush1.bf16.msra.mxu0 %v13553_v33  ;;  %v4588_v32 = vld [vmem:[#allocation15 + $0x880] sm:$0xff] }
 0x7e5   :  { %13524 = vmatprep.subr.bf16.mxu1 %v13523_v37  ;;  %13556 = vmatprep.subr.bf16.mxu0 %v13555_v38  ;;  %v4596_v33 = vld [vmem:[#allocation15 + $0x8c0] sm:$0xff]  ;;  %v4590_v37 = vld [vmem:[#allocation15 + $0x890] sm:$0xff] }
 0x7e6   :  { %v4598_v38 = vld [vmem:[#allocation15 + $0x8d0] sm:$0xff]  ;;  %v13577_v45 = vpack.c.bf16 %v4596_v33, %v4588_v32  ;;  %v13627_v32 = vpack.c.bf16 %v4679_v22, %v4671_v21 }
 0x7e7   :  { %v13609_v46 = vpack.c.bf16 %v4598_v38, %v4590_v37  ;;  %v4670_v33 = vld [vmem:[#allocation15 + $0xb10] sm:$0xff]  ;;  %v4693_v37 = vld [vmem:[#allocation15 + $0xbc8] sm:$0xff]  ;;  %v4687_v38 = vld [vmem:[#allocation15 + $0xb98] sm:$0xff] }
 0x7e8   :  { %13526 = vmatpush1.bf16.msra.mxu1 %v13525_v47  ;;  %13558 = vmatpush1.bf16.msra.mxu0 %v13557_v48  ;;  %v4604_v47 = vld [vmem:[#allocation15 + $0x900] sm:$0xff] }
 0x7e9   :  { %13528 = vmatprep.subr.bf16.mxu1 %v13527_v51  ;;  %13560 = vmatprep.subr.bf16.mxu0 %v13559_v26  ;;  %v4612_v48 = vld [vmem:[#allocation15 + $0x940] sm:$0xff]  ;;  %v4606_v51 = vld [vmem:[#allocation15 + $0x910] sm:$0xff] }
 0x7ea   :  { %v4614_v26 = vld [vmem:[#allocation15 + $0x950] sm:$0xff] }
 0x7eb   :  { %v13613_v56 = vpack.c.bf16 %v4614_v26, %v4606_v51  ;;  %v4585_v51 = vld [vmem:[#allocation15 + $0x868] sm:$0xff]  ;;  %v4579_v26 = vld [vmem:[#allocation15 + $0x838] sm:$0xff] }
 0x7ec   :  { %13530 = vmatpush1.bf16.msra.mxu1 %v13529_v58  ;;  %13562 = vmatpush1.bf16.msra.mxu0 %v13561_v27  ;;  %v4628_v58 = vld [vmem:[#allocation15 + $0x9c0] sm:$0xff]  ;;  %v13583_v27 = vpack.c.bf16 %v4629_v54, %v4621_v52  ;;  %v4587_v52 = vld [vmem:[#allocation15 + $0x878] sm:$0xff] }
 0x7ed   :  { %13532 = vmatprep.subr.bf16.mxu1 %v13531_v6  ;;  %13564 = vmatprep.subr.bf16.mxu0 %v13563_v61  ;;  %v4630_v6 = vld [vmem:[#allocation15 + $0x9d0] sm:$0xff]  ;;  %v4637_v61 = vld [vmem:[#allocation15 + $0xa08] sm:$0xff]  ;;  %v13585_v2 = vpack.c.bf16 %v4628_v58, %v4620_v57  ;;  %v13667_v57 = vpack.c.bf16 %v4587_v52, %v4579_v26 }
 0x7ee   :  { %v13617_v3 = vpack.c.bf16 %v4630_v6, %v4622_v60  ;;  %v4578_v58 = vld [vmem:[#allocation15 + $0x830] sm:$0xff]  ;;  %v4601_v60 = vld [vmem:[#allocation15 + $0x8e8] sm:$0xff]  ;;  %v4595_v6 = vld [vmem:[#allocation15 + $0x8b8] sm:$0xff] }
 0x7f0   :  { %13534 = vmatpush1.bf16.msra.mxu1 %v13533_v9  ;;  %13566 = vmatpush1.bf16.msra.mxu0 %v13565_v10  ;;  %v4644_v9 = vld [vmem:[#allocation15 + $0xa40] sm:$0xff]  ;;  %v13587_v10 = vpack.c.bf16 %v4645_v63, %v4637_v61  ;;  %v4603_v61 = vld [vmem:[#allocation15 + $0x8f8] sm:$0xff] }
 0x7f1   :  { %13536 = vmatprep.subr.bf16.mxu1 %v13535_v62  ;;  %13568 = vmatprep.subr.bf16.mxu0 %v13567_v11  ;;  %v4646_v62 = vld [vmem:[#allocation15 + $0xa50] sm:$0xff]  ;;  %v4653_v11 = vld [vmem:[#allocation15 + $0xa88] sm:$0xff]  ;;  %v13589_v16 = vpack.c.bf16 %v4644_v9, %v4636_v4  ;;  %v16642_v63 = vld [vmem:[#allocation2 + $0x4] sm:$0x3]  ;;  %v13671_v9 = vpack.c.bf16 %v4603_v61, %v4595_v6 }
 0x7f2   :  { %v13621_v14 = vpack.c.bf16 %v4646_v62, %v4638_v53  ;;  %v4609_v53 = vld [vmem:[#allocation15 + $0x928] sm:$0xff] }
 0x7f3   :  { %v4617_v62 = vld [vmem:[#allocation15 + $0x968] sm:$0xff] }
 0x7f4   :  { %13538 = vmatpush1.bf16.msra.mxu1 %v13537_v25  ;;  %13570 = vmatpush1.bf16.msra.mxu0 %v13569_v17  ;;  %v4660_v25 = vld [vmem:[#allocation15 + $0xac0] sm:$0xff]  ;;  %v13591_v17 = vpack.c.bf16 %v4661_v12, %v4653_v11  ;;  %v4611_v11 = vld [vmem:[#allocation15 + $0x938] sm:$0xff] }
 0x7f5   :  { %13572 = vmatprep.subr.bf16.mxu1 %v13571_v19  ;;  %13604 = vmatprep.subr.bf16.mxu0 %v13603_v31  ;;  %v4662_v19 = vld [vmem:[#allocation15 + $0xad0] sm:$0xff]  ;;  %v4669_v31 = vld [vmem:[#allocation15 + $0xb08] sm:$0xff]  ;;  %v13593_v23 = vpack.c.bf16 %v4660_v25, %v4652_v15  ;;  %v4619_v12 = vld [vmem:[#allocation15 + $0x978] sm:$0xff]  ;;  %v13643_v15 = vpack.c.bf16 %v4617_v62, %v4609_v53 }
 0x7f6   :  { %v13625_v24 = vpack.c.bf16 %v4662_v19, %v4654_v18  ;;  %v13675_v25 = vpack.c.bf16 %v4619_v12, %v4611_v11  ;;  %v4625_v18 = vld [vmem:[#allocation15 + $0x9a8] sm:$0xff]  ;;  %v4691_v53 = vld [vmem:[#allocation15 + $0xbb8] sm:$0xff] }
 0x7f7   :  { %4493 = vmatmul.mubr.f32.vlgmr.msra.gmra.mrb[22].mxu1 %v16632_v5  ;;  %4564 = vmatmul.mubr.f32.vlgmr.msra.gmra.mrb[66].mxu0 %v16632_v5  ;;  %v13581_v5 = vpack.c.bf16 %v4612_v48, %v4604_v47  ;;  %v13631_v47 = vpack.c.bf16 %v4695_v39, %v4687_v38  ;;  %v4686_v48 = vld [vmem:[#allocation15 + $0xb90] sm:$0xff]  ;;  %v4633_v19 = vld [vmem:[#allocation15 + $0x9e8] sm:$0xff]  ;;  %v4699_v62 = vld [vmem:[#allocation15 + $0xbf8] sm:$0xff] }
 0x7f8   :  { %13574 = vmatpush1.bf16.msra.mxu1 %v13573_v29  ;;  %13606 = vmatpush1.bf16.msra.mxu0 %v13605_v30  ;;  %v4676_v29 = vld [vmem:[#allocation15 + $0xb40] sm:$0xff]  ;;  %v13595_v30 = vpack.c.bf16 %v4677_v20, %v4669_v31  ;;  %v4627_v31 = vld [vmem:[#allocation15 + $0x9b8] sm:$0xff] }
 0x7f9   :  { %13576 = vmatprep.subr.bf16.mxu1 %v13575_v34  ;;  %13608 = vmatprep.subr.bf16.mxu0 %v13607_v36  ;;  %v4678_v34 = vld [vmem:[#allocation15 + $0xb50] sm:$0xff]  ;;  %v4685_v36 = vld [vmem:[#allocation15 + $0xb88] sm:$0xff]  ;;  %v13597_v40 = vpack.c.bf16 %v4676_v29, %v4668_v28  ;;  %v4635_v20 = vld [vmem:[#allocation15 + $0x9f8] sm:$0xff]  ;;  %v13647_v28 = vpack.c.bf16 %v4633_v19, %v4625_v18 }
 0x7fa   :  { %4764 = vmatprep.mubr.f32.mxu1 %v15872_v41  ;;  %4835 = vmatprep.mubr.f32.mxu0 %v15872_v41  ;;  %v13629_v42 = vpack.c.bf16 %v4678_v34, %v4670_v33  ;;  %v13679_v29 = vpack.c.bf16 %v4635_v20, %v4627_v31  ;;  %v4641_v33 = vld [vmem:[#allocation15 + $0xa28] sm:$0xff]  ;;  %v4997_v18 = vld [vmem:[#allocation15 + $0xc18] sm:$0xff] }
 0x7fb   :  { %v4649_v34 = vld [vmem:[#allocation15 + $0xa68] sm:$0xff]  ;;  %v5005_v19 = vld [vmem:[#allocation15 + $0xc58] sm:$0xff] }
 0x7fc   :  { %13578 = vmatpush1.bf16.msra.mxu1 %v13577_v45  ;;  %13610 = vmatpush1.bf16.msra.mxu0 %v13609_v46  ;;  %v4692_v45 = vld [vmem:[#allocation15 + $0xbc0] sm:$0xff]  ;;  %v13599_v46 = vpack.c.bf16 %v4693_v37, %v4685_v36  ;;  %v4643_v36 = vld [vmem:[#allocation15 + $0xa38] sm:$0xff] }
 0x7fd   :  { %13580 = vmatprep.subr.bf16.mxu1 %v13579_v49  ;;  %13612 = vmatprep.subr.bf16.mxu0 %v13611_v50  ;;  %v4694_v49 = vld [vmem:[#allocation15 + $0xbd0] sm:$0xff]  ;;  %v4577_v50 = vld [vmem:[#allocation15 + $0x828] sm:$0xff]  ;;  %v13601_v54 = vpack.c.bf16 %v4692_v45, %v4684_v43  ;;  %v4651_v37 = vld [vmem:[#allocation15 + $0xa78] sm:$0xff]  ;;  %v13651_v43 = vpack.c.bf16 %v4649_v34, %v4641_v33 }
 0x7fe   :  { %v13633_v55 = vpack.c.bf16 %v4694_v49, %v4686_v48  ;;  %v13683_v45 = vpack.c.bf16 %v4651_v37, %v4643_v36  ;;  %v4657_v48 = vld [vmem:[#allocation15 + $0xaa8] sm:$0xff]  ;;  %v5013_v33 = vld [vmem:[#allocation15 + $0xc98] sm:$0xff] }
 0x7ff   :  { %v4665_v49 = vld [vmem:[#allocation15 + $0xae8] sm:$0xff]  ;;  %v5021_v34 = vld [vmem:[#allocation15 + $0xcd8] sm:$0xff] }
 0x800   :  { %13582 = vmatpush1.bf16.msra.mxu1 %v13581_v5  ;;  %13614 = vmatpush1.bf16.msra.mxu0 %v13613_v56  ;;  %v4584_v5 = vld [vmem:[#allocation15 + $0x860] sm:$0xff]  ;;  %v13635_v56 = vpack.c.bf16 %v4585_v51, %v4577_v50  ;;  %v4659_v50 = vld [vmem:[#allocation15 + $0xab8] sm:$0xff] }
 0x801   :  { %13584 = vmatprep.subr.bf16.mxu1 %v13583_v27  ;;  %13616 = vmatprep.subr.bf16.mxu0 %v13615_v59  ;;  %v4586_v27 = vld [vmem:[#allocation15 + $0x870] sm:$0xff]  ;;  %v4593_v59 = vld [vmem:[#allocation15 + $0x8a8] sm:$0xff]  ;;  %v13637_v0 = vpack.c.bf16 %v4584_v5, %v4576_v8  ;;  %v4667_v51 = vld [vmem:[#allocation15 + $0xaf8] sm:$0xff]  ;;  %v13655_v8 = vpack.c.bf16 %v4665_v49, %v4657_v48 }
 0x802   :  { %v13669_v1 = vpack.c.bf16 %v4586_v27, %v4578_v58  ;;  %v13639_v4 = vpack.c.bf16 %v4601_v60, %v4593_v59  ;;  %v13687_v5 = vpack.c.bf16 %v4667_v51, %v4659_v50  ;;  %v4673_v58 = vld [vmem:[#allocation15 + $0xb28] sm:$0xff]  ;;  %v4675_v59 = vld [vmem:[#allocation15 + $0xb38] sm:$0xff] }
 0x803   :  { %v4681_v27 = vld [vmem:[#allocation15 + $0xb68] sm:$0xff]  ;;  %v4683_v60 = vld [vmem:[#allocation15 + $0xb78] sm:$0xff] }
 0x804   :  { %13586 = vmatpush1.bf16.msra.mxu1 %v13585_v2  ;;  %13618 = vmatpush1.bf16.msra.mxu0 %v13617_v3  ;;  %v4592_v2 = vld [vmem:[#allocation15 + $0x8a0] sm:$0xff]  ;;  %v5029_v48 = vld [vmem:[#allocation15 + $0xd18] sm:$0xff] }
 0x805   :  { %13588 = vmatprep.subr.bf16.mxu1 %v13587_v10  ;;  %13620 = vmatprep.subr.bf16.mxu0 %v13619_v44  ;;  %v4600_v3 = vld [vmem:[#allocation15 + $0x8e0] sm:$0xff]  ;;  %v4594_v10 = vld [vmem:[#allocation15 + $0x8b0] sm:$0xff]  ;;  %v5037_v49 = vld [vmem:[#allocation15 + $0xd58] sm:$0xff] }
 0x806   :  { %v4602_v44 = vld [vmem:[#allocation15 + $0x8f0] sm:$0xff]  ;;  %v13641_v7 = vpack.c.bf16 %v4600_v3, %v4592_v2  ;;  %v13659_v2 = vpack.c.bf16 %v4681_v27, %v4673_v58  ;;  %v13691_v3 = vpack.c.bf16 %v4683_v60, %v4675_v59  ;;  %v5045_v58 = vld [vmem:[#allocation15 + $0xd98] sm:$0xff]  ;;  %v5042_v60 = vld [vmem:[#allocation15 + $0xd80] sm:$0xff] }
 0x807   :  { %v13673_v13 = vpack.c.bf16 %v4602_v44, %v4594_v10  ;;  %v4689_v10 = vld [vmem:[#allocation15 + $0xba8] sm:$0xff]  ;;  %v5053_v27 = vld [vmem:[#allocation15 + $0xdd8] sm:$0xff] }
 0x808   :  { %13590 = vmatpush1.bf16.msra.mxu1 %v13589_v16  ;;  %13622 = vmatpush1.bf16.msra.mxu0 %v13621_v14  ;;  %v4608_v16 = vld [vmem:[#allocation15 + $0x920] sm:$0xff]  ;;  %v4697_v44 = vld [vmem:[#allocation15 + $0xbe8] sm:$0xff] }
 0x809   :  { %13592 = vmatprep.subr.bf16.mxu1 %v13591_v17  ;;  %13624 = vmatprep.subr.bf16.mxu0 %v13623_v35  ;;  %v4616_v14 = vld [vmem:[#allocation15 + $0x960] sm:$0xff]  ;;  %v4610_v17 = vld [vmem:[#allocation15 + $0x930] sm:$0xff] }
 0x80a   :  { %v4618_v35 = vld [vmem:[#allocation15 + $0x970] sm:$0xff]  ;;  %v13645_v21 = vpack.c.bf16 %v4616_v14, %v4608_v16  ;;  %v13663_v16 = vpack.c.bf16 %v4697_v44, %v4689_v10  ;;  %v13695_v14 = vpack.c.bf16 %v4699_v62, %v4691_v53  ;;  %v5069_v10 = vld [vmem:[#allocation15 + $0xe58] sm:$0xff]  ;;  %v5058_v62 = vld [vmem:[#allocation15 + $0xe00] sm:$0xff] }
 0x80b   :  { %v13677_v22 = vpack.c.bf16 %v4618_v35, %v4610_v17  ;;  %v4995_v17 = vld [vmem:[#allocation15 + $0xc08] sm:$0xff] }
 0x80c   :  { %13594 = vmatpush1.bf16.msra.mxu1 %v13593_v23  ;;  %13626 = vmatpush1.bf16.msra.mxu0 %v13625_v24  ;;  %v4624_v23 = vld [vmem:[#allocation15 + $0x9a0] sm:$0xff]  ;;  %v5003_v35 = vld [vmem:[#allocation15 + $0xc48] sm:$0xff] }
 0x80d   :  { %13596 = vmatprep.subr.bf16.mxu1 %v13595_v30  ;;  %13628 = vmatprep.subr.bf16.mxu0 %v13627_v32  ;;  %v4632_v24 = vld [vmem:[#allocation15 + $0x9e0] sm:$0xff]  ;;  %v4626_v30 = vld [vmem:[#allocation15 + $0x9b0] sm:$0xff] }
 0x80e   :  { %v4634_v32 = vld [vmem:[#allocation15 + $0x9f0] sm:$0xff]  ;;  %v13649_v38 = vpack.c.bf16 %v4632_v24, %v4624_v23  ;;  %v13699_v23 = vpack.c.bf16 %v5003_v35, %v4995_v17  ;;  %v13731_v24 = vpack.c.bf16 %v5005_v19, %v4997_v18  ;;  %v5085_v17 = vld [vmem:[#allocation15 + $0xed8] sm:$0xff]  ;;  %v5074_v19 = vld [vmem:[#allocation15 + $0xe80] sm:$0xff] }
 0x80f   :  { %v13681_v39 = vpack.c.bf16 %v4634_v32, %v4626_v30  ;;  %v5011_v30 = vld [vmem:[#allocation15 + $0xc88] sm:$0xff] }
 0x810   :  { %13598 = vmatpush1.bf16.msra.mxu1 %v13597_v40  ;;  %13630 = vmatpush1.bf16.msra.mxu0 %v13629_v42  ;;  %v4640_v40 = vld [vmem:[#allocation15 + $0xa20] sm:$0xff]  ;;  %v5019_v32 = vld [vmem:[#allocation15 + $0xcc8] sm:$0xff] }
 0x811   :  { %13600 = vmatprep.subr.bf16.mxu1 %v13599_v46  ;;  %13632 = vmatprep.subr.bf16.mxu0 %v13631_v47  ;;  %v4648_v42 = vld [vmem:[#allocation15 + $0xa60] sm:$0xff]  ;;  %v4642_v46 = vld [vmem:[#allocation15 + $0xa30] sm:$0xff] }
 0x812   :  { %v4650_v47 = vld [vmem:[#allocation15 + $0xa70] sm:$0xff]  ;;  %v13653_v26 = vpack.c.bf16 %v4648_v42, %v4640_v40  ;;  %v13703_v40 = vpack.c.bf16 %v5019_v32, %v5011_v30  ;;  %v13735_v42 = vpack.c.bf16 %v5021_v34, %v5013_v33  ;;  %v5101_v30 = vld [vmem:[#allocation15 + $0xf58] sm:$0xff]  ;;  %v5090_v34 = vld [vmem:[#allocation15 + $0xf00] sm:$0xff] }
 0x813   :  { %v13685_v52 = vpack.c.bf16 %v4650_v47, %v4642_v46  ;;  %v5027_v46 = vld [vmem:[#allocation15 + $0xd08] sm:$0xff] }
 0x814   :  { %13602 = vmatpush1.bf16.msra.mxu1 %v13601_v54  ;;  %13634 = vmatpush1.bf16.msra.mxu0 %v13633_v55  ;;  %v4656_v54 = vld [vmem:[#allocation15 + $0xaa0] sm:$0xff]  ;;  %v5035_v47 = vld [vmem:[#allocation15 + $0xd48] sm:$0xff] }
 0x815   :  { %13636 = vmatprep.subr.bf16.mxu1 %v13635_v56  ;;  %13668 = vmatprep.subr.bf16.mxu0 %v13667_v57  ;;  %v4664_v55 = vld [vmem:[#allocation15 + $0xae0] sm:$0xff]  ;;  %v4658_v56 = vld [vmem:[#allocation15 + $0xab0] sm:$0xff] }
 0x816   :  { %v4666_v57 = vld [vmem:[#allocation15 + $0xaf0] sm:$0xff]  ;;  %v13657_v6 = vpack.c.bf16 %v4664_v55, %v4656_v54  ;;  %v13707_v54 = vpack.c.bf16 %v5035_v47, %v5027_v46  ;;  %v13739_v55 = vpack.c.bf16 %v5037_v49, %v5029_v48  ;;  %v5117_v46 = vld [vmem:[#allocation15 + $0xfd8] sm:$0xff]  ;;  %v5106_v49 = vld [vmem:[#allocation15 + $0xf80] sm:$0xff] }
 0x817   :  { %4765 = vmatmul.mubr.f32.vlgmr.msra.gmra.mrb[20].mxu1 %v16642_v63  ;;  %4836 = vmatmul.mubr.f32.vlgmr.msra.gmra.mrb[64].mxu0 %v16642_v63  ;;  %v13689_v61 = vpack.c.bf16 %v4666_v57, %v4658_v56  ;;  %v5043_v56 = vld [vmem:[#allocation15 + $0xd88] sm:$0xff] }
 0x818   :  { %13638 = vmatpush1.bf16.msra.mxu1 %v13637_v0  ;;  %13670 = vmatpush1.bf16.msra.mxu0 %v13669_v1  ;;  %v4672_v0 = vld [vmem:[#allocation15 + $0xb20] sm:$0xff]  ;;  %v5051_v57 = vld [vmem:[#allocation15 + $0xdc8] sm:$0xff] }
 0x819   :  { %13640 = vmatprep.subr.bf16.mxu1 %v13639_v4  ;;  %13672 = vmatprep.subr.bf16.mxu0 %v13671_v9  ;;  %v4680_v1 = vld [vmem:[#allocation15 + $0xb60] sm:$0xff]  ;;  %v4674_v4 = vld [vmem:[#allocation15 + $0xb30] sm:$0xff] }
 0x81a   :  { %4906 = vmatprep.mubr.f32.mxu1 %v15872_v41  ;;  %4977 = vmatprep.mubr.f32.mxu0 %v15872_v41  ;;  %v4682_v9 = vld [vmem:[#allocation15 + $0xb70] sm:$0xff]  ;;  %v13661_v11 = vpack.c.bf16 %v4680_v1, %v4672_v0  ;;  %v13743_v0 = vpack.c.bf16 %v5053_v27, %v5045_v58  ;;  %v4998_v27 = vld [vmem:[#allocation15 + $0xc20] sm:$0xff] }
 0x81b   :  { %v13693_v12 = vpack.c.bf16 %v4682_v9, %v4674_v4  ;;  %v5044_v1 = vld [vmem:[#allocation15 + $0xd90] sm:$0xff]  ;;  %v5067_v4 = vld [vmem:[#allocation15 + $0xe48] sm:$0xff]  ;;  %v5061_v9 = vld [vmem:[#allocation15 + $0xe18] sm:$0xff] }
 0x81c   :  { %13642 = vmatpush1.bf16.msra.mxu1 %v13641_v7  ;;  %13674 = vmatpush1.bf16.msra.mxu0 %v13673_v13  ;;  %v4688_v7 = vld [vmem:[#allocation15 + $0xba0] sm:$0xff] }
 0x81d   :  { %13644 = vmatprep.subr.bf16.mxu1 %v13643_v15  ;;  %13676 = vmatprep.subr.bf16.mxu0 %v13675_v25  ;;  %v4696_v13 = vld [vmem:[#allocation15 + $0xbe0] sm:$0xff]  ;;  %v4690_v15 = vld [vmem:[#allocation15 + $0xbb0] sm:$0xff] }
 0x81e   :  { %v4698_v25 = vld [vmem:[#allocation15 + $0xbf0] sm:$0xff]  ;;  %v13665_v31 = vpack.c.bf16 %v4696_v13, %v4688_v7  ;;  %v13747_v7 = vpack.c.bf16 %v5069_v10, %v5061_v9 }
 0x81f   :  { %v13697_v20 = vpack.c.bf16 %v4698_v25, %v4690_v15  ;;  %v5060_v13 = vld [vmem:[#allocation15 + $0xe10] sm:$0xff]  ;;  %v5083_v15 = vld [vmem:[#allocation15 + $0xec8] sm:$0xff]  ;;  %v5077_v25 = vld [vmem:[#allocation15 + $0xe98] sm:$0xff] }
 0x820   :  { %13646 = vmatpush1.bf16.msra.mxu1 %v13645_v21  ;;  %13678 = vmatpush1.bf16.msra.mxu0 %v13677_v22  ;;  %v4994_v21 = vld [vmem:[#allocation15 + $0xc00] sm:$0xff] }
 0x821   :  { %13648 = vmatprep.subr.bf16.mxu1 %v13647_v28  ;;  %13680 = vmatprep.subr.bf16.mxu0 %v13679_v29  ;;  %v5002_v22 = vld [vmem:[#allocation15 + $0xc40] sm:$0xff]  ;;  %v4996_v28 = vld [vmem:[#allocation15 + $0xc10] sm:$0xff] }
 0x822   :  { %v5004_v29 = vld [vmem:[#allocation15 + $0xc50] sm:$0xff]  ;;  %v13701_v36 = vpack.c.bf16 %v5002_v22, %v4994_v21  ;;  %v13751_v21 = vpack.c.bf16 %v5085_v17, %v5077_v25 }
 0x823   :  { %v13733_v37 = vpack.c.bf16 %v5004_v29, %v4996_v28  ;;  %v5076_v22 = vld [vmem:[#allocation15 + $0xe90] sm:$0xff]  ;;  %v5099_v28 = vld [vmem:[#allocation15 + $0xf48] sm:$0xff]  ;;  %v5093_v29 = vld [vmem:[#allocation15 + $0xf18] sm:$0xff] }
 0x824   :  { %13650 = vmatpush1.bf16.msra.mxu1 %v13649_v38  ;;  %13682 = vmatpush1.bf16.msra.mxu0 %v13681_v39  ;;  %v5010_v38 = vld [vmem:[#allocation15 + $0xc80] sm:$0xff] }
 0x825   :  { %13652 = vmatprep.subr.bf16.mxu1 %v13651_v43  ;;  %13684 = vmatprep.subr.bf16.mxu0 %v13683_v45  ;;  %v5018_v39 = vld [vmem:[#allocation15 + $0xcc0] sm:$0xff]  ;;  %v5012_v43 = vld [vmem:[#allocation15 + $0xc90] sm:$0xff] }
 0x826   :  { %v5020_v45 = vld [vmem:[#allocation15 + $0xcd0] sm:$0xff]  ;;  %v13705_v50 = vpack.c.bf16 %v5018_v39, %v5010_v38  ;;  %v13755_v38 = vpack.c.bf16 %v5101_v30, %v5093_v29 }
 0x827   :  { %v13737_v51 = vpack.c.bf16 %v5020_v45, %v5012_v43  ;;  %v5092_v39 = vld [vmem:[#allocation15 + $0xf10] sm:$0xff]  ;;  %v5115_v43 = vld [vmem:[#allocation15 + $0xfc8] sm:$0xff]  ;;  %v5109_v45 = vld [vmem:[#allocation15 + $0xf98] sm:$0xff] }
 0x828   :  { %13654 = vmatpush1.bf16.msra.mxu1 %v13653_v26  ;;  %13686 = vmatpush1.bf16.msra.mxu0 %v13685_v52  ;;  %v5026_v26 = vld [vmem:[#allocation15 + $0xd00] sm:$0xff] }
 0x829   :  { %13656 = vmatprep.subr.bf16.mxu1 %v13655_v8  ;;  %13688 = vmatprep.subr.bf16.mxu0 %v13687_v5  ;;  %v5034_v52 = vld [vmem:[#allocation15 + $0xd40] sm:$0xff]  ;;  %v5028_v8 = vld [vmem:[#allocation15 + $0xd10] sm:$0xff] }
 0x82a   :  { %v5036_v5 = vld [vmem:[#allocation15 + $0xd50] sm:$0xff] }
 0x82b   :  { %v13741_v59 = vpack.c.bf16 %v5036_v5, %v5028_v8  ;;  %v5007_v8 = vld [vmem:[#allocation15 + $0xc68] sm:$0xff]  ;;  %v5001_v5 = vld [vmem:[#allocation15 + $0xc38] sm:$0xff] }
 0x82c   :  { %13658 = vmatpush1.bf16.msra.mxu1 %v13657_v6  ;;  %13690 = vmatpush1.bf16.msra.mxu0 %v13689_v61  ;;  %v5050_v6 = vld [vmem:[#allocation15 + $0xdc0] sm:$0xff]  ;;  %v13711_v61 = vpack.c.bf16 %v5051_v57, %v5043_v56  ;;  %v5009_v56 = vld [vmem:[#allocation15 + $0xc78] sm:$0xff] }
 0x82d   :  { %13660 = vmatprep.subr.bf16.mxu1 %v13659_v2  ;;  %13692 = vmatprep.subr.bf16.mxu0 %v13691_v3  ;;  %v5052_v2 = vld [vmem:[#allocation15 + $0xdd0] sm:$0xff]  ;;  %v5059_v3 = vld [vmem:[#allocation15 + $0xe08] sm:$0xff]  ;;  %v13713_v44 = vpack.c.bf16 %v5050_v6, %v5042_v60  ;;  %v13795_v60 = vpack.c.bf16 %v5009_v56, %v5001_v5 }
 0x82e   :  { %v13745_v53 = vpack.c.bf16 %v5052_v2, %v5044_v1  ;;  %v5000_v6 = vld [vmem:[#allocation15 + $0xc30] sm:$0xff]  ;;  %v5023_v1 = vld [vmem:[#allocation15 + $0xce8] sm:$0xff]  ;;  %v5017_v2 = vld [vmem:[#allocation15 + $0xcb8] sm:$0xff] }
 0x830   :  { %13662 = vmatpush1.bf16.msra.mxu1 %v13661_v11  ;;  %13694 = vmatpush1.bf16.msra.mxu0 %v13693_v12  ;;  %v5066_v11 = vld [vmem:[#allocation15 + $0xe40] sm:$0xff]  ;;  %v13715_v12 = vpack.c.bf16 %v5067_v4, %v5059_v3  ;;  %v5025_v3 = vld [vmem:[#allocation15 + $0xcf8] sm:$0xff] }
 0x831   :  { %13664 = vmatprep.subr.bf16.mxu1 %v13663_v16  ;;  %13696 = vmatprep.subr.bf16.mxu0 %v13695_v14  ;;  %v5068_v16 = vld [vmem:[#allocation15 + $0xe50] sm:$0xff]  ;;  %v5075_v14 = vld [vmem:[#allocation15 + $0xe88] sm:$0xff]  ;;  %v13717_v35 = vpack.c.bf16 %v5066_v11, %v5058_v62  ;;  %v16652_v4 = vld [vmem:[#allocation2 + $0x6] sm:$0x3]  ;;  %v13799_v11 = vpack.c.bf16 %v5025_v3, %v5017_v2 }
 0x832   :  { %v13749_v18 = vpack.c.bf16 %v5068_v16, %v5060_v13  ;;  %v5031_v13 = vld [vmem:[#allocation15 + $0xd28] sm:$0xff] }
 0x833   :  { %v5039_v16 = vld [vmem:[#allocation15 + $0xd68] sm:$0xff] }
 0x834   :  { %13666 = vmatpush1.bf16.msra.mxu1 %v13665_v31  ;;  %13698 = vmatpush1.bf16.msra.mxu0 %v13697_v20  ;;  %v5082_v31 = vld [vmem:[#allocation15 + $0xec0] sm:$0xff]  ;;  %v13719_v20 = vpack.c.bf16 %v5083_v15, %v5075_v14  ;;  %v5033_v14 = vld [vmem:[#allocation15 + $0xd38] sm:$0xff] }
 0x835   :  { %13700 = vmatprep.subr.bf16.mxu1 %v13699_v23  ;;  %13732 = vmatprep.subr.bf16.mxu0 %v13731_v24  ;;  %v5084_v23 = vld [vmem:[#allocation15 + $0xed0] sm:$0xff]  ;;  %v5091_v24 = vld [vmem:[#allocation15 + $0xf08] sm:$0xff]  ;;  %v13721_v32 = vpack.c.bf16 %v5082_v31, %v5074_v19  ;;  %v5041_v15 = vld [vmem:[#allocation15 + $0xd78] sm:$0xff]  ;;  %v13771_v19 = vpack.c.bf16 %v5039_v16, %v5031_v13 }
 0x836   :  { %v13753_v33 = vpack.c.bf16 %v5084_v23, %v5076_v22  ;;  %v13803_v31 = vpack.c.bf16 %v5041_v15, %v5033_v14  ;;  %v5047_v22 = vld [vmem:[#allocation15 + $0xda8] sm:$0xff]  ;;  %v5113_v13 = vld [vmem:[#allocation15 + $0xfb8] sm:$0xff] }
 0x837   :  { %4907 = vmatmul.mubr.f32.vlgmr.msra.gmra.mrb[22].mxu1 %v16642_v63  ;;  %4978 = vmatmul.mubr.f32.vlgmr.msra.gmra.mrb[66].mxu0 %v16642_v63  ;;  %v13709_v63 = vpack.c.bf16 %v5034_v52, %v5026_v26  ;;  %v13759_v26 = vpack.c.bf16 %v5117_v46, %v5109_v45  ;;  %v5108_v52 = vld [vmem:[#allocation15 + $0xf90] sm:$0xff]  ;;  %v5055_v23 = vld [vmem:[#allocation15 + $0xde8] sm:$0xff]  ;;  %v5121_v16 = vld [vmem:[#allocation15 + $0xff8] sm:$0xff] }
 0x838   :  { %13702 = vmatpush1.bf16.msra.mxu1 %v13701_v36  ;;  %13734 = vmatpush1.bf16.msra.mxu0 %v13733_v37  ;;  %v5098_v36 = vld [vmem:[#allocation15 + $0xf40] sm:$0xff]  ;;  %v13723_v37 = vpack.c.bf16 %v5099_v28, %v5091_v24  ;;  %v5049_v24 = vld [vmem:[#allocation15 + $0xdb8] sm:$0xff] }
 0x839   :  { %13704 = vmatprep.subr.bf16.mxu1 %v13703_v40  ;;  %13736 = vmatprep.subr.bf16.mxu0 %v13735_v42  ;;  %v5100_v40 = vld [vmem:[#allocation15 + $0xf50] sm:$0xff]  ;;  %v5107_v42 = vld [vmem:[#allocation15 + $0xf88] sm:$0xff]  ;;  %v13725_v47 = vpack.c.bf16 %v5098_v36, %v5090_v34  ;;  %v5057_v28 = vld [vmem:[#allocation15 + $0xdf8] sm:$0xff]  ;;  %v13775_v34 = vpack.c.bf16 %v5055_v23, %v5047_v22 }
 0x83a   :  { %5186 = vmatprep.mubr.f32.mxu1 %v15872_v41  ;;  %5257 = vmatprep.mubr.f32.mxu0 %v15872_v41  ;;  %v13757_v48 = vpack.c.bf16 %v5100_v40, %v5092_v39  ;;  %v13807_v36 = vpack.c.bf16 %v5057_v28, %v5049_v24  ;;  %v5063_v39 = vld [vmem:[#allocation15 + $0xe28] sm:$0xff]  ;;  %v5419_v22 = vld [vmem:[#allocation15 + $0x1018] sm:$0xff] }
 0x83b   :  { %v5071_v40 = vld [vmem:[#allocation15 + $0xe68] sm:$0xff]  ;;  %v5427_v23 = vld [vmem:[#allocation15 + $0x1058] sm:$0xff] }
 0x83c   :  { %13706 = vmatpush1.bf16.msra.mxu1 %v13705_v50  ;;  %13738 = vmatpush1.bf16.msra.mxu0 %v13737_v51  ;;  %v5114_v50 = vld [vmem:[#allocation15 + $0xfc0] sm:$0xff]  ;;  %v13727_v51 = vpack.c.bf16 %v5115_v43, %v5107_v42  ;;  %v5065_v42 = vld [vmem:[#allocation15 + $0xe38] sm:$0xff] }
 0x83d   :  { %13708 = vmatprep.subr.bf16.mxu1 %v13707_v54  ;;  %13740 = vmatprep.subr.bf16.mxu0 %v13739_v55  ;;  %v5116_v54 = vld [vmem:[#allocation15 + $0xfd0] sm:$0xff]  ;;  %v4999_v55 = vld [vmem:[#allocation15 + $0xc28] sm:$0xff]  ;;  %v13729_v57 = vpack.c.bf16 %v5114_v50, %v5106_v49  ;;  %v5073_v43 = vld [vmem:[#allocation15 + $0xe78] sm:$0xff]  ;;  %v13779_v49 = vpack.c.bf16 %v5071_v40, %v5063_v39 }
 0x83e   :  { %v13761_v58 = vpack.c.bf16 %v5116_v54, %v5108_v52  ;;  %v13811_v50 = vpack.c.bf16 %v5073_v43, %v5065_v42  ;;  %v5079_v52 = vld [vmem:[#allocation15 + $0xea8] sm:$0xff]  ;;  %v5435_v39 = vld [vmem:[#allocation15 + $0x1098] sm:$0xff] }
 0x83f   :  { %v5087_v54 = vld [vmem:[#allocation15 + $0xee8] sm:$0xff]  ;;  %v5443_v40 = vld [vmem:[#allocation15 + $0x10d8] sm:$0xff] }
 0x840   :  { %13710 = vmatpush1.bf16.msra.mxu1 %v13709_v63  ;;  %13742 = vmatpush1.bf16.msra.mxu0 %v13741_v59  ;;  %v5006_v63 = vld [vmem:[#allocation15 + $0xc60] sm:$0xff]  ;;  %v13763_v59 = vpack.c.bf16 %v5007_v8, %v4999_v55  ;;  %v5081_v55 = vld [vmem:[#allocation15 + $0xeb8] sm:$0xff] }
 0x841   :  { %13712 = vmatprep.subr.bf16.mxu1 %v13711_v61  ;;  %13744 = vmatprep.subr.bf16.mxu0 %v13743_v0  ;;  %v5008_v61 = vld [vmem:[#allocation15 + $0xc70] sm:$0xff]  ;;  %v5015_v0 = vld [vmem:[#allocation15 + $0xca8] sm:$0xff]  ;;  %v13765_v9 = vpack.c.bf16 %v5006_v63, %v4998_v27  ;;  %v5089_v8 = vld [vmem:[#allocation15 + $0xef8] sm:$0xff]  ;;  %v13783_v27 = vpack.c.bf16 %v5087_v54, %v5079_v52 }
 0x842   :  { %v13797_v10 = vpack.c.bf16 %v5008_v61, %v5000_v6  ;;  %v13767_v62 = vpack.c.bf16 %v5023_v1, %v5015_v0  ;;  %v13815_v63 = vpack.c.bf16 %v5089_v8, %v5081_v55  ;;  %v5095_v6 = vld [vmem:[#allocation15 + $0xf28] sm:$0xff]  ;;  %v5097_v0 = vld [vmem:[#allocation15 + $0xf38] sm:$0xff] }
 0x843   :  { %v5103_v61 = vld [vmem:[#allocation15 + $0xf68] sm:$0xff]  ;;  %v5105_v1 = vld [vmem:[#allocation15 + $0xf78] sm:$0xff] }
 0x844   :  { %13714 = vmatpush1.bf16.msra.mxu1 %v13713_v44  ;;  %13746 = vmatpush1.bf16.msra.mxu0 %v13745_v53  ;;  %v5014_v44 = vld [vmem:[#allocation15 + $0xca0] sm:$0xff]  ;;  %v5451_v52 = vld [vmem:[#allocation15 + $0x1118] sm:$0xff] }
 0x845   :  { %13716 = vmatprep.subr.bf16.mxu1 %v13715_v12  ;;  %13748 = vmatprep.subr.bf16.mxu0 %v13747_v7  ;;  %v5022_v53 = vld [vmem:[#allocation15 + $0xce0] sm:$0xff]  ;;  %v5016_v12 = vld [vmem:[#allocation15 + $0xcb0] sm:$0xff]  ;;  %v5459_v54 = vld [vmem:[#allocation15 + $0x1158] sm:$0xff] }
 0x846   :  { %v5024_v7 = vld [vmem:[#allocation15 + $0xcf0] sm:$0xff]  ;;  %v13769_v25 = vpack.c.bf16 %v5022_v53, %v5014_v44  ;;  %v13787_v44 = vpack.c.bf16 %v5103_v61, %v5095_v6  ;;  %v13819_v53 = vpack.c.bf16 %v5105_v1, %v5097_v0  ;;  %v5467_v6 = vld [vmem:[#allocation15 + $0x1198] sm:$0xff]  ;;  %v5464_v1 = vld [vmem:[#allocation15 + $0x1180] sm:$0xff] }
 0x847   :  { %v13801_v17 = vpack.c.bf16 %v5024_v7, %v5016_v12  ;;  %v5111_v12 = vld [vmem:[#allocation15 + $0xfa8] sm:$0xff]  ;;  %v5475_v61 = vld [vmem:[#allocation15 + $0x11d8] sm:$0xff] }
 0x848   :  { %13718 = vmatpush1.bf16.msra.mxu1 %v13717_v35  ;;  %13750 = vmatpush1.bf16.msra.mxu0 %v13749_v18  ;;  %v5030_v35 = vld [vmem:[#allocation15 + $0xd20] sm:$0xff]  ;;  %v5119_v7 = vld [vmem:[#allocation15 + $0xfe8] sm:$0xff] }
 0x849   :  { %13720 = vmatprep.subr.bf16.mxu1 %v13719_v20  ;;  %13752 = vmatprep.subr.bf16.mxu0 %v13751_v21  ;;  %v5038_v18 = vld [vmem:[#allocation15 + $0xd60] sm:$0xff]  ;;  %v5032_v20 = vld [vmem:[#allocation15 + $0xd30] sm:$0xff] }
 0x84a   :  { %v5040_v21 = vld [vmem:[#allocation15 + $0xd70] sm:$0xff]  ;;  %v13773_v29 = vpack.c.bf16 %v5038_v18, %v5030_v35  ;;  %v13791_v35 = vpack.c.bf16 %v5119_v7, %v5111_v12  ;;  %v13823_v18 = vpack.c.bf16 %v5121_v16, %v5113_v13  ;;  %v5491_v12 = vld [vmem:[#allocation15 + $0x1258] sm:$0xff]  ;;  %v5480_v16 = vld [vmem:[#allocation15 + $0x1200] sm:$0xff] }
 0x84b   :  { %v13805_v30 = vpack.c.bf16 %v5040_v21, %v5032_v20  ;;  %v5417_v20 = vld [vmem:[#allocation15 + $0x1008] sm:$0xff] }
 0x84c   :  { %13722 = vmatpush1.bf16.msra.mxu1 %v13721_v32  ;;  %13754 = vmatpush1.bf16.msra.mxu0 %v13753_v33  ;;  %v5046_v32 = vld [vmem:[#allocation15 + $0xda0] sm:$0xff]  ;;  %v5425_v21 = vld [vmem:[#allocation15 + $0x1048] sm:$0xff] }
 0x84d   :  { %13724 = vmatprep.subr.bf16.mxu1 %v13723_v37  ;;  %13756 = vmatprep.subr.bf16.mxu0 %v13755_v38  ;;  %v5054_v33 = vld [vmem:[#allocation15 + $0xde0] sm:$0xff]  ;;  %v5048_v37 = vld [vmem:[#allocation15 + $0xdb0] sm:$0xff] }
 0x84e   :  { %v5056_v38 = vld [vmem:[#allocation15 + $0xdf0] sm:$0xff]  ;;  %v13777_v45 = vpack.c.bf16 %v5054_v33, %v5046_v32  ;;  %v13827_v32 = vpack.c.bf16 %v5425_v21, %v5417_v20  ;;  %v13859_v33 = vpack.c.bf16 %v5427_v23, %v5419_v22  ;;  %v5507_v20 = vld [vmem:[#allocation15 + $0x12d8] sm:$0xff]  ;;  %v5496_v23 = vld [vmem:[#allocation15 + $0x1280] sm:$0xff] }
 0x84f   :  { %v13809_v46 = vpack.c.bf16 %v5056_v38, %v5048_v37  ;;  %v5433_v37 = vld [vmem:[#allocation15 + $0x1088] sm:$0xff] }
 0x850   :  { %13726 = vmatpush1.bf16.msra.mxu1 %v13725_v47  ;;  %13758 = vmatpush1.bf16.msra.mxu0 %v13757_v48  ;;  %v5062_v47 = vld [vmem:[#allocation15 + $0xe20] sm:$0xff]  ;;  %v5441_v38 = vld [vmem:[#allocation15 + $0x10c8] sm:$0xff] }
 0x851   :  { %13728 = vmatprep.subr.bf16.mxu1 %v13727_v51  ;;  %13760 = vmatprep.subr.bf16.mxu0 %v13759_v26  ;;  %v5070_v48 = vld [vmem:[#allocation15 + $0xe60] sm:$0xff]  ;;  %v5064_v51 = vld [vmem:[#allocation15 + $0xe30] sm:$0xff] }
 0x852   :  { %v5072_v26 = vld [vmem:[#allocation15 + $0xe70] sm:$0xff]  ;;  %v13781_v5 = vpack.c.bf16 %v5070_v48, %v5062_v47  ;;  %v13831_v47 = vpack.c.bf16 %v5441_v38, %v5433_v37  ;;  %v13863_v48 = vpack.c.bf16 %v5443_v40, %v5435_v39  ;;  %v5523_v37 = vld [vmem:[#allocation15 + $0x1358] sm:$0xff]  ;;  %v5512_v40 = vld [vmem:[#allocation15 + $0x1300] sm:$0xff] }
 0x853   :  { %v13813_v56 = vpack.c.bf16 %v5072_v26, %v5064_v51  ;;  %v5449_v51 = vld [vmem:[#allocation15 + $0x1108] sm:$0xff] }
 0x854   :  { %13730 = vmatpush1.bf16.msra.mxu1 %v13729_v57  ;;  %13762 = vmatpush1.bf16.msra.mxu0 %v13761_v58  ;;  %v5078_v57 = vld [vmem:[#allocation15 + $0xea0] sm:$0xff]  ;;  %v5457_v26 = vld [vmem:[#allocation15 + $0x1148] sm:$0xff] }
 0x855   :  { %13764 = vmatprep.subr.bf16.mxu1 %v13763_v59  ;;  %13796 = vmatprep.subr.bf16.mxu0 %v13795_v60  ;;  %v5086_v58 = vld [vmem:[#allocation15 + $0xee0] sm:$0xff]  ;;  %v5080_v59 = vld [vmem:[#allocation15 + $0xeb0] sm:$0xff] }
 0x856   :  { %v5088_v60 = vld [vmem:[#allocation15 + $0xef0] sm:$0xff]  ;;  %v13785_v2 = vpack.c.bf16 %v5086_v58, %v5078_v57  ;;  %v13835_v57 = vpack.c.bf16 %v5457_v26, %v5449_v51  ;;  %v13867_v58 = vpack.c.bf16 %v5459_v54, %v5451_v52  ;;  %v5539_v51 = vld [vmem:[#allocation15 + $0x13d8] sm:$0xff]  ;;  %v5528_v54 = vld [vmem:[#allocation15 + $0x1380] sm:$0xff] }
 0x857   :  { %5187 = vmatmul.mubr.f32.vlgmr.msra.gmra.mrb[20].mxu1 %v16652_v4  ;;  %5258 = vmatmul.mubr.f32.vlgmr.msra.gmra.mrb[64].mxu0 %v16652_v4  ;;  %v13817_v3 = vpack.c.bf16 %v5088_v60, %v5080_v59  ;;  %v5465_v59 = vld [vmem:[#allocation15 + $0x1188] sm:$0xff] }
 0x858   :  { %13766 = vmatpush1.bf16.msra.mxu1 %v13765_v9  ;;  %13798 = vmatpush1.bf16.msra.mxu0 %v13797_v10  ;;  %v5094_v9 = vld [vmem:[#allocation15 + $0xf20] sm:$0xff]  ;;  %v5473_v60 = vld [vmem:[#allocation15 + $0x11c8] sm:$0xff] }
 0x859   :  { %13768 = vmatprep.subr.bf16.mxu1 %v13767_v62  ;;  %13800 = vmatprep.subr.bf16.mxu0 %v13799_v11  ;;  %v5102_v10 = vld [vmem:[#allocation15 + $0xf60] sm:$0xff]  ;;  %v5096_v62 = vld [vmem:[#allocation15 + $0xf30] sm:$0xff] }
 0x85a   :  { %5328 = vmatprep.mubr.f32.mxu1 %v15872_v41  ;;  %5399 = vmatprep.mubr.f32.mxu0 %v15872_v41  ;;  %v5104_v11 = vld [vmem:[#allocation15 + $0xf70] sm:$0xff]  ;;  %v13789_v14 = vpack.c.bf16 %v5102_v10, %v5094_v9  ;;  %v13871_v9 = vpack.c.bf16 %v5475_v61, %v5467_v6  ;;  %v5420_v61 = vld [vmem:[#allocation15 + $0x1020] sm:$0xff] }
 0x85b   :  { %v13821_v15 = vpack.c.bf16 %v5104_v11, %v5096_v62  ;;  %v5466_v10 = vld [vmem:[#allocation15 + $0x1190] sm:$0xff]  ;;  %v5489_v62 = vld [vmem:[#allocation15 + $0x1248] sm:$0xff]  ;;  %v5483_v11 = vld [vmem:[#allocation15 + $0x1218] sm:$0xff] }
 0x85c   :  { %13770 = vmatpush1.bf16.msra.mxu1 %v13769_v25  ;;  %13802 = vmatpush1.bf16.msra.mxu0 %v13801_v17  ;;  %v5110_v25 = vld [vmem:[#allocation15 + $0xfa0] sm:$0xff] }
 0x85d   :  { %13772 = vmatprep.subr.bf16.mxu1 %v13771_v19  ;;  %13804 = vmatprep.subr.bf16.mxu0 %v13803_v31  ;;  %v5118_v17 = vld [vmem:[#allocation15 + $0xfe0] sm:$0xff]  ;;  %v5112_v19 = vld [vmem:[#allocation15 + $0xfb0] sm:$0xff] }
 0x85e   :  { %v5120_v31 = vld [vmem:[#allocation15 + $0xff0] sm:$0xff]  ;;  %v13793_v24 = vpack.c.bf16 %v5118_v17, %v5110_v25  ;;  %v13875_v25 = vpack.c.bf16 %v5491_v12, %v5483_v11 }
 0x85f   :  { %v13825_v28 = vpack.c.bf16 %v5120_v31, %v5112_v19  ;;  %v5482_v17 = vld [vmem:[#allocation15 + $0x1210] sm:$0xff]  ;;  %v5505_v19 = vld [vmem:[#allocation15 + $0x12c8] sm:$0xff]  ;;  %v5499_v31 = vld [vmem:[#allocation15 + $0x1298] sm:$0xff] }
 0x860   :  { %13774 = vmatpush1.bf16.msra.mxu1 %v13773_v29  ;;  %13806 = vmatpush1.bf16.msra.mxu0 %v13805_v30  ;;  %v5416_v29 = vld [vmem:[#allocation15 + $0x1000] sm:$0xff] }
 0x861   :  { %13776 = vmatprep.subr.bf16.mxu1 %v13775_v34  ;;  %13808 = vmatprep.subr.bf16.mxu0 %v13807_v36  ;;  %v5424_v30 = vld [vmem:[#allocation15 + $0x1040] sm:$0xff]  ;;  %v5418_v34 = vld [vmem:[#allocation15 + $0x1010] sm:$0xff] }
 0x862   :  { %v5426_v36 = vld [vmem:[#allocation15 + $0x1050] sm:$0xff]  ;;  %v13829_v42 = vpack.c.bf16 %v5424_v30, %v5416_v29  ;;  %v13879_v29 = vpack.c.bf16 %v5507_v20, %v5499_v31 }
 0x863   :  { %v13861_v43 = vpack.c.bf16 %v5426_v36, %v5418_v34  ;;  %v5498_v30 = vld [vmem:[#allocation15 + $0x1290] sm:$0xff]  ;;  %v5521_v34 = vld [vmem:[#allocation15 + $0x1348] sm:$0xff]  ;;  %v5515_v36 = vld [vmem:[#allocation15 + $0x1318] sm:$0xff] }
 0x864   :  { %13778 = vmatpush1.bf16.msra.mxu1 %v13777_v45  ;;  %13810 = vmatpush1.bf16.msra.mxu0 %v13809_v46  ;;  %v5432_v45 = vld [vmem:[#allocation15 + $0x1080] sm:$0xff] }
 0x865   :  { %13780 = vmatprep.subr.bf16.mxu1 %v13779_v49  ;;  %13812 = vmatprep.subr.bf16.mxu0 %v13811_v50  ;;  %v5440_v46 = vld [vmem:[#allocation15 + $0x10c0] sm:$0xff]  ;;  %v5434_v49 = vld [vmem:[#allocation15 + $0x1090] sm:$0xff] }
 0x866   :  { %v5442_v50 = vld [vmem:[#allocation15 + $0x10d0] sm:$0xff]  ;;  %v13833_v55 = vpack.c.bf16 %v5440_v46, %v5432_v45  ;;  %v13883_v45 = vpack.c.bf16 %v5523_v37, %v5515_v36 }
 0x867   :  { %v13865_v8 = vpack.c.bf16 %v5442_v50, %v5434_v49  ;;  %v5514_v46 = vld [vmem:[#allocation15 + $0x1310] sm:$0xff]  ;;  %v5537_v49 = vld [vmem:[#allocation15 + $0x13c8] sm:$0xff]  ;;  %v5531_v50 = vld [vmem:[#allocation15 + $0x1398] sm:$0xff] }
 0x868   :  { %13782 = vmatpush1.bf16.msra.mxu1 %v13781_v5  ;;  %13814 = vmatpush1.bf16.msra.mxu0 %v13813_v56  ;;  %v5448_v5 = vld [vmem:[#allocation15 + $0x1100] sm:$0xff] }
 0x869   :  { %13784 = vmatprep.subr.bf16.mxu1 %v13783_v27  ;;  %13816 = vmatprep.subr.bf16.mxu0 %v13815_v63  ;;  %v5456_v56 = vld [vmem:[#allocation15 + $0x1140] sm:$0xff]  ;;  %v5450_v27 = vld [vmem:[#allocation15 + $0x1110] sm:$0xff] }
 0x86a   :  { %v5458_v63 = vld [vmem:[#allocation15 + $0x1150] sm:$0xff] }
 0x86b   :  { %v13869_v0 = vpack.c.bf16 %v5458_v63, %v5450_v27  ;;  %v5429_v27 = vld [vmem:[#allocation15 + $0x1068] sm:$0xff]  ;;  %v5423_v63 = vld [vmem:[#allocation15 + $0x1038] sm:$0xff] }
 0x86c   :  { %13786 = vmatpush1.bf16.msra.mxu1 %v13785_v2  ;;  %13818 = vmatpush1.bf16.msra.mxu0 %v13817_v3  ;;  %v5472_v2 = vld [vmem:[#allocation15 + $0x11c0] sm:$0xff]  ;;  %v13839_v3 = vpack.c.bf16 %v5473_v60, %v5465_v59  ;;  %v5431_v59 = vld [vmem:[#allocation15 + $0x1078] sm:$0xff] }
 0x86d   :  { %13788 = vmatprep.subr.bf16.mxu1 %v13787_v44  ;;  %13820 = vmatprep.subr.bf16.mxu0 %v13819_v53  ;;  %v5474_v44 = vld [vmem:[#allocation15 + $0x11d0] sm:$0xff]  ;;  %v5481_v53 = vld [vmem:[#allocation15 + $0x1208] sm:$0xff]  ;;  %v13841_v7 = vpack.c.bf16 %v5472_v2, %v5464_v1  ;;  %v13923_v1 = vpack.c.bf16 %v5431_v59, %v5423_v63 }
 0x86e   :  { %v13873_v13 = vpack.c.bf16 %v5474_v44, %v5466_v10  ;;  %v5422_v2 = vld [vmem:[#allocation15 + $0x1030] sm:$0xff]  ;;  %v5445_v10 = vld [vmem:[#allocation15 + $0x10e8] sm:$0xff]  ;;  %v5439_v44 = vld [vmem:[#allocation15 + $0x10b8] sm:$0xff] }
 0x870   :  { %13790 = vmatpush1.bf16.msra.mxu1 %v13789_v14  ;;  %13822 = vmatpush1.bf16.msra.mxu0 %v13821_v15  ;;  %v5488_v14 = vld [vmem:[#allocation15 + $0x1240] sm:$0xff]  ;;  %v13843_v15 = vpack.c.bf16 %v5489_v62, %v5481_v53  ;;  %v5447_v53 = vld [vmem:[#allocation15 + $0x10f8] sm:$0xff] }
 0x871   :  { %13792 = vmatprep.subr.bf16.mxu1 %v13791_v35  ;;  %13824 = vmatprep.subr.bf16.mxu0 %v13823_v18  ;;  %v5490_v35 = vld [vmem:[#allocation15 + $0x1250] sm:$0xff]  ;;  %v5497_v18 = vld [vmem:[#allocation15 + $0x1288] sm:$0xff]  ;;  %v13845_v21 = vpack.c.bf16 %v5488_v14, %v5480_v16  ;;  %v16662_v62 = vld [vmem:[#allocation2 + $0x8] sm:$0x3]  ;;  %v13927_v14 = vpack.c.bf16 %v5447_v53, %v5439_v44 }
 0x872   :  { %v13877_v22 = vpack.c.bf16 %v5490_v35, %v5482_v17  ;;  %v5453_v17 = vld [vmem:[#allocation15 + $0x1128] sm:$0xff] }
 0x873   :  { %v5461_v35 = vld [vmem:[#allocation15 + $0x1168] sm:$0xff] }
 0x874   :  { %13794 = vmatpush1.bf16.msra.mxu1 %v13793_v24  ;;  %13826 = vmatpush1.bf16.msra.mxu0 %v13825_v28  ;;  %v5504_v24 = vld [vmem:[#allocation15 + $0x12c0] sm:$0xff]  ;;  %v13847_v28 = vpack.c.bf16 %v5505_v19, %v5497_v18  ;;  %v5455_v18 = vld [vmem:[#allocation15 + $0x1138] sm:$0xff] }
 0x875   :  { %13828 = vmatprep.subr.bf16.mxu1 %v13827_v32  ;;  %13860 = vmatprep.subr.bf16.mxu0 %v13859_v33  ;;  %v5506_v32 = vld [vmem:[#allocation15 + $0x12d0] sm:$0xff]  ;;  %v5513_v33 = vld [vmem:[#allocation15 + $0x1308] sm:$0xff]  ;;  %v13849_v38 = vpack.c.bf16 %v5504_v24, %v5496_v23  ;;  %v5463_v19 = vld [vmem:[#allocation15 + $0x1178] sm:$0xff]  ;;  %v13899_v23 = vpack.c.bf16 %v5461_v35, %v5453_v17 }
 0x876   :  { %v13881_v39 = vpack.c.bf16 %v5506_v32, %v5498_v30  ;;  %v13931_v24 = vpack.c.bf16 %v5463_v19, %v5455_v18  ;;  %v5469_v30 = vld [vmem:[#allocation15 + $0x11a8] sm:$0xff]  ;;  %v5535_v17 = vld [vmem:[#allocation15 + $0x13b8] sm:$0xff] }
 0x877   :  { %5329 = vmatmul.mubr.f32.vlgmr.msra.gmra.mrb[22].mxu1 %v16652_v4  ;;  %5400 = vmatmul.mubr.f32.vlgmr.msra.gmra.mrb[66].mxu0 %v16652_v4  ;;  %v13837_v4 = vpack.c.bf16 %v5456_v56, %v5448_v5  ;;  %v13887_v5 = vpack.c.bf16 %v5539_v51, %v5531_v50  ;;  %v5530_v56 = vld [vmem:[#allocation15 + $0x1390] sm:$0xff]  ;;  %v5477_v32 = vld [vmem:[#allocation15 + $0x11e8] sm:$0xff]  ;;  %v5543_v35 = vld [vmem:[#allocation15 + $0x13f8] sm:$0xff] }
 0x878   :  { %13830 = vmatpush1.bf16.msra.mxu1 %v13829_v42  ;;  %13862 = vmatpush1.bf16.msra.mxu0 %v13861_v43  ;;  %v5520_v42 = vld [vmem:[#allocation15 + $0x1340] sm:$0xff]  ;;  %v13851_v43 = vpack.c.bf16 %v5521_v34, %v5513_v33  ;;  %v5471_v33 = vld [vmem:[#allocation15 + $0x11b8] sm:$0xff] }
 0x879   :  { %13832 = vmatprep.subr.bf16.mxu1 %v13831_v47  ;;  %13864 = vmatprep.subr.bf16.mxu0 %v13863_v48  ;;  %v5522_v47 = vld [vmem:[#allocation15 + $0x1350] sm:$0xff]  ;;  %v5529_v48 = vld [vmem:[#allocation15 + $0x1388] sm:$0xff]  ;;  %v13853_v26 = vpack.c.bf16 %v5520_v42, %v5512_v40  ;;  %v5479_v34 = vld [vmem:[#allocation15 + $0x11f8] sm:$0xff]  ;;  %v13903_v40 = vpack.c.bf16 %v5477_v32, %v5469_v30 }
 0x87a   :  { %5608 = vmatprep.mubr.f32.mxu1 %v15872_v41  ;;  %5679 = vmatprep.mubr.f32.mxu0 %v15872_v41  ;;  %v13885_v52 = vpack.c.bf16 %v5522_v47, %v5514_v46  ;;  %v13935_v42 = vpack.c.bf16 %v5479_v34, %v5471_v33  ;;  %v5485_v46 = vld [vmem:[#allocation15 + $0x1228] sm:$0xff]  ;;  %v5841_v30 = vld [vmem:[#allocation15 + $0x1418] sm:$0xff] }
 0x87b   :  { %v5493_v47 = vld [vmem:[#allocation15 + $0x1268] sm:$0xff]  ;;  %v5849_v32 = vld [vmem:[#allocation15 + $0x1458] sm:$0xff] }
 0x87c   :  { %13834 = vmatpush1.bf16.msra.mxu1 %v13833_v55  ;;  %13866 = vmatpush1.bf16.msra.mxu0 %v13865_v8  ;;  %v5536_v55 = vld [vmem:[#allocation15 + $0x13c0] sm:$0xff]  ;;  %v13855_v8 = vpack.c.bf16 %v5537_v49, %v5529_v48  ;;  %v5487_v48 = vld [vmem:[#allocation15 + $0x1238] sm:$0xff] }
 0x87d   :  { %13836 = vmatprep.subr.bf16.mxu1 %v13835_v57  ;;  %13868 = vmatprep.subr.bf16.mxu0 %v13867_v58  ;;  %v5538_v57 = vld [vmem:[#allocation15 + $0x13d0] sm:$0xff]  ;;  %v5421_v58 = vld [vmem:[#allocation15 + $0x1028] sm:$0xff]  ;;  %v13857_v60 = vpack.c.bf16 %v5536_v55, %v5528_v54  ;;  %v5495_v49 = vld [vmem:[#allocation15 + $0x1278] sm:$0xff]  ;;  %v13907_v54 = vpack.c.bf16 %v5493_v47, %v5485_v46 }
 0x87e   :  { %v13889_v6 = vpack.c.bf16 %v5538_v57, %v5530_v56  ;;  %v13939_v55 = vpack.c.bf16 %v5495_v49, %v5487_v48  ;;  %v5501_v56 = vld [vmem:[#allocation15 + $0x12a8] sm:$0xff]  ;;  %v5857_v46 = vld [vmem:[#allocation15 + $0x1498] sm:$0xff] }
 0x87f   :  { %v5509_v57 = vld [vmem:[#allocation15 + $0x12e8] sm:$0xff]  ;;  %v5865_v47 = vld [vmem:[#allocation15 + $0x14d8] sm:$0xff] }
 0x880   :  { %13838 = vmatpush1.bf16.msra.mxu1 %v13837_v4  ;;  %13870 = vmatpush1.bf16.msra.mxu0 %v13869_v0  ;;  %v5428_v4 = vld [vmem:[#allocation15 + $0x1060] sm:$0xff]  ;;  %v13891_v0 = vpack.c.bf16 %v5429_v27, %v5421_v58  ;;  %v5503_v58 = vld [vmem:[#allocation15 + $0x12b8] sm:$0xff] }
 0x881   :  { %13840 = vmatprep.subr.bf16.mxu1 %v13839_v3  ;;  %13872 = vmatprep.subr.bf16.mxu0 %v13871_v9  ;;  %v5430_v3 = vld [vmem:[#allocation15 + $0x1070] sm:$0xff]  ;;  %v5437_v9 = vld [vmem:[#allocation15 + $0x10a8] sm:$0xff]  ;;  %v13893_v11 = vpack.c.bf16 %v5428_v4, %v5420_v61  ;;  %v5511_v27 = vld [vmem:[#allocation15 + $0x12f8] sm:$0xff]  ;;  %v13911_v61 = vpack.c.bf16 %v5509_v57, %v5501_v56 }
 0x882   :  { %v13925_v12 = vpack.c.bf16 %v5430_v3, %v5422_v2  ;;  %v13895_v16 = vpack.c.bf16 %v5445_v10, %v5437_v9  ;;  %v13943_v4 = vpack.c.bf16 %v5511_v27, %v5503_v58  ;;  %v5517_v2 = vld [vmem:[#allocation15 + $0x1328] sm:$0xff]  ;;  %v5519_v9 = vld [vmem:[#allocation15 + $0x1338] sm:$0xff] }
 0x883   :  { %v5525_v3 = vld [vmem:[#allocation15 + $0x1368] sm:$0xff]  ;;  %v5527_v10 = vld [vmem:[#allocation15 + $0x1378] sm:$0xff] }
 0x884   :  { %13842 = vmatpush1.bf16.msra.mxu1 %v13841_v7  ;;  %13874 = vmatpush1.bf16.msra.mxu0 %v13873_v13  ;;  %v5436_v7 = vld [vmem:[#allocation15 + $0x10a0] sm:$0xff]  ;;  %v5873_v56 = vld [vmem:[#allocation15 + $0x1518] sm:$0xff] }
 0x885   :  { %13844 = vmatprep.subr.bf16.mxu1 %v13843_v15  ;;  %13876 = vmatprep.subr.bf16.mxu0 %v13875_v25  ;;  %v5444_v13 = vld [vmem:[#allocation15 + $0x10e0] sm:$0xff]  ;;  %v5438_v15 = vld [vmem:[#allocation15 + $0x10b0] sm:$0xff]  ;;  %v5881_v57 = vld [vmem:[#allocation15 + $0x1558] sm:$0xff] }
 0x886   :  { %v5446_v25 = vld [vmem:[#allocation15 + $0x10f0] sm:$0xff]  ;;  %v13897_v31 = vpack.c.bf16 %v5444_v13, %v5436_v7  ;;  %v13915_v7 = vpack.c.bf16 %v5525_v3, %v5517_v2  ;;  %v13947_v13 = vpack.c.bf16 %v5527_v10, %v5519_v9  ;;  %v5889_v2 = vld [vmem:[#allocation15 + $0x1598] sm:$0xff]  ;;  %v5886_v10 = vld [vmem:[#allocation15 + $0x1580] sm:$0xff] }
 0x887   :  { %v13929_v20 = vpack.c.bf16 %v5446_v25, %v5438_v15  ;;  %v5533_v15 = vld [vmem:[#allocation15 + $0x13a8] sm:$0xff]  ;;  %v5897_v3 = vld [vmem:[#allocation15 + $0x15d8] sm:$0xff] }
 0x888   :  { %13846 = vmatpush1.bf16.msra.mxu1 %v13845_v21  ;;  %13878 = vmatpush1.bf16.msra.mxu0 %v13877_v22  ;;  %v5452_v21 = vld [vmem:[#allocation15 + $0x1120] sm:$0xff]  ;;  %v5541_v25 = vld [vmem:[#allocation15 + $0x13e8] sm:$0xff] }
 0x889   :  { %13848 = vmatprep.subr.bf16.mxu1 %v13847_v28  ;;  %13880 = vmatprep.subr.bf16.mxu0 %v13879_v29  ;;  %v5460_v22 = vld [vmem:[#allocation15 + $0x1160] sm:$0xff]  ;;  %v5454_v28 = vld [vmem:[#allocation15 + $0x1130] sm:$0xff] }
 0x88a   :  { %v5462_v29 = vld [vmem:[#allocation15 + $0x1170] sm:$0xff]  ;;  %v13901_v36 = vpack.c.bf16 %v5460_v22, %v5452_v21  ;;  %v13919_v21 = vpack.c.bf16 %v5541_v25, %v5533_v15  ;;  %v13951_v22 = vpack.c.bf16 %v5543_v35, %v5535_v17  ;;  %v5913_v15 = vld [vmem:[#allocation15 + $0x1658] sm:$0xff]  ;;  %v5902_v35 = vld [vmem:[#allocation15 + $0x1600] sm:$0xff] }
 0x88b   :  { %v13933_v37 = vpack.c.bf16 %v5462_v29, %v5454_v28  ;;  %v5839_v28 = vld [vmem:[#allocation15 + $0x1408] sm:$0xff] }
 0x88c   :  { %13850 = vmatpush1.bf16.msra.mxu1 %v13849_v38  ;;  %13882 = vmatpush1.bf16.msra.mxu0 %v13881_v39  ;;  %v5468_v38 = vld [vmem:[#allocation15 + $0x11a0] sm:$0xff]  ;;  %v5847_v29 = vld [vmem:[#allocation15 + $0x1448] sm:$0xff] }
 0x88d   :  { %13852 = vmatprep.subr.bf16.mxu1 %v13851_v43  ;;  %13884 = vmatprep.subr.bf16.mxu0 %v13883_v45  ;;  %v5476_v39 = vld [vmem:[#allocation15 + $0x11e0] sm:$0xff]  ;;  %v5470_v43 = vld [vmem:[#allocation15 + $0x11b0] sm:$0xff] }
 0x88e   :  { %v5478_v45 = vld [vmem:[#allocation15 + $0x11f0] sm:$0xff]  ;;  %v13905_v50 = vpack.c.bf16 %v5476_v39, %v5468_v38  ;;  %v13955_v38 = vpack.c.bf16 %v5847_v29, %v5839_v28  ;;  %v13987_v39 = vpack.c.bf16 %v5849_v32, %v5841_v30  ;;  %v5929_v28 = vld [vmem:[#allocation15 + $0x16d8] sm:$0xff]  ;;  %v5918_v32 = vld [vmem:[#allocation15 + $0x1680] sm:$0xff] }
 0x88f   :  { %v13937_v51 = vpack.c.bf16 %v5478_v45, %v5470_v43  ;;  %v5855_v43 = vld [vmem:[#allocation15 + $0x1488] sm:$0xff] }
 0x890   :  { %13854 = vmatpush1.bf16.msra.mxu1 %v13853_v26  ;;  %13886 = vmatpush1.bf16.msra.mxu0 %v13885_v52  ;;  %v5484_v26 = vld [vmem:[#allocation15 + $0x1220] sm:$0xff]  ;;  %v5863_v45 = vld [vmem:[#allocation15 + $0x14c8] sm:$0xff] }
 0x891   :  { %13856 = vmatprep.subr.bf16.mxu1 %v13855_v8  ;;  %13888 = vmatprep.subr.bf16.mxu0 %v13887_v5  ;;  %v5492_v52 = vld [vmem:[#allocation15 + $0x1260] sm:$0xff]  ;;  %v5486_v8 = vld [vmem:[#allocation15 + $0x1230] sm:$0xff] }
 0x892   :  { %v5494_v5 = vld [vmem:[#allocation15 + $0x1270] sm:$0xff]  ;;  %v13909_v63 = vpack.c.bf16 %v5492_v52, %v5484_v26  ;;  %v13959_v26 = vpack.c.bf16 %v5863_v45, %v5855_v43  ;;  %v13991_v52 = vpack.c.bf16 %v5865_v47, %v5857_v46  ;;  %v5945_v43 = vld [vmem:[#allocation15 + $0x1758] sm:$0xff]  ;;  %v5934_v47 = vld [vmem:[#allocation15 + $0x1700] sm:$0xff] }
 0x893   :  { %v13941_v59 = vpack.c.bf16 %v5494_v5, %v5486_v8  ;;  %v5871_v8 = vld [vmem:[#allocation15 + $0x1508] sm:$0xff] }
 0x894   :  { %13858 = vmatpush1.bf16.msra.mxu1 %v13857_v60  ;;  %13890 = vmatpush1.bf16.msra.mxu0 %v13889_v6  ;;  %v5500_v60 = vld [vmem:[#allocation15 + $0x12a0] sm:$0xff]  ;;  %v5879_v5 = vld [vmem:[#allocation15 + $0x1548] sm:$0xff] }
 0x895   :  { %13892 = vmatprep.subr.bf16.mxu1 %v13891_v0  ;;  %13924 = vmatprep.subr.bf16.mxu0 %v13923_v1  ;;  %v5508_v6 = vld [vmem:[#allocation15 + $0x12e0] sm:$0xff]  ;;  %v5502_v0 = vld [vmem:[#allocation15 + $0x12b0] sm:$0xff] }
 0x896   :  { %v5510_v1 = vld [vmem:[#allocation15 + $0x12f0] sm:$0xff]  ;;  %v13913_v44 = vpack.c.bf16 %v5508_v6, %v5500_v60  ;;  %v13963_v60 = vpack.c.bf16 %v5879_v5, %v5871_v8  ;;  %v13995_v6 = vpack.c.bf16 %v5881_v57, %v5873_v56  ;;  %v5961_v8 = vld [vmem:[#allocation15 + $0x17d8] sm:$0xff]  ;;  %v5950_v57 = vld [vmem:[#allocation15 + $0x1780] sm:$0xff] }
 0x897   :  { %5609 = vmatmul.mubr.f32.vlgmr.msra.gmra.mrb[20].mxu1 %v16662_v62  ;;  %5680 = vmatmul.mubr.f32.vlgmr.msra.gmra.mrb[64].mxu0 %v16662_v62  ;;  %v13945_v53 = vpack.c.bf16 %v5510_v1, %v5502_v0  ;;  %v5887_v0 = vld [vmem:[#allocation15 + $0x1588] sm:$0xff] }
 0x898   :  { %13894 = vmatpush1.bf16.msra.mxu1 %v13893_v11  ;;  %13926 = vmatpush1.bf16.msra.mxu0 %v13925_v12  ;;  %v5516_v11 = vld [vmem:[#allocation15 + $0x1320] sm:$0xff]  ;;  %v5895_v1 = vld [vmem:[#allocation15 + $0x15c8] sm:$0xff] }
 0x899   :  { %13896 = vmatprep.subr.bf16.mxu1 %v13895_v16  ;;  %13928 = vmatprep.subr.bf16.mxu0 %v13927_v14  ;;  %v5524_v12 = vld [vmem:[#allocation15 + $0x1360] sm:$0xff]  ;;  %v5518_v16 = vld [vmem:[#allocation15 + $0x1330] sm:$0xff] }
 0x89a   :  { %5750 = vmatprep.mubr.f32.mxu1 %v15872_v41  ;;  %5821 = vmatprep.mubr.f32.mxu0 %v15872_v41  ;;  %v5526_v14 = vld [vmem:[#allocation15 + $0x1370] sm:$0xff]  ;;  %v13917_v18 = vpack.c.bf16 %v5524_v12, %v5516_v11  ;;  %v13999_v11 = vpack.c.bf16 %v5897_v3, %v5889_v2  ;;  %v5842_v3 = vld [vmem:[#allocation15 + $0x1420] sm:$0xff] }
 0x89b   :  { %v13949_v19 = vpack.c.bf16 %v5526_v14, %v5518_v16  ;;  %v5888_v12 = vld [vmem:[#allocation15 + $0x1590] sm:$0xff]  ;;  %v5911_v16 = vld [vmem:[#allocation15 + $0x1648] sm:$0xff]  ;;  %v5905_v14 = vld [vmem:[#allocation15 + $0x1618] sm:$0xff] }
 0x89c   :  { %13898 = vmatpush1.bf16.msra.mxu1 %v13897_v31  ;;  %13930 = vmatpush1.bf16.msra.mxu0 %v13929_v20  ;;  %v5532_v31 = vld [vmem:[#allocation15 + $0x13a0] sm:$0xff] }
 0x89d   :  { %13900 = vmatprep.subr.bf16.mxu1 %v13899_v23  ;;  %13932 = vmatprep.subr.bf16.mxu0 %v13931_v24  ;;  %v5540_v20 = vld [vmem:[#allocation15 + $0x13e0] sm:$0xff]  ;;  %v5534_v23 = vld [vmem:[#allocation15 + $0x13b0] sm:$0xff] }
 0x89e   :  { %v5542_v24 = vld [vmem:[#allocation15 + $0x13f0] sm:$0xff]  ;;  %v13921_v33 = vpack.c.bf16 %v5540_v20, %v5532_v31  ;;  %v14003_v31 = vpack.c.bf16 %v5913_v15, %v5905_v14 }
 0x89f   :  { %v13953_v34 = vpack.c.bf16 %v5542_v24, %v5534_v23  ;;  %v5904_v20 = vld [vmem:[#allocation15 + $0x1610] sm:$0xff]  ;;  %v5927_v23 = vld [vmem:[#allocation15 + $0x16c8] sm:$0xff]  ;;  %v5921_v24 = vld [vmem:[#allocation15 + $0x1698] sm:$0xff] }
 0x8a0   :  { %13902 = vmatpush1.bf16.msra.mxu1 %v13901_v36  ;;  %13934 = vmatpush1.bf16.msra.mxu0 %v13933_v37  ;;  %v5838_v36 = vld [vmem:[#allocation15 + $0x1400] sm:$0xff] }
 0x8a1   :  { %13904 = vmatprep.subr.bf16.mxu1 %v13903_v40  ;;  %13936 = vmatprep.subr.bf16.mxu0 %v13935_v42  ;;  %v5846_v37 = vld [vmem:[#allocation15 + $0x1440] sm:$0xff]  ;;  %v5840_v40 = vld [vmem:[#allocation15 + $0x1410] sm:$0xff] }
 0x8a2   :  { %v5848_v42 = vld [vmem:[#allocation15 + $0x1450] sm:$0xff]  ;;  %v13957_v48 = vpack.c.bf16 %v5846_v37, %v5838_v36  ;;  %v14007_v36 = vpack.c.bf16 %v5929_v28, %v5921_v24 }
 0x8a3   :  { %v13989_v49 = vpack.c.bf16 %v5848_v42, %v5840_v40  ;;  %v5920_v37 = vld [vmem:[#allocation15 + $0x1690] sm:$0xff]  ;;  %v5943_v40 = vld [vmem:[#allocation15 + $0x1748] sm:$0xff]  ;;  %v5937_v42 = vld [vmem:[#allocation15 + $0x1718] sm:$0xff] }
 0x8a4   :  { %13906 = vmatpush1.bf16.msra.mxu1 %v13905_v50  ;;  %13938 = vmatpush1.bf16.msra.mxu0 %v13937_v51  ;;  %v5854_v50 = vld [vmem:[#allocation15 + $0x1480] sm:$0xff] }
 0x8a5   :  { %13908 = vmatprep.subr.bf16.mxu1 %v13907_v54  ;;  %13940 = vmatprep.subr.bf16.mxu0 %v13939_v55  ;;  %v5862_v51 = vld [vmem:[#allocation15 + $0x14c0] sm:$0xff]  ;;  %v5856_v54 = vld [vmem:[#allocation15 + $0x1490] sm:$0xff] }
 0x8a6   :  { %v5864_v55 = vld [vmem:[#allocation15 + $0x14d0] sm:$0xff]  ;;  %v13961_v58 = vpack.c.bf16 %v5862_v51, %v5854_v50  ;;  %v14011_v50 = vpack.c.bf16 %v5945_v43, %v5937_v42 }
 0x8a7   :  { %v13993_v27 = vpack.c.bf16 %v5864_v55, %v5856_v54  ;;  %v5936_v51 = vld [vmem:[#allocation15 + $0x1710] sm:$0xff]  ;;  %v5959_v54 = vld [vmem:[#allocation15 + $0x17c8] sm:$0xff]  ;;  %v5953_v55 = vld [vmem:[#allocation15 + $0x1798] sm:$0xff] }
 0x8a8   :  { %13910 = vmatpush1.bf16.msra.mxu1 %v13909_v63  ;;  %13942 = vmatpush1.bf16.msra.mxu0 %v13941_v59  ;;  %v5870_v63 = vld [vmem:[#allocation15 + $0x1500] sm:$0xff] }
 0x8a9   :  { %13912 = vmatprep.subr.bf16.mxu1 %v13911_v61  ;;  %13944 = vmatprep.subr.bf16.mxu0 %v13943_v4  ;;  %v5878_v59 = vld [vmem:[#allocation15 + $0x1540] sm:$0xff]  ;;  %v5872_v61 = vld [vmem:[#allocation15 + $0x1510] sm:$0xff] }
 0x8aa   :  { %v5880_v4 = vld [vmem:[#allocation15 + $0x1550] sm:$0xff] }
 0x8ab   :  { %v13997_v9 = vpack.c.bf16 %v5880_v4, %v5872_v61  ;;  %v5851_v61 = vld [vmem:[#allocation15 + $0x1468] sm:$0xff]  ;;  %v5845_v4 = vld [vmem:[#allocation15 + $0x1438] sm:$0xff] }
 0x8ac   :  { %13914 = vmatpush1.bf16.msra.mxu1 %v13913_v44  ;;  %13946 = vmatpush1.bf16.msra.mxu0 %v13945_v53  ;;  %v5894_v44 = vld [vmem:[#allocation15 + $0x15c0] sm:$0xff]  ;;  %v13967_v53 = vpack.c.bf16 %v5895_v1, %v5887_v0  ;;  %v5853_v0 = vld [vmem:[#allocation15 + $0x1478] sm:$0xff] }
 0x8ad   :  { %13916 = vmatprep.subr.bf16.mxu1 %v13915_v7  ;;  %13948 = vmatprep.subr.bf16.mxu0 %v13947_v13  ;;  %v5896_v7 = vld [vmem:[#allocation15 + $0x15d0] sm:$0xff]  ;;  %v5903_v13 = vld [vmem:[#allocation15 + $0x1608] sm:$0xff]  ;;  %v13969_v25 = vpack.c.bf16 %v5894_v44, %v5886_v10  ;;  %v14051_v10 = vpack.c.bf16 %v5853_v0, %v5845_v4 }
 0x8ae   :  { %v14001_v17 = vpack.c.bf16 %v5896_v7, %v5888_v12  ;;  %v5844_v44 = vld [vmem:[#allocation15 + $0x1430] sm:$0xff]  ;;  %v5867_v12 = vld [vmem:[#allocation15 + $0x14e8] sm:$0xff]  ;;  %v5861_v7 = vld [vmem:[#allocation15 + $0x14b8] sm:$0xff] }
 0x8b0   :  { %13918 = vmatpush1.bf16.msra.mxu1 %v13917_v18  ;;  %13950 = vmatpush1.bf16.msra.mxu0 %v13949_v19  ;;  %v5910_v18 = vld [vmem:[#allocation15 + $0x1640] sm:$0xff]  ;;  %v13971_v19 = vpack.c.bf16 %v5911_v16, %v5903_v13  ;;  %v5869_v13 = vld [vmem:[#allocation15 + $0x14f8] sm:$0xff] }
 0x8b1   :  { %13920 = vmatprep.subr.bf16.mxu1 %v13919_v21  ;;  %13952 = vmatprep.subr.bf16.mxu0 %v13951_v22  ;;  %v5912_v21 = vld [vmem:[#allocation15 + $0x1650] sm:$0xff]  ;;  %v5919_v22 = vld [vmem:[#allocation15 + $0x1688] sm:$0xff]  ;;  %v13973_v29 = vpack.c.bf16 %v5910_v18, %v5902_v35  ;;  %v16672_v16 = vld [vmem:[#allocation2 + $0xa] sm:$0x3]  ;;  %v14055_v18 = vpack.c.bf16 %v5869_v13, %v5861_v7 }
 0x8b2   :  { %v14005_v30 = vpack.c.bf16 %v5912_v21, %v5904_v20  ;;  %v5875_v20 = vld [vmem:[#allocation15 + $0x1528] sm:$0xff] }
 0x8b3   :  { %v5883_v21 = vld [vmem:[#allocation15 + $0x1568] sm:$0xff] }
 0x8b4   :  { %13922 = vmatpush1.bf16.msra.mxu1 %v13921_v33  ;;  %13954 = vmatpush1.bf16.msra.mxu0 %v13953_v34  ;;  %v5926_v33 = vld [vmem:[#allocation15 + $0x16c0] sm:$0xff]  ;;  %v13975_v34 = vpack.c.bf16 %v5927_v23, %v5919_v22  ;;  %v5877_v22 = vld [vmem:[#allocation15 + $0x1538] sm:$0xff] }
 0x8b5   :  { %13956 = vmatprep.subr.bf16.mxu1 %v13955_v38  ;;  %13988 = vmatprep.subr.bf16.mxu0 %v13987_v39  ;;  %v5928_v38 = vld [vmem:[#allocation15 + $0x16d0] sm:$0xff]  ;;  %v5935_v39 = vld [vmem:[#allocation15 + $0x1708] sm:$0xff]  ;;  %v13977_v45 = vpack.c.bf16 %v5926_v33, %v5918_v32  ;;  %v5885_v23 = vld [vmem:[#allocation15 + $0x1578] sm:$0xff]  ;;  %v14027_v32 = vpack.c.bf16 %v5883_v21, %v5875_v20 }
 0x8b6   :  { %v14009_v46 = vpack.c.bf16 %v5928_v38, %v5920_v37  ;;  %v14059_v33 = vpack.c.bf16 %v5885_v23, %v5877_v22  ;;  %v5891_v37 = vld [vmem:[#allocation15 + $0x15a8] sm:$0xff]  ;;  %v5957_v20 = vld [vmem:[#allocation15 + $0x17b8] sm:$0xff] }
 0x8b7   :  { %5751 = vmatmul.mubr.f32.vlgmr.msra.gmra.mrb[22].mxu1 %v16662_v62  ;;  %5822 = vmatmul.mubr.f32.vlgmr.msra.gmra.mrb[66].mxu0 %v16662_v62  ;;  %v13965_v62 = vpack.c.bf16 %v5878_v59, %v5870_v63  ;;  %v14015_v63 = vpack.c.bf16 %v5961_v8, %v5953_v55  ;;  %v5952_v59 = vld [vmem:[#allocation15 + $0x1790] sm:$0xff]  ;;  %v5899_v38 = vld [vmem:[#allocation15 + $0x15e8] sm:$0xff]  ;;  %v5965_v21 = vld [vmem:[#allocation15 + $0x17f8] sm:$0xff] }
 0x8b8   :  { %13958 = vmatpush1.bf16.msra.mxu1 %v13957_v48  ;;  %13990 = vmatpush1.bf16.msra.mxu0 %v13989_v49  ;;  %v5942_v48 = vld [vmem:[#allocation15 + $0x1740] sm:$0xff]  ;;  %v13979_v49 = vpack.c.bf16 %v5943_v40, %v5935_v39  ;;  %v5893_v39 = vld [vmem:[#allocation15 + $0x15b8] sm:$0xff] }
 0x8b9   :  { %13960 = vmatprep.subr.bf16.mxu1 %v13959_v26  ;;  %13992 = vmatprep.subr.bf16.mxu0 %v13991_v52  ;;  %v5944_v26 = vld [vmem:[#allocation15 + $0x1750] sm:$0xff]  ;;  %v5951_v52 = vld [vmem:[#allocation15 + $0x1788] sm:$0xff]  ;;  %v13981_v5 = vpack.c.bf16 %v5942_v48, %v5934_v47  ;;  %v5901_v40 = vld [vmem:[#allocation15 + $0x15f8] sm:$0xff]  ;;  %v14031_v47 = vpack.c.bf16 %v5899_v38, %v5891_v37 }
 0x8ba   :  { %6030 = vmatprep.mubr.f32.mxu1 %v15872_v41  ;;  %6101 = vmatprep.mubr.f32.mxu0 %v15872_v41  ;;  %v14013_v56 = vpack.c.bf16 %v5944_v26, %v5936_v51  ;;  %v14063_v48 = vpack.c.bf16 %v5901_v40, %v5893_v39  ;;  %v5907_v51 = vld [vmem:[#allocation15 + $0x1628] sm:$0xff]  ;;  %v6263_v37 = vld [vmem:[#allocation15 + $0x1818] sm:$0xff] }
 0x8bb   :  { %v5915_v26 = vld [vmem:[#allocation15 + $0x1668] sm:$0xff]  ;;  %v6271_v38 = vld [vmem:[#allocation15 + $0x1858] sm:$0xff] }
 0x8bc   :  { %13962 = vmatpush1.bf16.msra.mxu1 %v13961_v58  ;;  %13994 = vmatpush1.bf16.msra.mxu0 %v13993_v27  ;;  %v5958_v58 = vld [vmem:[#allocation15 + $0x17c0] sm:$0xff]  ;;  %v13983_v27 = vpack.c.bf16 %v5959_v54, %v5951_v52  ;;  %v5909_v52 = vld [vmem:[#allocation15 + $0x1638] sm:$0xff] }
 0x8bd   :  { %13964 = vmatprep.subr.bf16.mxu1 %v13963_v60  ;;  %13996 = vmatprep.subr.bf16.mxu0 %v13995_v6  ;;  %v5960_v60 = vld [vmem:[#allocation15 + $0x17d0] sm:$0xff]  ;;  %v5843_v6 = vld [vmem:[#allocation15 + $0x1428] sm:$0xff]  ;;  %v13985_v1 = vpack.c.bf16 %v5958_v58, %v5950_v57  ;;  %v5917_v54 = vld [vmem:[#allocation15 + $0x1678] sm:$0xff]  ;;  %v14035_v57 = vpack.c.bf16 %v5915_v26, %v5907_v51 }
 0x8be   :  { %v14017_v2 = vpack.c.bf16 %v5960_v60, %v5952_v59  ;;  %v14067_v58 = vpack.c.bf16 %v5917_v54, %v5909_v52  ;;  %v5923_v59 = vld [vmem:[#allocation15 + $0x16a8] sm:$0xff]  ;;  %v6279_v51 = vld [vmem:[#allocation15 + $0x1898] sm:$0xff] }
 0x8bf   :  { %v5931_v60 = vld [vmem:[#allocation15 + $0x16e8] sm:$0xff]  ;;  %v6287_v26 = vld [vmem:[#allocation15 + $0x18d8] sm:$0xff] }
 0x8c0   :  { %13966 = vmatpush1.bf16.msra.mxu1 %v13965_v62  ;;  %13998 = vmatpush1.bf16.msra.mxu0 %v13997_v9  ;;  %v5850_v62 = vld [vmem:[#allocation15 + $0x1460] sm:$0xff]  ;;  %v14019_v9 = vpack.c.bf16 %v5851_v61, %v5843_v6  ;;  %v5925_v6 = vld [vmem:[#allocation15 + $0x16b8] sm:$0xff] }
 0x8c1   :  { %13968 = vmatprep.subr.bf16.mxu1 %v13967_v53  ;;  %14000 = vmatprep.subr.bf16.mxu0 %v13999_v11  ;;  %v5852_v53 = vld [vmem:[#allocation15 + $0x1470] sm:$0xff]  ;;  %v5859_v11 = vld [vmem:[#allocation15 + $0x14a8] sm:$0xff]  ;;  %v14021_v14 = vpack.c.bf16 %v5850_v62, %v5842_v3  ;;  %v5933_v61 = vld [vmem:[#allocation15 + $0x16f8] sm:$0xff]  ;;  %v14039_v3 = vpack.c.bf16 %v5931_v60, %v5923_v59 }
 0x8c2   :  { %v14053_v15 = vpack.c.bf16 %v5852_v53, %v5844_v44  ;;  %v14023_v35 = vpack.c.bf16 %v5867_v12, %v5859_v11  ;;  %v14071_v62 = vpack.c.bf16 %v5933_v61, %v5925_v6  ;;  %v5939_v44 = vld [vmem:[#allocation15 + $0x1728] sm:$0xff]  ;;  %v5941_v11 = vld [vmem:[#allocation15 + $0x1738] sm:$0xff] }
 0x8c3   :  { %v5947_v53 = vld [vmem:[#allocation15 + $0x1768] sm:$0xff]  ;;  %v5949_v12 = vld [vmem:[#allocation15 + $0x1778] sm:$0xff] }
 0x8c4   :  { %13970 = vmatpush1.bf16.msra.mxu1 %v13969_v25  ;;  %14002 = vmatpush1.bf16.msra.mxu0 %v14001_v17  ;;  %v5858_v25 = vld [vmem:[#allocation15 + $0x14a0] sm:$0xff]  ;;  %v6295_v59 = vld [vmem:[#allocation15 + $0x1918] sm:$0xff] }
 0x8c5   :  { %13972 = vmatprep.subr.bf16.mxu1 %v13971_v19  ;;  %14004 = vmatprep.subr.bf16.mxu0 %v14003_v31  ;;  %v5866_v17 = vld [vmem:[#allocation15 + $0x14e0] sm:$0xff]  ;;  %v5860_v19 = vld [vmem:[#allocation15 + $0x14b0] sm:$0xff]  ;;  %v6303_v60 = vld [vmem:[#allocation15 + $0x1958] sm:$0xff] }
 0x8c6   :  { %v5868_v31 = vld [vmem:[#allocation15 + $0x14f0] sm:$0xff]  ;;  %v14025_v24 = vpack.c.bf16 %v5866_v17, %v5858_v25  ;;  %v14043_v25 = vpack.c.bf16 %v5947_v53, %v5939_v44  ;;  %v14075_v17 = vpack.c.bf16 %v5949_v12, %v5941_v11  ;;  %v6311_v44 = vld [vmem:[#allocation15 + $0x1998] sm:$0xff]  ;;  %v6308_v12 = vld [vmem:[#allocation15 + $0x1980] sm:$0xff] }
 0x8c7   :  { %v14057_v28 = vpack.c.bf16 %v5868_v31, %v5860_v19  ;;  %v5955_v19 = vld [vmem:[#allocation15 + $0x17a8] sm:$0xff]  ;;  %v6319_v53 = vld [vmem:[#allocation15 + $0x19d8] sm:$0xff] }
 0x8c8   :  { %13974 = vmatpush1.bf16.msra.mxu1 %v13973_v29  ;;  %14006 = vmatpush1.bf16.msra.mxu0 %v14005_v30  ;;  %v5874_v29 = vld [vmem:[#allocation15 + $0x1520] sm:$0xff]  ;;  %v5963_v31 = vld [vmem:[#allocation15 + $0x17e8] sm:$0xff] }
 0x8c9   :  { %13976 = vmatprep.subr.bf16.mxu1 %v13975_v34  ;;  %14008 = vmatprep.subr.bf16.mxu0 %v14007_v36  ;;  %v5882_v30 = vld [vmem:[#allocation15 + $0x1560] sm:$0xff]  ;;  %v5876_v34 = vld [vmem:[#allocation15 + $0x1530] sm:$0xff] }
 0x8ca   :  { %v5884_v36 = vld [vmem:[#allocation15 + $0x1570] sm:$0xff]  ;;  %v14029_v42 = vpack.c.bf16 %v5882_v30, %v5874_v29  ;;  %v14047_v29 = vpack.c.bf16 %v5963_v31, %v5955_v19  ;;  %v14079_v30 = vpack.c.bf16 %v5965_v21, %v5957_v20  ;;  %v6335_v19 = vld [vmem:[#allocation15 + $0x1a58] sm:$0xff]  ;;  %v6324_v21 = vld [vmem:[#allocation15 + $0x1a00] sm:$0xff] }
 0x8cb   :  { %v14061_v43 = vpack.c.bf16 %v5884_v36, %v5876_v34  ;;  %v6261_v34 = vld [vmem:[#allocation15 + $0x1808] sm:$0xff] }
 0x8cc   :  { %13978 = vmatpush1.bf16.msra.mxu1 %v13977_v45  ;;  %14010 = vmatpush1.bf16.msra.mxu0 %v14009_v46  ;;  %v5890_v45 = vld [vmem:[#allocation15 + $0x15a0] sm:$0xff]  ;;  %v6269_v36 = vld [vmem:[#allocation15 + $0x1848] sm:$0xff] }
 0x8cd   :  { %13980 = vmatprep.subr.bf16.mxu1 %v13979_v49  ;;  %14012 = vmatprep.subr.bf16.mxu0 %v14011_v50  ;;  %v5898_v46 = vld [vmem:[#allocation15 + $0x15e0] sm:$0xff]  ;;  %v5892_v49 = vld [vmem:[#allocation15 + $0x15b0] sm:$0xff] }
 0x8ce   :  { %v5900_v50 = vld [vmem:[#allocation15 + $0x15f0] sm:$0xff]  ;;  %v14033_v55 = vpack.c.bf16 %v5898_v46, %v5890_v45  ;;  %v14083_v45 = vpack.c.bf16 %v6269_v36, %v6261_v34  ;;  %v14115_v46 = vpack.c.bf16 %v6271_v38, %v6263_v37  ;;  %v6351_v34 = vld [vmem:[#allocation15 + $0x1ad8] sm:$0xff]  ;;  %v6340_v38 = vld [vmem:[#allocation15 + $0x1a80] sm:$0xff] }
 0x8cf   :  { %v14065_v8 = vpack.c.bf16 %v5900_v50, %v5892_v49  ;;  %v6277_v49 = vld [vmem:[#allocation15 + $0x1888] sm:$0xff] }
 0x8d0   :  { %13982 = vmatpush1.bf16.msra.mxu1 %v13981_v5  ;;  %14014 = vmatpush1.bf16.msra.mxu0 %v14013_v56  ;;  %v5906_v5 = vld [vmem:[#allocation15 + $0x1620] sm:$0xff]  ;;  %v6285_v50 = vld [vmem:[#allocation15 + $0x18c8] sm:$0xff] }
 0x8d1   :  { %13984 = vmatprep.subr.bf16.mxu1 %v13983_v27  ;;  %14016 = vmatprep.subr.bf16.mxu0 %v14015_v63  ;;  %v5914_v56 = vld [vmem:[#allocation15 + $0x1660] sm:$0xff]  ;;  %v5908_v27 = vld [vmem:[#allocation15 + $0x1630] sm:$0xff] }
 0x8d2   :  { %v5916_v63 = vld [vmem:[#allocation15 + $0x1670] sm:$0xff]  ;;  %v14037_v4 = vpack.c.bf16 %v5914_v56, %v5906_v5  ;;  %v14087_v5 = vpack.c.bf16 %v6285_v50, %v6277_v49  ;;  %v14119_v56 = vpack.c.bf16 %v6287_v26, %v6279_v51  ;;  %v6367_v49 = vld [vmem:[#allocation15 + $0x1b58] sm:$0xff]  ;;  %v6356_v26 = vld [vmem:[#allocation15 + $0x1b00] sm:$0xff] }
 0x8d3   :  { %v14069_v0 = vpack.c.bf16 %v5916_v63, %v5908_v27  ;;  %v6293_v27 = vld [vmem:[#allocation15 + $0x1908] sm:$0xff] }
 0x8d4   :  { %13986 = vmatpush1.bf16.msra.mxu1 %v13985_v1  ;;  %14018 = vmatpush1.bf16.msra.mxu0 %v14017_v2  ;;  %v5922_v1 = vld [vmem:[#allocation15 + $0x16a0] sm:$0xff]  ;;  %v6301_v63 = vld [vmem:[#allocation15 + $0x1948] sm:$0xff] }
 0x8d5   :  { %14020 = vmatprep.subr.bf16.mxu1 %v14019_v9  ;;  %14052 = vmatprep.subr.bf16.mxu0 %v14051_v10  ;;  %v5930_v2 = vld [vmem:[#allocation15 + $0x16e0] sm:$0xff]  ;;  %v5924_v9 = vld [vmem:[#allocation15 + $0x16b0] sm:$0xff] }
 0x8d6   :  { %v5932_v10 = vld [vmem:[#allocation15 + $0x16f0] sm:$0xff]  ;;  %v14041_v7 = vpack.c.bf16 %v5930_v2, %v5922_v1  ;;  %v14091_v1 = vpack.c.bf16 %v6301_v63, %v6293_v27  ;;  %v14123_v2 = vpack.c.bf16 %v6303_v60, %v6295_v59  ;;  %v6383_v27 = vld [vmem:[#allocation15 + $0x1bd8] sm:$0xff]  ;;  %v6372_v60 = vld [vmem:[#allocation15 + $0x1b80] sm:$0xff] }
 0x8d7   :  { %6031 = vmatmul.mubr.f32.vlgmr.msra.gmra.mrb[20].mxu1 %v16672_v16  ;;  %6102 = vmatmul.mubr.f32.vlgmr.msra.gmra.mrb[64].mxu0 %v16672_v16  ;;  %v14073_v13 = vpack.c.bf16 %v5932_v10, %v5924_v9  ;;  %v6309_v9 = vld [vmem:[#allocation15 + $0x1988] sm:$0xff] }
 0x8d8   :  { %14022 = vmatpush1.bf16.msra.mxu1 %v14021_v14  ;;  %14054 = vmatpush1.bf16.msra.mxu0 %v14053_v15  ;;  %v5938_v14 = vld [vmem:[#allocation15 + $0x1720] sm:$0xff]  ;;  %v6317_v10 = vld [vmem:[#allocation15 + $0x19c8] sm:$0xff] }
 0x8d9   :  { %14024 = vmatprep.subr.bf16.mxu1 %v14023_v35  ;;  %14056 = vmatprep.subr.bf16.mxu0 %v14055_v18  ;;  %v5946_v15 = vld [vmem:[#allocation15 + $0x1760] sm:$0xff]  ;;  %v5940_v35 = vld [vmem:[#allocation15 + $0x1730] sm:$0xff] }
 0x8da   :  { %6172 = vmatprep.mubr.f32.mxu1 %v15872_v41  ;;  %6243 = vmatprep.mubr.f32.mxu0 %v15872_v41  ;;  %v5948_v18 = vld [vmem:[#allocation15 + $0x1770] sm:$0xff]  ;;  %v14045_v22 = vpack.c.bf16 %v5946_v15, %v5938_v14  ;;  %v14127_v14 = vpack.c.bf16 %v6319_v53, %v6311_v44  ;;  %v6264_v53 = vld [vmem:[#allocation15 + $0x1820] sm:$0xff] }
 0x8db   :  { %v14077_v23 = vpack.c.bf16 %v5948_v18, %v5940_v35  ;;  %v6310_v15 = vld [vmem:[#allocation15 + $0x1990] sm:$0xff]  ;;  %v6333_v35 = vld [vmem:[#allocation15 + $0x1a48] sm:$0xff]  ;;  %v6327_v18 = vld [vmem:[#allocation15 + $0x1a18] sm:$0xff] }
 0x8dc   :  { %14026 = vmatpush1.bf16.msra.mxu1 %v14025_v24  ;;  %14058 = vmatpush1.bf16.msra.mxu0 %v14057_v28  ;;  %v5954_v24 = vld [vmem:[#allocation15 + $0x17a0] sm:$0xff] }
 0x8dd   :  { %14028 = vmatprep.subr.bf16.mxu1 %v14027_v32  ;;  %14060 = vmatprep.subr.bf16.mxu0 %v14059_v33  ;;  %v5962_v28 = vld [vmem:[#allocation15 + $0x17e0] sm:$0xff]  ;;  %v5956_v32 = vld [vmem:[#allocation15 + $0x17b0] sm:$0xff] }
 0x8de   :  { %v5964_v33 = vld [vmem:[#allocation15 + $0x17f0] sm:$0xff]  ;;  %v14049_v39 = vpack.c.bf16 %v5962_v28, %v5954_v24  ;;  %v14131_v24 = vpack.c.bf16 %v6335_v19, %v6327_v18 }
 0x8df   :  { %v14081_v40 = vpack.c.bf16 %v5964_v33, %v5956_v32  ;;  %v6326_v28 = vld [vmem:[#allocation15 + $0x1a10] sm:$0xff]  ;;  %v6349_v32 = vld [vmem:[#allocation15 + $0x1ac8] sm:$0xff]  ;;  %v6343_v33 = vld [vmem:[#allocation15 + $0x1a98] sm:$0xff] }
 0x8e0   :  { %14030 = vmatpush1.bf16.msra.mxu1 %v14029_v42  ;;  %14062 = vmatpush1.bf16.msra.mxu0 %v14061_v43  ;;  %v6260_v42 = vld [vmem:[#allocation15 + $0x1800] sm:$0xff] }
 0x8e1   :  { %14032 = vmatprep.subr.bf16.mxu1 %v14031_v47  ;;  %14064 = vmatprep.subr.bf16.mxu0 %v14063_v48  ;;  %v6268_v43 = vld [vmem:[#allocation15 + $0x1840] sm:$0xff]  ;;  %v6262_v47 = vld [vmem:[#allocation15 + $0x1810] sm:$0xff] }
 0x8e2   :  { %v6270_v48 = vld [vmem:[#allocation15 + $0x1850] sm:$0xff]  ;;  %v14085_v52 = vpack.c.bf16 %v6268_v43, %v6260_v42  ;;  %v14135_v42 = vpack.c.bf16 %v6351_v34, %v6343_v33 }
 0x8e3   :  { %v14117_v54 = vpack.c.bf16 %v6270_v48, %v6262_v47  ;;  %v6342_v43 = vld [vmem:[#allocation15 + $0x1a90] sm:$0xff]  ;;  %v6365_v47 = vld [vmem:[#allocation15 + $0x1b48] sm:$0xff]  ;;  %v6359_v48 = vld [vmem:[#allocation15 + $0x1b18] sm:$0xff] }
 0x8e4   :  { %14034 = vmatpush1.bf16.msra.mxu1 %v14033_v55  ;;  %14066 = vmatpush1.bf16.msra.mxu0 %v14065_v8  ;;  %v6276_v55 = vld [vmem:[#allocation15 + $0x1880] sm:$0xff] }
 0x8e5   :  { %14036 = vmatprep.subr.bf16.mxu1 %v14035_v57  ;;  %14068 = vmatprep.subr.bf16.mxu0 %v14067_v58  ;;  %v6284_v8 = vld [vmem:[#allocation15 + $0x18c0] sm:$0xff]  ;;  %v6278_v57 = vld [vmem:[#allocation15 + $0x1890] sm:$0xff] }
 0x8e6   :  { %v6286_v58 = vld [vmem:[#allocation15 + $0x18d0] sm:$0xff]  ;;  %v14089_v6 = vpack.c.bf16 %v6284_v8, %v6276_v55  ;;  %v14139_v55 = vpack.c.bf16 %v6367_v49, %v6359_v48 }
 0x8e7   :  { %v14121_v61 = vpack.c.bf16 %v6286_v58, %v6278_v57  ;;  %v6358_v8 = vld [vmem:[#allocation15 + $0x1b10] sm:$0xff]  ;;  %v6381_v57 = vld [vmem:[#allocation15 + $0x1bc8] sm:$0xff]  ;;  %v6375_v58 = vld [vmem:[#allocation15 + $0x1b98] sm:$0xff] }
 0x8e8   :  { %14038 = vmatpush1.bf16.msra.mxu1 %v14037_v4  ;;  %14070 = vmatpush1.bf16.msra.mxu0 %v14069_v0  ;;  %v6292_v4 = vld [vmem:[#allocation15 + $0x1900] sm:$0xff] }
 0x8e9   :  { %14040 = vmatprep.subr.bf16.mxu1 %v14039_v3  ;;  %14072 = vmatprep.subr.bf16.mxu0 %v14071_v62  ;;  %v6300_v0 = vld [vmem:[#allocation15 + $0x1940] sm:$0xff]  ;;  %v6294_v3 = vld [vmem:[#allocation15 + $0x1910] sm:$0xff] }
 0x8ea   :  { %v6302_v62 = vld [vmem:[#allocation15 + $0x1950] sm:$0xff] }
 0x8eb   :  { %v14125_v11 = vpack.c.bf16 %v6302_v62, %v6294_v3  ;;  %v6273_v3 = vld [vmem:[#allocation15 + $0x1868] sm:$0xff]  ;;  %v6267_v62 = vld [vmem:[#allocation15 + $0x1838] sm:$0xff] }
 0x8ec   :  { %14042 = vmatpush1.bf16.msra.mxu1 %v14041_v7  ;;  %14074 = vmatpush1.bf16.msra.mxu0 %v14073_v13  ;;  %v6316_v7 = vld [vmem:[#allocation15 + $0x19c0] sm:$0xff]  ;;  %v14095_v13 = vpack.c.bf16 %v6317_v10, %v6309_v9  ;;  %v6275_v9 = vld [vmem:[#allocation15 + $0x1878] sm:$0xff] }
 0x8ed   :  { %14044 = vmatprep.subr.bf16.mxu1 %v14043_v25  ;;  %14076 = vmatprep.subr.bf16.mxu0 %v14075_v17  ;;  %v6318_v25 = vld [vmem:[#allocation15 + $0x19d0] sm:$0xff]  ;;  %v6325_v17 = vld [vmem:[#allocation15 + $0x1a08] sm:$0xff]  ;;  %v14097_v31 = vpack.c.bf16 %v6316_v7, %v6308_v12  ;;  %v14179_v12 = vpack.c.bf16 %v6275_v9, %v6267_v62 }
 0x8ee   :  { %v14129_v20 = vpack.c.bf16 %v6318_v25, %v6310_v15  ;;  %v6266_v7 = vld [vmem:[#allocation15 + $0x1830] sm:$0xff]  ;;  %v6289_v15 = vld [vmem:[#allocation15 + $0x18e8] sm:$0xff]  ;;  %v6283_v25 = vld [vmem:[#allocation15 + $0x18b8] sm:$0xff] }
 0x8f0   :  { %14046 = vmatpush1.bf16.msra.mxu1 %v14045_v22  ;;  %14078 = vmatpush1.bf16.msra.mxu0 %v14077_v23  ;;  %v6332_v22 = vld [vmem:[#allocation15 + $0x1a40] sm:$0xff]  ;;  %v14099_v23 = vpack.c.bf16 %v6333_v35, %v6325_v17  ;;  %v6291_v17 = vld [vmem:[#allocation15 + $0x18f8] sm:$0xff] }
 0x8f1   :  { %14048 = vmatprep.subr.bf16.mxu1 %v14047_v29  ;;  %14080 = vmatprep.subr.bf16.mxu0 %v14079_v30  ;;  %v6334_v29 = vld [vmem:[#allocation15 + $0x1a50] sm:$0xff]  ;;  %v6341_v30 = vld [vmem:[#allocation15 + $0x1a88] sm:$0xff]  ;;  %v14101_v36 = vpack.c.bf16 %v6332_v22, %v6324_v21  ;;  %v16682_v35 = vld [vmem:[#allocation2 + $0xc] sm:$0x3]  ;;  %v14183_v22 = vpack.c.bf16 %v6291_v17, %v6283_v25 }
 0x8f2   :  { %v14133_v37 = vpack.c.bf16 %v6334_v29, %v6326_v28  ;;  %v6297_v28 = vld [vmem:[#allocation15 + $0x1928] sm:$0xff] }
 0x8f3   :  { %v6305_v29 = vld [vmem:[#allocation15 + $0x1968] sm:$0xff] }
 0x8f4   :  { %14050 = vmatpush1.bf16.msra.mxu1 %v14049_v39  ;;  %14082 = vmatpush1.bf16.msra.mxu0 %v14081_v40  ;;  %v6348_v39 = vld [vmem:[#allocation15 + $0x1ac0] sm:$0xff]  ;;  %v14103_v40 = vpack.c.bf16 %v6349_v32, %v6341_v30  ;;  %v6299_v30 = vld [vmem:[#allocation15 + $0x1938] sm:$0xff] }
 0x8f5   :  { %14084 = vmatprep.subr.bf16.mxu1 %v14083_v45  ;;  %14116 = vmatprep.subr.bf16.mxu0 %v14115_v46  ;;  %v6350_v45 = vld [vmem:[#allocation15 + $0x1ad0] sm:$0xff]  ;;  %v6357_v46 = vld [vmem:[#allocation15 + $0x1b08] sm:$0xff]  ;;  %v14105_v50 = vpack.c.bf16 %v6348_v39, %v6340_v38  ;;  %v6307_v32 = vld [vmem:[#allocation15 + $0x1978] sm:$0xff]  ;;  %v14155_v38 = vpack.c.bf16 %v6305_v29, %v6297_v28 }
 0x8f6   :  { %v14137_v51 = vpack.c.bf16 %v6350_v45, %v6342_v43  ;;  %v14187_v39 = vpack.c.bf16 %v6307_v32, %v6299_v30  ;;  %v6313_v43 = vld [vmem:[#allocation15 + $0x19a8] sm:$0xff]  ;;  %v6379_v28 = vld [vmem:[#allocation15 + $0x1bb8] sm:$0xff] }
 0x8f7   :  { %6173 = vmatmul.mubr.f32.vlgmr.msra.gmra.mrb[22].mxu1 %v16672_v16  ;;  %6244 = vmatmul.mubr.f32.vlgmr.msra.gmra.mrb[66].mxu0 %v16672_v16  ;;  %v14093_v16 = vpack.c.bf16 %v6300_v0, %v6292_v4  ;;  %v14143_v4 = vpack.c.bf16 %v6383_v27, %v6375_v58  ;;  %v6374_v0 = vld [vmem:[#allocation15 + $0x1b90] sm:$0xff]  ;;  %v6321_v45 = vld [vmem:[#allocation15 + $0x19e8] sm:$0xff]  ;;  %v6387_v29 = vld [vmem:[#allocation15 + $0x1bf8] sm:$0xff] }
 0x8f8   :  { %14086 = vmatpush1.bf16.msra.mxu1 %v14085_v52  ;;  %14118 = vmatpush1.bf16.msra.mxu0 %v14117_v54  ;;  %v6364_v52 = vld [vmem:[#allocation15 + $0x1b40] sm:$0xff]  ;;  %v14107_v54 = vpack.c.bf16 %v6365_v47, %v6357_v46  ;;  %v6315_v46 = vld [vmem:[#allocation15 + $0x19b8] sm:$0xff] }
 0x8f9   :  { %14088 = vmatprep.subr.bf16.mxu1 %v14087_v5  ;;  %14120 = vmatprep.subr.bf16.mxu0 %v14119_v56  ;;  %v6366_v5 = vld [vmem:[#allocation15 + $0x1b50] sm:$0xff]  ;;  %v6373_v56 = vld [vmem:[#allocation15 + $0x1b88] sm:$0xff]  ;;  %v14109_v63 = vpack.c.bf16 %v6364_v52, %v6356_v26  ;;  %v6323_v47 = vld [vmem:[#allocation15 + $0x19f8] sm:$0xff]  ;;  %v14159_v26 = vpack.c.bf16 %v6321_v45, %v6313_v43 }
 0x8fa   :  { %6452 = vmatprep.mubr.f32.mxu1 %v15872_v41  ;;  %6523 = vmatprep.mubr.f32.mxu0 %v15872_v41  ;;  %v14141_v59 = vpack.c.bf16 %v6366_v5, %v6358_v8  ;;  %v14191_v52 = vpack.c.bf16 %v6323_v47, %v6315_v46  ;;  %v6329_v8 = vld [vmem:[#allocation15 + $0x1a28] sm:$0xff]  ;;  %v6685_v43 = vld [vmem:[#allocation15 + $0x1c18] sm:$0xff] }
 0x8fb   :  { %v6337_v5 = vld [vmem:[#allocation15 + $0x1a68] sm:$0xff]  ;;  %v6693_v45 = vld [vmem:[#allocation15 + $0x1c58] sm:$0xff] }
 0x8fc   :  { %14090 = vmatpush1.bf16.msra.mxu1 %v14089_v6  ;;  %14122 = vmatpush1.bf16.msra.mxu0 %v14121_v61  ;;  %v6380_v6 = vld [vmem:[#allocation15 + $0x1bc0] sm:$0xff]  ;;  %v14111_v61 = vpack.c.bf16 %v6381_v57, %v6373_v56  ;;  %v6331_v56 = vld [vmem:[#allocation15 + $0x1a38] sm:$0xff] }
 0x8fd   :  { %14092 = vmatprep.subr.bf16.mxu1 %v14091_v1  ;;  %14124 = vmatprep.subr.bf16.mxu0 %v14123_v2  ;;  %v6382_v1 = vld [vmem:[#allocation15 + $0x1bd0] sm:$0xff]  ;;  %v6265_v2 = vld [vmem:[#allocation15 + $0x1828] sm:$0xff]  ;;  %v14113_v10 = vpack.c.bf16 %v6380_v6, %v6372_v60  ;;  %v6339_v57 = vld [vmem:[#allocation15 + $0x1a78] sm:$0xff]  ;;  %v14163_v60 = vpack.c.bf16 %v6337_v5, %v6329_v8 }
 0x8fe   :  { %v14145_v44 = vpack.c.bf16 %v6382_v1, %v6374_v0  ;;  %v14195_v6 = vpack.c.bf16 %v6339_v57, %v6331_v56  ;;  %v6345_v0 = vld [vmem:[#allocation15 + $0x1aa8] sm:$0xff]  ;;  %v6701_v8 = vld [vmem:[#allocation15 + $0x1c98] sm:$0xff] }
 0x8ff   :  { %v6353_v1 = vld [vmem:[#allocation15 + $0x1ae8] sm:$0xff]  ;;  %v6709_v5 = vld [vmem:[#allocation15 + $0x1cd8] sm:$0xff] }
 0x900   :  { %14094 = vmatpush1.bf16.msra.mxu1 %v14093_v16  ;;  %14126 = vmatpush1.bf16.msra.mxu0 %v14125_v11  ;;  %v6272_v16 = vld [vmem:[#allocation15 + $0x1860] sm:$0xff]  ;;  %v14147_v11 = vpack.c.bf16 %v6273_v3, %v6265_v2  ;;  %v6347_v2 = vld [vmem:[#allocation15 + $0x1ab8] sm:$0xff] }
 0x901   :  { %14096 = vmatprep.subr.bf16.mxu1 %v14095_v13  ;;  %14128 = vmatprep.subr.bf16.mxu0 %v14127_v14  ;;  %v6274_v13 = vld [vmem:[#allocation15 + $0x1870] sm:$0xff]  ;;  %v6281_v14 = vld [vmem:[#allocation15 + $0x18a8] sm:$0xff]  ;;  %v14149_v18 = vpack.c.bf16 %v6272_v16, %v6264_v53  ;;  %v6355_v3 = vld [vmem:[#allocation15 + $0x1af8] sm:$0xff]  ;;  %v14167_v53 = vpack.c.bf16 %v6353_v1, %v6345_v0 }
 0x902   :  { %v14181_v19 = vpack.c.bf16 %v6274_v13, %v6266_v7  ;;  %v14151_v21 = vpack.c.bf16 %v6289_v15, %v6281_v14  ;;  %v14199_v16 = vpack.c.bf16 %v6355_v3, %v6347_v2  ;;  %v6361_v7 = vld [vmem:[#allocation15 + $0x1b28] sm:$0xff]  ;;  %v6363_v14 = vld [vmem:[#allocation15 + $0x1b38] sm:$0xff] }
 0x903   :  { %v6369_v13 = vld [vmem:[#allocation15 + $0x1b68] sm:$0xff]  ;;  %v6371_v15 = vld [vmem:[#allocation15 + $0x1b78] sm:$0xff] }
 0x904   :  { %14098 = vmatpush1.bf16.msra.mxu1 %v14097_v31  ;;  %14130 = vmatpush1.bf16.msra.mxu0 %v14129_v20  ;;  %v6280_v31 = vld [vmem:[#allocation15 + $0x18a0] sm:$0xff]  ;;  %v6717_v0 = vld [vmem:[#allocation15 + $0x1d18] sm:$0xff] }
 0x905   :  { %14100 = vmatprep.subr.bf16.mxu1 %v14099_v23  ;;  %14132 = vmatprep.subr.bf16.mxu0 %v14131_v24  ;;  %v6288_v20 = vld [vmem:[#allocation15 + $0x18e0] sm:$0xff]  ;;  %v6282_v23 = vld [vmem:[#allocation15 + $0x18b0] sm:$0xff]  ;;  %v6725_v1 = vld [vmem:[#allocation15 + $0x1d58] sm:$0xff] }
 0x906   :  { %v6290_v24 = vld [vmem:[#allocation15 + $0x18f0] sm:$0xff]  ;;  %v14153_v33 = vpack.c.bf16 %v6288_v20, %v6280_v31  ;;  %v14171_v31 = vpack.c.bf16 %v6369_v13, %v6361_v7  ;;  %v14203_v20 = vpack.c.bf16 %v6371_v15, %v6363_v14  ;;  %v6733_v7 = vld [vmem:[#allocation15 + $0x1d98] sm:$0xff]  ;;  %v6730_v15 = vld [vmem:[#allocation15 + $0x1d80] sm:$0xff] }
 0x907   :  { %v14185_v34 = vpack.c.bf16 %v6290_v24, %v6282_v23  ;;  %v6377_v23 = vld [vmem:[#allocation15 + $0x1ba8] sm:$0xff]  ;;  %v6741_v13 = vld [vmem:[#allocation15 + $0x1dd8] sm:$0xff] }
 0x908   :  { %14102 = vmatpush1.bf16.msra.mxu1 %v14101_v36  ;;  %14134 = vmatpush1.bf16.msra.mxu0 %v14133_v37  ;;  %v6296_v36 = vld [vmem:[#allocation15 + $0x1920] sm:$0xff]  ;;  %v6385_v24 = vld [vmem:[#allocation15 + $0x1be8] sm:$0xff] }
 0x909   :  { %14104 = vmatprep.subr.bf16.mxu1 %v14103_v40  ;;  %14136 = vmatprep.subr.bf16.mxu0 %v14135_v42  ;;  %v6304_v37 = vld [vmem:[#allocation15 + $0x1960] sm:$0xff]  ;;  %v6298_v40 = vld [vmem:[#allocation15 + $0x1930] sm:$0xff] }
 0x90a   :  { %v6306_v42 = vld [vmem:[#allocation15 + $0x1970] sm:$0xff]  ;;  %v14157_v48 = vpack.c.bf16 %v6304_v37, %v6296_v36  ;;  %v14175_v36 = vpack.c.bf16 %v6385_v24, %v6377_v23  ;;  %v14207_v37 = vpack.c.bf16 %v6387_v29, %v6379_v28  ;;  %v6757_v23 = vld [vmem:[#allocation15 + $0x1e58] sm:$0xff]  ;;  %v6746_v29 = vld [vmem:[#allocation15 + $0x1e00] sm:$0xff] }
 0x90b   :  { %v14189_v49 = vpack.c.bf16 %v6306_v42, %v6298_v40  ;;  %v6683_v40 = vld [vmem:[#allocation15 + $0x1c08] sm:$0xff] }
 0x90c   :  { %14106 = vmatpush1.bf16.msra.mxu1 %v14105_v50  ;;  %14138 = vmatpush1.bf16.msra.mxu0 %v14137_v51  ;;  %v6312_v50 = vld [vmem:[#allocation15 + $0x19a0] sm:$0xff]  ;;  %v6691_v42 = vld [vmem:[#allocation15 + $0x1c48] sm:$0xff] }
 0x90d   :  { %14108 = vmatprep.subr.bf16.mxu1 %v14107_v54  ;;  %14140 = vmatprep.subr.bf16.mxu0 %v14139_v55  ;;  %v6320_v51 = vld [vmem:[#allocation15 + $0x19e0] sm:$0xff]  ;;  %v6314_v54 = vld [vmem:[#allocation15 + $0x19b0] sm:$0xff] }
 0x90e   :  { %v6322_v55 = vld [vmem:[#allocation15 + $0x19f0] sm:$0xff]  ;;  %v14161_v58 = vpack.c.bf16 %v6320_v51, %v6312_v50  ;;  %v14211_v50 = vpack.c.bf16 %v6691_v42, %v6683_v40  ;;  %v14243_v51 = vpack.c.bf16 %v6693_v45, %v6685_v43  ;;  %v6773_v40 = vld [vmem:[#allocation15 + $0x1ed8] sm:$0xff]  ;;  %v6762_v45 = vld [vmem:[#allocation15 + $0x1e80] sm:$0xff] }
 0x90f   :  { %v14193_v27 = vpack.c.bf16 %v6322_v55, %v6314_v54  ;;  %v6699_v54 = vld [vmem:[#allocation15 + $0x1c88] sm:$0xff] }
 0x910   :  { %14110 = vmatpush1.bf16.msra.mxu1 %v14109_v63  ;;  %14142 = vmatpush1.bf16.msra.mxu0 %v14141_v59  ;;  %v6328_v63 = vld [vmem:[#allocation15 + $0x1a20] sm:$0xff]  ;;  %v6707_v55 = vld [vmem:[#allocation15 + $0x1cc8] sm:$0xff] }
 0x911   :  { %14112 = vmatprep.subr.bf16.mxu1 %v14111_v61  ;;  %14144 = vmatprep.subr.bf16.mxu0 %v14143_v4  ;;  %v6336_v59 = vld [vmem:[#allocation15 + $0x1a60] sm:$0xff]  ;;  %v6330_v61 = vld [vmem:[#allocation15 + $0x1a30] sm:$0xff] }
 0x912   :  { %v6338_v4 = vld [vmem:[#allocation15 + $0x1a70] sm:$0xff]  ;;  %v14165_v62 = vpack.c.bf16 %v6336_v59, %v6328_v63  ;;  %v14215_v63 = vpack.c.bf16 %v6707_v55, %v6699_v54  ;;  %v14247_v59 = vpack.c.bf16 %v6709_v5, %v6701_v8  ;;  %v6789_v54 = vld [vmem:[#allocation15 + $0x1f58] sm:$0xff]  ;;  %v6778_v5 = vld [vmem:[#allocation15 + $0x1f00] sm:$0xff] }
 0x913   :  { %v14197_v9 = vpack.c.bf16 %v6338_v4, %v6330_v61  ;;  %v6715_v61 = vld [vmem:[#allocation15 + $0x1d08] sm:$0xff] }
 0x914   :  { %14114 = vmatpush1.bf16.msra.mxu1 %v14113_v10  ;;  %14146 = vmatpush1.bf16.msra.mxu0 %v14145_v44  ;;  %v6344_v10 = vld [vmem:[#allocation15 + $0x1aa0] sm:$0xff]  ;;  %v6723_v4 = vld [vmem:[#allocation15 + $0x1d48] sm:$0xff] }
 0x915   :  { %14148 = vmatprep.subr.bf16.mxu1 %v14147_v11  ;;  %14180 = vmatprep.subr.bf16.mxu0 %v14179_v12  ;;  %v6352_v44 = vld [vmem:[#allocation15 + $0x1ae0] sm:$0xff]  ;;  %v6346_v11 = vld [vmem:[#allocation15 + $0x1ab0] sm:$0xff] }
 0x916   :  { %v6354_v12 = vld [vmem:[#allocation15 + $0x1af0] sm:$0xff]  ;;  %v14169_v25 = vpack.c.bf16 %v6352_v44, %v6344_v10  ;;  %v14219_v10 = vpack.c.bf16 %v6723_v4, %v6715_v61  ;;  %v14251_v44 = vpack.c.bf16 %v6725_v1, %v6717_v0  ;;  %v6805_v61 = vld [vmem:[#allocation15 + $0x1fd8] sm:$0xff]  ;;  %v6794_v1 = vld [vmem:[#allocation15 + $0x1f80] sm:$0xff] }
 0x917   :  { %6453 = vmatmul.mubr.f32.vlgmr.msra.gmra.mrb[20].mxu1 %v16682_v35  ;;  %6524 = vmatmul.mubr.f32.vlgmr.msra.gmra.mrb[64].mxu0 %v16682_v35  ;;  %v14201_v17 = vpack.c.bf16 %v6354_v12, %v6346_v11  ;;  %v6731_v11 = vld [vmem:[#allocation15 + $0x1d88] sm:$0xff] }
 0x918   :  { %14150 = vmatpush1.bf16.msra.mxu1 %v14149_v18  ;;  %14182 = vmatpush1.bf16.msra.mxu0 %v14181_v19  ;;  %v6360_v18 = vld [vmem:[#allocation15 + $0x1b20] sm:$0xff]  ;;  %v6739_v12 = vld [vmem:[#allocation15 + $0x1dc8] sm:$0xff] }
 0x919   :  { %14152 = vmatprep.subr.bf16.mxu1 %v14151_v21  ;;  %14184 = vmatprep.subr.bf16.mxu0 %v14183_v22  ;;  %v6368_v19 = vld [vmem:[#allocation15 + $0x1b60] sm:$0xff]  ;;  %v6362_v21 = vld [vmem:[#allocation15 + $0x1b30] sm:$0xff] }
 0x91a   :  { %6594 = vmatprep.mubr.f32.mxu1 %v15872_v41  ;;  %6665 = vmatprep.mubr.f32.mxu0 %v15872_v41  ;;  %v6370_v22 = vld [vmem:[#allocation15 + $0x1b70] sm:$0xff]  ;;  %v14173_v30 = vpack.c.bf16 %v6368_v19, %v6360_v18  ;;  %v14255_v18 = vpack.c.bf16 %v6741_v13, %v6733_v7  ;;  %v6686_v13 = vld [vmem:[#allocation15 + $0x1c20] sm:$0xff] }
 0x91b   :  { %v14205_v32 = vpack.c.bf16 %v6370_v22, %v6362_v21  ;;  %v6732_v19 = vld [vmem:[#allocation15 + $0x1d90] sm:$0xff]  ;;  %v6755_v21 = vld [vmem:[#allocation15 + $0x1e48] sm:$0xff]  ;;  %v6749_v22 = vld [vmem:[#allocation15 + $0x1e18] sm:$0xff] }
 0x91c   :  { %14154 = vmatpush1.bf16.msra.mxu1 %v14153_v33  ;;  %14186 = vmatpush1.bf16.msra.mxu0 %v14185_v34  ;;  %v6376_v33 = vld [vmem:[#allocation15 + $0x1ba0] sm:$0xff] }
 0x91d   :  { %14156 = vmatprep.subr.bf16.mxu1 %v14155_v38  ;;  %14188 = vmatprep.subr.bf16.mxu0 %v14187_v39  ;;  %v6384_v34 = vld [vmem:[#allocation15 + $0x1be0] sm:$0xff]  ;;  %v6378_v38 = vld [vmem:[#allocation15 + $0x1bb0] sm:$0xff] }
 0x91e   :  { %v6386_v39 = vld [vmem:[#allocation15 + $0x1bf0] sm:$0xff]  ;;  %v14177_v46 = vpack.c.bf16 %v6384_v34, %v6376_v33  ;;  %v14259_v33 = vpack.c.bf16 %v6757_v23, %v6749_v22 }
 0x91f   :  { %v14209_v47 = vpack.c.bf16 %v6386_v39, %v6378_v38  ;;  %v6748_v34 = vld [vmem:[#allocation15 + $0x1e10] sm:$0xff]  ;;  %v6771_v38 = vld [vmem:[#allocation15 + $0x1ec8] sm:$0xff]  ;;  %v6765_v39 = vld [vmem:[#allocation15 + $0x1e98] sm:$0xff] }
 0x920   :  { %14158 = vmatpush1.bf16.msra.mxu1 %v14157_v48  ;;  %14190 = vmatpush1.bf16.msra.mxu0 %v14189_v49  ;;  %v6682_v48 = vld [vmem:[#allocation15 + $0x1c00] sm:$0xff] }
 0x921   :  { %14160 = vmatprep.subr.bf16.mxu1 %v14159_v26  ;;  %14192 = vmatprep.subr.bf16.mxu0 %v14191_v52  ;;  %v6690_v49 = vld [vmem:[#allocation15 + $0x1c40] sm:$0xff]  ;;  %v6684_v26 = vld [vmem:[#allocation15 + $0x1c10] sm:$0xff] }
 0x922   :  { %v6692_v52 = vld [vmem:[#allocation15 + $0x1c50] sm:$0xff]  ;;  %v14213_v56 = vpack.c.bf16 %v6690_v49, %v6682_v48  ;;  %v14263_v48 = vpack.c.bf16 %v6773_v40, %v6765_v39 }
 0x923   :  { %v14245_v57 = vpack.c.bf16 %v6692_v52, %v6684_v26  ;;  %v6764_v49 = vld [vmem:[#allocation15 + $0x1e90] sm:$0xff]  ;;  %v6787_v26 = vld [vmem:[#allocation15 + $0x1f48] sm:$0xff]  ;;  %v6781_v52 = vld [vmem:[#allocation15 + $0x1f18] sm:$0xff] }
 0x924   :  { %14162 = vmatpush1.bf16.msra.mxu1 %v14161_v58  ;;  %14194 = vmatpush1.bf16.msra.mxu0 %v14193_v27  ;;  %v6698_v58 = vld [vmem:[#allocation15 + $0x1c80] sm:$0xff] }
 0x925   :  { %14164 = vmatprep.subr.bf16.mxu1 %v14163_v60  ;;  %14196 = vmatprep.subr.bf16.mxu0 %v14195_v6  ;;  %v6706_v27 = vld [vmem:[#allocation15 + $0x1cc0] sm:$0xff]  ;;  %v6700_v60 = vld [vmem:[#allocation15 + $0x1c90] sm:$0xff] }
 0x926   :  { %v6708_v6 = vld [vmem:[#allocation15 + $0x1cd0] sm:$0xff]  ;;  %v14217_v2 = vpack.c.bf16 %v6706_v27, %v6698_v58  ;;  %v14267_v58 = vpack.c.bf16 %v6789_v54, %v6781_v52 }
 0x927   :  { %v14249_v3 = vpack.c.bf16 %v6708_v6, %v6700_v60  ;;  %v6780_v27 = vld [vmem:[#allocation15 + $0x1f10] sm:$0xff]  ;;  %v6803_v60 = vld [vmem:[#allocation15 + $0x1fc8] sm:$0xff]  ;;  %v6797_v6 = vld [vmem:[#allocation15 + $0x1f98] sm:$0xff] }
 0x928   :  { %14166 = vmatpush1.bf16.msra.mxu1 %v14165_v62  ;;  %14198 = vmatpush1.bf16.msra.mxu0 %v14197_v9  ;;  %v6714_v62 = vld [vmem:[#allocation15 + $0x1d00] sm:$0xff] }
 0x929   :  { %14168 = vmatprep.subr.bf16.mxu1 %v14167_v53  ;;  %14200 = vmatprep.subr.bf16.mxu0 %v14199_v16  ;;  %v6722_v9 = vld [vmem:[#allocation15 + $0x1d40] sm:$0xff]  ;;  %v6716_v53 = vld [vmem:[#allocation15 + $0x1d10] sm:$0xff] }
 0x92a   :  { %v6724_v16 = vld [vmem:[#allocation15 + $0x1d50] sm:$0xff] }
 0x92b   :  { %v14253_v14 = vpack.c.bf16 %v6724_v16, %v6716_v53  ;;  %v6695_v53 = vld [vmem:[#allocation15 + $0x1c68] sm:$0xff]  ;;  %v6689_v16 = vld [vmem:[#allocation15 + $0x1c38] sm:$0xff] }
 0x92c   :  { %14170 = vmatpush1.bf16.msra.mxu1 %v14169_v25  ;;  %14202 = vmatpush1.bf16.msra.mxu0 %v14201_v17  ;;  %v6738_v25 = vld [vmem:[#allocation15 + $0x1dc0] sm:$0xff]  ;;  %v14223_v17 = vpack.c.bf16 %v6739_v12, %v6731_v11  ;;  %v6697_v11 = vld [vmem:[#allocation15 + $0x1c78] sm:$0xff] }
 0x92d   :  { %14172 = vmatprep.subr.bf16.mxu1 %v14171_v31  ;;  %14204 = vmatprep.subr.bf16.mxu0 %v14203_v20  ;;  %v6740_v31 = vld [vmem:[#allocation15 + $0x1dd0] sm:$0xff]  ;;  %v6747_v20 = vld [vmem:[#allocation15 + $0x1e08] sm:$0xff]  ;;  %v14225_v24 = vpack.c.bf16 %v6738_v25, %v6730_v15  ;;  %v14307_v15 = vpack.c.bf16 %v6697_v11, %v6689_v16 }
 0x92e   :  { %v14257_v28 = vpack.c.bf16 %v6740_v31, %v6732_v19  ;;  %v6688_v25 = vld [vmem:[#allocation15 + $0x1c30] sm:$0xff]  ;;  %v6711_v19 = vld [vmem:[#allocation15 + $0x1ce8] sm:$0xff]  ;;  %v6705_v31 = vld [vmem:[#allocation15 + $0x1cb8] sm:$0xff] }
 0x930   :  { %14174 = vmatpush1.bf16.msra.mxu1 %v14173_v30  ;;  %14206 = vmatpush1.bf16.msra.mxu0 %v14205_v32  ;;  %v6754_v30 = vld [vmem:[#allocation15 + $0x1e40] sm:$0xff]  ;;  %v14227_v32 = vpack.c.bf16 %v6755_v21, %v6747_v20  ;;  %v6713_v20 = vld [vmem:[#allocation15 + $0x1cf8] sm:$0xff] }
 0x931   :  { %14176 = vmatprep.subr.bf16.mxu1 %v14175_v36  ;;  %14208 = vmatprep.subr.bf16.mxu0 %v14207_v37  ;;  %v6756_v36 = vld [vmem:[#allocation15 + $0x1e50] sm:$0xff]  ;;  %v6763_v37 = vld [vmem:[#allocation15 + $0x1e88] sm:$0xff]  ;;  %v14229_v42 = vpack.c.bf16 %v6754_v30, %v6746_v29  ;;  %v16692_v21 = vld [vmem:[#allocation2 + $0xe] sm:$0x3]  ;;  %v14311_v30 = vpack.c.bf16 %v6713_v20, %v6705_v31 }
 0x932   :  { %v14261_v43 = vpack.c.bf16 %v6756_v36, %v6748_v34  ;;  %v6719_v34 = vld [vmem:[#allocation15 + $0x1d28] sm:$0xff] }
 0x933   :  { %v6727_v36 = vld [vmem:[#allocation15 + $0x1d68] sm:$0xff] }
 0x934   :  { %14178 = vmatpush1.bf16.msra.mxu1 %v14177_v46  ;;  %14210 = vmatpush1.bf16.msra.mxu0 %v14209_v47  ;;  %v6770_v46 = vld [vmem:[#allocation15 + $0x1ec0] sm:$0xff]  ;;  %v14231_v47 = vpack.c.bf16 %v6771_v38, %v6763_v37  ;;  %v6721_v37 = vld [vmem:[#allocation15 + $0x1d38] sm:$0xff] }
 0x935   :  { %14212 = vmatprep.subr.bf16.mxu1 %v14211_v50  ;;  %14244 = vmatprep.subr.bf16.mxu0 %v14243_v51  ;;  %v6772_v50 = vld [vmem:[#allocation15 + $0x1ed0] sm:$0xff]  ;;  %v6779_v51 = vld [vmem:[#allocation15 + $0x1f08] sm:$0xff]  ;;  %v14233_v55 = vpack.c.bf16 %v6770_v46, %v6762_v45  ;;  %v6729_v38 = vld [vmem:[#allocation15 + $0x1d78] sm:$0xff]  ;;  %v14283_v45 = vpack.c.bf16 %v6727_v36, %v6719_v34 }
 0x936   :  { %v14265_v8 = vpack.c.bf16 %v6772_v50, %v6764_v49  ;;  %v14315_v46 = vpack.c.bf16 %v6729_v38, %v6721_v37  ;;  %v6735_v49 = vld [vmem:[#allocation15 + $0x1da8] sm:$0xff]  ;;  %v6801_v34 = vld [vmem:[#allocation15 + $0x1fb8] sm:$0xff] }
 0x937   :  { %6595 = vmatmul.mubr.f32.vlgmr.msra.gmra.mrb[22].mxu1 %v16682_v35  ;;  %6666 = vmatmul.mubr.f32.vlgmr.msra.gmra.mrb[66].mxu0 %v16682_v35  ;;  %v14221_v35 = vpack.c.bf16 %v6722_v9, %v6714_v62  ;;  %v14271_v62 = vpack.c.bf16 %v6805_v61, %v6797_v6  ;;  %v6796_v9 = vld [vmem:[#allocation15 + $0x1f90] sm:$0xff]  ;;  %v6743_v50 = vld [vmem:[#allocation15 + $0x1de8] sm:$0xff]  ;;  %v6809_v36 = vld [vmem:[#allocation15 + $0x1ff8] sm:$0xff] }
 0x938   :  { %14214 = vmatpush1.bf16.msra.mxu1 %v14213_v56  ;;  %14246 = vmatpush1.bf16.msra.mxu0 %v14245_v57  ;;  %v6786_v56 = vld [vmem:[#allocation15 + $0x1f40] sm:$0xff]  ;;  %v14235_v57 = vpack.c.bf16 %v6787_v26, %v6779_v51  ;;  %v6737_v51 = vld [vmem:[#allocation15 + $0x1db8] sm:$0xff] }
 0x939   :  { %14216 = vmatprep.subr.bf16.mxu1 %v14215_v63  ;;  %14248 = vmatprep.subr.bf16.mxu0 %v14247_v59  ;;  %v6788_v63 = vld [vmem:[#allocation15 + $0x1f50] sm:$0xff]  ;;  %v6795_v59 = vld [vmem:[#allocation15 + $0x1f88] sm:$0xff]  ;;  %v14237_v4 = vpack.c.bf16 %v6786_v56, %v6778_v5  ;;  %v6745_v26 = vld [vmem:[#allocation15 + $0x1df8] sm:$0xff]  ;;  %v14287_v5 = vpack.c.bf16 %v6743_v50, %v6735_v49 }
 0x93a   :  { %6874 = vmatprep.mubr.f32.mxu1 %v15872_v41  ;;  %6945 = vmatprep.mubr.f32.mxu0 %v15872_v41  ;;  %v14269_v0 = vpack.c.bf16 %v6788_v63, %v6780_v27  ;;  %v14319_v56 = vpack.c.bf16 %v6745_v26, %v6737_v51  ;;  %v6751_v27 = vld [vmem:[#allocation15 + $0x1e28] sm:$0xff]  ;;  %v7107_v49 = vld [vmem:[#allocation15 + $0x2018] sm:$0xff] }
 0x93b   :  { %v6759_v63 = vld [vmem:[#allocation15 + $0x1e68] sm:$0xff]  ;;  %v7115_v50 = vld [vmem:[#allocation15 + $0x2058] sm:$0xff] }
 0x93c   :  { %14218 = vmatpush1.bf16.msra.mxu1 %v14217_v2  ;;  %14250 = vmatpush1.bf16.msra.mxu0 %v14249_v3  ;;  %v6802_v2 = vld [vmem:[#allocation15 + $0x1fc0] sm:$0xff]  ;;  %v14239_v3 = vpack.c.bf16 %v6803_v60, %v6795_v59  ;;  %v6753_v59 = vld [vmem:[#allocation15 + $0x1e38] sm:$0xff] }
 0x93d   :  { %14220 = vmatprep.subr.bf16.mxu1 %v14219_v10  ;;  %14252 = vmatprep.subr.bf16.mxu0 %v14251_v44  ;;  %v6804_v10 = vld [vmem:[#allocation15 + $0x1fd0] sm:$0xff]  ;;  %v6687_v44 = vld [vmem:[#allocation15 + $0x1c28] sm:$0xff]  ;;  %v14241_v12 = vpack.c.bf16 %v6802_v2, %v6794_v1  ;;  %v6761_v60 = vld [vmem:[#allocation15 + $0x1e78] sm:$0xff]  ;;  %v14291_v1 = vpack.c.bf16 %v6759_v63, %v6751_v27 }
 0x93e   :  { %v14273_v7 = vpack.c.bf16 %v6804_v10, %v6796_v9  ;;  %v14323_v2 = vpack.c.bf16 %v6761_v60, %v6753_v59  ;;  %v6767_v9 = vld [vmem:[#allocation15 + $0x1ea8] sm:$0xff]  ;;  %v7123_v27 = vld [vmem:[#allocation15 + $0x2098] sm:$0xff] }
 0x93f   :  { %v6775_v10 = vld [vmem:[#allocation15 + $0x1ee8] sm:$0xff]  ;;  %v7131_v63 = vld [vmem:[#allocation15 + $0x20d8] sm:$0xff] }
 0x940   :  { %14222 = vmatpush1.bf16.msra.mxu1 %v14221_v35  ;;  %14254 = vmatpush1.bf16.msra.mxu0 %v14253_v14  ;;  %v6694_v35 = vld [vmem:[#allocation15 + $0x1c60] sm:$0xff]  ;;  %v14275_v14 = vpack.c.bf16 %v6695_v53, %v6687_v44  ;;  %v6769_v44 = vld [vmem:[#allocation15 + $0x1eb8] sm:$0xff] }
 0x941   :  { %14224 = vmatprep.subr.bf16.mxu1 %v14223_v17  ;;  %14256 = vmatprep.subr.bf16.mxu0 %v14255_v18  ;;  %v6696_v17 = vld [vmem:[#allocation15 + $0x1c70] sm:$0xff]  ;;  %v6703_v18 = vld [vmem:[#allocation15 + $0x1ca8] sm:$0xff]  ;;  %v14277_v22 = vpack.c.bf16 %v6694_v35, %v6686_v13  ;;  %v6777_v53 = vld [vmem:[#allocation15 + $0x1ef8] sm:$0xff]  ;;  %v14295_v13 = vpack.c.bf16 %v6775_v10, %v6767_v9 }
 0x942   :  { %v14309_v23 = vpack.c.bf16 %v6696_v17, %v6688_v25  ;;  %v14279_v29 = vpack.c.bf16 %v6711_v19, %v6703_v18  ;;  %v14327_v35 = vpack.c.bf16 %v6777_v53, %v6769_v44  ;;  %v6783_v25 = vld [vmem:[#allocation15 + $0x1f28] sm:$0xff]  ;;  %v6785_v18 = vld [vmem:[#allocation15 + $0x1f38] sm:$0xff] }
 0x943   :  { %v6791_v17 = vld [vmem:[#allocation15 + $0x1f68] sm:$0xff]  ;;  %v6793_v19 = vld [vmem:[#allocation15 + $0x1f78] sm:$0xff] }
 0x944   :  { %14226 = vmatpush1.bf16.msra.mxu1 %v14225_v24  ;;  %14258 = vmatpush1.bf16.msra.mxu0 %v14257_v28  ;;  %v6702_v24 = vld [vmem:[#allocation15 + $0x1ca0] sm:$0xff]  ;;  %v7139_v9 = vld [vmem:[#allocation15 + $0x2118] sm:$0xff] }
 0x945   :  { %14228 = vmatprep.subr.bf16.mxu1 %v14227_v32  ;;  %14260 = vmatprep.subr.bf16.mxu0 %v14259_v33  ;;  %v6710_v28 = vld [vmem:[#allocation15 + $0x1ce0] sm:$0xff]  ;;  %v6704_v32 = vld [vmem:[#allocation15 + $0x1cb0] sm:$0xff]  ;;  %v7147_v10 = vld [vmem:[#allocation15 + $0x2158] sm:$0xff] }
 0x946   :  { %v6712_v33 = vld [vmem:[#allocation15 + $0x1cf0] sm:$0xff]  ;;  %v14281_v39 = vpack.c.bf16 %v6710_v28, %v6702_v24  ;;  %v14299_v24 = vpack.c.bf16 %v6791_v17, %v6783_v25  ;;  %v14331_v28 = vpack.c.bf16 %v6793_v19, %v6785_v18  ;;  %v7155_v25 = vld [vmem:[#allocation15 + $0x2198] sm:$0xff]  ;;  %v7152_v19 = vld [vmem:[#allocation15 + $0x2180] sm:$0xff] }
 0x947   :  { %v14313_v40 = vpack.c.bf16 %v6712_v33, %v6704_v32  ;;  %v6799_v32 = vld [vmem:[#allocation15 + $0x1fa8] sm:$0xff]  ;;  %v7163_v17 = vld [vmem:[#allocation15 + $0x21d8] sm:$0xff] }
 0x948   :  { %14230 = vmatpush1.bf16.msra.mxu1 %v14229_v42  ;;  %14262 = vmatpush1.bf16.msra.mxu0 %v14261_v43  ;;  %v6718_v42 = vld [vmem:[#allocation15 + $0x1d20] sm:$0xff]  ;;  %v6807_v33 = vld [vmem:[#allocation15 + $0x1fe8] sm:$0xff] }
 0x949   :  { %14232 = vmatprep.subr.bf16.mxu1 %v14231_v47  ;;  %14264 = vmatprep.subr.bf16.mxu0 %v14263_v48  ;;  %v6726_v43 = vld [vmem:[#allocation15 + $0x1d60] sm:$0xff]  ;;  %v6720_v47 = vld [vmem:[#allocation15 + $0x1d30] sm:$0xff] }
 0x94a   :  { %v6728_v48 = vld [vmem:[#allocation15 + $0x1d70] sm:$0xff]  ;;  %v14285_v52 = vpack.c.bf16 %v6726_v43, %v6718_v42  ;;  %v14303_v42 = vpack.c.bf16 %v6807_v33, %v6799_v32  ;;  %v14335_v43 = vpack.c.bf16 %v6809_v36, %v6801_v34  ;;  %v7179_v32 = vld [vmem:[#allocation15 + $0x2258] sm:$0xff]  ;;  %v7168_v36 = vld [vmem:[#allocation15 + $0x2200] sm:$0xff] }
 0x94b   :  { %v14317_v54 = vpack.c.bf16 %v6728_v48, %v6720_v47  ;;  %v7105_v47 = vld [vmem:[#allocation15 + $0x2008] sm:$0xff] }
 0x94c   :  { %14234 = vmatpush1.bf16.msra.mxu1 %v14233_v55  ;;  %14266 = vmatpush1.bf16.msra.mxu0 %v14265_v8  ;;  %v6734_v55 = vld [vmem:[#allocation15 + $0x1da0] sm:$0xff]  ;;  %v7113_v48 = vld [vmem:[#allocation15 + $0x2048] sm:$0xff] }
 0x94d   :  { %14236 = vmatprep.subr.bf16.mxu1 %v14235_v57  ;;  %14268 = vmatprep.subr.bf16.mxu0 %v14267_v58  ;;  %v6742_v8 = vld [vmem:[#allocation15 + $0x1de0] sm:$0xff]  ;;  %v6736_v57 = vld [vmem:[#allocation15 + $0x1db0] sm:$0xff] }
 0x94e   :  { %v6744_v58 = vld [vmem:[#allocation15 + $0x1df0] sm:$0xff]  ;;  %v14289_v6 = vpack.c.bf16 %v6742_v8, %v6734_v55  ;;  %v14339_v55 = vpack.c.bf16 %v7113_v48, %v7105_v47  ;;  %v14371_v8 = vpack.c.bf16 %v7115_v50, %v7107_v49  ;;  %v7195_v47 = vld [vmem:[#allocation15 + $0x22d8] sm:$0xff]  ;;  %v7184_v50 = vld [vmem:[#allocation15 + $0x2280] sm:$0xff] }
 0x94f   :  { %v14321_v61 = vpack.c.bf16 %v6744_v58, %v6736_v57  ;;  %v7121_v57 = vld [vmem:[#allocation15 + $0x2088] sm:$0xff] }
 0x950   :  { %14238 = vmatpush1.bf16.msra.mxu1 %v14237_v4  ;;  %14270 = vmatpush1.bf16.msra.mxu0 %v14269_v0  ;;  %v6750_v4 = vld [vmem:[#allocation15 + $0x1e20] sm:$0xff]  ;;  %v7129_v58 = vld [vmem:[#allocation15 + $0x20c8] sm:$0xff] }
 0x951   :  { %14240 = vmatprep.subr.bf16.mxu1 %v14239_v3  ;;  %14272 = vmatprep.subr.bf16.mxu0 %v14271_v62  ;;  %v6758_v0 = vld [vmem:[#allocation15 + $0x1e60] sm:$0xff]  ;;  %v6752_v3 = vld [vmem:[#allocation15 + $0x1e30] sm:$0xff] }
 0x952   :  { %v6760_v62 = vld [vmem:[#allocation15 + $0x1e70] sm:$0xff]  ;;  %v14293_v16 = vpack.c.bf16 %v6758_v0, %v6750_v4  ;;  %v14343_v4 = vpack.c.bf16 %v7129_v58, %v7121_v57  ;;  %v14375_v0 = vpack.c.bf16 %v7131_v63, %v7123_v27  ;;  %v7211_v57 = vld [vmem:[#allocation15 + $0x2358] sm:$0xff]  ;;  %v7200_v63 = vld [vmem:[#allocation15 + $0x2300] sm:$0xff] }
 0x953   :  { %v14325_v11 = vpack.c.bf16 %v6760_v62, %v6752_v3  ;;  %v7137_v3 = vld [vmem:[#allocation15 + $0x2108] sm:$0xff] }
 0x954   :  { %14242 = vmatpush1.bf16.msra.mxu1 %v14241_v12  ;;  %14274 = vmatpush1.bf16.msra.mxu0 %v14273_v7  ;;  %v6766_v12 = vld [vmem:[#allocation15 + $0x1ea0] sm:$0xff]  ;;  %v7145_v62 = vld [vmem:[#allocation15 + $0x2148] sm:$0xff] }
 0x955   :  { %14276 = vmatprep.subr.bf16.mxu1 %v14275_v14  ;;  %14308 = vmatprep.subr.bf16.mxu0 %v14307_v15  ;;  %v6774_v7 = vld [vmem:[#allocation15 + $0x1ee0] sm:$0xff]  ;;  %v6768_v14 = vld [vmem:[#allocation15 + $0x1eb0] sm:$0xff] }
 0x956   :  { %v6776_v15 = vld [vmem:[#allocation15 + $0x1ef0] sm:$0xff]  ;;  %v14297_v31 = vpack.c.bf16 %v6774_v7, %v6766_v12  ;;  %v14347_v12 = vpack.c.bf16 %v7145_v62, %v7137_v3  ;;  %v14379_v7 = vpack.c.bf16 %v7147_v10, %v7139_v9  ;;  %v7227_v3 = vld [vmem:[#allocation15 + $0x23d8] sm:$0xff]  ;;  %v7216_v10 = vld [vmem:[#allocation15 + $0x2380] sm:$0xff] }
 0x957   :  { %6875 = vmatmul.mubr.f32.vlgmr.msra.gmra.mrb[20].mxu1 %v16692_v21  ;;  %6946 = vmatmul.mubr.f32.vlgmr.msra.gmra.mrb[64].mxu0 %v16692_v21  ;;  %v14329_v20 = vpack.c.bf16 %v6776_v15, %v6768_v14  ;;  %v7153_v14 = vld [vmem:[#allocation15 + $0x2188] sm:$0xff] }
 0x958   :  { %14278 = vmatpush1.bf16.msra.mxu1 %v14277_v22  ;;  %14310 = vmatpush1.bf16.msra.mxu0 %v14309_v23  ;;  %v6782_v22 = vld [vmem:[#allocation15 + $0x1f20] sm:$0xff]  ;;  %v7161_v15 = vld [vmem:[#allocation15 + $0x21c8] sm:$0xff] }
 0x959   :  { %14280 = vmatprep.subr.bf16.mxu1 %v14279_v29  ;;  %14312 = vmatprep.subr.bf16.mxu0 %v14311_v30  ;;  %v6790_v23 = vld [vmem:[#allocation15 + $0x1f60] sm:$0xff]  ;;  %v6784_v29 = vld [vmem:[#allocation15 + $0x1f30] sm:$0xff] }
 0x95a   :  { %7016 = vmatprep.mubr.f32.mxu1 %v15872_v41  ;;  %7087 = vmatprep.mubr.f32.mxu0 %v15872_v41  ;;  %v6792_v30 = vld [vmem:[#allocation15 + $0x1f70] sm:$0xff]  ;;  %v14301_v37 = vpack.c.bf16 %v6790_v23, %v6782_v22  ;;  %v14383_v22 = vpack.c.bf16 %v7163_v17, %v7155_v25  ;;  %v7108_v17 = vld [vmem:[#allocation15 + $0x2020] sm:$0xff] }
 0x95b   :  { %v14333_v38 = vpack.c.bf16 %v6792_v30, %v6784_v29  ;;  %v7154_v23 = vld [vmem:[#allocation15 + $0x2190] sm:$0xff]  ;;  %v7177_v29 = vld [vmem:[#allocation15 + $0x2248] sm:$0xff]  ;;  %v7171_v30 = vld [vmem:[#allocation15 + $0x2218] sm:$0xff] }
 0x95c   :  { %14282 = vmatpush1.bf16.msra.mxu1 %v14281_v39  ;;  %14314 = vmatpush1.bf16.msra.mxu0 %v14313_v40  ;;  %v6798_v39 = vld [vmem:[#allocation15 + $0x1fa0] sm:$0xff] }
 0x95d   :  { %14284 = vmatprep.subr.bf16.mxu1 %v14283_v45  ;;  %14316 = vmatprep.subr.bf16.mxu0 %v14315_v46  ;;  %v6806_v40 = vld [vmem:[#allocation15 + $0x1fe0] sm:$0xff]  ;;  %v6800_v45 = vld [vmem:[#allocation15 + $0x1fb0] sm:$0xff] }
 0x95e   :  { %v6808_v46 = vld [vmem:[#allocation15 + $0x1ff0] sm:$0xff]  ;;  %v14305_v51 = vpack.c.bf16 %v6806_v40, %v6798_v39  ;;  %v14387_v39 = vpack.c.bf16 %v7179_v32, %v7171_v30 }
 0x95f   :  { %v14337_v26 = vpack.c.bf16 %v6808_v46, %v6800_v45  ;;  %v7170_v40 = vld [vmem:[#allocation15 + $0x2210] sm:$0xff]  ;;  %v7193_v45 = vld [vmem:[#allocation15 + $0x22c8] sm:$0xff]  ;;  %v7187_v46 = vld [vmem:[#allocation15 + $0x2298] sm:$0xff] }
 0x960   :  { %14286 = vmatpush1.bf16.msra.mxu1 %v14285_v52  ;;  %14318 = vmatpush1.bf16.msra.mxu0 %v14317_v54  ;;  %v7104_v52 = vld [vmem:[#allocation15 + $0x2000] sm:$0xff] }
 0x961   :  { %14288 = vmatprep.subr.bf16.mxu1 %v14287_v5  ;;  %14320 = vmatprep.subr.bf16.mxu0 %v14319_v56  ;;  %v7112_v54 = vld [vmem:[#allocation15 + $0x2040] sm:$0xff]  ;;  %v7106_v5 = vld [vmem:[#allocation15 + $0x2010] sm:$0xff] }
 0x962   :  { %v7114_v56 = vld [vmem:[#allocation15 + $0x2050] sm:$0xff]  ;;  %v14341_v59 = vpack.c.bf16 %v7112_v54, %v7104_v52  ;;  %v14391_v52 = vpack.c.bf16 %v7195_v47, %v7187_v46 }
 0x963   :  { %v14373_v60 = vpack.c.bf16 %v7114_v56, %v7106_v5  ;;  %v7186_v54 = vld [vmem:[#allocation15 + $0x2290] sm:$0xff]  ;;  %v7209_v5 = vld [vmem:[#allocation15 + $0x2348] sm:$0xff]  ;;  %v7203_v56 = vld [vmem:[#allocation15 + $0x2318] sm:$0xff] }
 0x964   :  { %14290 = vmatpush1.bf16.msra.mxu1 %v14289_v6  ;;  %14322 = vmatpush1.bf16.msra.mxu0 %v14321_v61  ;;  %v7120_v6 = vld [vmem:[#allocation15 + $0x2080] sm:$0xff] }
 0x965   :  { %14292 = vmatprep.subr.bf16.mxu1 %v14291_v1  ;;  %14324 = vmatprep.subr.bf16.mxu0 %v14323_v2  ;;  %v7128_v61 = vld [vmem:[#allocation15 + $0x20c0] sm:$0xff]  ;;  %v7122_v1 = vld [vmem:[#allocation15 + $0x2090] sm:$0xff] }
 0x966   :  { %v7130_v2 = vld [vmem:[#allocation15 + $0x20d0] sm:$0xff]  ;;  %v14345_v44 = vpack.c.bf16 %v7128_v61, %v7120_v6  ;;  %v14395_v6 = vpack.c.bf16 %v7211_v57, %v7203_v56 }
 0x967   :  { %v14377_v53 = vpack.c.bf16 %v7130_v2, %v7122_v1  ;;  %v7202_v61 = vld [vmem:[#allocation15 + $0x2310] sm:$0xff]  ;;  %v7225_v1 = vld [vmem:[#allocation15 + $0x23c8] sm:$0xff]  ;;  %v7219_v2 = vld [vmem:[#allocation15 + $0x2398] sm:$0xff] }
 0x968   :  { %14294 = vmatpush1.bf16.msra.mxu1 %v14293_v16  ;;  %14326 = vmatpush1.bf16.msra.mxu0 %v14325_v11  ;;  %v7136_v16 = vld [vmem:[#allocation15 + $0x2100] sm:$0xff] }
 0x969   :  { %14296 = vmatprep.subr.bf16.mxu1 %v14295_v13  ;;  %14328 = vmatprep.subr.bf16.mxu0 %v14327_v35  ;;  %v7144_v11 = vld [vmem:[#allocation15 + $0x2140] sm:$0xff]  ;;  %v7138_v13 = vld [vmem:[#allocation15 + $0x2110] sm:$0xff] }
 0x96a   :  { %v7146_v35 = vld [vmem:[#allocation15 + $0x2150] sm:$0xff] }
 0x96b   :  { %v14381_v18 = vpack.c.bf16 %v7146_v35, %v7138_v13  ;;  %v7117_v13 = vld [vmem:[#allocation15 + $0x2068] sm:$0xff]  ;;  %v7111_v35 = vld [vmem:[#allocation15 + $0x2038] sm:$0xff] }
 0x96c   :  { %14298 = vmatpush1.bf16.msra.mxu1 %v14297_v31  ;;  %14330 = vmatpush1.bf16.msra.mxu0 %v14329_v20  ;;  %v7160_v31 = vld [vmem:[#allocation15 + $0x21c0] sm:$0xff]  ;;  %v14351_v20 = vpack.c.bf16 %v7161_v15, %v7153_v14  ;;  %v7119_v14 = vld [vmem:[#allocation15 + $0x2078] sm:$0xff] }
 0x96d   :  { %14300 = vmatprep.subr.bf16.mxu1 %v14299_v24  ;;  %14332 = vmatprep.subr.bf16.mxu0 %v14331_v28  ;;  %v7162_v24 = vld [vmem:[#allocation15 + $0x21d0] sm:$0xff]  ;;  %v7169_v28 = vld [vmem:[#allocation15 + $0x2208] sm:$0xff]  ;;  %v14353_v33 = vpack.c.bf16 %v7160_v31, %v7152_v19  ;;  %v14435_v19 = vpack.c.bf16 %v7119_v14, %v7111_v35 }
 0x96e   :  { %v14385_v34 = vpack.c.bf16 %v7162_v24, %v7154_v23  ;;  %v7110_v31 = vld [vmem:[#allocation15 + $0x2030] sm:$0xff]  ;;  %v7133_v23 = vld [vmem:[#allocation15 + $0x20e8] sm:$0xff]  ;;  %v7127_v24 = vld [vmem:[#allocation15 + $0x20b8] sm:$0xff] }
 0x970   :  { %14302 = vmatpush1.bf16.msra.mxu1 %v14301_v37  ;;  %14334 = vmatpush1.bf16.msra.mxu0 %v14333_v38  ;;  %v7176_v37 = vld [vmem:[#allocation15 + $0x2240] sm:$0xff]  ;;  %v14355_v38 = vpack.c.bf16 %v7177_v29, %v7169_v28  ;;  %v7135_v28 = vld [vmem:[#allocation15 + $0x20f8] sm:$0xff] }
 0x971   :  { %14304 = vmatprep.subr.bf16.mxu1 %v14303_v42  ;;  %14336 = vmatprep.subr.bf16.mxu0 %v14335_v43  ;;  %v7178_v42 = vld [vmem:[#allocation15 + $0x2250] sm:$0xff]  ;;  %v7185_v43 = vld [vmem:[#allocation15 + $0x2288] sm:$0xff]  ;;  %v14357_v48 = vpack.c.bf16 %v7176_v37, %v7168_v36  ;;  %v14439_v37 = vpack.c.bf16 %v7135_v28, %v7127_v24 }
 0x972   :  { %v14389_v49 = vpack.c.bf16 %v7178_v42, %v7170_v40  ;;  %v16702_v29 = vld [vmem:[#allocation2 + $0x10] sm:$0x3] }
 0x973   :  { %v7141_v40 = vld [vmem:[#allocation15 + $0x2128] sm:$0xff] }
 0x974   :  { %14306 = vmatpush1.bf16.msra.mxu1 %v14305_v51  ;;  %14338 = vmatpush1.bf16.msra.mxu0 %v14337_v26  ;;  %v7192_v51 = vld [vmem:[#allocation15 + $0x22c0] sm:$0xff]  ;;  %v14359_v26 = vpack.c.bf16 %v7193_v45, %v7185_v43  ;;  %v7149_v42 = vld [vmem:[#allocation15 + $0x2168] sm:$0xff]  ;;  %v7143_v43 = vld [vmem:[#allocation15 + $0x2138] sm:$0xff] }
 0x975   :  { %14340 = vmatprep.subr.bf16.mxu1 %v14339_v55  ;;  %14372 = vmatprep.subr.bf16.mxu0 %v14371_v8  ;;  %v7194_v55 = vld [vmem:[#allocation15 + $0x22d0] sm:$0xff]  ;;  %v7201_v8 = vld [vmem:[#allocation15 + $0x2308] sm:$0xff]  ;;  %v14361_v58 = vpack.c.bf16 %v7192_v51, %v7184_v50  ;;  %v7151_v45 = vld [vmem:[#allocation15 + $0x2178] sm:$0xff]  ;;  %v14411_v50 = vpack.c.bf16 %v7149_v42, %v7141_v40 }
 0x976   :  { %v14393_v27 = vpack.c.bf16 %v7194_v55, %v7186_v54  ;;  %v14443_v51 = vpack.c.bf16 %v7151_v45, %v7143_v43  ;;  %v7157_v54 = vld [vmem:[#allocation15 + $0x21a8] sm:$0xff]  ;;  %v7223_v40 = vld [vmem:[#allocation15 + $0x23b8] sm:$0xff] }
 0x977   :  { %7017 = vmatmul.mubr.f32.vlgmr.msra.gmra.mrb[22].mxu1 %v16692_v21  ;;  %7088 = vmatmul.mubr.f32.vlgmr.msra.gmra.mrb[66].mxu0 %v16692_v21  ;;  %v14349_v21 = vpack.c.bf16 %v7144_v11, %v7136_v16  ;;  %v14399_v16 = vpack.c.bf16 %v7227_v3, %v7219_v2  ;;  %v7218_v11 = vld [vmem:[#allocation15 + $0x2390] sm:$0xff]  ;;  %v7165_v55 = vld [vmem:[#allocation15 + $0x21e8] sm:$0xff]  ;;  %v7231_v42 = vld [vmem:[#allocation15 + $0x23f8] sm:$0xff] }
 0x978   :  { %14342 = vmatpush1.bf16.msra.mxu1 %v14341_v59  ;;  %14374 = vmatpush1.bf16.msra.mxu0 %v14373_v60  ;;  %v7208_v59 = vld [vmem:[#allocation15 + $0x2340] sm:$0xff]  ;;  %v14363_v60 = vpack.c.bf16 %v7209_v5, %v7201_v8  ;;  %v7159_v8 = vld [vmem:[#allocation15 + $0x21b8] sm:$0xff] }
 0x979   :  { %14344 = vmatprep.subr.bf16.mxu1 %v14343_v4  ;;  %14376 = vmatprep.subr.bf16.mxu0 %v14375_v0  ;;  %v7210_v4 = vld [vmem:[#allocation15 + $0x2350] sm:$0xff]  ;;  %v7217_v0 = vld [vmem:[#allocation15 + $0x2388] sm:$0xff]  ;;  %v14365_v62 = vpack.c.bf16 %v7208_v59, %v7200_v63  ;;  %v7167_v5 = vld [vmem:[#allocation15 + $0x21f8] sm:$0xff]  ;;  %v14415_v63 = vpack.c.bf16 %v7165_v55, %v7157_v54 }
 0x97a   :  { %7296 = vmatprep.mubr.f32.mxu1 %v15872_v41  ;;  %7367 = vmatprep.mubr.f32.mxu0 %v15872_v41  ;;  %v14397_v9 = vpack.c.bf16 %v7210_v4, %v7202_v61  ;;  %v14447_v59 = vpack.c.bf16 %v7167_v5, %v7159_v8  ;;  %v7173_v61 = vld [vmem:[#allocation15 + $0x2228] sm:$0xff]  ;;  %v7529_v54 = vld [vmem:[#allocation15 + $0x2418] sm:$0xff] }
 0x97b   :  { %v7181_v4 = vld [vmem:[#allocation15 + $0x2268] sm:$0xff]  ;;  %v7537_v55 = vld [vmem:[#allocation15 + $0x2458] sm:$0xff] }
 0x97c   :  { %14346 = vmatpush1.bf16.msra.mxu1 %v14345_v44  ;;  %14378 = vmatpush1.bf16.msra.mxu0 %v14377_v53  ;;  %v7224_v44 = vld [vmem:[#allocation15 + $0x23c0] sm:$0xff]  ;;  %v14367_v53 = vpack.c.bf16 %v7225_v1, %v7217_v0  ;;  %v7175_v0 = vld [vmem:[#allocation15 + $0x2238] sm:$0xff] }
 0x97d   :  { %14348 = vmatprep.subr.bf16.mxu1 %v14347_v12  ;;  %14380 = vmatprep.subr.bf16.mxu0 %v14379_v7  ;;  %v7226_v12 = vld [vmem:[#allocation15 + $0x23d0] sm:$0xff]  ;;  %v7109_v7 = vld [vmem:[#allocation15 + $0x2028] sm:$0xff]  ;;  %v14369_v15 = vpack.c.bf16 %v7224_v44, %v7216_v10  ;;  %v7183_v1 = vld [vmem:[#allocation15 + $0x2278] sm:$0xff]  ;;  %v14419_v10 = vpack.c.bf16 %v7181_v4, %v7173_v61 }
 0x97e   :  { %v14401_v25 = vpack.c.bf16 %v7226_v12, %v7218_v11  ;;  %v14451_v44 = vpack.c.bf16 %v7183_v1, %v7175_v0  ;;  %v7189_v11 = vld [vmem:[#allocation15 + $0x22a8] sm:$0xff]  ;;  %v7545_v61 = vld [vmem:[#allocation15 + $0x2498] sm:$0xff] }
 0x97f   :  { %v7197_v12 = vld [vmem:[#allocation15 + $0x22e8] sm:$0xff]  ;;  %v7553_v4 = vld [vmem:[#allocation15 + $0x24d8] sm:$0xff] }
 0x980   :  { %14350 = vmatpush1.bf16.msra.mxu1 %v14349_v21  ;;  %14382 = vmatpush1.bf16.msra.mxu0 %v14381_v18  ;;  %v7116_v21 = vld [vmem:[#allocation15 + $0x2060] sm:$0xff]  ;;  %v14403_v18 = vpack.c.bf16 %v7117_v13, %v7109_v7  ;;  %v7191_v7 = vld [vmem:[#allocation15 + $0x22b8] sm:$0xff] }
 0x981   :  { %14352 = vmatprep.subr.bf16.mxu1 %v14351_v20  ;;  %14384 = vmatprep.subr.bf16.mxu0 %v14383_v22  ;;  %v7118_v20 = vld [vmem:[#allocation15 + $0x2070] sm:$0xff]  ;;  %v7125_v22 = vld [vmem:[#allocation15 + $0x20a8] sm:$0xff]  ;;  %v14405_v30 = vpack.c.bf16 %v7116_v21, %v7108_v17  ;;  %v7199_v13 = vld [vmem:[#allocation15 + $0x22f8] sm:$0xff]  ;;  %v14423_v17 = vpack.c.bf16 %v7197_v12, %v7189_v11 }
 0x982   :  { %v14437_v32 = vpack.c.bf16 %v7118_v20, %v7110_v31  ;;  %v14407_v36 = vpack.c.bf16 %v7133_v23, %v7125_v22  ;;  %v14455_v21 = vpack.c.bf16 %v7199_v13, %v7191_v7  ;;  %v7205_v31 = vld [vmem:[#allocation15 + $0x2328] sm:$0xff]  ;;  %v7207_v22 = vld [vmem:[#allocation15 + $0x2338] sm:$0xff] }
 0x983   :  { %v7213_v20 = vld [vmem:[#allocation15 + $0x2368] sm:$0xff]  ;;  %v7215_v23 = vld [vmem:[#allocation15 + $0x2378] sm:$0xff] }
 0x984   :  { %14354 = vmatpush1.bf16.msra.mxu1 %v14353_v33  ;;  %14386 = vmatpush1.bf16.msra.mxu0 %v14385_v34  ;;  %v7124_v33 = vld [vmem:[#allocation15 + $0x20a0] sm:$0xff]  ;;  %v7561_v11 = vld [vmem:[#allocation15 + $0x2518] sm:$0xff] }
 0x985   :  { %14356 = vmatprep.subr.bf16.mxu1 %v14355_v38  ;;  %14388 = vmatprep.subr.bf16.mxu0 %v14387_v39  ;;  %v7132_v34 = vld [vmem:[#allocation15 + $0x20e0] sm:$0xff]  ;;  %v7126_v38 = vld [vmem:[#allocation15 + $0x20b0] sm:$0xff]  ;;  %v7569_v12 = vld [vmem:[#allocation15 + $0x2558] sm:$0xff] }
 0x986   :  { %v7134_v39 = vld [vmem:[#allocation15 + $0x20f0] sm:$0xff]  ;;  %v14409_v46 = vpack.c.bf16 %v7132_v34, %v7124_v33  ;;  %v14427_v33 = vpack.c.bf16 %v7213_v20, %v7205_v31  ;;  %v14459_v34 = vpack.c.bf16 %v7215_v23, %v7207_v22  ;;  %v7577_v31 = vld [vmem:[#allocation15 + $0x2598] sm:$0xff]  ;;  %v7574_v23 = vld [vmem:[#allocation15 + $0x2580] sm:$0xff] }
 0x987   :  { %v14441_v47 = vpack.c.bf16 %v7134_v39, %v7126_v38  ;;  %v7221_v38 = vld [vmem:[#allocation15 + $0x23a8] sm:$0xff]  ;;  %v7585_v20 = vld [vmem:[#allocation15 + $0x25d8] sm:$0xff] }
 0x988   :  { %14358 = vmatpush1.bf16.msra.mxu1 %v14357_v48  ;;  %14390 = vmatpush1.bf16.msra.mxu0 %v14389_v49  ;;  %v7140_v48 = vld [vmem:[#allocation15 + $0x2120] sm:$0xff]  ;;  %v7229_v39 = vld [vmem:[#allocation15 + $0x23e8] sm:$0xff] }
 0x989   :  { %14360 = vmatprep.subr.bf16.mxu1 %v14359_v26  ;;  %14392 = vmatprep.subr.bf16.mxu0 %v14391_v52  ;;  %v7148_v49 = vld [vmem:[#allocation15 + $0x2160] sm:$0xff]  ;;  %v7142_v26 = vld [vmem:[#allocation15 + $0x2130] sm:$0xff] }
 0x98a   :  { %v7150_v52 = vld [vmem:[#allocation15 + $0x2170] sm:$0xff]  ;;  %v14413_v56 = vpack.c.bf16 %v7148_v49, %v7140_v48  ;;  %v14431_v48 = vpack.c.bf16 %v7229_v39, %v7221_v38  ;;  %v14463_v49 = vpack.c.bf16 %v7231_v42, %v7223_v40  ;;  %v7601_v38 = vld [vmem:[#allocation15 + $0x2658] sm:$0xff]  ;;  %v7590_v42 = vld [vmem:[#allocation15 + $0x2600] sm:$0xff] }
 0x98b   :  { %v14445_v57 = vpack.c.bf16 %v7150_v52, %v7142_v26  ;;  %v7527_v26 = vld [vmem:[#allocation15 + $0x2408] sm:$0xff] }
 0x98c   :  { %14362 = vmatpush1.bf16.msra.mxu1 %v14361_v58  ;;  %14394 = vmatpush1.bf16.msra.mxu0 %v14393_v27  ;;  %v7156_v58 = vld [vmem:[#allocation15 + $0x21a0] sm:$0xff]  ;;  %v7535_v52 = vld [vmem:[#allocation15 + $0x2448] sm:$0xff] }
 0x98d   :  { %14364 = vmatprep.subr.bf16.mxu1 %v14363_v60  ;;  %14396 = vmatprep.subr.bf16.mxu0 %v14395_v6  ;;  %v7164_v27 = vld [vmem:[#allocation15 + $0x21e0] sm:$0xff]  ;;  %v7158_v60 = vld [vmem:[#allocation15 + $0x21b0] sm:$0xff] }
 0x98e   :  { %v7166_v6 = vld [vmem:[#allocation15 + $0x21f0] sm:$0xff]  ;;  %v14417_v2 = vpack.c.bf16 %v7164_v27, %v7156_v58  ;;  %v14467_v58 = vpack.c.bf16 %v7535_v52, %v7527_v26  ;;  %v14499_v27 = vpack.c.bf16 %v7537_v55, %v7529_v54  ;;  %v7617_v26 = vld [vmem:[#allocation15 + $0x26d8] sm:$0xff]  ;;  %v7606_v55 = vld [vmem:[#allocation15 + $0x2680] sm:$0xff] }
 0x98f   :  { %v14449_v3 = vpack.c.bf16 %v7166_v6, %v7158_v60  ;;  %v7543_v60 = vld [vmem:[#allocation15 + $0x2488] sm:$0xff] }
 0x990   :  { %14366 = vmatpush1.bf16.msra.mxu1 %v14365_v62  ;;  %14398 = vmatpush1.bf16.msra.mxu0 %v14397_v9  ;;  %v7172_v62 = vld [vmem:[#allocation15 + $0x2220] sm:$0xff]  ;;  %v7551_v6 = vld [vmem:[#allocation15 + $0x24c8] sm:$0xff] }
 0x991   :  { %14368 = vmatprep.subr.bf16.mxu1 %v14367_v53  ;;  %14400 = vmatprep.subr.bf16.mxu0 %v14399_v16  ;;  %v7180_v9 = vld [vmem:[#allocation15 + $0x2260] sm:$0xff]  ;;  %v7174_v53 = vld [vmem:[#allocation15 + $0x2230] sm:$0xff] }
 0x992   :  { %v7182_v16 = vld [vmem:[#allocation15 + $0x2270] sm:$0xff]  ;;  %v14421_v35 = vpack.c.bf16 %v7180_v9, %v7172_v62  ;;  %v14471_v62 = vpack.c.bf16 %v7551_v6, %v7543_v60  ;;  %v14503_v9 = vpack.c.bf16 %v7553_v4, %v7545_v61  ;;  %v7633_v60 = vld [vmem:[#allocation15 + $0x2758] sm:$0xff]  ;;  %v7622_v4 = vld [vmem:[#allocation15 + $0x2700] sm:$0xff] }
 0x993   :  { %v14453_v14 = vpack.c.bf16 %v7182_v16, %v7174_v53  ;;  %v7559_v53 = vld [vmem:[#allocation15 + $0x2508] sm:$0xff] }
 0x994   :  { %14370 = vmatpush1.bf16.msra.mxu1 %v14369_v15  ;;  %14402 = vmatpush1.bf16.msra.mxu0 %v14401_v25  ;;  %v7188_v15 = vld [vmem:[#allocation15 + $0x22a0] sm:$0xff]  ;;  %v7567_v16 = vld [vmem:[#allocation15 + $0x2548] sm:$0xff] }
 0x995   :  { %14404 = vmatprep.subr.bf16.mxu1 %v14403_v18  ;;  %14436 = vmatprep.subr.bf16.mxu0 %v14435_v19  ;;  %v7196_v25 = vld [vmem:[#allocation15 + $0x22e0] sm:$0xff]  ;;  %v7190_v18 = vld [vmem:[#allocation15 + $0x22b0] sm:$0xff] }
 0x996   :  { %v7198_v19 = vld [vmem:[#allocation15 + $0x22f0] sm:$0xff]  ;;  %v14425_v24 = vpack.c.bf16 %v7196_v25, %v7188_v15  ;;  %v14475_v15 = vpack.c.bf16 %v7567_v16, %v7559_v53  ;;  %v14507_v25 = vpack.c.bf16 %v7569_v12, %v7561_v11  ;;  %v7649_v53 = vld [vmem:[#allocation15 + $0x27d8] sm:$0xff]  ;;  %v7638_v12 = vld [vmem:[#allocation15 + $0x2780] sm:$0xff] }
 0x997   :  { %7297 = vmatmul.mubr.f32.vlgmr.msra.gmra.mrb[20].mxu1 %v16702_v29  ;;  %7368 = vmatmul.mubr.f32.vlgmr.msra.gmra.mrb[64].mxu0 %v16702_v29  ;;  %v14457_v28 = vpack.c.bf16 %v7198_v19, %v7190_v18  ;;  %v7575_v18 = vld [vmem:[#allocation15 + $0x2588] sm:$0xff] }
 0x998   :  { %14406 = vmatpush1.bf16.msra.mxu1 %v14405_v30  ;;  %14438 = vmatpush1.bf16.msra.mxu0 %v14437_v32  ;;  %v7204_v30 = vld [vmem:[#allocation15 + $0x2320] sm:$0xff]  ;;  %v7583_v19 = vld [vmem:[#allocation15 + $0x25c8] sm:$0xff] }
 0x999   :  { %14408 = vmatprep.subr.bf16.mxu1 %v14407_v36  ;;  %14440 = vmatprep.subr.bf16.mxu0 %v14439_v37  ;;  %v7212_v32 = vld [vmem:[#allocation15 + $0x2360] sm:$0xff]  ;;  %v7206_v36 = vld [vmem:[#allocation15 + $0x2330] sm:$0xff] }
 0x99a   :  { %7438 = vmatprep.mubr.f32.mxu1 %v15872_v41  ;;  %7509 = vmatprep.mubr.f32.mxu0 %v15872_v41  ;;  %v7214_v37 = vld [vmem:[#allocation15 + $0x2370] sm:$0xff]  ;;  %v14429_v43 = vpack.c.bf16 %v7212_v32, %v7204_v30  ;;  %v14511_v30 = vpack.c.bf16 %v7585_v20, %v7577_v31  ;;  %v7530_v20 = vld [vmem:[#allocation15 + $0x2420] sm:$0xff] }
 0x99b   :  { %v14461_v45 = vpack.c.bf16 %v7214_v37, %v7206_v36  ;;  %v7576_v32 = vld [vmem:[#allocation15 + $0x2590] sm:$0xff]  ;;  %v7599_v36 = vld [vmem:[#allocation15 + $0x2648] sm:$0xff]  ;;  %v7593_v37 = vld [vmem:[#allocation15 + $0x2618] sm:$0xff] }
 0x99c   :  { %14410 = vmatpush1.bf16.msra.mxu1 %v14409_v46  ;;  %14442 = vmatpush1.bf16.msra.mxu0 %v14441_v47  ;;  %v7220_v46 = vld [vmem:[#allocation15 + $0x23a0] sm:$0xff] }
 0x99d   :  { %14412 = vmatprep.subr.bf16.mxu1 %v14411_v50  ;;  %14444 = vmatprep.subr.bf16.mxu0 %v14443_v51  ;;  %v7228_v47 = vld [vmem:[#allocation15 + $0x23e0] sm:$0xff]  ;;  %v7222_v50 = vld [vmem:[#allocation15 + $0x23b0] sm:$0xff] }
 0x99e   :  { %v7230_v51 = vld [vmem:[#allocation15 + $0x23f0] sm:$0xff]  ;;  %v14433_v8 = vpack.c.bf16 %v7228_v47, %v7220_v46  ;;  %v14515_v46 = vpack.c.bf16 %v7601_v38, %v7593_v37 }
 0x99f   :  { %v14465_v5 = vpack.c.bf16 %v7230_v51, %v7222_v50  ;;  %v7592_v47 = vld [vmem:[#allocation15 + $0x2610] sm:$0xff]  ;;  %v7615_v50 = vld [vmem:[#allocation15 + $0x26c8] sm:$0xff]  ;;  %v7609_v51 = vld [vmem:[#allocation15 + $0x2698] sm:$0xff] }
 0x9a0   :  { %14414 = vmatpush1.bf16.msra.mxu1 %v14413_v56  ;;  %14446 = vmatpush1.bf16.msra.mxu0 %v14445_v57  ;;  %v7526_v56 = vld [vmem:[#allocation15 + $0x2400] sm:$0xff] }
 0x9a1   :  { %14416 = vmatprep.subr.bf16.mxu1 %v14415_v63  ;;  %14448 = vmatprep.subr.bf16.mxu0 %v14447_v59  ;;  %v7534_v57 = vld [vmem:[#allocation15 + $0x2440] sm:$0xff]  ;;  %v7528_v63 = vld [vmem:[#allocation15 + $0x2410] sm:$0xff] }
 0x9a2   :  { %v7536_v59 = vld [vmem:[#allocation15 + $0x2450] sm:$0xff]  ;;  %v14469_v0 = vpack.c.bf16 %v7534_v57, %v7526_v56  ;;  %v14519_v56 = vpack.c.bf16 %v7617_v26, %v7609_v51 }
 0x9a3   :  { %v14501_v1 = vpack.c.bf16 %v7536_v59, %v7528_v63  ;;  %v7608_v57 = vld [vmem:[#allocation15 + $0x2690] sm:$0xff]  ;;  %v7631_v63 = vld [vmem:[#allocation15 + $0x2748] sm:$0xff]  ;;  %v7625_v59 = vld [vmem:[#allocation15 + $0x2718] sm:$0xff] }
 0x9a4   :  { %14418 = vmatpush1.bf16.msra.mxu1 %v14417_v2  ;;  %14450 = vmatpush1.bf16.msra.mxu0 %v14449_v3  ;;  %v7542_v2 = vld [vmem:[#allocation15 + $0x2480] sm:$0xff] }
 0x9a5   :  { %14420 = vmatprep.subr.bf16.mxu1 %v14419_v10  ;;  %14452 = vmatprep.subr.bf16.mxu0 %v14451_v44  ;;  %v7550_v3 = vld [vmem:[#allocation15 + $0x24c0] sm:$0xff]  ;;  %v7544_v10 = vld [vmem:[#allocation15 + $0x2490] sm:$0xff] }
 0x9a6   :  { %v7552_v44 = vld [vmem:[#allocation15 + $0x24d0] sm:$0xff]  ;;  %v14473_v7 = vpack.c.bf16 %v7550_v3, %v7542_v2  ;;  %v14523_v2 = vpack.c.bf16 %v7633_v60, %v7625_v59 }
 0x9a7   :  { %v14505_v13 = vpack.c.bf16 %v7552_v44, %v7544_v10  ;;  %v7624_v3 = vld [vmem:[#allocation15 + $0x2710] sm:$0xff]  ;;  %v7647_v10 = vld [vmem:[#allocation15 + $0x27c8] sm:$0xff]  ;;  %v7641_v44 = vld [vmem:[#allocation15 + $0x2798] sm:$0xff] }
 0x9a8   :  { %14422 = vmatpush1.bf16.msra.mxu1 %v14421_v35  ;;  %14454 = vmatpush1.bf16.msra.mxu0 %v14453_v14  ;;  %v7558_v35 = vld [vmem:[#allocation15 + $0x2500] sm:$0xff] }
 0x9a9   :  { %14424 = vmatprep.subr.bf16.mxu1 %v14423_v17  ;;  %14456 = vmatprep.subr.bf16.mxu0 %v14455_v21  ;;  %v7566_v14 = vld [vmem:[#allocation15 + $0x2540] sm:$0xff]  ;;  %v7560_v17 = vld [vmem:[#allocation15 + $0x2510] sm:$0xff] }
 0x9aa   :  { %v7568_v21 = vld [vmem:[#allocation15 + $0x2550] sm:$0xff] }
 0x9ab   :  { %v14509_v22 = vpack.c.bf16 %v7568_v21, %v7560_v17  ;;  %v7539_v17 = vld [vmem:[#allocation15 + $0x2468] sm:$0xff]  ;;  %v7533_v21 = vld [vmem:[#allocation15 + $0x2438] sm:$0xff] }
 0x9ac   :  { %14426 = vmatpush1.bf16.msra.mxu1 %v14425_v24  ;;  %14458 = vmatpush1.bf16.msra.mxu0 %v14457_v28  ;;  %v7582_v24 = vld [vmem:[#allocation15 + $0x25c0] sm:$0xff]  ;;  %v14479_v28 = vpack.c.bf16 %v7583_v19, %v7575_v18  ;;  %v7541_v18 = vld [vmem:[#allocation15 + $0x2478] sm:$0xff] }
 0x9ad   :  { %14428 = vmatprep.subr.bf16.mxu1 %v14427_v33  ;;  %14460 = vmatprep.subr.bf16.mxu0 %v14459_v34  ;;  %v7584_v33 = vld [vmem:[#allocation15 + $0x25d0] sm:$0xff]  ;;  %v7591_v34 = vld [vmem:[#allocation15 + $0x2608] sm:$0xff]  ;;  %v14481_v39 = vpack.c.bf16 %v7582_v24, %v7574_v23  ;;  %v14563_v23 = vpack.c.bf16 %v7541_v18, %v7533_v21 }
 0x9ae   :  { %v14513_v40 = vpack.c.bf16 %v7584_v33, %v7576_v32  ;;  %v7532_v24 = vld [vmem:[#allocation15 + $0x2430] sm:$0xff]  ;;  %v7555_v32 = vld [vmem:[#allocation15 + $0x24e8] sm:$0xff]  ;;  %v7549_v33 = vld [vmem:[#allocation15 + $0x24b8] sm:$0xff] }
 0x9b0   :  { %14430 = vmatpush1.bf16.msra.mxu1 %v14429_v43  ;;  %14462 = vmatpush1.bf16.msra.mxu0 %v14461_v45  ;;  %v7598_v43 = vld [vmem:[#allocation15 + $0x2640] sm:$0xff]  ;;  %v14483_v45 = vpack.c.bf16 %v7599_v36, %v7591_v34  ;;  %v7557_v34 = vld [vmem:[#allocation15 + $0x24f8] sm:$0xff]  ;;  %v16712_v36 = vld [vmem:[#allocation2 + $0x12] sm:$0x3] }
 0x9b1   :  { %14432 = vmatprep.subr.bf16.mxu1 %v14431_v48  ;;  %14464 = vmatprep.subr.bf16.mxu0 %v14463_v49  ;;  %v7600_v48 = vld [vmem:[#allocation15 + $0x2650] sm:$0xff]  ;;  %v7607_v49 = vld [vmem:[#allocation15 + $0x2688] sm:$0xff]  ;;  %v14485_v52 = vpack.c.bf16 %v7598_v43, %v7590_v42  ;;  %v14567_v43 = vpack.c.bf16 %v7557_v34, %v7549_v33 }
 0x9b2   :  { %v14517_v54 = vpack.c.bf16 %v7600_v48, %v7592_v47  ;;  %v7563_v47 = vld [vmem:[#allocation15 + $0x2528] sm:$0xff] }
 0x9b3   :  { %v7571_v48 = vld [vmem:[#allocation15 + $0x2568] sm:$0xff] }
 0x9b4   :  { %14434 = vmatpush1.bf16.msra.mxu1 %v14433_v8  ;;  %14466 = vmatpush1.bf16.msra.mxu0 %v14465_v5  ;;  %v7614_v8 = vld [vmem:[#allocation15 + $0x26c0] sm:$0xff]  ;;  %v14487_v5 = vpack.c.bf16 %v7615_v50, %v7607_v49  ;;  %v7565_v49 = vld [vmem:[#allocation15 + $0x2538] sm:$0xff] }
 0x9b5   :  { %14468 = vmatprep.subr.bf16.mxu1 %v14467_v58  ;;  %14500 = vmatprep.subr.bf16.mxu0 %v14499_v27  ;;  %v7616_v58 = vld [vmem:[#allocation15 + $0x26d0] sm:$0xff]  ;;  %v7623_v27 = vld [vmem:[#allocation15 + $0x2708] sm:$0xff]  ;;  %v14489_v6 = vpack.c.bf16 %v7614_v8, %v7606_v55  ;;  %v7573_v50 = vld [vmem:[#allocation15 + $0x2578] sm:$0xff]  ;;  %v14539_v55 = vpack.c.bf16 %v7571_v48, %v7563_v47 }
 0x9b6   :  { %v14521_v61 = vpack.c.bf16 %v7616_v58, %v7608_v57  ;;  %v14571_v8 = vpack.c.bf16 %v7573_v50, %v7565_v49  ;;  %v7579_v57 = vld [vmem:[#allocation15 + $0x25a8] sm:$0xff]  ;;  %v7645_v47 = vld [vmem:[#allocation15 + $0x27b8] sm:$0xff] }
 0x9b7   :  { %7439 = vmatmul.mubr.f32.vlgmr.msra.gmra.mrb[22].mxu1 %v16702_v29  ;;  %7510 = vmatmul.mubr.f32.vlgmr.msra.gmra.mrb[66].mxu0 %v16702_v29  ;;  %v14477_v29 = vpack.c.bf16 %v7566_v14, %v7558_v35  ;;  %v14527_v35 = vpack.c.bf16 %v7649_v53, %v7641_v44  ;;  %v7640_v14 = vld [vmem:[#allocation15 + $0x2790] sm:$0xff]  ;;  %v7587_v58 = vld [vmem:[#allocation15 + $0x25e8] sm:$0xff]  ;;  %v7653_v48 = vld [vmem:[#allocation15 + $0x27f8] sm:$0xff] }
 0x9b8   :  { %14470 = vmatpush1.bf16.msra.mxu1 %v14469_v0  ;;  %14502 = vmatpush1.bf16.msra.mxu0 %v14501_v1  ;;  %v7630_v0 = vld [vmem:[#allocation15 + $0x2740] sm:$0xff]  ;;  %v14491_v1 = vpack.c.bf16 %v7631_v63, %v7623_v27  ;;  %v7581_v27 = vld [vmem:[#allocation15 + $0x25b8] sm:$0xff] }
 0x9b9   :  { %14472 = vmatprep.subr.bf16.mxu1 %v14471_v62  ;;  %14504 = vmatprep.subr.bf16.mxu0 %v14503_v9  ;;  %v7632_v62 = vld [vmem:[#allocation15 + $0x2750] sm:$0xff]  ;;  %v7639_v9 = vld [vmem:[#allocation15 + $0x2788] sm:$0xff]  ;;  %v14493_v16 = vpack.c.bf16 %v7630_v0, %v7622_v4  ;;  %v7589_v63 = vld [vmem:[#allocation15 + $0x25f8] sm:$0xff]  ;;  %v14543_v4 = vpack.c.bf16 %v7587_v58, %v7579_v57 }
 0x9ba   :  { %7718 = vmatprep.mubr.f32.mxu1 %v15872_v41  ;;  %7789 = vmatprep.mubr.f32.mxu0 %v15872_v41  ;;  %v14525_v11 = vpack.c.bf16 %v7632_v62, %v7624_v3  ;;  %v14575_v0 = vpack.c.bf16 %v7589_v63, %v7581_v27  ;;  %v7595_v3 = vld [vmem:[#allocation15 + $0x2628] sm:$0xff]  ;;  %v7951_v57 = vld [vmem:[#allocation15 + $0x2818] sm:$0xff] }
 0x9bb   :  { %v7603_v62 = vld [vmem:[#allocation15 + $0x2668] sm:$0xff]  ;;  %v7959_v58 = vld [vmem:[#allocation15 + $0x2858] sm:$0xff] }
 0x9bc   :  { %14474 = vmatpush1.bf16.msra.mxu1 %v14473_v7  ;;  %14506 = vmatpush1.bf16.msra.mxu0 %v14505_v13  ;;  %v7646_v7 = vld [vmem:[#allocation15 + $0x27c0] sm:$0xff]  ;;  %v14495_v13 = vpack.c.bf16 %v7647_v10, %v7639_v9  ;;  %v7597_v9 = vld [vmem:[#allocation15 + $0x2638] sm:$0xff] }
 0x9bd   :  { %14476 = vmatprep.subr.bf16.mxu1 %v14475_v15  ;;  %14508 = vmatprep.subr.bf16.mxu0 %v14507_v25  ;;  %v7648_v15 = vld [vmem:[#allocation15 + $0x27d0] sm:$0xff]  ;;  %v7531_v25 = vld [vmem:[#allocation15 + $0x2428] sm:$0xff]  ;;  %v14497_v19 = vpack.c.bf16 %v7646_v7, %v7638_v12  ;;  %v7605_v10 = vld [vmem:[#allocation15 + $0x2678] sm:$0xff]  ;;  %v14547_v12 = vpack.c.bf16 %v7603_v62, %v7595_v3 }
 0x9be   :  { %v14529_v31 = vpack.c.bf16 %v7648_v15, %v7640_v14  ;;  %v14579_v7 = vpack.c.bf16 %v7605_v10, %v7597_v9  ;;  %v7611_v14 = vld [vmem:[#allocation15 + $0x26a8] sm:$0xff]  ;;  %v7967_v3 = vld [vmem:[#allocation15 + $0x2898] sm:$0xff] }
 0x9bf   :  { %v7619_v15 = vld [vmem:[#allocation15 + $0x26e8] sm:$0xff]  ;;  %v7975_v62 = vld [vmem:[#allocation15 + $0x28d8] sm:$0xff] }
 0x9c0   :  { %14478 = vmatpush1.bf16.msra.mxu1 %v14477_v29  ;;  %14510 = vmatpush1.bf16.msra.mxu0 %v14509_v22  ;;  %v7538_v29 = vld [vmem:[#allocation15 + $0x2460] sm:$0xff]  ;;  %v14531_v22 = vpack.c.bf16 %v7539_v17, %v7531_v25  ;;  %v7613_v25 = vld [vmem:[#allocation15 + $0x26b8] sm:$0xff] }
 0x9c1   :  { %14480 = vmatprep.subr.bf16.mxu1 %v14479_v28  ;;  %14512 = vmatprep.subr.bf16.mxu0 %v14511_v30  ;;  %v7540_v28 = vld [vmem:[#allocation15 + $0x2470] sm:$0xff]  ;;  %v7547_v30 = vld [vmem:[#allocation15 + $0x24a8] sm:$0xff]  ;;  %v14533_v37 = vpack.c.bf16 %v7538_v29, %v7530_v20  ;;  %v7621_v17 = vld [vmem:[#allocation15 + $0x26f8] sm:$0xff]  ;;  %v14551_v20 = vpack.c.bf16 %v7619_v15, %v7611_v14 }
 0x9c2   :  { %v14565_v38 = vpack.c.bf16 %v7540_v28, %v7532_v24  ;;  %v14535_v42 = vpack.c.bf16 %v7555_v32, %v7547_v30  ;;  %v14583_v29 = vpack.c.bf16 %v7621_v17, %v7613_v25  ;;  %v7627_v24 = vld [vmem:[#allocation15 + $0x2728] sm:$0xff]  ;;  %v7629_v30 = vld [vmem:[#allocation15 + $0x2738] sm:$0xff] }
 0x9c3   :  { %v7635_v28 = vld [vmem:[#allocation15 + $0x2768] sm:$0xff]  ;;  %v7637_v32 = vld [vmem:[#allocation15 + $0x2778] sm:$0xff] }
 0x9c4   :  { %14482 = vmatpush1.bf16.msra.mxu1 %v14481_v39  ;;  %14514 = vmatpush1.bf16.msra.mxu0 %v14513_v40  ;;  %v7546_v39 = vld [vmem:[#allocation15 + $0x24a0] sm:$0xff]  ;;  %v7983_v14 = vld [vmem:[#allocation15 + $0x2918] sm:$0xff] }
 0x9c5   :  { %14484 = vmatprep.subr.bf16.mxu1 %v14483_v45  ;;  %14516 = vmatprep.subr.bf16.mxu0 %v14515_v46  ;;  %v7554_v40 = vld [vmem:[#allocation15 + $0x24e0] sm:$0xff]  ;;  %v7548_v45 = vld [vmem:[#allocation15 + $0x24b0] sm:$0xff]  ;;  %v7991_v15 = vld [vmem:[#allocation15 + $0x2958] sm:$0xff] }
 0x9c6   :  { %v7556_v46 = vld [vmem:[#allocation15 + $0x24f0] sm:$0xff]  ;;  %v14537_v51 = vpack.c.bf16 %v7554_v40, %v7546_v39  ;;  %v14555_v39 = vpack.c.bf16 %v7635_v28, %v7627_v24  ;;  %v14587_v40 = vpack.c.bf16 %v7637_v32, %v7629_v30  ;;  %v7999_v24 = vld [vmem:[#allocation15 + $0x2998] sm:$0xff]  ;;  %v7996_v32 = vld [vmem:[#allocation15 + $0x2980] sm:$0xff] }
 0x9c7   :  { %v14569_v26 = vpack.c.bf16 %v7556_v46, %v7548_v45  ;;  %v7643_v45 = vld [vmem:[#allocation15 + $0x27a8] sm:$0xff]  ;;  %v8007_v28 = vld [vmem:[#allocation15 + $0x29d8] sm:$0xff] }
 0x9c8   :  { %14486 = vmatpush1.bf16.msra.mxu1 %v14485_v52  ;;  %14518 = vmatpush1.bf16.msra.mxu0 %v14517_v54  ;;  %v7562_v52 = vld [vmem:[#allocation15 + $0x2520] sm:$0xff]  ;;  %v7651_v46 = vld [vmem:[#allocation15 + $0x27e8] sm:$0xff] }
 0x9c9   :  { %14488 = vmatprep.subr.bf16.mxu1 %v14487_v5  ;;  %14520 = vmatprep.subr.bf16.mxu0 %v14519_v56  ;;  %v7570_v54 = vld [vmem:[#allocation15 + $0x2560] sm:$0xff]  ;;  %v7564_v5 = vld [vmem:[#allocation15 + $0x2530] sm:$0xff] }
 0x9ca   :  { %v7572_v56 = vld [vmem:[#allocation15 + $0x2570] sm:$0xff]  ;;  %v14541_v59 = vpack.c.bf16 %v7570_v54, %v7562_v52  ;;  %v14559_v52 = vpack.c.bf16 %v7651_v46, %v7643_v45  ;;  %v14591_v54 = vpack.c.bf16 %v7653_v48, %v7645_v47  ;;  %v8023_v45 = vld [vmem:[#allocation15 + $0x2a58] sm:$0xff]  ;;  %v8012_v48 = vld [vmem:[#allocation15 + $0x2a00] sm:$0xff] }
 0x9cb   :  { %v14573_v60 = vpack.c.bf16 %v7572_v56, %v7564_v5  ;;  %v7949_v5 = vld [vmem:[#allocation15 + $0x2808] sm:$0xff] }
 0x9cc   :  { %14490 = vmatpush1.bf16.msra.mxu1 %v14489_v6  ;;  %14522 = vmatpush1.bf16.msra.mxu0 %v14521_v61  ;;  %v7578_v6 = vld [vmem:[#allocation15 + $0x25a0] sm:$0xff]  ;;  %v7957_v56 = vld [vmem:[#allocation15 + $0x2848] sm:$0xff] }
 0x9cd   :  { %14492 = vmatprep.subr.bf16.mxu1 %v14491_v1  ;;  %14524 = vmatprep.subr.bf16.mxu0 %v14523_v2  ;;  %v7586_v61 = vld [vmem:[#allocation15 + $0x25e0] sm:$0xff]  ;;  %v7580_v1 = vld [vmem:[#allocation15 + $0x25b0] sm:$0xff] }
 0x9ce   :  { %v7588_v2 = vld [vmem:[#allocation15 + $0x25f0] sm:$0xff]  ;;  %v14545_v44 = vpack.c.bf16 %v7586_v61, %v7578_v6  ;;  %v14595_v6 = vpack.c.bf16 %v7957_v56, %v7949_v5  ;;  %v14627_v61 = vpack.c.bf16 %v7959_v58, %v7951_v57  ;;  %v8039_v5 = vld [vmem:[#allocation15 + $0x2ad8] sm:$0xff]  ;;  %v8028_v58 = vld [vmem:[#allocation15 + $0x2a80] sm:$0xff] }
 0x9cf   :  { %v14577_v53 = vpack.c.bf16 %v7588_v2, %v7580_v1  ;;  %v7965_v1 = vld [vmem:[#allocation15 + $0x2888] sm:$0xff] }
 0x9d0   :  { %14494 = vmatpush1.bf16.msra.mxu1 %v14493_v16  ;;  %14526 = vmatpush1.bf16.msra.mxu0 %v14525_v11  ;;  %v7594_v16 = vld [vmem:[#allocation15 + $0x2620] sm:$0xff]  ;;  %v7973_v2 = vld [vmem:[#allocation15 + $0x28c8] sm:$0xff] }
 0x9d1   :  { %14496 = vmatprep.subr.bf16.mxu1 %v14495_v13  ;;  %14528 = vmatprep.subr.bf16.mxu0 %v14527_v35  ;;  %v7602_v11 = vld [vmem:[#allocation15 + $0x2660] sm:$0xff]  ;;  %v7596_v13 = vld [vmem:[#allocation15 + $0x2630] sm:$0xff] }
 0x9d2   :  { %v7604_v35 = vld [vmem:[#allocation15 + $0x2670] sm:$0xff]  ;;  %v14549_v21 = vpack.c.bf16 %v7602_v11, %v7594_v16  ;;  %v14599_v16 = vpack.c.bf16 %v7973_v2, %v7965_v1  ;;  %v14631_v11 = vpack.c.bf16 %v7975_v62, %v7967_v3  ;;  %v8055_v1 = vld [vmem:[#allocation15 + $0x2b58] sm:$0xff]  ;;  %v8044_v62 = vld [vmem:[#allocation15 + $0x2b00] sm:$0xff] }
 0x9d3   :  { %v14581_v18 = vpack.c.bf16 %v7604_v35, %v7596_v13  ;;  %v7981_v13 = vld [vmem:[#allocation15 + $0x2908] sm:$0xff] }
 0x9d4   :  { %14498 = vmatpush1.bf16.msra.mxu1 %v14497_v19  ;;  %14530 = vmatpush1.bf16.msra.mxu0 %v14529_v31  ;;  %v7610_v19 = vld [vmem:[#allocation15 + $0x26a0] sm:$0xff]  ;;  %v7989_v35 = vld [vmem:[#allocation15 + $0x2948] sm:$0xff] }
 0x9d5   :  { %14532 = vmatprep.subr.bf16.mxu1 %v14531_v22  ;;  %14564 = vmatprep.subr.bf16.mxu0 %v14563_v23  ;;  %v7618_v31 = vld [vmem:[#allocation15 + $0x26e0] sm:$0xff]  ;;  %v7612_v22 = vld [vmem:[#allocation15 + $0x26b0] sm:$0xff] }
 0x9d6   :  { %v7620_v23 = vld [vmem:[#allocation15 + $0x26f0] sm:$0xff]  ;;  %v14553_v33 = vpack.c.bf16 %v7618_v31, %v7610_v19  ;;  %v14603_v19 = vpack.c.bf16 %v7989_v35, %v7981_v13  ;;  %v14635_v31 = vpack.c.bf16 %v7991_v15, %v7983_v14  ;;  %v8071_v13 = vld [vmem:[#allocation15 + $0x2bd8] sm:$0xff]  ;;  %v8060_v15 = vld [vmem:[#allocation15 + $0x2b80] sm:$0xff] }
 0x9d7   :  { %7719 = vmatmul.mubr.f32.vlgmr.msra.gmra.mrb[20].mxu1 %v16712_v36  ;;  %7790 = vmatmul.mubr.f32.vlgmr.msra.gmra.mrb[64].mxu0 %v16712_v36  ;;  %v14585_v34 = vpack.c.bf16 %v7620_v23, %v7612_v22  ;;  %v7997_v22 = vld [vmem:[#allocation15 + $0x2988] sm:$0xff] }
 0x9d8   :  { %14534 = vmatpush1.bf16.msra.mxu1 %v14533_v37  ;;  %14566 = vmatpush1.bf16.msra.mxu0 %v14565_v38  ;;  %v7626_v37 = vld [vmem:[#allocation15 + $0x2720] sm:$0xff]  ;;  %v8005_v23 = vld [vmem:[#allocation15 + $0x29c8] sm:$0xff] }
 0x9d9   :  { %14536 = vmatprep.subr.bf16.mxu1 %v14535_v42  ;;  %14568 = vmatprep.subr.bf16.mxu0 %v14567_v43  ;;  %v7634_v38 = vld [vmem:[#allocation15 + $0x2760] sm:$0xff]  ;;  %v7628_v42 = vld [vmem:[#allocation15 + $0x2730] sm:$0xff] }
 0x9da   :  { %7860 = vmatprep.mubr.f32.mxu1 %v15872_v41  ;;  %7931 = vmatprep.mubr.f32.mxu0 %v15872_v41  ;;  %v7636_v43 = vld [vmem:[#allocation15 + $0x2770] sm:$0xff]  ;;  %v14557_v49 = vpack.c.bf16 %v7634_v38, %v7626_v37  ;;  %v14639_v37 = vpack.c.bf16 %v8007_v28, %v7999_v24  ;;  %v7952_v28 = vld [vmem:[#allocation15 + $0x2820] sm:$0xff] }
 0x9db   :  { %v14589_v50 = vpack.c.bf16 %v7636_v43, %v7628_v42  ;;  %v7998_v38 = vld [vmem:[#allocation15 + $0x2990] sm:$0xff]  ;;  %v8021_v42 = vld [vmem:[#allocation15 + $0x2a48] sm:$0xff]  ;;  %v8015_v43 = vld [vmem:[#allocation15 + $0x2a18] sm:$0xff] }
 0x9dc   :  { %14538 = vmatpush1.bf16.msra.mxu1 %v14537_v51  ;;  %14570 = vmatpush1.bf16.msra.mxu0 %v14569_v26  ;;  %v7642_v51 = vld [vmem:[#allocation15 + $0x27a0] sm:$0xff] }
 0x9dd   :  { %14540 = vmatprep.subr.bf16.mxu1 %v14539_v55  ;;  %14572 = vmatprep.subr.bf16.mxu0 %v14571_v8  ;;  %v7650_v26 = vld [vmem:[#allocation15 + $0x27e0] sm:$0xff]  ;;  %v7644_v55 = vld [vmem:[#allocation15 + $0x27b0] sm:$0xff] }
 0x9de   :  { %v7652_v8 = vld [vmem:[#allocation15 + $0x27f0] sm:$0xff]  ;;  %v14561_v27 = vpack.c.bf16 %v7650_v26, %v7642_v51  ;;  %v14643_v51 = vpack.c.bf16 %v8023_v45, %v8015_v43 }
 0x9df   :  { %v14593_v63 = vpack.c.bf16 %v7652_v8, %v7644_v55  ;;  %v8014_v26 = vld [vmem:[#allocation15 + $0x2a10] sm:$0xff]  ;;  %v8037_v55 = vld [vmem:[#allocation15 + $0x2ac8] sm:$0xff]  ;;  %v8031_v8 = vld [vmem:[#allocation15 + $0x2a98] sm:$0xff] }
 0x9e0   :  { %14542 = vmatpush1.bf16.msra.mxu1 %v14541_v59  ;;  %14574 = vmatpush1.bf16.msra.mxu0 %v14573_v60  ;;  %v7948_v59 = vld [vmem:[#allocation15 + $0x2800] sm:$0xff] }
 0x9e1   :  { %14544 = vmatprep.subr.bf16.mxu1 %v14543_v4  ;;  %14576 = vmatprep.subr.bf16.mxu0 %v14575_v0  ;;  %v7956_v60 = vld [vmem:[#allocation15 + $0x2840] sm:$0xff]  ;;  %v7950_v4 = vld [vmem:[#allocation15 + $0x2810] sm:$0xff] }
 0x9e2   :  { %v7958_v0 = vld [vmem:[#allocation15 + $0x2850] sm:$0xff]  ;;  %v14597_v9 = vpack.c.bf16 %v7956_v60, %v7948_v59  ;;  %v14647_v59 = vpack.c.bf16 %v8039_v5, %v8031_v8 }
 0x9e3   :  { %v14629_v10 = vpack.c.bf16 %v7958_v0, %v7950_v4  ;;  %v8030_v60 = vld [vmem:[#allocation15 + $0x2a90] sm:$0xff]  ;;  %v8053_v4 = vld [vmem:[#allocation15 + $0x2b48] sm:$0xff]  ;;  %v8047_v0 = vld [vmem:[#allocation15 + $0x2b18] sm:$0xff] }
 0x9e4   :  { %14546 = vmatpush1.bf16.msra.mxu1 %v14545_v44  ;;  %14578 = vmatpush1.bf16.msra.mxu0 %v14577_v53  ;;  %v7964_v44 = vld [vmem:[#allocation15 + $0x2880] sm:$0xff] }
 0x9e5   :  { %14548 = vmatprep.subr.bf16.mxu1 %v14547_v12  ;;  %14580 = vmatprep.subr.bf16.mxu0 %v14579_v7  ;;  %v7972_v53 = vld [vmem:[#allocation15 + $0x28c0] sm:$0xff]  ;;  %v7966_v12 = vld [vmem:[#allocation15 + $0x2890] sm:$0xff] }
 0x9e6   :  { %v7974_v7 = vld [vmem:[#allocation15 + $0x28d0] sm:$0xff]  ;;  %v14601_v25 = vpack.c.bf16 %v7972_v53, %v7964_v44  ;;  %v14651_v44 = vpack.c.bf16 %v8055_v1, %v8047_v0 }
 0x9e7   :  { %v14633_v17 = vpack.c.bf16 %v7974_v7, %v7966_v12  ;;  %v8046_v53 = vld [vmem:[#allocation15 + $0x2b10] sm:$0xff]  ;;  %v8069_v12 = vld [vmem:[#allocation15 + $0x2bc8] sm:$0xff]  ;;  %v8063_v7 = vld [vmem:[#allocation15 + $0x2b98] sm:$0xff] }
 0x9e8   :  { %14550 = vmatpush1.bf16.msra.mxu1 %v14549_v21  ;;  %14582 = vmatpush1.bf16.msra.mxu0 %v14581_v18  ;;  %v7980_v21 = vld [vmem:[#allocation15 + $0x2900] sm:$0xff] }
 0x9e9   :  { %14552 = vmatprep.subr.bf16.mxu1 %v14551_v20  ;;  %14584 = vmatprep.subr.bf16.mxu0 %v14583_v29  ;;  %v7988_v18 = vld [vmem:[#allocation15 + $0x2940] sm:$0xff]  ;;  %v7982_v20 = vld [vmem:[#allocation15 + $0x2910] sm:$0xff] }
 0x9ea   :  { %v7990_v29 = vld [vmem:[#allocation15 + $0x2950] sm:$0xff] }
 0x9eb   :  { %v14637_v30 = vpack.c.bf16 %v7990_v29, %v7982_v20  ;;  %v7961_v20 = vld [vmem:[#allocation15 + $0x2868] sm:$0xff]  ;;  %v7955_v29 = vld [vmem:[#allocation15 + $0x2838] sm:$0xff] }
 0x9ec   :  { %14554 = vmatpush1.bf16.msra.mxu1 %v14553_v33  ;;  %14586 = vmatpush1.bf16.msra.mxu0 %v14585_v34  ;;  %v8004_v33 = vld [vmem:[#allocation15 + $0x29c0] sm:$0xff]  ;;  %v14607_v34 = vpack.c.bf16 %v8005_v23, %v7997_v22  ;;  %v7963_v22 = vld [vmem:[#allocation15 + $0x2878] sm:$0xff] }
 0x9ed   :  { %14556 = vmatprep.subr.bf16.mxu1 %v14555_v39  ;;  %14588 = vmatprep.subr.bf16.mxu0 %v14587_v40  ;;  %v8006_v39 = vld [vmem:[#allocation15 + $0x29d0] sm:$0xff]  ;;  %v8013_v40 = vld [vmem:[#allocation15 + $0x2a08] sm:$0xff]  ;;  %v14609_v46 = vpack.c.bf16 %v8004_v33, %v7996_v32  ;;  %v14691_v32 = vpack.c.bf16 %v7963_v22, %v7955_v29 }
 0x9ee   :  { %v14641_v47 = vpack.c.bf16 %v8006_v39, %v7998_v38  ;;  %v7954_v33 = vld [vmem:[#allocation15 + $0x2830] sm:$0xff]  ;;  %v7977_v38 = vld [vmem:[#allocation15 + $0x28e8] sm:$0xff]  ;;  %v7971_v39 = vld [vmem:[#allocation15 + $0x28b8] sm:$0xff] }
 0x9f0   :  { %14558 = vmatpush1.bf16.msra.mxu1 %v14557_v49  ;;  %14590 = vmatpush1.bf16.msra.mxu0 %v14589_v50  ;;  %v8020_v49 = vld [vmem:[#allocation15 + $0x2a40] sm:$0xff]  ;;  %v14611_v50 = vpack.c.bf16 %v8021_v42, %v8013_v40  ;;  %v7979_v40 = vld [vmem:[#allocation15 + $0x28f8] sm:$0xff]  ;;  %v16722_v42 = vld [vmem:[#allocation2 + $0x14] sm:$0x3] }
 0x9f1   :  { %14560 = vmatprep.subr.bf16.mxu1 %v14559_v52  ;;  %14592 = vmatprep.subr.bf16.mxu0 %v14591_v54  ;;  %v8022_v52 = vld [vmem:[#allocation15 + $0x2a50] sm:$0xff]  ;;  %v8029_v54 = vld [vmem:[#allocation15 + $0x2a88] sm:$0xff]  ;;  %v14613_v56 = vpack.c.bf16 %v8020_v49, %v8012_v48  ;;  %v14695_v49 = vpack.c.bf16 %v7979_v40, %v7971_v39 }
 0x9f2   :  { %v14645_v57 = vpack.c.bf16 %v8022_v52, %v8014_v26  ;;  %v7985_v26 = vld [vmem:[#allocation15 + $0x2928] sm:$0xff] }
 0x9f3   :  { %v7993_v52 = vld [vmem:[#allocation15 + $0x2968] sm:$0xff] }
 0x9f4   :  { %14562 = vmatpush1.bf16.msra.mxu1 %v14561_v27  ;;  %14594 = vmatpush1.bf16.msra.mxu0 %v14593_v63  ;;  %v8036_v27 = vld [vmem:[#allocation15 + $0x2ac0] sm:$0xff]  ;;  %v14615_v63 = vpack.c.bf16 %v8037_v55, %v8029_v54  ;;  %v7987_v54 = vld [vmem:[#allocation15 + $0x2938] sm:$0xff] }
 0x9f5   :  { %14596 = vmatprep.subr.bf16.mxu1 %v14595_v6  ;;  %14628 = vmatprep.subr.bf16.mxu0 %v14627_v61  ;;  %v8038_v6 = vld [vmem:[#allocation15 + $0x2ad0] sm:$0xff]  ;;  %v8045_v61 = vld [vmem:[#allocation15 + $0x2b08] sm:$0xff]  ;;  %v14617_v2 = vpack.c.bf16 %v8036_v27, %v8028_v58  ;;  %v7995_v55 = vld [vmem:[#allocation15 + $0x2978] sm:$0xff]  ;;  %v14667_v58 = vpack.c.bf16 %v7993_v52, %v7985_v26 }
 0x9f6   :  { %v14649_v3 = vpack.c.bf16 %v8038_v6, %v8030_v60  ;;  %v14699_v27 = vpack.c.bf16 %v7995_v55, %v7987_v54  ;;  %v8001_v60 = vld [vmem:[#allocation15 + $0x29a8] sm:$0xff]  ;;  %v8067_v26 = vld [vmem:[#allocation15 + $0x2bb8] sm:$0xff] }
 0x9f7   :  { %7861 = vmatmul.mubr.f32.vlgmr.msra.gmra.mrb[22].mxu1 %v16712_v36  ;;  %7932 = vmatmul.mubr.f32.vlgmr.msra.gmra.mrb[66].mxu0 %v16712_v36  ;;  %v14605_v36 = vpack.c.bf16 %v7988_v18, %v7980_v21  ;;  %v14655_v21 = vpack.c.bf16 %v8071_v13, %v8063_v7  ;;  %v8062_v18 = vld [vmem:[#allocation15 + $0x2b90] sm:$0xff]  ;;  %v8009_v6 = vld [vmem:[#allocation15 + $0x29e8] sm:$0xff]  ;;  %v8075_v52 = vld [vmem:[#allocation15 + $0x2bf8] sm:$0xff] }
 0x9f8   :  { %14598 = vmatpush1.bf16.msra.mxu1 %v14597_v9  ;;  %14630 = vmatpush1.bf16.msra.mxu0 %v14629_v10  ;;  %v8052_v9 = vld [vmem:[#allocation15 + $0x2b40] sm:$0xff]  ;;  %v14619_v10 = vpack.c.bf16 %v8053_v4, %v8045_v61  ;;  %v8003_v61 = vld [vmem:[#allocation15 + $0x29b8] sm:$0xff] }
 0x9f9   :  { %14600 = vmatprep.subr.bf16.mxu1 %v14599_v16  ;;  %14632 = vmatprep.subr.bf16.mxu0 %v14631_v11  ;;  %v8054_v16 = vld [vmem:[#allocation15 + $0x2b50] sm:$0xff]  ;;  %v8061_v11 = vld [vmem:[#allocation15 + $0x2b88] sm:$0xff]  ;;  %v14621_v35 = vpack.c.bf16 %v8052_v9, %v8044_v62  ;;  %v8011_v4 = vld [vmem:[#allocation15 + $0x29f8] sm:$0xff]  ;;  %v14671_v62 = vpack.c.bf16 %v8009_v6, %v8001_v60 }
 0x9fa   :  { %8140 = vmatprep.mubr.f32.mxu1 %v15872_v41  ;;  %8211 = vmatprep.mubr.f32.mxu0 %v15872_v41  ;;  %v14653_v14 = vpack.c.bf16 %v8054_v16, %v8046_v53  ;;  %v14703_v9 = vpack.c.bf16 %v8011_v4, %v8003_v61  ;;  %v8017_v53 = vld [vmem:[#allocation15 + $0x2a28] sm:$0xff]  ;;  %v8373_v60 = vld [vmem:[#allocation15 + $0x2c18] sm:$0xff] }
 0x9fb   :  { %v8025_v16 = vld [vmem:[#allocation15 + $0x2a68] sm:$0xff]  ;;  %v8381_v6 = vld [vmem:[#allocation15 + $0x2c58] sm:$0xff] }
 0x9fc   :  { %14602 = vmatpush1.bf16.msra.mxu1 %v14601_v25  ;;  %14634 = vmatpush1.bf16.msra.mxu0 %v14633_v17  ;;  %v8068_v25 = vld [vmem:[#allocation15 + $0x2bc0] sm:$0xff]  ;;  %v14623_v17 = vpack.c.bf16 %v8069_v12, %v8061_v11  ;;  %v8019_v11 = vld [vmem:[#allocation15 + $0x2a38] sm:$0xff] }
 0x9fd   :  { %14604 = vmatprep.subr.bf16.mxu1 %v14603_v19  ;;  %14636 = vmatprep.subr.bf16.mxu0 %v14635_v31  ;;  %v8070_v19 = vld [vmem:[#allocation15 + $0x2bd0] sm:$0xff]  ;;  %v7953_v31 = vld [vmem:[#allocation15 + $0x2828] sm:$0xff]  ;;  %v14625_v23 = vpack.c.bf16 %v8068_v25, %v8060_v15  ;;  %v8027_v12 = vld [vmem:[#allocation15 + $0x2a78] sm:$0xff]  ;;  %v14675_v15 = vpack.c.bf16 %v8025_v16, %v8017_v53 }
 0x9fe   :  { %v14657_v24 = vpack.c.bf16 %v8070_v19, %v8062_v18  ;;  %v14707_v25 = vpack.c.bf16 %v8027_v12, %v8019_v11  ;;  %v8033_v18 = vld [vmem:[#allocation15 + $0x2aa8] sm:$0xff]  ;;  %v8389_v53 = vld [vmem:[#allocation15 + $0x2c98] sm:$0xff] }
 0x9ff   :  { %v8041_v19 = vld [vmem:[#allocation15 + $0x2ae8] sm:$0xff]  ;;  %v8397_v16 = vld [vmem:[#allocation15 + $0x2cd8] sm:$0xff] }
 0xa00   :  { %14606 = vmatpush1.bf16.msra.mxu1 %v14605_v36  ;;  %14638 = vmatpush1.bf16.msra.mxu0 %v14637_v30  ;;  %v7960_v36 = vld [vmem:[#allocation15 + $0x2860] sm:$0xff]  ;;  %v14659_v30 = vpack.c.bf16 %v7961_v20, %v7953_v31  ;;  %v8035_v31 = vld [vmem:[#allocation15 + $0x2ab8] sm:$0xff] }
 0xa01   :  { %14608 = vmatprep.subr.bf16.mxu1 %v14607_v34  ;;  %14640 = vmatprep.subr.bf16.mxu0 %v14639_v37  ;;  %v7962_v34 = vld [vmem:[#allocation15 + $0x2870] sm:$0xff]  ;;  %v7969_v37 = vld [vmem:[#allocation15 + $0x28a8] sm:$0xff]  ;;  %v14661_v43 = vpack.c.bf16 %v7960_v36, %v7952_v28  ;;  %v8043_v20 = vld [vmem:[#allocation15 + $0x2af8] sm:$0xff]  ;;  %v14679_v28 = vpack.c.bf16 %v8041_v19, %v8033_v18 }
 0xa02   :  { %v14693_v45 = vpack.c.bf16 %v7962_v34, %v7954_v33  ;;  %v14663_v48 = vpack.c.bf16 %v7977_v38, %v7969_v37  ;;  %v14711_v36 = vpack.c.bf16 %v8043_v20, %v8035_v31  ;;  %v8049_v33 = vld [vmem:[#allocation15 + $0x2b28] sm:$0xff]  ;;  %v8051_v37 = vld [vmem:[#allocation15 + $0x2b38] sm:$0xff] }
 0xa03   :  { %v8057_v34 = vld [vmem:[#allocation15 + $0x2b68] sm:$0xff]  ;;  %v8059_v38 = vld [vmem:[#allocation15 + $0x2b78] sm:$0xff] }
 0xa04   :  { %14610 = vmatpush1.bf16.msra.mxu1 %v14609_v46  ;;  %14642 = vmatpush1.bf16.msra.mxu0 %v14641_v47  ;;  %v7968_v46 = vld [vmem:[#allocation15 + $0x28a0] sm:$0xff]  ;;  %v8405_v18 = vld [vmem:[#allocation15 + $0x2d18] sm:$0xff] }
 0xa05   :  { %14612 = vmatprep.subr.bf16.mxu1 %v14611_v50  ;;  %14644 = vmatprep.subr.bf16.mxu0 %v14643_v51  ;;  %v7976_v47 = vld [vmem:[#allocation15 + $0x28e0] sm:$0xff]  ;;  %v7970_v50 = vld [vmem:[#allocation15 + $0x28b0] sm:$0xff]  ;;  %v8413_v19 = vld [vmem:[#allocation15 + $0x2d58] sm:$0xff] }
 0xa06   :  { %v7978_v51 = vld [vmem:[#allocation15 + $0x28f0] sm:$0xff]  ;;  %v14665_v8 = vpack.c.bf16 %v7976_v47, %v7968_v46  ;;  %v14683_v46 = vpack.c.bf16 %v8057_v34, %v8049_v33  ;;  %v14715_v47 = vpack.c.bf16 %v8059_v38, %v8051_v37  ;;  %v8421_v33 = vld [vmem:[#allocation15 + $0x2d98] sm:$0xff]  ;;  %v8418_v38 = vld [vmem:[#allocation15 + $0x2d80] sm:$0xff] }
 0xa07   :  { %v14697_v5 = vpack.c.bf16 %v7978_v51, %v7970_v50  ;;  %v8065_v50 = vld [vmem:[#allocation15 + $0x2ba8] sm:$0xff]  ;;  %v8429_v34 = vld [vmem:[#allocation15 + $0x2dd8] sm:$0xff] }
 0xa08   :  { %14614 = vmatpush1.bf16.msra.mxu1 %v14613_v56  ;;  %14646 = vmatpush1.bf16.msra.mxu0 %v14645_v57  ;;  %v7984_v56 = vld [vmem:[#allocation15 + $0x2920] sm:$0xff]  ;;  %v8073_v51 = vld [vmem:[#allocation15 + $0x2be8] sm:$0xff] }
 0xa09   :  { %14616 = vmatprep.subr.bf16.mxu1 %v14615_v63  ;;  %14648 = vmatprep.subr.bf16.mxu0 %v14647_v59  ;;  %v7992_v57 = vld [vmem:[#allocation15 + $0x2960] sm:$0xff]  ;;  %v7986_v63 = vld [vmem:[#allocation15 + $0x2930] sm:$0xff] }
 0xa0a   :  { %v7994_v59 = vld [vmem:[#allocation15 + $0x2970] sm:$0xff]  ;;  %v14669_v0 = vpack.c.bf16 %v7992_v57, %v7984_v56  ;;  %v14687_v56 = vpack.c.bf16 %v8073_v51, %v8065_v50  ;;  %v14719_v57 = vpack.c.bf16 %v8075_v52, %v8067_v26  ;;  %v8445_v50 = vld [vmem:[#allocation15 + $0x2e58] sm:$0xff]  ;;  %v8434_v52 = vld [vmem:[#allocation15 + $0x2e00] sm:$0xff] }
 0xa0b   :  { %v14701_v1 = vpack.c.bf16 %v7994_v59, %v7986_v63  ;;  %v8371_v63 = vld [vmem:[#allocation15 + $0x2c08] sm:$0xff] }
 0xa0c   :  { %14618 = vmatpush1.bf16.msra.mxu1 %v14617_v2  ;;  %14650 = vmatpush1.bf16.msra.mxu0 %v14649_v3  ;;  %v8000_v2 = vld [vmem:[#allocation15 + $0x29a0] sm:$0xff]  ;;  %v8379_v59 = vld [vmem:[#allocation15 + $0x2c48] sm:$0xff] }
 0xa0d   :  { %14620 = vmatprep.subr.bf16.mxu1 %v14619_v10  ;;  %14652 = vmatprep.subr.bf16.mxu0 %v14651_v44  ;;  %v8008_v3 = vld [vmem:[#allocation15 + $0x29e0] sm:$0xff]  ;;  %v8002_v10 = vld [vmem:[#allocation15 + $0x29b0] sm:$0xff] }
 0xa0e   :  { %v8010_v44 = vld [vmem:[#allocation15 + $0x29f0] sm:$0xff]  ;;  %v14673_v7 = vpack.c.bf16 %v8008_v3, %v8000_v2  ;;  %v14723_v2 = vpack.c.bf16 %v8379_v59, %v8371_v63  ;;  %v14755_v3 = vpack.c.bf16 %v8381_v6, %v8373_v60  ;;  %v8461_v63 = vld [vmem:[#allocation15 + $0x2ed8] sm:$0xff]  ;;  %v8450_v6 = vld [vmem:[#allocation15 + $0x2e80] sm:$0xff] }
 0xa0f   :  { %v14705_v13 = vpack.c.bf16 %v8010_v44, %v8002_v10  ;;  %v8387_v10 = vld [vmem:[#allocation15 + $0x2c88] sm:$0xff] }
 0xa10   :  { %14622 = vmatpush1.bf16.msra.mxu1 %v14621_v35  ;;  %14654 = vmatpush1.bf16.msra.mxu0 %v14653_v14  ;;  %v8016_v35 = vld [vmem:[#allocation15 + $0x2a20] sm:$0xff]  ;;  %v8395_v44 = vld [vmem:[#allocation15 + $0x2cc8] sm:$0xff] }
 0xa11   :  { %14624 = vmatprep.subr.bf16.mxu1 %v14623_v17  ;;  %14656 = vmatprep.subr.bf16.mxu0 %v14655_v21  ;;  %v8024_v14 = vld [vmem:[#allocation15 + $0x2a60] sm:$0xff]  ;;  %v8018_v17 = vld [vmem:[#allocation15 + $0x2a30] sm:$0xff] }
 0xa12   :  { %v8026_v21 = vld [vmem:[#allocation15 + $0x2a70] sm:$0xff]  ;;  %v14677_v29 = vpack.c.bf16 %v8024_v14, %v8016_v35  ;;  %v14727_v35 = vpack.c.bf16 %v8395_v44, %v8387_v10  ;;  %v14759_v14 = vpack.c.bf16 %v8397_v16, %v8389_v53  ;;  %v8477_v10 = vld [vmem:[#allocation15 + $0x2f58] sm:$0xff]  ;;  %v8466_v16 = vld [vmem:[#allocation15 + $0x2f00] sm:$0xff] }
 0xa13   :  { %v14709_v22 = vpack.c.bf16 %v8026_v21, %v8018_v17  ;;  %v8403_v17 = vld [vmem:[#allocation15 + $0x2d08] sm:$0xff] }
 0xa14   :  { %14626 = vmatpush1.bf16.msra.mxu1 %v14625_v23  ;;  %14658 = vmatpush1.bf16.msra.mxu0 %v14657_v24  ;;  %v8032_v23 = vld [vmem:[#allocation15 + $0x2aa0] sm:$0xff]  ;;  %v8411_v21 = vld [vmem:[#allocation15 + $0x2d48] sm:$0xff] }
 0xa15   :  { %14660 = vmatprep.subr.bf16.mxu1 %v14659_v30  ;;  %14692 = vmatprep.subr.bf16.mxu0 %v14691_v32  ;;  %v8040_v24 = vld [vmem:[#allocation15 + $0x2ae0] sm:$0xff]  ;;  %v8034_v30 = vld [vmem:[#allocation15 + $0x2ab0] sm:$0xff] }
 0xa16   :  { %v8042_v32 = vld [vmem:[#allocation15 + $0x2af0] sm:$0xff]  ;;  %v14681_v39 = vpack.c.bf16 %v8040_v24, %v8032_v23  ;;  %v14731_v23 = vpack.c.bf16 %v8411_v21, %v8403_v17  ;;  %v14763_v24 = vpack.c.bf16 %v8413_v19, %v8405_v18  ;;  %v8493_v17 = vld [vmem:[#allocation15 + $0x2fd8] sm:$0xff]  ;;  %v8482_v19 = vld [vmem:[#allocation15 + $0x2f80] sm:$0xff] }
 0xa17   :  { %8141 = vmatmul.mubr.f32.vlgmr.msra.gmra.mrb[20].mxu1 %v16722_v42  ;;  %8212 = vmatmul.mubr.f32.vlgmr.msra.gmra.mrb[64].mxu0 %v16722_v42  ;;  %v14713_v40 = vpack.c.bf16 %v8042_v32, %v8034_v30  ;;  %v8419_v30 = vld [vmem:[#allocation15 + $0x2d88] sm:$0xff] }
 0xa18   :  { %14662 = vmatpush1.bf16.msra.mxu1 %v14661_v43  ;;  %14694 = vmatpush1.bf16.msra.mxu0 %v14693_v45  ;;  %v8048_v43 = vld [vmem:[#allocation15 + $0x2b20] sm:$0xff]  ;;  %v8427_v32 = vld [vmem:[#allocation15 + $0x2dc8] sm:$0xff] }
 0xa19   :  { %14664 = vmatprep.subr.bf16.mxu1 %v14663_v48  ;;  %14696 = vmatprep.subr.bf16.mxu0 %v14695_v49  ;;  %v8056_v45 = vld [vmem:[#allocation15 + $0x2b60] sm:$0xff]  ;;  %v8050_v48 = vld [vmem:[#allocation15 + $0x2b30] sm:$0xff] }
 0xa1a   :  { %8282 = vmatprep.mubr.f32.mxu1 %v15872_v41  ;;  %8353 = vmatprep.mubr.f32.mxu0 %v15872_v41  ;;  %v8058_v49 = vld [vmem:[#allocation15 + $0x2b70] sm:$0xff]  ;;  %v14685_v54 = vpack.c.bf16 %v8056_v45, %v8048_v43  ;;  %v14767_v43 = vpack.c.bf16 %v8429_v34, %v8421_v33  ;;  %v8374_v34 = vld [vmem:[#allocation15 + $0x2c20] sm:$0xff] }
 0xa1b   :  { %v14717_v55 = vpack.c.bf16 %v8058_v49, %v8050_v48  ;;  %v8420_v45 = vld [vmem:[#allocation15 + $0x2d90] sm:$0xff]  ;;  %v8443_v48 = vld [vmem:[#allocation15 + $0x2e48] sm:$0xff]  ;;  %v8437_v49 = vld [vmem:[#allocation15 + $0x2e18] sm:$0xff] }
 0xa1c   :  { %14666 = vmatpush1.bf16.msra.mxu1 %v14665_v8  ;;  %14698 = vmatpush1.bf16.msra.mxu0 %v14697_v5  ;;  %v8064_v8 = vld [vmem:[#allocation15 + $0x2ba0] sm:$0xff] }
 0xa1d   :  { %14668 = vmatprep.subr.bf16.mxu1 %v14667_v58  ;;  %14700 = vmatprep.subr.bf16.mxu0 %v14699_v27  ;;  %v8072_v5 = vld [vmem:[#allocation15 + $0x2be0] sm:$0xff]  ;;  %v8066_v58 = vld [vmem:[#allocation15 + $0x2bb0] sm:$0xff] }
 0xa1e   :  { %v8074_v27 = vld [vmem:[#allocation15 + $0x2bf0] sm:$0xff]  ;;  %v14689_v61 = vpack.c.bf16 %v8072_v5, %v8064_v8  ;;  %v14771_v8 = vpack.c.bf16 %v8445_v50, %v8437_v49 }
 0xa1f   :  { %v14721_v4 = vpack.c.bf16 %v8074_v27, %v8066_v58  ;;  %v8436_v5 = vld [vmem:[#allocation15 + $0x2e10] sm:$0xff]  ;;  %v8459_v58 = vld [vmem:[#allocation15 + $0x2ec8] sm:$0xff]  ;;  %v8453_v27 = vld [vmem:[#allocation15 + $0x2e98] sm:$0xff] }
 0xa20   :  { %14670 = vmatpush1.bf16.msra.mxu1 %v14669_v0  ;;  %14702 = vmatpush1.bf16.msra.mxu0 %v14701_v1  ;;  %v8370_v0 = vld [vmem:[#allocation15 + $0x2c00] sm:$0xff] }
 0xa21   :  { %14672 = vmatprep.subr.bf16.mxu1 %v14671_v62  ;;  %14704 = vmatprep.subr.bf16.mxu0 %v14703_v9  ;;  %v8378_v1 = vld [vmem:[#allocation15 + $0x2c40] sm:$0xff]  ;;  %v8372_v62 = vld [vmem:[#allocation15 + $0x2c10] sm:$0xff] }
 0xa22   :  { %v8380_v9 = vld [vmem:[#allocation15 + $0x2c50] sm:$0xff]  ;;  %v14725_v11 = vpack.c.bf16 %v8378_v1, %v8370_v0  ;;  %v14775_v0 = vpack.c.bf16 %v8461_v63, %v8453_v27 }
 0xa23   :  { %v14757_v12 = vpack.c.bf16 %v8380_v9, %v8372_v62  ;;  %v8452_v1 = vld [vmem:[#allocation15 + $0x2e90] sm:$0xff]  ;;  %v8475_v62 = vld [vmem:[#allocation15 + $0x2f48] sm:$0xff]  ;;  %v8469_v9 = vld [vmem:[#allocation15 + $0x2f18] sm:$0xff] }
 0xa24   :  { %14674 = vmatpush1.bf16.msra.mxu1 %v14673_v7  ;;  %14706 = vmatpush1.bf16.msra.mxu0 %v14705_v13  ;;  %v8386_v7 = vld [vmem:[#allocation15 + $0x2c80] sm:$0xff] }
 0xa25   :  { %14676 = vmatprep.subr.bf16.mxu1 %v14675_v15  ;;  %14708 = vmatprep.subr.bf16.mxu0 %v14707_v25  ;;  %v8394_v13 = vld [vmem:[#allocation15 + $0x2cc0] sm:$0xff]  ;;  %v8388_v15 = vld [vmem:[#allocation15 + $0x2c90] sm:$0xff] }
 0xa26   :  { %v8396_v25 = vld [vmem:[#allocation15 + $0x2cd0] sm:$0xff]  ;;  %v14729_v31 = vpack.c.bf16 %v8394_v13, %v8386_v7  ;;  %v14779_v7 = vpack.c.bf16 %v8477_v10, %v8469_v9 }
 0xa27   :  { %v14761_v20 = vpack.c.bf16 %v8396_v25, %v8388_v15  ;;  %v8468_v13 = vld [vmem:[#allocation15 + $0x2f10] sm:$0xff]  ;;  %v8491_v15 = vld [vmem:[#allocation15 + $0x2fc8] sm:$0xff]  ;;  %v8485_v25 = vld [vmem:[#allocation15 + $0x2f98] sm:$0xff] }
 0xa28   :  { %14678 = vmatpush1.bf16.msra.mxu1 %v14677_v29  ;;  %14710 = vmatpush1.bf16.msra.mxu0 %v14709_v22  ;;  %v8402_v29 = vld [vmem:[#allocation15 + $0x2d00] sm:$0xff] }
 0xa29   :  { %14680 = vmatprep.subr.bf16.mxu1 %v14679_v28  ;;  %14712 = vmatprep.subr.bf16.mxu0 %v14711_v36  ;;  %v8410_v22 = vld [vmem:[#allocation15 + $0x2d40] sm:$0xff]  ;;  %v8404_v28 = vld [vmem:[#allocation15 + $0x2d10] sm:$0xff] }
 0xa2a   :  { %v8412_v36 = vld [vmem:[#allocation15 + $0x2d50] sm:$0xff] }
 0xa2b   :  { %v14765_v37 = vpack.c.bf16 %v8412_v36, %v8404_v28  ;;  %v8383_v28 = vld [vmem:[#allocation15 + $0x2c68] sm:$0xff]  ;;  %v8377_v36 = vld [vmem:[#allocation15 + $0x2c38] sm:$0xff] }
 0xa2c   :  { %14682 = vmatpush1.bf16.msra.mxu1 %v14681_v39  ;;  %14714 = vmatpush1.bf16.msra.mxu0 %v14713_v40  ;;  %v8426_v39 = vld [vmem:[#allocation15 + $0x2dc0] sm:$0xff]  ;;  %v14735_v40 = vpack.c.bf16 %v8427_v32, %v8419_v30  ;;  %v8385_v30 = vld [vmem:[#allocation15 + $0x2c78] sm:$0xff] }
 0xa2d   :  { %14684 = vmatprep.subr.bf16.mxu1 %v14683_v46  ;;  %14716 = vmatprep.subr.bf16.mxu0 %v14715_v47  ;;  %v8428_v46 = vld [vmem:[#allocation15 + $0x2dd0] sm:$0xff]  ;;  %v8435_v47 = vld [vmem:[#allocation15 + $0x2e08] sm:$0xff]  ;;  %v14737_v51 = vpack.c.bf16 %v8426_v39, %v8418_v38  ;;  %v14819_v38 = vpack.c.bf16 %v8385_v30, %v8377_v36 }
 0xa2e   :  { %v14769_v26 = vpack.c.bf16 %v8428_v46, %v8420_v45  ;;  %v8376_v39 = vld [vmem:[#allocation15 + $0x2c30] sm:$0xff]  ;;  %v8399_v45 = vld [vmem:[#allocation15 + $0x2ce8] sm:$0xff]  ;;  %v8393_v46 = vld [vmem:[#allocation15 + $0x2cb8] sm:$0xff] }
 0xa30   :  { %14686 = vmatpush1.bf16.msra.mxu1 %v14685_v54  ;;  %14718 = vmatpush1.bf16.msra.mxu0 %v14717_v55  ;;  %v8442_v54 = vld [vmem:[#allocation15 + $0x2e40] sm:$0xff]  ;;  %v14739_v55 = vpack.c.bf16 %v8443_v48, %v8435_v47  ;;  %v8401_v47 = vld [vmem:[#allocation15 + $0x2cf8] sm:$0xff]  ;;  %v16732_v48 = vld [vmem:[#allocation2 + $0x16] sm:$0x3] }
 0xa31   :  { %14688 = vmatprep.subr.bf16.mxu1 %v14687_v56  ;;  %14720 = vmatprep.subr.bf16.mxu0 %v14719_v57  ;;  %v8444_v56 = vld [vmem:[#allocation15 + $0x2e50] sm:$0xff]  ;;  %v8451_v57 = vld [vmem:[#allocation15 + $0x2e88] sm:$0xff]  ;;  %v14741_v59 = vpack.c.bf16 %v8442_v54, %v8434_v52  ;;  %v14823_v54 = vpack.c.bf16 %v8401_v47, %v8393_v46 }
 0xa32   :  { %v14773_v60 = vpack.c.bf16 %v8444_v56, %v8436_v5  ;;  %v8407_v5 = vld [vmem:[#allocation15 + $0x2d28] sm:$0xff] }
 0xa33   :  { %v8415_v56 = vld [vmem:[#allocation15 + $0x2d68] sm:$0xff] }
 0xa34   :  { %14690 = vmatpush1.bf16.msra.mxu1 %v14689_v61  ;;  %14722 = vmatpush1.bf16.msra.mxu0 %v14721_v4  ;;  %v8458_v61 = vld [vmem:[#allocation15 + $0x2ec0] sm:$0xff]  ;;  %v14743_v4 = vpack.c.bf16 %v8459_v58, %v8451_v57  ;;  %v8409_v57 = vld [vmem:[#allocation15 + $0x2d38] sm:$0xff] }
 0xa35   :  { %14724 = vmatprep.subr.bf16.mxu1 %v14723_v2  ;;  %14756 = vmatprep.subr.bf16.mxu0 %v14755_v3  ;;  %v8460_v2 = vld [vmem:[#allocation15 + $0x2ed0] sm:$0xff]  ;;  %v8467_v3 = vld [vmem:[#allocation15 + $0x2f08] sm:$0xff]  ;;  %v14745_v44 = vpack.c.bf16 %v8458_v61, %v8450_v6  ;;  %v8417_v58 = vld [vmem:[#allocation15 + $0x2d78] sm:$0xff]  ;;  %v14795_v6 = vpack.c.bf16 %v8415_v56, %v8407_v5 }
 0xa36   :  { %v14777_v53 = vpack.c.bf16 %v8460_v2, %v8452_v1  ;;  %v14827_v61 = vpack.c.bf16 %v8417_v58, %v8409_v57  ;;  %v8423_v1 = vld [vmem:[#allocation15 + $0x2da8] sm:$0xff]  ;;  %v8489_v5 = vld [vmem:[#allocation15 + $0x2fb8] sm:$0xff] }
 0xa37   :  { %8283 = vmatmul.mubr.f32.vlgmr.msra.gmra.mrb[22].mxu1 %v16722_v42  ;;  %8354 = vmatmul.mubr.f32.vlgmr.msra.gmra.mrb[66].mxu0 %v16722_v42  ;;  %v14733_v42 = vpack.c.bf16 %v8410_v22, %v8402_v29  ;;  %v14783_v29 = vpack.c.bf16 %v8493_v17, %v8485_v25  ;;  %v8484_v22 = vld [vmem:[#allocation15 + $0x2f90] sm:$0xff]  ;;  %v8431_v2 = vld [vmem:[#allocation15 + $0x2de8] sm:$0xff]  ;;  %v8497_v56 = vld [vmem:[#allocation15 + $0x2ff8] sm:$0xff] }
 0xa38   :  { %14726 = vmatpush1.bf16.msra.mxu1 %v14725_v11  ;;  %14758 = vmatpush1.bf16.msra.mxu0 %v14757_v12  ;;  %v8474_v11 = vld [vmem:[#allocation15 + $0x2f40] sm:$0xff]  ;;  %v14747_v12 = vpack.c.bf16 %v8475_v62, %v8467_v3  ;;  %v8425_v3 = vld [vmem:[#allocation15 + $0x2db8] sm:$0xff] }
 0xa39   :  { %14728 = vmatprep.subr.bf16.mxu1 %v14727_v35  ;;  %14760 = vmatprep.subr.bf16.mxu0 %v14759_v14  ;;  %v8476_v35 = vld [vmem:[#allocation15 + $0x2f50] sm:$0xff]  ;;  %v8483_v14 = vld [vmem:[#allocation15 + $0x2f88] sm:$0xff]  ;;  %v14749_v21 = vpack.c.bf16 %v8474_v11, %v8466_v16  ;;  %v8433_v62 = vld [vmem:[#allocation15 + $0x2df8] sm:$0xff]  ;;  %v14799_v16 = vpack.c.bf16 %v8431_v2, %v8423_v1 }
 0xa3a   :  { %8562 = vmatprep.mubr.f32.mxu1 %v15872_v41  ;;  %8633 = vmatprep.mubr.f32.mxu0 %v15872_v41  ;;  %v14781_v18 = vpack.c.bf16 %v8476_v35, %v8468_v13  ;;  %v14831_v11 = vpack.c.bf16 %v8433_v62, %v8425_v3  ;;  %v8439_v13 = vld [vmem:[#allocation15 + $0x2e28] sm:$0xff]  ;;  %v8795_v1 = vld [vmem:[#allocation15 + $0x3018] sm:$0xff] }
 0xa3b   :  { %v8447_v35 = vld [vmem:[#allocation15 + $0x2e68] sm:$0xff]  ;;  %v8803_v2 = vld [vmem:[#allocation15 + $0x3058] sm:$0xff] }
 0xa3c   :  { %14730 = vmatpush1.bf16.msra.mxu1 %v14729_v31  ;;  %14762 = vmatpush1.bf16.msra.mxu0 %v14761_v20  ;;  %v8490_v31 = vld [vmem:[#allocation15 + $0x2fc0] sm:$0xff]  ;;  %v14751_v20 = vpack.c.bf16 %v8491_v15, %v8483_v14  ;;  %v8441_v14 = vld [vmem:[#allocation15 + $0x2e38] sm:$0xff] }
 0xa3d   :  { %14732 = vmatprep.subr.bf16.mxu1 %v14731_v23  ;;  %14764 = vmatprep.subr.bf16.mxu0 %v14763_v24  ;;  %v8492_v23 = vld [vmem:[#allocation15 + $0x2fd0] sm:$0xff]  ;;  %v8375_v24 = vld [vmem:[#allocation15 + $0x2c28] sm:$0xff]  ;;  %v14753_v32 = vpack.c.bf16 %v8490_v31, %v8482_v19  ;;  %v8449_v15 = vld [vmem:[#allocation15 + $0x2e78] sm:$0xff]  ;;  %v14803_v19 = vpack.c.bf16 %v8447_v35, %v8439_v13 }
 0xa3e   :  { %v14785_v33 = vpack.c.bf16 %v8492_v23, %v8484_v22  ;;  %v14835_v31 = vpack.c.bf16 %v8449_v15, %v8441_v14  ;;  %v8455_v22 = vld [vmem:[#allocation15 + $0x2ea8] sm:$0xff]  ;;  %v8811_v13 = vld [vmem:[#allocation15 + $0x3098] sm:$0xff] }
 0xa3f   :  { %v8463_v23 = vld [vmem:[#allocation15 + $0x2ee8] sm:$0xff]  ;;  %v8819_v35 = vld [vmem:[#allocation15 + $0x30d8] sm:$0xff] }
 0xa40   :  { %14734 = vmatpush1.bf16.msra.mxu1 %v14733_v42  ;;  %14766 = vmatpush1.bf16.msra.mxu0 %v14765_v37  ;;  %v8382_v42 = vld [vmem:[#allocation15 + $0x2c60] sm:$0xff]  ;;  %v14787_v37 = vpack.c.bf16 %v8383_v28, %v8375_v24  ;;  %v8457_v24 = vld [vmem:[#allocation15 + $0x2eb8] sm:$0xff] }
 0xa41   :  { %14736 = vmatprep.subr.bf16.mxu1 %v14735_v40  ;;  %14768 = vmatprep.subr.bf16.mxu0 %v14767_v43  ;;  %v8384_v40 = vld [vmem:[#allocation15 + $0x2c70] sm:$0xff]  ;;  %v8391_v43 = vld [vmem:[#allocation15 + $0x2ca8] sm:$0xff]  ;;  %v14789_v49 = vpack.c.bf16 %v8382_v42, %v8374_v34  ;;  %v8465_v28 = vld [vmem:[#allocation15 + $0x2ef8] sm:$0xff]  ;;  %v14807_v34 = vpack.c.bf16 %v8463_v23, %v8455_v22 }
 0xa42   :  { %v14821_v50 = vpack.c.bf16 %v8384_v40, %v8376_v39  ;;  %v14791_v52 = vpack.c.bf16 %v8399_v45, %v8391_v43  ;;  %v14839_v42 = vpack.c.bf16 %v8465_v28, %v8457_v24  ;;  %v8471_v39 = vld [vmem:[#allocation15 + $0x2f28] sm:$0xff]  ;;  %v8473_v43 = vld [vmem:[#allocation15 + $0x2f38] sm:$0xff] }
 0xa43   :  { %v8479_v40 = vld [vmem:[#allocation15 + $0x2f68] sm:$0xff]  ;;  %v8481_v45 = vld [vmem:[#allocation15 + $0x2f78] sm:$0xff] }
 0xa44   :  { %14738 = vmatpush1.bf16.msra.mxu1 %v14737_v51  ;;  %14770 = vmatpush1.bf16.msra.mxu0 %v14769_v26  ;;  %v8390_v51 = vld [vmem:[#allocation15 + $0x2ca0] sm:$0xff]  ;;  %v8827_v22 = vld [vmem:[#allocation15 + $0x3118] sm:$0xff] }
 0xa45   :  { %14740 = vmatprep.subr.bf16.mxu1 %v14739_v55  ;;  %14772 = vmatprep.subr.bf16.mxu0 %v14771_v8  ;;  %v8398_v26 = vld [vmem:[#allocation15 + $0x2ce0] sm:$0xff]  ;;  %v8392_v55 = vld [vmem:[#allocation15 + $0x2cb0] sm:$0xff]  ;;  %v8835_v23 = vld [vmem:[#allocation15 + $0x3158] sm:$0xff] }
 0xa46   :  { %v8400_v8 = vld [vmem:[#allocation15 + $0x2cf0] sm:$0xff]  ;;  %v14793_v27 = vpack.c.bf16 %v8398_v26, %v8390_v51  ;;  %v14811_v51 = vpack.c.bf16 %v8479_v40, %v8471_v39  ;;  %v14843_v26 = vpack.c.bf16 %v8481_v45, %v8473_v43  ;;  %v8843_v39 = vld [vmem:[#allocation15 + $0x3198] sm:$0xff]  ;;  %v8840_v45 = vld [vmem:[#allocation15 + $0x3180] sm:$0xff] }
 0xa47   :  { %v14825_v63 = vpack.c.bf16 %v8400_v8, %v8392_v55  ;;  %v8487_v55 = vld [vmem:[#allocation15 + $0x2fa8] sm:$0xff]  ;;  %v8851_v40 = vld [vmem:[#allocation15 + $0x31d8] sm:$0xff] }
 0xa48   :  { %14742 = vmatpush1.bf16.msra.mxu1 %v14741_v59  ;;  %14774 = vmatpush1.bf16.msra.mxu0 %v14773_v60  ;;  %v8406_v59 = vld [vmem:[#allocation15 + $0x2d20] sm:$0xff]  ;;  %v8495_v8 = vld [vmem:[#allocation15 + $0x2fe8] sm:$0xff] }
 0xa49   :  { %14744 = vmatprep.subr.bf16.mxu1 %v14743_v4  ;;  %14776 = vmatprep.subr.bf16.mxu0 %v14775_v0  ;;  %v8414_v60 = vld [vmem:[#allocation15 + $0x2d60] sm:$0xff]  ;;  %v8408_v4 = vld [vmem:[#allocation15 + $0x2d30] sm:$0xff] }
 0xa4a   :  { %v8416_v0 = vld [vmem:[#allocation15 + $0x2d70] sm:$0xff]  ;;  %v14797_v9 = vpack.c.bf16 %v8414_v60, %v8406_v59  ;;  %v14815_v59 = vpack.c.bf16 %v8495_v8, %v8487_v55  ;;  %v14847_v60 = vpack.c.bf16 %v8497_v56, %v8489_v5  ;;  %v8867_v55 = vld [vmem:[#allocation15 + $0x3258] sm:$0xff]  ;;  %v8856_v56 = vld [vmem:[#allocation15 + $0x3200] sm:$0xff] }
 0xa4b   :  { %v14829_v10 = vpack.c.bf16 %v8416_v0, %v8408_v4  ;;  %v8793_v4 = vld [vmem:[#allocation15 + $0x3008] sm:$0xff] }
 0xa4c   :  { %14746 = vmatpush1.bf16.msra.mxu1 %v14745_v44  ;;  %14778 = vmatpush1.bf16.msra.mxu0 %v14777_v53  ;;  %v8422_v44 = vld [vmem:[#allocation15 + $0x2da0] sm:$0xff]  ;;  %v8801_v0 = vld [vmem:[#allocation15 + $0x3048] sm:$0xff] }
 0xa4d   :  { %14748 = vmatprep.subr.bf16.mxu1 %v14747_v12  ;;  %14780 = vmatprep.subr.bf16.mxu0 %v14779_v7  ;;  %v8430_v53 = vld [vmem:[#allocation15 + $0x2de0] sm:$0xff]  ;;  %v8424_v12 = vld [vmem:[#allocation15 + $0x2db0] sm:$0xff] }
 0xa4e   :  { %v8432_v7 = vld [vmem:[#allocation15 + $0x2df0] sm:$0xff]  ;;  %v14801_v25 = vpack.c.bf16 %v8430_v53, %v8422_v44  ;;  %v14851_v44 = vpack.c.bf16 %v8801_v0, %v8793_v4  ;;  %v14883_v53 = vpack.c.bf16 %v8803_v2, %v8795_v1  ;;  %v8883_v4 = vld [vmem:[#allocation15 + $0x32d8] sm:$0xff]  ;;  %v8872_v2 = vld [vmem:[#allocation15 + $0x3280] sm:$0xff] }
 0xa4f   :  { %v14833_v17 = vpack.c.bf16 %v8432_v7, %v8424_v12  ;;  %v8809_v12 = vld [vmem:[#allocation15 + $0x3088] sm:$0xff] }
 0xa50   :  { %14750 = vmatpush1.bf16.msra.mxu1 %v14749_v21  ;;  %14782 = vmatpush1.bf16.msra.mxu0 %v14781_v18  ;;  %v8438_v21 = vld [vmem:[#allocation15 + $0x2e20] sm:$0xff]  ;;  %v8817_v7 = vld [vmem:[#allocation15 + $0x30c8] sm:$0xff] }
 0xa51   :  { %14752 = vmatprep.subr.bf16.mxu1 %v14751_v20  ;;  %14784 = vmatprep.subr.bf16.mxu0 %v14783_v29  ;;  %v8446_v18 = vld [vmem:[#allocation15 + $0x2e60] sm:$0xff]  ;;  %v8440_v20 = vld [vmem:[#allocation15 + $0x2e30] sm:$0xff] }
 0xa52   :  { %v8448_v29 = vld [vmem:[#allocation15 + $0x2e70] sm:$0xff]  ;;  %v14805_v36 = vpack.c.bf16 %v8446_v18, %v8438_v21  ;;  %v14855_v21 = vpack.c.bf16 %v8817_v7, %v8809_v12  ;;  %v14887_v18 = vpack.c.bf16 %v8819_v35, %v8811_v13  ;;  %v8899_v12 = vld [vmem:[#allocation15 + $0x3358] sm:$0xff]  ;;  %v8888_v35 = vld [vmem:[#allocation15 + $0x3300] sm:$0xff] }
 0xa53   :  { %v14837_v30 = vpack.c.bf16 %v8448_v29, %v8440_v20  ;;  %v8825_v20 = vld [vmem:[#allocation15 + $0x3108] sm:$0xff] }
 0xa54   :  { %14754 = vmatpush1.bf16.msra.mxu1 %v14753_v32  ;;  %14786 = vmatpush1.bf16.msra.mxu0 %v14785_v33  ;;  %v8454_v32 = vld [vmem:[#allocation15 + $0x2ea0] sm:$0xff]  ;;  %v8833_v29 = vld [vmem:[#allocation15 + $0x3148] sm:$0xff] }
 0xa55   :  { %14788 = vmatprep.subr.bf16.mxu1 %v14787_v37  ;;  %14820 = vmatprep.subr.bf16.mxu0 %v14819_v38  ;;  %v8462_v33 = vld [vmem:[#allocation15 + $0x2ee0] sm:$0xff]  ;;  %v8456_v37 = vld [vmem:[#allocation15 + $0x2eb0] sm:$0xff] }
 0xa56   :  { %v8464_v38 = vld [vmem:[#allocation15 + $0x2ef0] sm:$0xff]  ;;  %v14809_v46 = vpack.c.bf16 %v8462_v33, %v8454_v32  ;;  %v14859_v32 = vpack.c.bf16 %v8833_v29, %v8825_v20  ;;  %v14891_v33 = vpack.c.bf16 %v8835_v23, %v8827_v22  ;;  %v8915_v20 = vld [vmem:[#allocation15 + $0x33d8] sm:$0xff]  ;;  %v8904_v23 = vld [vmem:[#allocation15 + $0x3380] sm:$0xff] }
 0xa57   :  { %8563 = vmatmul.mubr.f32.vlgmr.msra.gmra.mrb[20].mxu1 %v16732_v48  ;;  %8634 = vmatmul.mubr.f32.vlgmr.msra.gmra.mrb[64].mxu0 %v16732_v48  ;;  %v14841_v47 = vpack.c.bf16 %v8464_v38, %v8456_v37  ;;  %v8841_v37 = vld [vmem:[#allocation15 + $0x3188] sm:$0xff] }
 0xa58   :  { %14790 = vmatpush1.bf16.msra.mxu1 %v14789_v49  ;;  %14822 = vmatpush1.bf16.msra.mxu0 %v14821_v50  ;;  %v8470_v49 = vld [vmem:[#allocation15 + $0x2f20] sm:$0xff]  ;;  %v8849_v38 = vld [vmem:[#allocation15 + $0x31c8] sm:$0xff] }
 0xa59   :  { %14792 = vmatprep.subr.bf16.mxu1 %v14791_v52  ;;  %14824 = vmatprep.subr.bf16.mxu0 %v14823_v54  ;;  %v8478_v50 = vld [vmem:[#allocation15 + $0x2f60] sm:$0xff]  ;;  %v8472_v52 = vld [vmem:[#allocation15 + $0x2f30] sm:$0xff] }
 0xa5a   :  { %8704 = vmatprep.mubr.f32.mxu1 %v15872_v41  ;;  %8775 = vmatprep.mubr.f32.mxu0 %v15872_v41  ;;  %v8480_v54 = vld [vmem:[#allocation15 + $0x2f70] sm:$0xff]  ;;  %v14813_v57 = vpack.c.bf16 %v8478_v50, %v8470_v49  ;;  %v14895_v49 = vpack.c.bf16 %v8851_v40, %v8843_v39  ;;  %v8796_v40 = vld [vmem:[#allocation15 + $0x3020] sm:$0xff] }
 0xa5b   :  { %v14845_v58 = vpack.c.bf16 %v8480_v54, %v8472_v52  ;;  %v8842_v50 = vld [vmem:[#allocation15 + $0x3190] sm:$0xff]  ;;  %v8865_v52 = vld [vmem:[#allocation15 + $0x3248] sm:$0xff]  ;;  %v8859_v54 = vld [vmem:[#allocation15 + $0x3218] sm:$0xff] }
 0xa5c   :  { %14794 = vmatpush1.bf16.msra.mxu1 %v14793_v27  ;;  %14826 = vmatpush1.bf16.msra.mxu0 %v14825_v63  ;;  %v8486_v27 = vld [vmem:[#allocation15 + $0x2fa0] sm:$0xff] }
 0xa5d   :  { %14796 = vmatprep.subr.bf16.mxu1 %v14795_v6  ;;  %14828 = vmatprep.subr.bf16.mxu0 %v14827_v61  ;;  %v8494_v63 = vld [vmem:[#allocation15 + $0x2fe0] sm:$0xff]  ;;  %v8488_v6 = vld [vmem:[#allocation15 + $0x2fb0] sm:$0xff] }
 0xa5e   :  { %v8496_v61 = vld [vmem:[#allocation15 + $0x2ff0] sm:$0xff]  ;;  %v14817_v3 = vpack.c.bf16 %v8494_v63, %v8486_v27  ;;  %v14899_v27 = vpack.c.bf16 %v8867_v55, %v8859_v54 }
 0xa5f   :  { %v14849_v62 = vpack.c.bf16 %v8496_v61, %v8488_v6  ;;  %v8858_v63 = vld [vmem:[#allocation15 + $0x3210] sm:$0xff]  ;;  %v8881_v6 = vld [vmem:[#allocation15 + $0x32c8] sm:$0xff]  ;;  %v8875_v61 = vld [vmem:[#allocation15 + $0x3298] sm:$0xff] }
 0xa60   :  { %14798 = vmatpush1.bf16.msra.mxu1 %v14797_v9  ;;  %14830 = vmatpush1.bf16.msra.mxu0 %v14829_v10  ;;  %v8792_v9 = vld [vmem:[#allocation15 + $0x3000] sm:$0xff] }
 0xa61   :  { %14800 = vmatprep.subr.bf16.mxu1 %v14799_v16  ;;  %14832 = vmatprep.subr.bf16.mxu0 %v14831_v11  ;;  %v8800_v10 = vld [vmem:[#allocation15 + $0x3040] sm:$0xff]  ;;  %v8794_v16 = vld [vmem:[#allocation15 + $0x3010] sm:$0xff] }
 0xa62   :  { %v8802_v11 = vld [vmem:[#allocation15 + $0x3050] sm:$0xff]  ;;  %v14853_v14 = vpack.c.bf16 %v8800_v10, %v8792_v9  ;;  %v14903_v9 = vpack.c.bf16 %v8883_v4, %v8875_v61 }
 0xa63   :  { %v14885_v15 = vpack.c.bf16 %v8802_v11, %v8794_v16  ;;  %v8874_v10 = vld [vmem:[#allocation15 + $0x3290] sm:$0xff]  ;;  %v8897_v16 = vld [vmem:[#allocation15 + $0x3348] sm:$0xff]  ;;  %v8891_v11 = vld [vmem:[#allocation15 + $0x3318] sm:$0xff] }
 0xa64   :  { %14802 = vmatpush1.bf16.msra.mxu1 %v14801_v25  ;;  %14834 = vmatpush1.bf16.msra.mxu0 %v14833_v17  ;;  %v8808_v25 = vld [vmem:[#allocation15 + $0x3080] sm:$0xff] }
 0xa65   :  { %14804 = vmatprep.subr.bf16.mxu1 %v14803_v19  ;;  %14836 = vmatprep.subr.bf16.mxu0 %v14835_v31  ;;  %v8816_v17 = vld [vmem:[#allocation15 + $0x30c0] sm:$0xff]  ;;  %v8810_v19 = vld [vmem:[#allocation15 + $0x3090] sm:$0xff] }
 0xa66   :  { %v8818_v31 = vld [vmem:[#allocation15 + $0x30d0] sm:$0xff]  ;;  %v14857_v24 = vpack.c.bf16 %v8816_v17, %v8808_v25  ;;  %v14907_v25 = vpack.c.bf16 %v8899_v12, %v8891_v11 }
 0xa67   :  { %v14889_v28 = vpack.c.bf16 %v8818_v31, %v8810_v19  ;;  %v8890_v17 = vld [vmem:[#allocation15 + $0x3310] sm:$0xff]  ;;  %v8913_v19 = vld [vmem:[#allocation15 + $0x33c8] sm:$0xff]  ;;  %v8907_v31 = vld [vmem:[#allocation15 + $0x3398] sm:$0xff] }
 0xa68   :  { %14806 = vmatpush1.bf16.msra.mxu1 %v14805_v36  ;;  %14838 = vmatpush1.bf16.msra.mxu0 %v14837_v30  ;;  %v8824_v36 = vld [vmem:[#allocation15 + $0x3100] sm:$0xff] }
 0xa69   :  { %14808 = vmatprep.subr.bf16.mxu1 %v14807_v34  ;;  %14840 = vmatprep.subr.bf16.mxu0 %v14839_v42  ;;  %v8832_v30 = vld [vmem:[#allocation15 + $0x3140] sm:$0xff]  ;;  %v8826_v34 = vld [vmem:[#allocation15 + $0x3110] sm:$0xff] }
 0xa6a   :  { %v8834_v42 = vld [vmem:[#allocation15 + $0x3150] sm:$0xff] }
 0xa6b   :  { %v14893_v43 = vpack.c.bf16 %v8834_v42, %v8826_v34  ;;  %v8805_v34 = vld [vmem:[#allocation15 + $0x3068] sm:$0xff]  ;;  %v8799_v42 = vld [vmem:[#allocation15 + $0x3038] sm:$0xff] }
 0xa6c   :  { %14810 = vmatpush1.bf16.msra.mxu1 %v14809_v46  ;;  %14842 = vmatpush1.bf16.msra.mxu0 %v14841_v47  ;;  %v8848_v46 = vld [vmem:[#allocation15 + $0x31c0] sm:$0xff]  ;;  %v14863_v47 = vpack.c.bf16 %v8849_v38, %v8841_v37  ;;  %v8807_v37 = vld [vmem:[#allocation15 + $0x3078] sm:$0xff] }
 0xa6d   :  { %14812 = vmatprep.subr.bf16.mxu1 %v14811_v51  ;;  %14844 = vmatprep.subr.bf16.mxu0 %v14843_v26  ;;  %v8850_v51 = vld [vmem:[#allocation15 + $0x31d0] sm:$0xff]  ;;  %v8857_v26 = vld [vmem:[#allocation15 + $0x3208] sm:$0xff]  ;;  %v14865_v8 = vpack.c.bf16 %v8848_v46, %v8840_v45  ;;  %v14947_v45 = vpack.c.bf16 %v8807_v37, %v8799_v42 }
 0xa6e   :  { %v14897_v5 = vpack.c.bf16 %v8850_v51, %v8842_v50  ;;  %v8798_v46 = vld [vmem:[#allocation15 + $0x3030] sm:$0xff]  ;;  %v8821_v50 = vld [vmem:[#allocation15 + $0x30e8] sm:$0xff]  ;;  %v8815_v51 = vld [vmem:[#allocation15 + $0x30b8] sm:$0xff] }
 0xa70   :  { %14814 = vmatpush1.bf16.msra.mxu1 %v14813_v57  ;;  %14846 = vmatpush1.bf16.msra.mxu0 %v14845_v58  ;;  %v8864_v57 = vld [vmem:[#allocation15 + $0x3240] sm:$0xff]  ;;  %v14867_v58 = vpack.c.bf16 %v8865_v52, %v8857_v26  ;;  %v8823_v26 = vld [vmem:[#allocation15 + $0x30f8] sm:$0xff]  ;;  %v16742_v52 = vld [vmem:[#allocation2 + $0x18] sm:$0x3] }
 0xa71   :  { %14816 = vmatprep.subr.bf16.mxu1 %v14815_v59  ;;  %14848 = vmatprep.subr.bf16.mxu0 %v14847_v60  ;;  %v8866_v59 = vld [vmem:[#allocation15 + $0x3250] sm:$0xff]  ;;  %v8873_v60 = vld [vmem:[#allocation15 + $0x3288] sm:$0xff]  ;;  %v14869_v0 = vpack.c.bf16 %v8864_v57, %v8856_v56  ;;  %v14951_v57 = vpack.c.bf16 %v8823_v26, %v8815_v51 }
 0xa72   :  { %v14901_v1 = vpack.c.bf16 %v8866_v59, %v8858_v63  ;;  %v8829_v63 = vld [vmem:[#allocation15 + $0x3128] sm:$0xff] }
 0xa73   :  { %v8837_v59 = vld [vmem:[#allocation15 + $0x3168] sm:$0xff] }
 0xa74   :  { %14818 = vmatpush1.bf16.msra.mxu1 %v14817_v3  ;;  %14850 = vmatpush1.bf16.msra.mxu0 %v14849_v62  ;;  %v8880_v3 = vld [vmem:[#allocation15 + $0x32c0] sm:$0xff]  ;;  %v14871_v62 = vpack.c.bf16 %v8881_v6, %v8873_v60  ;;  %v8831_v60 = vld [vmem:[#allocation15 + $0x3138] sm:$0xff] }
 0xa75   :  { %14852 = vmatprep.subr.bf16.mxu1 %v14851_v44  ;;  %14884 = vmatprep.subr.bf16.mxu0 %v14883_v53  ;;  %v8882_v44 = vld [vmem:[#allocation15 + $0x32d0] sm:$0xff]  ;;  %v8889_v53 = vld [vmem:[#allocation15 + $0x3308] sm:$0xff]  ;;  %v14873_v7 = vpack.c.bf16 %v8880_v3, %v8872_v2  ;;  %v8839_v6 = vld [vmem:[#allocation15 + $0x3178] sm:$0xff]  ;;  %v14923_v2 = vpack.c.bf16 %v8837_v59, %v8829_v63 }
 0xa76   :  { %v14905_v13 = vpack.c.bf16 %v8882_v44, %v8874_v10  ;;  %v14955_v3 = vpack.c.bf16 %v8839_v6, %v8831_v60  ;;  %v8845_v10 = vld [vmem:[#allocation15 + $0x31a8] sm:$0xff]  ;;  %v8911_v63 = vld [vmem:[#allocation15 + $0x33b8] sm:$0xff] }
 0xa77   :  { %8705 = vmatmul.mubr.f32.vlgmr.msra.gmra.mrb[22].mxu1 %v16732_v48  ;;  %8776 = vmatmul.mubr.f32.vlgmr.msra.gmra.mrb[66].mxu0 %v16732_v48  ;;  %v14861_v48 = vpack.c.bf16 %v8832_v30, %v8824_v36  ;;  %v14911_v36 = vpack.c.bf16 %v8915_v20, %v8907_v31  ;;  %v8906_v30 = vld [vmem:[#allocation15 + $0x3390] sm:$0xff]  ;;  %v8853_v44 = vld [vmem:[#allocation15 + $0x31e8] sm:$0xff]  ;;  %v8919_v59 = vld [vmem:[#allocation15 + $0x33f8] sm:$0xff] }
 0xa78   :  { %14854 = vmatpush1.bf16.msra.mxu1 %v14853_v14  ;;  %14886 = vmatpush1.bf16.msra.mxu0 %v14885_v15  ;;  %v8896_v14 = vld [vmem:[#allocation15 + $0x3340] sm:$0xff]  ;;  %v14875_v15 = vpack.c.bf16 %v8897_v16, %v8889_v53  ;;  %v8847_v53 = vld [vmem:[#allocation15 + $0x31b8] sm:$0xff] }
 0xa79   :  { %14856 = vmatprep.subr.bf16.mxu1 %v14855_v21  ;;  %14888 = vmatprep.subr.bf16.mxu0 %v14887_v18  ;;  %v8898_v21 = vld [vmem:[#allocation15 + $0x3350] sm:$0xff]  ;;  %v8905_v18 = vld [vmem:[#allocation15 + $0x3388] sm:$0xff]  ;;  %v14877_v29 = vpack.c.bf16 %v8896_v14, %v8888_v35  ;;  %v8855_v16 = vld [vmem:[#allocation15 + $0x31f8] sm:$0xff]  ;;  %v14927_v35 = vpack.c.bf16 %v8853_v44, %v8845_v10 }
 0xa7a   :  { %8984 = vmatprep.mubr.f32.mxu1 %v15872_v41  ;;  %9055 = vmatprep.mubr.f32.mxu0 %v15872_v41  ;;  %v14909_v22 = vpack.c.bf16 %v8898_v21, %v8890_v17  ;;  %v14959_v14 = vpack.c.bf16 %v8855_v16, %v8847_v53  ;;  %v8861_v17 = vld [vmem:[#allocation15 + $0x3228] sm:$0xff]  ;;  %v9217_v10 = vld [vmem:[#allocation15 + $0x3418] sm:$0xff] }
 0xa7b   :  { %v8869_v21 = vld [vmem:[#allocation15 + $0x3268] sm:$0xff]  ;;  %v9225_v44 = vld [vmem:[#allocation15 + $0x3458] sm:$0xff] }
 0xa7c   :  { %14858 = vmatpush1.bf16.msra.mxu1 %v14857_v24  ;;  %14890 = vmatpush1.bf16.msra.mxu0 %v14889_v28  ;;  %v8912_v24 = vld [vmem:[#allocation15 + $0x33c0] sm:$0xff]  ;;  %v14879_v28 = vpack.c.bf16 %v8913_v19, %v8905_v18  ;;  %v8863_v18 = vld [vmem:[#allocation15 + $0x3238] sm:$0xff] }
 0xa7d   :  { %14860 = vmatprep.subr.bf16.mxu1 %v14859_v32  ;;  %14892 = vmatprep.subr.bf16.mxu0 %v14891_v33  ;;  %v8914_v32 = vld [vmem:[#allocation15 + $0x33d0] sm:$0xff]  ;;  %v8797_v33 = vld [vmem:[#allocation15 + $0x3028] sm:$0xff]  ;;  %v14881_v38 = vpack.c.bf16 %v8912_v24, %v8904_v23  ;;  %v8871_v19 = vld [vmem:[#allocation15 + $0x3278] sm:$0xff]  ;;  %v14931_v23 = vpack.c.bf16 %v8869_v21, %v8861_v17 }
 0xa7e   :  { %v14913_v39 = vpack.c.bf16 %v8914_v32, %v8906_v30  ;;  %v14963_v24 = vpack.c.bf16 %v8871_v19, %v8863_v18  ;;  %v8877_v30 = vld [vmem:[#allocation15 + $0x32a8] sm:$0xff]  ;;  %v9233_v17 = vld [vmem:[#allocation15 + $0x3498] sm:$0xff] }
 0xa7f   :  { %v8885_v32 = vld [vmem:[#allocation15 + $0x32e8] sm:$0xff]  ;;  %v9241_v21 = vld [vmem:[#allocation15 + $0x34d8] sm:$0xff] }
 0xa80   :  { %14862 = vmatpush1.bf16.msra.mxu1 %v14861_v48  ;;  %14894 = vmatpush1.bf16.msra.mxu0 %v14893_v43  ;;  %v8804_v48 = vld [vmem:[#allocation15 + $0x3060] sm:$0xff]  ;;  %v14915_v43 = vpack.c.bf16 %v8805_v34, %v8797_v33  ;;  %v8879_v33 = vld [vmem:[#allocation15 + $0x32b8] sm:$0xff] }
 0xa81   :  { %14864 = vmatprep.subr.bf16.mxu1 %v14863_v47  ;;  %14896 = vmatprep.subr.bf16.mxu0 %v14895_v49  ;;  %v8806_v47 = vld [vmem:[#allocation15 + $0x3070] sm:$0xff]  ;;  %v8813_v49 = vld [vmem:[#allocation15 + $0x30a8] sm:$0xff]  ;;  %v14917_v54 = vpack.c.bf16 %v8804_v48, %v8796_v40  ;;  %v8887_v34 = vld [vmem:[#allocation15 + $0x32f8] sm:$0xff]  ;;  %v14935_v40 = vpack.c.bf16 %v8885_v32, %v8877_v30 }
 0xa82   :  { %v14949_v55 = vpack.c.bf16 %v8806_v47, %v8798_v46  ;;  %v14919_v56 = vpack.c.bf16 %v8821_v50, %v8813_v49  ;;  %v14967_v48 = vpack.c.bf16 %v8887_v34, %v8879_v33  ;;  %v8893_v46 = vld [vmem:[#allocation15 + $0x3328] sm:$0xff]  ;;  %v8895_v49 = vld [vmem:[#allocation15 + $0x3338] sm:$0xff] }
 0xa83   :  { %v8901_v47 = vld [vmem:[#allocation15 + $0x3368] sm:$0xff]  ;;  %v8903_v50 = vld [vmem:[#allocation15 + $0x3378] sm:$0xff] }
 0xa84   :  { %14866 = vmatpush1.bf16.msra.mxu1 %v14865_v8  ;;  %14898 = vmatpush1.bf16.msra.mxu0 %v14897_v5  ;;  %v8812_v8 = vld [vmem:[#allocation15 + $0x30a0] sm:$0xff]  ;;  %v9249_v30 = vld [vmem:[#allocation15 + $0x3518] sm:$0xff] }
 0xa85   :  { %14868 = vmatprep.subr.bf16.mxu1 %v14867_v58  ;;  %14900 = vmatprep.subr.bf16.mxu0 %v14899_v27  ;;  %v8820_v5 = vld [vmem:[#allocation15 + $0x30e0] sm:$0xff]  ;;  %v8814_v58 = vld [vmem:[#allocation15 + $0x30b0] sm:$0xff]  ;;  %v9257_v32 = vld [vmem:[#allocation15 + $0x3558] sm:$0xff] }
 0xa86   :  { %v8822_v27 = vld [vmem:[#allocation15 + $0x30f0] sm:$0xff]  ;;  %v14921_v61 = vpack.c.bf16 %v8820_v5, %v8812_v8  ;;  %v14939_v8 = vpack.c.bf16 %v8901_v47, %v8893_v46  ;;  %v14971_v5 = vpack.c.bf16 %v8903_v50, %v8895_v49  ;;  %v9265_v46 = vld [vmem:[#allocation15 + $0x3598] sm:$0xff]  ;;  %v9262_v50 = vld [vmem:[#allocation15 + $0x3580] sm:$0xff] }
 0xa87   :  { %v14953_v4 = vpack.c.bf16 %v8822_v27, %v8814_v58  ;;  %v8909_v58 = vld [vmem:[#allocation15 + $0x33a8] sm:$0xff]  ;;  %v9273_v47 = vld [vmem:[#allocation15 + $0x35d8] sm:$0xff] }
 0xa88   :  { %14870 = vmatpush1.bf16.msra.mxu1 %v14869_v0  ;;  %14902 = vmatpush1.bf16.msra.mxu0 %v14901_v1  ;;  %v8828_v0 = vld [vmem:[#allocation15 + $0x3120] sm:$0xff]  ;;  %v8917_v27 = vld [vmem:[#allocation15 + $0x33e8] sm:$0xff] }
 0xa89   :  { %14872 = vmatprep.subr.bf16.mxu1 %v14871_v62  ;;  %14904 = vmatprep.subr.bf16.mxu0 %v14903_v9  ;;  %v8836_v1 = vld [vmem:[#allocation15 + $0x3160] sm:$0xff]  ;;  %v8830_v62 = vld [vmem:[#allocation15 + $0x3130] sm:$0xff] }
 0xa8a   :  { %v8838_v9 = vld [vmem:[#allocation15 + $0x3170] sm:$0xff]  ;;  %v14925_v11 = vpack.c.bf16 %v8836_v1, %v8828_v0  ;;  %v14943_v0 = vpack.c.bf16 %v8917_v27, %v8909_v58  ;;  %v14975_v1 = vpack.c.bf16 %v8919_v59, %v8911_v63  ;;  %v9289_v58 = vld [vmem:[#allocation15 + $0x3658] sm:$0xff]  ;;  %v9278_v59 = vld [vmem:[#allocation15 + $0x3600] sm:$0xff] }
 0xa8b   :  { %v14957_v12 = vpack.c.bf16 %v8838_v9, %v8830_v62  ;;  %v9215_v62 = vld [vmem:[#allocation15 + $0x3408] sm:$0xff] }
 0xa8c   :  { %14874 = vmatpush1.bf16.msra.mxu1 %v14873_v7  ;;  %14906 = vmatpush1.bf16.msra.mxu0 %v14905_v13  ;;  %v8844_v7 = vld [vmem:[#allocation15 + $0x31a0] sm:$0xff]  ;;  %v9223_v9 = vld [vmem:[#allocation15 + $0x3448] sm:$0xff] }
 0xa8d   :  { %14876 = vmatprep.subr.bf16.mxu1 %v14875_v15  ;;  %14908 = vmatprep.subr.bf16.mxu0 %v14907_v25  ;;  %v8852_v13 = vld [vmem:[#allocation15 + $0x31e0] sm:$0xff]  ;;  %v8846_v15 = vld [vmem:[#allocation15 + $0x31b0] sm:$0xff] }
 0xa8e   :  { %v8854_v25 = vld [vmem:[#allocation15 + $0x31f0] sm:$0xff]  ;;  %v14929_v31 = vpack.c.bf16 %v8852_v13, %v8844_v7  ;;  %v14979_v7 = vpack.c.bf16 %v9223_v9, %v9215_v62  ;;  %v15011_v13 = vpack.c.bf16 %v9225_v44, %v9217_v10  ;;  %v9305_v62 = vld [vmem:[#allocation15 + $0x36d8] sm:$0xff]  ;;  %v9294_v44 = vld [vmem:[#allocation15 + $0x3680] sm:$0xff] }
 0xa8f   :  { %v14961_v20 = vpack.c.bf16 %v8854_v25, %v8846_v15  ;;  %v9231_v15 = vld [vmem:[#allocation15 + $0x3488] sm:$0xff] }
 0xa90   :  { %14878 = vmatpush1.bf16.msra.mxu1 %v14877_v29  ;;  %14910 = vmatpush1.bf16.msra.mxu0 %v14909_v22  ;;  %v8860_v29 = vld [vmem:[#allocation15 + $0x3220] sm:$0xff]  ;;  %v9239_v25 = vld [vmem:[#allocation15 + $0x34c8] sm:$0xff] }
 0xa91   :  { %14880 = vmatprep.subr.bf16.mxu1 %v14879_v28  ;;  %14912 = vmatprep.subr.bf16.mxu0 %v14911_v36  ;;  %v8868_v22 = vld [vmem:[#allocation15 + $0x3260] sm:$0xff]  ;;  %v8862_v28 = vld [vmem:[#allocation15 + $0x3230] sm:$0xff] }
 0xa92   :  { %v8870_v36 = vld [vmem:[#allocation15 + $0x3270] sm:$0xff]  ;;  %v14933_v42 = vpack.c.bf16 %v8868_v22, %v8860_v29  ;;  %v14983_v29 = vpack.c.bf16 %v9239_v25, %v9231_v15  ;;  %v15015_v22 = vpack.c.bf16 %v9241_v21, %v9233_v17  ;;  %v9321_v15 = vld [vmem:[#allocation15 + $0x3758] sm:$0xff]  ;;  %v9310_v21 = vld [vmem:[#allocation15 + $0x3700] sm:$0xff] }
 0xa93   :  { %v14965_v37 = vpack.c.bf16 %v8870_v36, %v8862_v28  ;;  %v9247_v28 = vld [vmem:[#allocation15 + $0x3508] sm:$0xff] }
 0xa94   :  { %14882 = vmatpush1.bf16.msra.mxu1 %v14881_v38  ;;  %14914 = vmatpush1.bf16.msra.mxu0 %v14913_v39  ;;  %v8876_v38 = vld [vmem:[#allocation15 + $0x32a0] sm:$0xff]  ;;  %v9255_v36 = vld [vmem:[#allocation15 + $0x3548] sm:$0xff] }
 0xa95   :  { %14916 = vmatprep.subr.bf16.mxu1 %v14915_v43  ;;  %14948 = vmatprep.subr.bf16.mxu0 %v14947_v45  ;;  %v8884_v39 = vld [vmem:[#allocation15 + $0x32e0] sm:$0xff]  ;;  %v8878_v43 = vld [vmem:[#allocation15 + $0x32b0] sm:$0xff] }
 0xa96   :  { %v8886_v45 = vld [vmem:[#allocation15 + $0x32f0] sm:$0xff]  ;;  %v14937_v51 = vpack.c.bf16 %v8884_v39, %v8876_v38  ;;  %v14987_v38 = vpack.c.bf16 %v9255_v36, %v9247_v28  ;;  %v15019_v39 = vpack.c.bf16 %v9257_v32, %v9249_v30  ;;  %v9337_v28 = vld [vmem:[#allocation15 + $0x37d8] sm:$0xff]  ;;  %v9326_v32 = vld [vmem:[#allocation15 + $0x3780] sm:$0xff] }
 0xa97   :  { %8985 = vmatmul.mubr.f32.vlgmr.msra.gmra.mrb[20].mxu1 %v16742_v52  ;;  %9056 = vmatmul.mubr.f32.vlgmr.msra.gmra.mrb[64].mxu0 %v16742_v52  ;;  %v14969_v26 = vpack.c.bf16 %v8886_v45, %v8878_v43  ;;  %v9263_v43 = vld [vmem:[#allocation15 + $0x3588] sm:$0xff] }
 0xa98   :  { %14918 = vmatpush1.bf16.msra.mxu1 %v14917_v54  ;;  %14950 = vmatpush1.bf16.msra.mxu0 %v14949_v55  ;;  %v8892_v54 = vld [vmem:[#allocation15 + $0x3320] sm:$0xff]  ;;  %v9271_v45 = vld [vmem:[#allocation15 + $0x35c8] sm:$0xff] }
 0xa99   :  { %14920 = vmatprep.subr.bf16.mxu1 %v14919_v56  ;;  %14952 = vmatprep.subr.bf16.mxu0 %v14951_v57  ;;  %v8900_v55 = vld [vmem:[#allocation15 + $0x3360] sm:$0xff]  ;;  %v8894_v56 = vld [vmem:[#allocation15 + $0x3330] sm:$0xff] }
 0xa9a   :  { %9126 = vmatprep.mubr.f32.mxu1 %v15872_v41  ;;  %9197 = vmatprep.mubr.f32.mxu0 %v15872_v41  ;;  %v8902_v57 = vld [vmem:[#allocation15 + $0x3370] sm:$0xff]  ;;  %v14941_v60 = vpack.c.bf16 %v8900_v55, %v8892_v54  ;;  %v15023_v54 = vpack.c.bf16 %v9273_v47, %v9265_v46  ;;  %v9218_v47 = vld [vmem:[#allocation15 + $0x3420] sm:$0xff] }
 0xa9b   :  { %v14973_v6 = vpack.c.bf16 %v8902_v57, %v8894_v56  ;;  %v9264_v55 = vld [vmem:[#allocation15 + $0x3590] sm:$0xff]  ;;  %v9287_v56 = vld [vmem:[#allocation15 + $0x3648] sm:$0xff]  ;;  %v9281_v57 = vld [vmem:[#allocation15 + $0x3618] sm:$0xff] }
 0xa9c   :  { %14922 = vmatpush1.bf16.msra.mxu1 %v14921_v61  ;;  %14954 = vmatpush1.bf16.msra.mxu0 %v14953_v4  ;;  %v8908_v61 = vld [vmem:[#allocation15 + $0x33a0] sm:$0xff] }
 0xa9d   :  { %14924 = vmatprep.subr.bf16.mxu1 %v14923_v2  ;;  %14956 = vmatprep.subr.bf16.mxu0 %v14955_v3  ;;  %v8916_v4 = vld [vmem:[#allocation15 + $0x33e0] sm:$0xff]  ;;  %v8910_v2 = vld [vmem:[#allocation15 + $0x33b0] sm:$0xff] }
 0xa9e   :  { %v8918_v3 = vld [vmem:[#allocation15 + $0x33f0] sm:$0xff]  ;;  %v14945_v53 = vpack.c.bf16 %v8916_v4, %v8908_v61  ;;  %v15027_v61 = vpack.c.bf16 %v9289_v58, %v9281_v57 }
 0xa9f   :  { %v14977_v16 = vpack.c.bf16 %v8918_v3, %v8910_v2  ;;  %v9280_v4 = vld [vmem:[#allocation15 + $0x3610] sm:$0xff]  ;;  %v9303_v2 = vld [vmem:[#allocation15 + $0x36c8] sm:$0xff]  ;;  %v9297_v3 = vld [vmem:[#allocation15 + $0x3698] sm:$0xff] }
 0xaa0   :  { %14926 = vmatpush1.bf16.msra.mxu1 %v14925_v11  ;;  %14958 = vmatpush1.bf16.msra.mxu0 %v14957_v12  ;;  %v9214_v11 = vld [vmem:[#allocation15 + $0x3400] sm:$0xff] }
 0xaa1   :  { %14928 = vmatprep.subr.bf16.mxu1 %v14927_v35  ;;  %14960 = vmatprep.subr.bf16.mxu0 %v14959_v14  ;;  %v9222_v12 = vld [vmem:[#allocation15 + $0x3440] sm:$0xff]  ;;  %v9216_v35 = vld [vmem:[#allocation15 + $0x3410] sm:$0xff] }
 0xaa2   :  { %v9224_v14 = vld [vmem:[#allocation15 + $0x3450] sm:$0xff]  ;;  %v14981_v18 = vpack.c.bf16 %v9222_v12, %v9214_v11  ;;  %v15031_v11 = vpack.c.bf16 %v9305_v62, %v9297_v3 }
 0xaa3   :  { %v15013_v19 = vpack.c.bf16 %v9224_v14, %v9216_v35  ;;  %v9296_v12 = vld [vmem:[#allocation15 + $0x3690] sm:$0xff]  ;;  %v9319_v35 = vld [vmem:[#allocation15 + $0x3748] sm:$0xff]  ;;  %v9313_v14 = vld [vmem:[#allocation15 + $0x3718] sm:$0xff] }
 0xaa4   :  { %14930 = vmatpush1.bf16.msra.mxu1 %v14929_v31  ;;  %14962 = vmatpush1.bf16.msra.mxu0 %v14961_v20  ;;  %v9230_v31 = vld [vmem:[#allocation15 + $0x3480] sm:$0xff] }
 0xaa5   :  { %14932 = vmatprep.subr.bf16.mxu1 %v14931_v23  ;;  %14964 = vmatprep.subr.bf16.mxu0 %v14963_v24  ;;  %v9238_v20 = vld [vmem:[#allocation15 + $0x34c0] sm:$0xff]  ;;  %v9232_v23 = vld [vmem:[#allocation15 + $0x3490] sm:$0xff] }
 0xaa6   :  { %v9240_v24 = vld [vmem:[#allocation15 + $0x34d0] sm:$0xff]  ;;  %v14985_v33 = vpack.c.bf16 %v9238_v20, %v9230_v31  ;;  %v15035_v31 = vpack.c.bf16 %v9321_v15, %v9313_v14 }
 0xaa7   :  { %v15017_v34 = vpack.c.bf16 %v9240_v24, %v9232_v23  ;;  %v9312_v20 = vld [vmem:[#allocation15 + $0x3710] sm:$0xff]  ;;  %v9335_v23 = vld [vmem:[#allocation15 + $0x37c8] sm:$0xff]  ;;  %v9329_v24 = vld [vmem:[#allocation15 + $0x3798] sm:$0xff] }
 0xaa8   :  { %14934 = vmatpush1.bf16.msra.mxu1 %v14933_v42  ;;  %14966 = vmatpush1.bf16.msra.mxu0 %v14965_v37  ;;  %v9246_v42 = vld [vmem:[#allocation15 + $0x3500] sm:$0xff] }
 0xaa9   :  { %14936 = vmatprep.subr.bf16.mxu1 %v14935_v40  ;;  %14968 = vmatprep.subr.bf16.mxu0 %v14967_v48  ;;  %v9254_v37 = vld [vmem:[#allocation15 + $0x3540] sm:$0xff]  ;;  %v9248_v40 = vld [vmem:[#allocation15 + $0x3510] sm:$0xff] }
 0xaaa   :  { %v9256_v48 = vld [vmem:[#allocation15 + $0x3550] sm:$0xff] }
 0xaab   :  { %v15021_v49 = vpack.c.bf16 %v9256_v48, %v9248_v40  ;;  %v9227_v40 = vld [vmem:[#allocation15 + $0x3468] sm:$0xff]  ;;  %v9221_v48 = vld [vmem:[#allocation15 + $0x3438] sm:$0xff] }
 0xaac   :  { %14938 = vmatpush1.bf16.msra.mxu1 %v14937_v51  ;;  %14970 = vmatpush1.bf16.msra.mxu0 %v14969_v26  ;;  %v9270_v51 = vld [vmem:[#allocation15 + $0x35c0] sm:$0xff]  ;;  %v14991_v26 = vpack.c.bf16 %v9271_v45, %v9263_v43  ;;  %v9229_v43 = vld [vmem:[#allocation15 + $0x3478] sm:$0xff] }
 0xaad   :  { %14940 = vmatprep.subr.bf16.mxu1 %v14939_v8  ;;  %14972 = vmatprep.subr.bf16.mxu0 %v14971_v5  ;;  %v9272_v8 = vld [vmem:[#allocation15 + $0x35d0] sm:$0xff]  ;;  %v9279_v5 = vld [vmem:[#allocation15 + $0x3608] sm:$0xff]  ;;  %v14993_v27 = vpack.c.bf16 %v9270_v51, %v9262_v50  ;;  %v15075_v50 = vpack.c.bf16 %v9229_v43, %v9221_v48 }
 0xaae   :  { %v15025_v63 = vpack.c.bf16 %v9272_v8, %v9264_v55  ;;  %v9220_v51 = vld [vmem:[#allocation15 + $0x3430] sm:$0xff]  ;;  %v9243_v55 = vld [vmem:[#allocation15 + $0x34e8] sm:$0xff]  ;;  %v9237_v8 = vld [vmem:[#allocation15 + $0x34b8] sm:$0xff] }
 0xab0   :  { %14942 = vmatpush1.bf16.msra.mxu1 %v14941_v60  ;;  %14974 = vmatpush1.bf16.msra.mxu0 %v14973_v6  ;;  %v9286_v60 = vld [vmem:[#allocation15 + $0x3640] sm:$0xff]  ;;  %v14995_v6 = vpack.c.bf16 %v9287_v56, %v9279_v5  ;;  %v9245_v5 = vld [vmem:[#allocation15 + $0x34f8] sm:$0xff]  ;;  %v16752_v56 = vld [vmem:[#allocation2 + $0x1a] sm:$0x3] }
 0xab1   :  { %14944 = vmatprep.subr.bf16.mxu1 %v14943_v0  ;;  %14976 = vmatprep.subr.bf16.mxu0 %v14975_v1  ;;  %v9288_v0 = vld [vmem:[#allocation15 + $0x3650] sm:$0xff]  ;;  %v9295_v1 = vld [vmem:[#allocation15 + $0x3688] sm:$0xff]  ;;  %v14997_v9 = vpack.c.bf16 %v9286_v60, %v9278_v59  ;;  %v15079_v60 = vpack.c.bf16 %v9245_v5, %v9237_v8 }
 0xab2   :  { %v15029_v10 = vpack.c.bf16 %v9288_v0, %v9280_v4  ;;  %v9251_v4 = vld [vmem:[#allocation15 + $0x3528] sm:$0xff] }
 0xab3   :  { %v9259_v0 = vld [vmem:[#allocation15 + $0x3568] sm:$0xff] }
 0xab4   :  { %14946 = vmatpush1.bf16.msra.mxu1 %v14945_v53  ;;  %14978 = vmatpush1.bf16.msra.mxu0 %v14977_v16  ;;  %v9302_v53 = vld [vmem:[#allocation15 + $0x36c0] sm:$0xff]  ;;  %v14999_v16 = vpack.c.bf16 %v9303_v2, %v9295_v1  ;;  %v9253_v1 = vld [vmem:[#allocation15 + $0x3538] sm:$0xff] }
 0xab5   :  { %14980 = vmatprep.subr.bf16.mxu1 %v14979_v7  ;;  %15012 = vmatprep.subr.bf16.mxu0 %v15011_v13  ;;  %v9304_v7 = vld [vmem:[#allocation15 + $0x36d0] sm:$0xff]  ;;  %v9311_v13 = vld [vmem:[#allocation15 + $0x3708] sm:$0xff]  ;;  %v15001_v25 = vpack.c.bf16 %v9302_v53, %v9294_v44  ;;  %v9261_v2 = vld [vmem:[#allocation15 + $0x3578] sm:$0xff]  ;;  %v15051_v44 = vpack.c.bf16 %v9259_v0, %v9251_v4 }
 0xab6   :  { %v15033_v17 = vpack.c.bf16 %v9304_v7, %v9296_v12  ;;  %v15083_v53 = vpack.c.bf16 %v9261_v2, %v9253_v1  ;;  %v9267_v12 = vld [vmem:[#allocation15 + $0x35a8] sm:$0xff]  ;;  %v9333_v4 = vld [vmem:[#allocation15 + $0x37b8] sm:$0xff] }
 0xab7   :  { %9127 = vmatmul.mubr.f32.vlgmr.msra.gmra.mrb[22].mxu1 %v16742_v52  ;;  %9198 = vmatmul.mubr.f32.vlgmr.msra.gmra.mrb[66].mxu0 %v16742_v52  ;;  %v14989_v52 = vpack.c.bf16 %v9254_v37, %v9246_v42  ;;  %v15039_v42 = vpack.c.bf16 %v9337_v28, %v9329_v24  ;;  %v9328_v37 = vld [vmem:[#allocation15 + $0x3790] sm:$0xff]  ;;  %v9275_v7 = vld [vmem:[#allocation15 + $0x35e8] sm:$0xff]  ;;  %v9341_v0 = vld [vmem:[#allocation15 + $0x37f8] sm:$0xff] }
 0xab8   :  { %14982 = vmatpush1.bf16.msra.mxu1 %v14981_v18  ;;  %15014 = vmatpush1.bf16.msra.mxu0 %v15013_v19  ;;  %v9318_v18 = vld [vmem:[#allocation15 + $0x3740] sm:$0xff]  ;;  %v15003_v19 = vpack.c.bf16 %v9319_v35, %v9311_v13  ;;  %v9269_v13 = vld [vmem:[#allocation15 + $0x35b8] sm:$0xff] }
 0xab9   :  { %14984 = vmatprep.subr.bf16.mxu1 %v14983_v29  ;;  %15016 = vmatprep.subr.bf16.mxu0 %v15015_v22  ;;  %v9320_v29 = vld [vmem:[#allocation15 + $0x3750] sm:$0xff]  ;;  %v9327_v22 = vld [vmem:[#allocation15 + $0x3788] sm:$0xff]  ;;  %v15005_v36 = vpack.c.bf16 %v9318_v18, %v9310_v21  ;;  %v9277_v35 = vld [vmem:[#allocation15 + $0x35f8] sm:$0xff]  ;;  %v15055_v21 = vpack.c.bf16 %v9275_v7, %v9267_v12 }
 0xaba   :  { %9406 = vmatprep.mubr.f32.mxu1 %v15872_v41  ;;  %9477 = vmatprep.mubr.f32.mxu0 %v15872_v41  ;;  %v15037_v30 = vpack.c.bf16 %v9320_v29, %v9312_v20  ;;  %v15087_v18 = vpack.c.bf16 %v9277_v35, %v9269_v13  ;;  %v9283_v20 = vld [vmem:[#allocation15 + $0x3628] sm:$0xff]  ;;  %v9639_v12 = vld [vmem:[#allocation15 + $0x3818] sm:$0xff] }
 0xabb   :  { %v9291_v29 = vld [vmem:[#allocation15 + $0x3668] sm:$0xff]  ;;  %v9647_v7 = vld [vmem:[#allocation15 + $0x3858] sm:$0xff] }
 0xabc   :  { %14986 = vmatpush1.bf16.msra.mxu1 %v14985_v33  ;;  %15018 = vmatpush1.bf16.msra.mxu0 %v15017_v34  ;;  %v9334_v33 = vld [vmem:[#allocation15 + $0x37c0] sm:$0xff]  ;;  %v15007_v34 = vpack.c.bf16 %v9335_v23, %v9327_v22  ;;  %v9285_v22 = vld [vmem:[#allocation15 + $0x3638] sm:$0xff] }
 0xabd   :  { %14988 = vmatprep.subr.bf16.mxu1 %v14987_v38  ;;  %15020 = vmatprep.subr.bf16.mxu0 %v15019_v39  ;;  %v9336_v38 = vld [vmem:[#allocation15 + $0x37d0] sm:$0xff]  ;;  %v9219_v39 = vld [vmem:[#allocation15 + $0x3428] sm:$0xff]  ;;  %v15009_v45 = vpack.c.bf16 %v9334_v33, %v9326_v32  ;;  %v9293_v23 = vld [vmem:[#allocation15 + $0x3678] sm:$0xff]  ;;  %v15059_v32 = vpack.c.bf16 %v9291_v29, %v9283_v20 }
 0xabe   :  { %v15041_v46 = vpack.c.bf16 %v9336_v38, %v9328_v37  ;;  %v15091_v33 = vpack.c.bf16 %v9293_v23, %v9285_v22  ;;  %v9299_v37 = vld [vmem:[#allocation15 + $0x36a8] sm:$0xff]  ;;  %v9655_v20 = vld [vmem:[#allocation15 + $0x3898] sm:$0xff] }
 0xabf   :  { %v9307_v38 = vld [vmem:[#allocation15 + $0x36e8] sm:$0xff]  ;;  %v9663_v29 = vld [vmem:[#allocation15 + $0x38d8] sm:$0xff] }
 0xac0   :  { %14990 = vmatpush1.bf16.msra.mxu1 %v14989_v52  ;;  %15022 = vmatpush1.bf16.msra.mxu0 %v15021_v49  ;;  %v9226_v52 = vld [vmem:[#allocation15 + $0x3460] sm:$0xff]  ;;  %v15043_v49 = vpack.c.bf16 %v9227_v40, %v9219_v39  ;;  %v9301_v39 = vld [vmem:[#allocation15 + $0x36b8] sm:$0xff] }
 0xac1   :  { %14992 = vmatprep.subr.bf16.mxu1 %v14991_v26  ;;  %15024 = vmatprep.subr.bf16.mxu0 %v15023_v54  ;;  %v9228_v26 = vld [vmem:[#allocation15 + $0x3470] sm:$0xff]  ;;  %v9235_v54 = vld [vmem:[#allocation15 + $0x34a8] sm:$0xff]  ;;  %v15045_v57 = vpack.c.bf16 %v9226_v52, %v9218_v47  ;;  %v9309_v40 = vld [vmem:[#allocation15 + $0x36f8] sm:$0xff]  ;;  %v15063_v47 = vpack.c.bf16 %v9307_v38, %v9299_v37 }
 0xac2   :  { %v15077_v58 = vpack.c.bf16 %v9228_v26, %v9220_v51  ;;  %v15047_v59 = vpack.c.bf16 %v9243_v55, %v9235_v54  ;;  %v15095_v52 = vpack.c.bf16 %v9309_v40, %v9301_v39  ;;  %v9315_v51 = vld [vmem:[#allocation15 + $0x3728] sm:$0xff]  ;;  %v9317_v54 = vld [vmem:[#allocation15 + $0x3738] sm:$0xff] }
 0xac3   :  { %v9323_v26 = vld [vmem:[#allocation15 + $0x3768] sm:$0xff]  ;;  %v9325_v55 = vld [vmem:[#allocation15 + $0x3778] sm:$0xff] }
 0xac4   :  { %14994 = vmatpush1.bf16.msra.mxu1 %v14993_v27  ;;  %15026 = vmatpush1.bf16.msra.mxu0 %v15025_v63  ;;  %v9234_v27 = vld [vmem:[#allocation15 + $0x34a0] sm:$0xff]  ;;  %v9671_v37 = vld [vmem:[#allocation15 + $0x3918] sm:$0xff] }
 0xac5   :  { %14996 = vmatprep.subr.bf16.mxu1 %v14995_v6  ;;  %15028 = vmatprep.subr.bf16.mxu0 %v15027_v61  ;;  %v9242_v63 = vld [vmem:[#allocation15 + $0x34e0] sm:$0xff]  ;;  %v9236_v6 = vld [vmem:[#allocation15 + $0x34b0] sm:$0xff]  ;;  %v9679_v38 = vld [vmem:[#allocation15 + $0x3958] sm:$0xff] }
 0xac6   :  { %v9244_v61 = vld [vmem:[#allocation15 + $0x34f0] sm:$0xff]  ;;  %v15049_v3 = vpack.c.bf16 %v9242_v63, %v9234_v27  ;;  %v15067_v27 = vpack.c.bf16 %v9323_v26, %v9315_v51  ;;  %v15099_v63 = vpack.c.bf16 %v9325_v55, %v9317_v54  ;;  %v9687_v51 = vld [vmem:[#allocation15 + $0x3998] sm:$0xff]  ;;  %v9684_v55 = vld [vmem:[#allocation15 + $0x3980] sm:$0xff] }
 0xac7   :  { %v15081_v62 = vpack.c.bf16 %v9244_v61, %v9236_v6  ;;  %v9331_v6 = vld [vmem:[#allocation15 + $0x37a8] sm:$0xff]  ;;  %v9695_v26 = vld [vmem:[#allocation15 + $0x39d8] sm:$0xff] }
 0xac8   :  { %14998 = vmatpush1.bf16.msra.mxu1 %v14997_v9  ;;  %15030 = vmatpush1.bf16.msra.mxu0 %v15029_v10  ;;  %v9250_v9 = vld [vmem:[#allocation15 + $0x3520] sm:$0xff]  ;;  %v9339_v61 = vld [vmem:[#allocation15 + $0x37e8] sm:$0xff] }
 0xac9   :  { %15000 = vmatprep.subr.bf16.mxu1 %v14999_v16  ;;  %15032 = vmatprep.subr.bf16.mxu0 %v15031_v11  ;;  %v9258_v10 = vld [vmem:[#allocation15 + $0x3560] sm:$0xff]  ;;  %v9252_v16 = vld [vmem:[#allocation15 + $0x3530] sm:$0xff] }
 0xaca   :  { %v9260_v11 = vld [vmem:[#allocation15 + $0x3570] sm:$0xff]  ;;  %v15053_v14 = vpack.c.bf16 %v9258_v10, %v9250_v9  ;;  %v15071_v9 = vpack.c.bf16 %v9339_v61, %v9331_v6  ;;  %v15103_v10 = vpack.c.bf16 %v9341_v0, %v9333_v4  ;;  %v9711_v6 = vld [vmem:[#allocation15 + $0x3a58] sm:$0xff]  ;;  %v9700_v0 = vld [vmem:[#allocation15 + $0x3a00] sm:$0xff] }
 0xacb   :  { %v15085_v15 = vpack.c.bf16 %v9260_v11, %v9252_v16  ;;  %v9637_v16 = vld [vmem:[#allocation15 + $0x3808] sm:$0xff] }
 0xacc   :  { %15002 = vmatpush1.bf16.msra.mxu1 %v15001_v25  ;;  %15034 = vmatpush1.bf16.msra.mxu0 %v15033_v17  ;;  %v9266_v25 = vld [vmem:[#allocation15 + $0x35a0] sm:$0xff]  ;;  %v9645_v11 = vld [vmem:[#allocation15 + $0x3848] sm:$0xff] }
 0xacd   :  { %15004 = vmatprep.subr.bf16.mxu1 %v15003_v19  ;;  %15036 = vmatprep.subr.bf16.mxu0 %v15035_v31  ;;  %v9274_v17 = vld [vmem:[#allocation15 + $0x35e0] sm:$0xff]  ;;  %v9268_v19 = vld [vmem:[#allocation15 + $0x35b0] sm:$0xff] }
 0xace   :  { %v9276_v31 = vld [vmem:[#allocation15 + $0x35f0] sm:$0xff]  ;;  %v15057_v24 = vpack.c.bf16 %v9274_v17, %v9266_v25  ;;  %v15107_v25 = vpack.c.bf16 %v9645_v11, %v9637_v16  ;;  %v15139_v17 = vpack.c.bf16 %v9647_v7, %v9639_v12  ;;  %v9727_v16 = vld [vmem:[#allocation15 + $0x3ad8] sm:$0xff]  ;;  %v9716_v7 = vld [vmem:[#allocation15 + $0x3a80] sm:$0xff] }
 0xacf   :  { %v15089_v28 = vpack.c.bf16 %v9276_v31, %v9268_v19  ;;  %v9653_v19 = vld [vmem:[#allocation15 + $0x3888] sm:$0xff] }
 0xad0   :  { %15006 = vmatpush1.bf16.msra.mxu1 %v15005_v36  ;;  %15038 = vmatpush1.bf16.msra.mxu0 %v15037_v30  ;;  %v9282_v36 = vld [vmem:[#allocation15 + $0x3620] sm:$0xff]  ;;  %v9661_v31 = vld [vmem:[#allocation15 + $0x38c8] sm:$0xff] }
 0xad1   :  { %15008 = vmatprep.subr.bf16.mxu1 %v15007_v34  ;;  %15040 = vmatprep.subr.bf16.mxu0 %v15039_v42  ;;  %v9290_v30 = vld [vmem:[#allocation15 + $0x3660] sm:$0xff]  ;;  %v9284_v34 = vld [vmem:[#allocation15 + $0x3630] sm:$0xff] }
 0xad2   :  { %v9292_v42 = vld [vmem:[#allocation15 + $0x3670] sm:$0xff]  ;;  %v15061_v48 = vpack.c.bf16 %v9290_v30, %v9282_v36  ;;  %v15111_v36 = vpack.c.bf16 %v9661_v31, %v9653_v19  ;;  %v15143_v30 = vpack.c.bf16 %v9663_v29, %v9655_v20  ;;  %v9743_v19 = vld [vmem:[#allocation15 + $0x3b58] sm:$0xff]  ;;  %v9732_v29 = vld [vmem:[#allocation15 + $0x3b00] sm:$0xff] }
 0xad3   :  { %v15093_v43 = vpack.c.bf16 %v9292_v42, %v9284_v34  ;;  %v9669_v34 = vld [vmem:[#allocation15 + $0x3908] sm:$0xff] }
 0xad4   :  { %15010 = vmatpush1.bf16.msra.mxu1 %v15009_v45  ;;  %15042 = vmatpush1.bf16.msra.mxu0 %v15041_v46  ;;  %v9298_v45 = vld [vmem:[#allocation15 + $0x36a0] sm:$0xff]  ;;  %v9677_v42 = vld [vmem:[#allocation15 + $0x3948] sm:$0xff] }
 0xad5   :  { %15044 = vmatprep.subr.bf16.mxu1 %v15043_v49  ;;  %15076 = vmatprep.subr.bf16.mxu0 %v15075_v50  ;;  %v9306_v46 = vld [vmem:[#allocation15 + $0x36e0] sm:$0xff]  ;;  %v9300_v49 = vld [vmem:[#allocation15 + $0x36b0] sm:$0xff] }
 0xad6   :  { %v9308_v50 = vld [vmem:[#allocation15 + $0x36f0] sm:$0xff]  ;;  %v15065_v8 = vpack.c.bf16 %v9306_v46, %v9298_v45  ;;  %v15115_v45 = vpack.c.bf16 %v9677_v42, %v9669_v34  ;;  %v15147_v46 = vpack.c.bf16 %v9679_v38, %v9671_v37  ;;  %v9759_v34 = vld [vmem:[#allocation15 + $0x3bd8] sm:$0xff]  ;;  %v9748_v38 = vld [vmem:[#allocation15 + $0x3b80] sm:$0xff] }
 0xad7   :  { %9407 = vmatmul.mubr.f32.vlgmr.msra.gmra.mrb[20].mxu1 %v16752_v56  ;;  %9478 = vmatmul.mubr.f32.vlgmr.msra.gmra.mrb[64].mxu0 %v16752_v56  ;;  %v15097_v5 = vpack.c.bf16 %v9308_v50, %v9300_v49  ;;  %v9685_v49 = vld [vmem:[#allocation15 + $0x3988] sm:$0xff] }
 0xad8   :  { %15046 = vmatpush1.bf16.msra.mxu1 %v15045_v57  ;;  %15078 = vmatpush1.bf16.msra.mxu0 %v15077_v58  ;;  %v9314_v57 = vld [vmem:[#allocation15 + $0x3720] sm:$0xff]  ;;  %v9693_v50 = vld [vmem:[#allocation15 + $0x39c8] sm:$0xff] }
 0xad9   :  { %15048 = vmatprep.subr.bf16.mxu1 %v15047_v59  ;;  %15080 = vmatprep.subr.bf16.mxu0 %v15079_v60  ;;  %v9322_v58 = vld [vmem:[#allocation15 + $0x3760] sm:$0xff]  ;;  %v9316_v59 = vld [vmem:[#allocation15 + $0x3730] sm:$0xff] }
 0xada   :  { %9548 = vmatprep.mubr.f32.mxu1 %v15872_v41  ;;  %9619 = vmatprep.mubr.f32.mxu0 %v15872_v41  ;;  %v9324_v60 = vld [vmem:[#allocation15 + $0x3770] sm:$0xff]  ;;  %v15069_v1 = vpack.c.bf16 %v9322_v58, %v9314_v57  ;;  %v15151_v57 = vpack.c.bf16 %v9695_v26, %v9687_v51  ;;  %v9640_v26 = vld [vmem:[#allocation15 + $0x3820] sm:$0xff] }
 0xadb   :  { %v15101_v2 = vpack.c.bf16 %v9324_v60, %v9316_v59  ;;  %v9686_v58 = vld [vmem:[#allocation15 + $0x3990] sm:$0xff]  ;;  %v9709_v59 = vld [vmem:[#allocation15 + $0x3a48] sm:$0xff]  ;;  %v9703_v60 = vld [vmem:[#allocation15 + $0x3a18] sm:$0xff] }
 0xadc   :  { %15050 = vmatpush1.bf16.msra.mxu1 %v15049_v3  ;;  %15082 = vmatpush1.bf16.msra.mxu0 %v15081_v62  ;;  %v9330_v3 = vld [vmem:[#allocation15 + $0x37a0] sm:$0xff] }
 0xadd   :  { %15052 = vmatprep.subr.bf16.mxu1 %v15051_v44  ;;  %15084 = vmatprep.subr.bf16.mxu0 %v15083_v53  ;;  %v9338_v62 = vld [vmem:[#allocation15 + $0x37e0] sm:$0xff]  ;;  %v9332_v44 = vld [vmem:[#allocation15 + $0x37b0] sm:$0xff] }
 0xade   :  { %v9340_v53 = vld [vmem:[#allocation15 + $0x37f0] sm:$0xff]  ;;  %v15073_v13 = vpack.c.bf16 %v9338_v62, %v9330_v3  ;;  %v15155_v3 = vpack.c.bf16 %v9711_v6, %v9703_v60 }
 0xadf   :  { %v15105_v35 = vpack.c.bf16 %v9340_v53, %v9332_v44  ;;  %v9702_v62 = vld [vmem:[#allocation15 + $0x3a10] sm:$0xff]  ;;  %v9725_v44 = vld [vmem:[#allocation15 + $0x3ac8] sm:$0xff]  ;;  %v9719_v53 = vld [vmem:[#allocation15 + $0x3a98] sm:$0xff] }
 0xae0   :  { %15054 = vmatpush1.bf16.msra.mxu1 %v15053_v14  ;;  %15086 = vmatpush1.bf16.msra.mxu0 %v15085_v15  ;;  %v9636_v14 = vld [vmem:[#allocation15 + $0x3800] sm:$0xff] }
 0xae1   :  { %15056 = vmatprep.subr.bf16.mxu1 %v15055_v21  ;;  %15088 = vmatprep.subr.bf16.mxu0 %v15087_v18  ;;  %v9644_v15 = vld [vmem:[#allocation15 + $0x3840] sm:$0xff]  ;;  %v9638_v21 = vld [vmem:[#allocation15 + $0x3810] sm:$0xff] }
 0xae2   :  { %v9646_v18 = vld [vmem:[#allocation15 + $0x3850] sm:$0xff]  ;;  %v15109_v22 = vpack.c.bf16 %v9644_v15, %v9636_v14  ;;  %v15159_v14 = vpack.c.bf16 %v9727_v16, %v9719_v53 }
 0xae3   :  { %v15141_v23 = vpack.c.bf16 %v9646_v18, %v9638_v21  ;;  %v9718_v15 = vld [vmem:[#allocation15 + $0x3a90] sm:$0xff]  ;;  %v9741_v21 = vld [vmem:[#allocation15 + $0x3b48] sm:$0xff]  ;;  %v9735_v18 = vld [vmem:[#allocation15 + $0x3b18] sm:$0xff] }
 0xae4   :  { %15058 = vmatpush1.bf16.msra.mxu1 %v15057_v24  ;;  %15090 = vmatpush1.bf16.msra.mxu0 %v15089_v28  ;;  %v9652_v24 = vld [vmem:[#allocation15 + $0x3880] sm:$0xff] }
 0xae5   :  { %15060 = vmatprep.subr.bf16.mxu1 %v15059_v32  ;;  %15092 = vmatprep.subr.bf16.mxu0 %v15091_v33  ;;  %v9660_v28 = vld [vmem:[#allocation15 + $0x38c0] sm:$0xff]  ;;  %v9654_v32 = vld [vmem:[#allocation15 + $0x3890] sm:$0xff] }
 0xae6   :  { %v9662_v33 = vld [vmem:[#allocation15 + $0x38d0] sm:$0xff]  ;;  %v15113_v39 = vpack.c.bf16 %v9660_v28, %v9652_v24  ;;  %v15163_v24 = vpack.c.bf16 %v9743_v19, %v9735_v18 }
 0xae7   :  { %v15145_v40 = vpack.c.bf16 %v9662_v33, %v9654_v32  ;;  %v9734_v28 = vld [vmem:[#allocation15 + $0x3b10] sm:$0xff]  ;;  %v9757_v32 = vld [vmem:[#allocation15 + $0x3bc8] sm:$0xff]  ;;  %v9751_v33 = vld [vmem:[#allocation15 + $0x3b98] sm:$0xff] }
 0xae8   :  { %15062 = vmatpush1.bf16.msra.mxu1 %v15061_v48  ;;  %15094 = vmatpush1.bf16.msra.mxu0 %v15093_v43  ;;  %v9668_v48 = vld [vmem:[#allocation15 + $0x3900] sm:$0xff] }
 0xae9   :  { %15064 = vmatprep.subr.bf16.mxu1 %v15063_v47  ;;  %15096 = vmatprep.subr.bf16.mxu0 %v15095_v52  ;;  %v9676_v43 = vld [vmem:[#allocation15 + $0x3940] sm:$0xff]  ;;  %v9670_v47 = vld [vmem:[#allocation15 + $0x3910] sm:$0xff] }
 0xaea   :  { %v9678_v52 = vld [vmem:[#allocation15 + $0x3950] sm:$0xff] }
 0xaeb   :  { %v15149_v54 = vpack.c.bf16 %v9678_v52, %v9670_v47  ;;  %v9649_v47 = vld [vmem:[#allocation15 + $0x3868] sm:$0xff]  ;;  %v9643_v52 = vld [vmem:[#allocation15 + $0x3838] sm:$0xff] }
 0xaec   :  { %15066 = vmatpush1.bf16.msra.mxu1 %v15065_v8  ;;  %15098 = vmatpush1.bf16.msra.mxu0 %v15097_v5  ;;  %v9692_v8 = vld [vmem:[#allocation15 + $0x39c0] sm:$0xff]  ;;  %v15119_v5 = vpack.c.bf16 %v9693_v50, %v9685_v49  ;;  %v9651_v49 = vld [vmem:[#allocation15 + $0x3878] sm:$0xff] }
 0xaed   :  { %15068 = vmatprep.subr.bf16.mxu1 %v15067_v27  ;;  %15100 = vmatprep.subr.bf16.mxu0 %v15099_v63  ;;  %v9694_v27 = vld [vmem:[#allocation15 + $0x39d0] sm:$0xff]  ;;  %v9701_v63 = vld [vmem:[#allocation15 + $0x3a08] sm:$0xff]  ;;  %v15121_v61 = vpack.c.bf16 %v9692_v8, %v9684_v55  ;;  %v15203_v55 = vpack.c.bf16 %v9651_v49, %v9643_v52 }
 0xaee   :  { %v15153_v4 = vpack.c.bf16 %v9694_v27, %v9686_v58  ;;  %v9642_v8 = vld [vmem:[#allocation15 + $0x3830] sm:$0xff]  ;;  %v9665_v58 = vld [vmem:[#allocation15 + $0x38e8] sm:$0xff]  ;;  %v9659_v27 = vld [vmem:[#allocation15 + $0x38b8] sm:$0xff] }
 0xaf0   :  { %15070 = vmatpush1.bf16.msra.mxu1 %v15069_v1  ;;  %15102 = vmatpush1.bf16.msra.mxu0 %v15101_v2  ;;  %v9708_v1 = vld [vmem:[#allocation15 + $0x3a40] sm:$0xff]  ;;  %v15123_v2 = vpack.c.bf16 %v9709_v59, %v9701_v63  ;;  %v9667_v63 = vld [vmem:[#allocation15 + $0x38f8] sm:$0xff]  ;;  %v16762_v59 = vld [vmem:[#allocation2 + $0x1c] sm:$0x3] }
 0xaf1   :  { %15072 = vmatprep.subr.bf16.mxu1 %v15071_v9  ;;  %15104 = vmatprep.subr.bf16.mxu0 %v15103_v10  ;;  %v9710_v9 = vld [vmem:[#allocation15 + $0x3a50] sm:$0xff]  ;;  %v9717_v10 = vld [vmem:[#allocation15 + $0x3a88] sm:$0xff]  ;;  %v15125_v11 = vpack.c.bf16 %v9708_v1, %v9700_v0  ;;  %v15207_v1 = vpack.c.bf16 %v9667_v63, %v9659_v27 }
 0xaf2   :  { %v15157_v12 = vpack.c.bf16 %v9710_v9, %v9702_v62  ;;  %v9673_v62 = vld [vmem:[#allocation15 + $0x3928] sm:$0xff] }
 0xaf3   :  { %v9681_v9 = vld [vmem:[#allocation15 + $0x3968] sm:$0xff] }
 0xaf4   :  { %15074 = vmatpush1.bf16.msra.mxu1 %v15073_v13  ;;  %15106 = vmatpush1.bf16.msra.mxu0 %v15105_v35  ;;  %v9724_v13 = vld [vmem:[#allocation15 + $0x3ac0] sm:$0xff]  ;;  %v15127_v35 = vpack.c.bf16 %v9725_v44, %v9717_v10  ;;  %v9675_v10 = vld [vmem:[#allocation15 + $0x3938] sm:$0xff] }
 0xaf5   :  { %15108 = vmatprep.subr.bf16.mxu1 %v15107_v25  ;;  %15140 = vmatprep.subr.bf16.mxu0 %v15139_v17  ;;  %v9726_v25 = vld [vmem:[#allocation15 + $0x3ad0] sm:$0xff]  ;;  %v9733_v17 = vld [vmem:[#allocation15 + $0x3b08] sm:$0xff]  ;;  %v15129_v31 = vpack.c.bf16 %v9724_v13, %v9716_v7  ;;  %v9683_v44 = vld [vmem:[#allocation15 + $0x3978] sm:$0xff]  ;;  %v15179_v7 = vpack.c.bf16 %v9681_v9, %v9673_v62 }
 0xaf6   :  { %v15161_v20 = vpack.c.bf16 %v9726_v25, %v9718_v15  ;;  %v15211_v13 = vpack.c.bf16 %v9683_v44, %v9675_v10  ;;  %v9689_v15 = vld [vmem:[#allocation15 + $0x39a8] sm:$0xff]  ;;  %v9755_v62 = vld [vmem:[#allocation15 + $0x3bb8] sm:$0xff] }
 0xaf7   :  { %9549 = vmatmul.mubr.f32.vlgmr.msra.gmra.mrb[22].mxu1 %v16752_v56  ;;  %9620 = vmatmul.mubr.f32.vlgmr.msra.gmra.mrb[66].mxu0 %v16752_v56  ;;  %v15117_v56 = vpack.c.bf16 %v9676_v43, %v9668_v48  ;;  %v15167_v48 = vpack.c.bf16 %v9759_v34, %v9751_v33  ;;  %v9750_v43 = vld [vmem:[#allocation15 + $0x3b90] sm:$0xff]  ;;  %v9697_v25 = vld [vmem:[#allocation15 + $0x39e8] sm:$0xff]  ;;  %v9763_v9 = vld [vmem:[#allocation15 + $0x3bf8] sm:$0xff] }
 0xaf8   :  { %15110 = vmatpush1.bf16.msra.mxu1 %v15109_v22  ;;  %15142 = vmatpush1.bf16.msra.mxu0 %v15141_v23  ;;  %v9740_v22 = vld [vmem:[#allocation15 + $0x3b40] sm:$0xff]  ;;  %v15131_v23 = vpack.c.bf16 %v9741_v21, %v9733_v17  ;;  %v9691_v17 = vld [vmem:[#allocation15 + $0x39b8] sm:$0xff] }
 0xaf9   :  { %15112 = vmatprep.subr.bf16.mxu1 %v15111_v36  ;;  %15144 = vmatprep.subr.bf16.mxu0 %v15143_v30  ;;  %v9742_v36 = vld [vmem:[#allocation15 + $0x3b50] sm:$0xff]  ;;  %v9749_v30 = vld [vmem:[#allocation15 + $0x3b88] sm:$0xff]  ;;  %v15133_v42 = vpack.c.bf16 %v9740_v22, %v9732_v29  ;;  %v9699_v21 = vld [vmem:[#allocation15 + $0x39f8] sm:$0xff]  ;;  %v15183_v29 = vpack.c.bf16 %v9697_v25, %v9689_v15 }
 0xafa   :  { %9828 = vmatprep.mubr.f32.mxu1 %v15872_v41  ;;  %9899 = vmatprep.mubr.f32.mxu0 %v15872_v41  ;;  %v15165_v37 = vpack.c.bf16 %v9742_v36, %v9734_v28  ;;  %v15215_v22 = vpack.c.bf16 %v9699_v21, %v9691_v17  ;;  %v9705_v28 = vld [vmem:[#allocation15 + $0x3a28] sm:$0xff]  ;;  %v10061_v15 = vld [vmem:[#allocation15 + $0x3c18] sm:$0xff] }
 0xafb   :  { %v9713_v36 = vld [vmem:[#allocation15 + $0x3a68] sm:$0xff]  ;;  %v10069_v25 = vld [vmem:[#allocation15 + $0x3c58] sm:$0xff] }
 0xafc   :  { %15114 = vmatpush1.bf16.msra.mxu1 %v15113_v39  ;;  %15146 = vmatpush1.bf16.msra.mxu0 %v15145_v40  ;;  %v9756_v39 = vld [vmem:[#allocation15 + $0x3bc0] sm:$0xff]  ;;  %v15135_v40 = vpack.c.bf16 %v9757_v32, %v9749_v30  ;;  %v9707_v30 = vld [vmem:[#allocation15 + $0x3a38] sm:$0xff] }
 0xafd   :  { %15116 = vmatprep.subr.bf16.mxu1 %v15115_v45  ;;  %15148 = vmatprep.subr.bf16.mxu0 %v15147_v46  ;;  %v9758_v45 = vld [vmem:[#allocation15 + $0x3bd0] sm:$0xff]  ;;  %v9641_v46 = vld [vmem:[#allocation15 + $0x3828] sm:$0xff]  ;;  %v15137_v50 = vpack.c.bf16 %v9756_v39, %v9748_v38  ;;  %v9715_v32 = vld [vmem:[#allocation15 + $0x3a78] sm:$0xff]  ;;  %v15187_v38 = vpack.c.bf16 %v9713_v36, %v9705_v28 }
 0xafe   :  { %v15169_v51 = vpack.c.bf16 %v9758_v45, %v9750_v43  ;;  %v15219_v39 = vpack.c.bf16 %v9715_v32, %v9707_v30  ;;  %v9721_v43 = vld [vmem:[#allocation15 + $0x3aa8] sm:$0xff]  ;;  %v10077_v28 = vld [vmem:[#allocation15 + $0x3c98] sm:$0xff] }
 0xaff   :  { %v9729_v45 = vld [vmem:[#allocation15 + $0x3ae8] sm:$0xff]  ;;  %v10085_v36 = vld [vmem:[#allocation15 + $0x3cd8] sm:$0xff] }
 0xb00   :  { %15118 = vmatpush1.bf16.msra.mxu1 %v15117_v56  ;;  %15150 = vmatpush1.bf16.msra.mxu0 %v15149_v54  ;;  %v9648_v56 = vld [vmem:[#allocation15 + $0x3860] sm:$0xff]  ;;  %v15171_v54 = vpack.c.bf16 %v9649_v47, %v9641_v46  ;;  %v9723_v46 = vld [vmem:[#allocation15 + $0x3ab8] sm:$0xff] }
 0xb01   :  { %15120 = vmatprep.subr.bf16.mxu1 %v15119_v5  ;;  %15152 = vmatprep.subr.bf16.mxu0 %v15151_v57  ;;  %v9650_v5 = vld [vmem:[#allocation15 + $0x3870] sm:$0xff]  ;;  %v9657_v57 = vld [vmem:[#allocation15 + $0x38a8] sm:$0xff]  ;;  %v15173_v60 = vpack.c.bf16 %v9648_v56, %v9640_v26  ;;  %v9731_v47 = vld [vmem:[#allocation15 + $0x3af8] sm:$0xff]  ;;  %v15191_v26 = vpack.c.bf16 %v9729_v45, %v9721_v43 }
 0xb02   :  { %v15205_v6 = vpack.c.bf16 %v9650_v5, %v9642_v8  ;;  %v15175_v0 = vpack.c.bf16 %v9665_v58, %v9657_v57  ;;  %v15223_v56 = vpack.c.bf16 %v9731_v47, %v9723_v46  ;;  %v9737_v8 = vld [vmem:[#allocation15 + $0x3b28] sm:$0xff]  ;;  %v9739_v57 = vld [vmem:[#allocation15 + $0x3b38] sm:$0xff] }
 0xb03   :  { %v9745_v5 = vld [vmem:[#allocation15 + $0x3b68] sm:$0xff]  ;;  %v9747_v58 = vld [vmem:[#allocation15 + $0x3b78] sm:$0xff] }
 0xb04   :  { %15122 = vmatpush1.bf16.msra.mxu1 %v15121_v61  ;;  %15154 = vmatpush1.bf16.msra.mxu0 %v15153_v4  ;;  %v9656_v61 = vld [vmem:[#allocation15 + $0x38a0] sm:$0xff]  ;;  %v10093_v43 = vld [vmem:[#allocation15 + $0x3d18] sm:$0xff] }
 0xb05   :  { %15124 = vmatprep.subr.bf16.mxu1 %v15123_v2  ;;  %15156 = vmatprep.subr.bf16.mxu0 %v15155_v3  ;;  %v9664_v4 = vld [vmem:[#allocation15 + $0x38e0] sm:$0xff]  ;;  %v9658_v2 = vld [vmem:[#allocation15 + $0x38b0] sm:$0xff]  ;;  %v10101_v45 = vld [vmem:[#allocation15 + $0x3d58] sm:$0xff] }
 0xb06   :  { %v9666_v3 = vld [vmem:[#allocation15 + $0x38f0] sm:$0xff]  ;;  %v15177_v53 = vpack.c.bf16 %v9664_v4, %v9656_v61  ;;  %v15195_v61 = vpack.c.bf16 %v9745_v5, %v9737_v8  ;;  %v15227_v4 = vpack.c.bf16 %v9747_v58, %v9739_v57  ;;  %v10109_v8 = vld [vmem:[#allocation15 + $0x3d98] sm:$0xff]  ;;  %v10106_v58 = vld [vmem:[#allocation15 + $0x3d80] sm:$0xff] }
 0xb07   :  { %v15209_v16 = vpack.c.bf16 %v9666_v3, %v9658_v2  ;;  %v9753_v2 = vld [vmem:[#allocation15 + $0x3ba8] sm:$0xff]  ;;  %v10117_v5 = vld [vmem:[#allocation15 + $0x3dd8] sm:$0xff] }
 0xb08   :  { %15126 = vmatpush1.bf16.msra.mxu1 %v15125_v11  ;;  %15158 = vmatpush1.bf16.msra.mxu0 %v15157_v12  ;;  %v9672_v11 = vld [vmem:[#allocation15 + $0x3920] sm:$0xff]  ;;  %v9761_v3 = vld [vmem:[#allocation15 + $0x3be8] sm:$0xff] }
 0xb09   :  { %15128 = vmatprep.subr.bf16.mxu1 %v15127_v35  ;;  %15160 = vmatprep.subr.bf16.mxu0 %v15159_v14  ;;  %v9680_v12 = vld [vmem:[#allocation15 + $0x3960] sm:$0xff]  ;;  %v9674_v35 = vld [vmem:[#allocation15 + $0x3930] sm:$0xff] }
 0xb0a   :  { %v9682_v14 = vld [vmem:[#allocation15 + $0x3970] sm:$0xff]  ;;  %v15181_v18 = vpack.c.bf16 %v9680_v12, %v9672_v11  ;;  %v15199_v11 = vpack.c.bf16 %v9761_v3, %v9753_v2  ;;  %v15231_v12 = vpack.c.bf16 %v9763_v9, %v9755_v62  ;;  %v10133_v2 = vld [vmem:[#allocation15 + $0x3e58] sm:$0xff]  ;;  %v10122_v9 = vld [vmem:[#allocation15 + $0x3e00] sm:$0xff] }
 0xb0b   :  { %v15213_v19 = vpack.c.bf16 %v9682_v14, %v9674_v35  ;;  %v10059_v35 = vld [vmem:[#allocation15 + $0x3c08] sm:$0xff] }
 0xb0c   :  { %15130 = vmatpush1.bf16.msra.mxu1 %v15129_v31  ;;  %15162 = vmatpush1.bf16.msra.mxu0 %v15161_v20  ;;  %v9688_v31 = vld [vmem:[#allocation15 + $0x39a0] sm:$0xff]  ;;  %v10067_v14 = vld [vmem:[#allocation15 + $0x3c48] sm:$0xff] }
 0xb0d   :  { %15132 = vmatprep.subr.bf16.mxu1 %v15131_v23  ;;  %15164 = vmatprep.subr.bf16.mxu0 %v15163_v24  ;;  %v9696_v20 = vld [vmem:[#allocation15 + $0x39e0] sm:$0xff]  ;;  %v9690_v23 = vld [vmem:[#allocation15 + $0x39b0] sm:$0xff] }
 0xb0e   :  { %v9698_v24 = vld [vmem:[#allocation15 + $0x39f0] sm:$0xff]  ;;  %v15185_v33 = vpack.c.bf16 %v9696_v20, %v9688_v31  ;;  %v15235_v31 = vpack.c.bf16 %v10067_v14, %v10059_v35  ;;  %v15267_v20 = vpack.c.bf16 %v10069_v25, %v10061_v15  ;;  %v10149_v35 = vld [vmem:[#allocation15 + $0x3ed8] sm:$0xff]  ;;  %v10138_v25 = vld [vmem:[#allocation15 + $0x3e80] sm:$0xff] }
 0xb0f   :  { %v15217_v34 = vpack.c.bf16 %v9698_v24, %v9690_v23  ;;  %v10075_v23 = vld [vmem:[#allocation15 + $0x3c88] sm:$0xff] }
 0xb10   :  { %15134 = vmatpush1.bf16.msra.mxu1 %v15133_v42  ;;  %15166 = vmatpush1.bf16.msra.mxu0 %v15165_v37  ;;  %v9704_v42 = vld [vmem:[#allocation15 + $0x3a20] sm:$0xff]  ;;  %v10083_v24 = vld [vmem:[#allocation15 + $0x3cc8] sm:$0xff] }
 0xb11   :  { %15136 = vmatprep.subr.bf16.mxu1 %v15135_v40  ;;  %15168 = vmatprep.subr.bf16.mxu0 %v15167_v48  ;;  %v9712_v37 = vld [vmem:[#allocation15 + $0x3a60] sm:$0xff]  ;;  %v9706_v40 = vld [vmem:[#allocation15 + $0x3a30] sm:$0xff] }
 0xb12   :  { %v9714_v48 = vld [vmem:[#allocation15 + $0x3a70] sm:$0xff]  ;;  %v15189_v52 = vpack.c.bf16 %v9712_v37, %v9704_v42  ;;  %v15239_v42 = vpack.c.bf16 %v10083_v24, %v10075_v23  ;;  %v15271_v37 = vpack.c.bf16 %v10085_v36, %v10077_v28  ;;  %v10165_v23 = vld [vmem:[#allocation15 + $0x3f58] sm:$0xff]  ;;  %v10154_v36 = vld [vmem:[#allocation15 + $0x3f00] sm:$0xff] }
 0xb13   :  { %v15221_v49 = vpack.c.bf16 %v9714_v48, %v9706_v40  ;;  %v10091_v40 = vld [vmem:[#allocation15 + $0x3d08] sm:$0xff] }
 0xb14   :  { %15138 = vmatpush1.bf16.msra.mxu1 %v15137_v50  ;;  %15170 = vmatpush1.bf16.msra.mxu0 %v15169_v51  ;;  %v9720_v50 = vld [vmem:[#allocation15 + $0x3aa0] sm:$0xff]  ;;  %v10099_v48 = vld [vmem:[#allocation15 + $0x3d48] sm:$0xff] }
 0xb15   :  { %15172 = vmatprep.subr.bf16.mxu1 %v15171_v54  ;;  %15204 = vmatprep.subr.bf16.mxu0 %v15203_v55  ;;  %v9728_v51 = vld [vmem:[#allocation15 + $0x3ae0] sm:$0xff]  ;;  %v9722_v54 = vld [vmem:[#allocation15 + $0x3ab0] sm:$0xff] }
 0xb16   :  { %v9730_v55 = vld [vmem:[#allocation15 + $0x3af0] sm:$0xff]  ;;  %v15193_v27 = vpack.c.bf16 %v9728_v51, %v9720_v50  ;;  %v15243_v50 = vpack.c.bf16 %v10099_v48, %v10091_v40  ;;  %v15275_v51 = vpack.c.bf16 %v10101_v45, %v10093_v43  ;;  %v10181_v40 = vld [vmem:[#allocation15 + $0x3fd8] sm:$0xff]  ;;  %v10170_v45 = vld [vmem:[#allocation15 + $0x3f80] sm:$0xff] }
 0xb17   :  { %9829 = vmatmul.mubr.f32.vlgmr.msra.gmra.mrb[20].mxu1 %v16762_v59  ;;  %9900 = vmatmul.mubr.f32.vlgmr.msra.gmra.mrb[64].mxu0 %v16762_v59  ;;  %v15225_v63 = vpack.c.bf16 %v9730_v55, %v9722_v54  ;;  %v10107_v54 = vld [vmem:[#allocation15 + $0x3d88] sm:$0xff] }
 0xb18   :  { %15174 = vmatpush1.bf16.msra.mxu1 %v15173_v60  ;;  %15206 = vmatpush1.bf16.msra.mxu0 %v15205_v6  ;;  %v9736_v60 = vld [vmem:[#allocation15 + $0x3b20] sm:$0xff]  ;;  %v10115_v55 = vld [vmem:[#allocation15 + $0x3dc8] sm:$0xff] }
 0xb19   :  { %15176 = vmatprep.subr.bf16.mxu1 %v15175_v0  ;;  %15208 = vmatprep.subr.bf16.mxu0 %v15207_v1  ;;  %v9744_v6 = vld [vmem:[#allocation15 + $0x3b60] sm:$0xff]  ;;  %v9738_v0 = vld [vmem:[#allocation15 + $0x3b30] sm:$0xff] }
 0xb1a   :  { %9970 = vmatprep.mubr.f32.mxu1 %v15872_v41  ;;  %10041 = vmatprep.mubr.f32.mxu0 %v15872_v41  ;;  %v9746_v1 = vld [vmem:[#allocation15 + $0x3b70] sm:$0xff]  ;;  %v15197_v10 = vpack.c.bf16 %v9744_v6, %v9736_v60  ;;  %v15279_v60 = vpack.c.bf16 %v10117_v5, %v10109_v8  ;;  %v10062_v5 = vld [vmem:[#allocation15 + $0x3c20] sm:$0xff] }
 0xb1b   :  { %v15229_v44 = vpack.c.bf16 %v9746_v1, %v9738_v0  ;;  %v10108_v6 = vld [vmem:[#allocation15 + $0x3d90] sm:$0xff]  ;;  %v10131_v0 = vld [vmem:[#allocation15 + $0x3e48] sm:$0xff]  ;;  %v10125_v1 = vld [vmem:[#allocation15 + $0x3e18] sm:$0xff] }
 0xb1c   :  { %15178 = vmatpush1.bf16.msra.mxu1 %v15177_v53  ;;  %15210 = vmatpush1.bf16.msra.mxu0 %v15209_v16  ;;  %v9752_v53 = vld [vmem:[#allocation15 + $0x3ba0] sm:$0xff] }
 0xb1d   :  { %15180 = vmatprep.subr.bf16.mxu1 %v15179_v7  ;;  %15212 = vmatprep.subr.bf16.mxu0 %v15211_v13  ;;  %v9760_v16 = vld [vmem:[#allocation15 + $0x3be0] sm:$0xff]  ;;  %v9754_v7 = vld [vmem:[#allocation15 + $0x3bb0] sm:$0xff] }
 0xb1e   :  { %v9762_v13 = vld [vmem:[#allocation15 + $0x3bf0] sm:$0xff]  ;;  %v15201_v17 = vpack.c.bf16 %v9760_v16, %v9752_v53  ;;  %v15283_v53 = vpack.c.bf16 %v10133_v2, %v10125_v1 }
 0xb1f   :  { %v15233_v21 = vpack.c.bf16 %v9762_v13, %v9754_v7  ;;  %v10124_v16 = vld [vmem:[#allocation15 + $0x3e10] sm:$0xff]  ;;  %v10147_v7 = vld [vmem:[#allocation15 + $0x3ec8] sm:$0xff]  ;;  %v10141_v13 = vld [vmem:[#allocation15 + $0x3e98] sm:$0xff] }
 0xb20   :  { %15182 = vmatpush1.bf16.msra.mxu1 %v15181_v18  ;;  %15214 = vmatpush1.bf16.msra.mxu0 %v15213_v19  ;;  %v10058_v18 = vld [vmem:[#allocation15 + $0x3c00] sm:$0xff] }
 0xb21   :  { %15184 = vmatprep.subr.bf16.mxu1 %v15183_v29  ;;  %15216 = vmatprep.subr.bf16.mxu0 %v15215_v22  ;;  %v10066_v19 = vld [vmem:[#allocation15 + $0x3c40] sm:$0xff]  ;;  %v10060_v29 = vld [vmem:[#allocation15 + $0x3c10] sm:$0xff] }
 0xb22   :  { %v10068_v22 = vld [vmem:[#allocation15 + $0x3c50] sm:$0xff]  ;;  %v15237_v30 = vpack.c.bf16 %v10066_v19, %v10058_v18  ;;  %v15287_v18 = vpack.c.bf16 %v10149_v35, %v10141_v13 }
 0xb23   :  { %v15269_v32 = vpack.c.bf16 %v10068_v22, %v10060_v29  ;;  %v10140_v19 = vld [vmem:[#allocation15 + $0x3e90] sm:$0xff]  ;;  %v10163_v29 = vld [vmem:[#allocation15 + $0x3f48] sm:$0xff]  ;;  %v10157_v22 = vld [vmem:[#allocation15 + $0x3f18] sm:$0xff] }
 0xb24   :  { %15186 = vmatpush1.bf16.msra.mxu1 %v15185_v33  ;;  %15218 = vmatpush1.bf16.msra.mxu0 %v15217_v34  ;;  %v10074_v33 = vld [vmem:[#allocation15 + $0x3c80] sm:$0xff] }
 0xb25   :  { %15188 = vmatprep.subr.bf16.mxu1 %v15187_v38  ;;  %15220 = vmatprep.subr.bf16.mxu0 %v15219_v39  ;;  %v10082_v34 = vld [vmem:[#allocation15 + $0x3cc0] sm:$0xff]  ;;  %v10076_v38 = vld [vmem:[#allocation15 + $0x3c90] sm:$0xff] }
 0xb26   :  { %v10084_v39 = vld [vmem:[#allocation15 + $0x3cd0] sm:$0xff]  ;;  %v15241_v46 = vpack.c.bf16 %v10082_v34, %v10074_v33  ;;  %v15291_v33 = vpack.c.bf16 %v10165_v23, %v10157_v22 }
 0xb27   :  { %v15273_v47 = vpack.c.bf16 %v10084_v39, %v10076_v38  ;;  %v10156_v34 = vld [vmem:[#allocation15 + $0x3f10] sm:$0xff]  ;;  %v10179_v38 = vld [vmem:[#allocation15 + $0x3fc8] sm:$0xff]  ;;  %v10173_v39 = vld [vmem:[#allocation15 + $0x3f98] sm:$0xff] }
 0xb28   :  { %15190 = vmatpush1.bf16.msra.mxu1 %v15189_v52  ;;  %15222 = vmatpush1.bf16.msra.mxu0 %v15221_v49  ;;  %v10090_v52 = vld [vmem:[#allocation15 + $0x3d00] sm:$0xff] }
 0xb29   :  { %15192 = vmatprep.subr.bf16.mxu1 %v15191_v26  ;;  %15224 = vmatprep.subr.bf16.mxu0 %v15223_v56  ;;  %v10098_v49 = vld [vmem:[#allocation15 + $0x3d40] sm:$0xff]  ;;  %v10092_v26 = vld [vmem:[#allocation15 + $0x3d10] sm:$0xff] }
 0xb2a   :  { %v10100_v56 = vld [vmem:[#allocation15 + $0x3d50] sm:$0xff] }
 0xb2b   :  { %v15277_v57 = vpack.c.bf16 %v10100_v56, %v10092_v26  ;;  %v10071_v26 = vld [vmem:[#allocation15 + $0x3c68] sm:$0xff]  ;;  %v10065_v56 = vld [vmem:[#allocation15 + $0x3c38] sm:$0xff] }
 0xb2c   :  { %15194 = vmatpush1.bf16.msra.mxu1 %v15193_v27  ;;  %15226 = vmatpush1.bf16.msra.mxu0 %v15225_v63  ;;  %v10114_v27 = vld [vmem:[#allocation15 + $0x3dc0] sm:$0xff]  ;;  %v15247_v63 = vpack.c.bf16 %v10115_v55, %v10107_v54  ;;  %v10073_v54 = vld [vmem:[#allocation15 + $0x3c78] sm:$0xff] }
 0xb2d   :  { %15196 = vmatprep.subr.bf16.mxu1 %v15195_v61  ;;  %15228 = vmatprep.subr.bf16.mxu0 %v15227_v4  ;;  %v10116_v61 = vld [vmem:[#allocation15 + $0x3dd0] sm:$0xff]  ;;  %v10123_v4 = vld [vmem:[#allocation15 + $0x3e08] sm:$0xff]  ;;  %v15249_v3 = vpack.c.bf16 %v10114_v27, %v10106_v58  ;;  %v15331_v58 = vpack.c.bf16 %v10073_v54, %v10065_v56  ;;  %v10142_v54 = vld [vmem:[#allocation15 + $0x3ea0] sm:$0xff] }
 0xb2e   :  { %v15281_v62 = vpack.c.bf16 %v10116_v61, %v10108_v6  ;;  %v10064_v27 = vld [vmem:[#allocation15 + $0x3c30] sm:$0xff]  ;;  %v10087_v6 = vld [vmem:[#allocation15 + $0x3ce8] sm:$0xff]  ;;  %v10081_v61 = vld [vmem:[#allocation15 + $0x3cb8] sm:$0xff] }
 0xb30   :  { %15198 = vmatpush1.bf16.msra.mxu1 %v15197_v10  ;;  %15230 = vmatpush1.bf16.msra.mxu0 %v15229_v44  ;;  %v10130_v10 = vld [vmem:[#allocation15 + $0x3e40] sm:$0xff]  ;;  %v15251_v44 = vpack.c.bf16 %v10131_v0, %v10123_v4  ;;  %v10089_v4 = vld [vmem:[#allocation15 + $0x3cf8] sm:$0xff]  ;;  %v16772_v0 = vld [vmem:[#allocation2 + $0x1e] sm:$0x3] }
 0xb31   :  { %15200 = vmatprep.subr.bf16.mxu1 %v15199_v11  ;;  %15232 = vmatprep.subr.bf16.mxu0 %v15231_v12  ;;  %v10132_v11 = vld [vmem:[#allocation15 + $0x3e50] sm:$0xff]  ;;  %v10139_v12 = vld [vmem:[#allocation15 + $0x3e88] sm:$0xff]  ;;  %v15253_v14 = vpack.c.bf16 %v10130_v10, %v10122_v9  ;;  %v15335_v10 = vpack.c.bf16 %v10089_v4, %v10081_v61  ;;  %v10158_v4 = vld [vmem:[#allocation15 + $0x3f20] sm:$0xff] }
 0xb32   :  { %v15285_v15 = vpack.c.bf16 %v10132_v11, %v10124_v16  ;;  %v10095_v16 = vld [vmem:[#allocation15 + $0x3d28] sm:$0xff] }
 0xb33   :  { %v10103_v11 = vld [vmem:[#allocation15 + $0x3d68] sm:$0xff] }
 0xb34   :  { %15202 = vmatpush1.bf16.msra.mxu1 %v15201_v17  ;;  %15234 = vmatpush1.bf16.msra.mxu0 %v15233_v21  ;;  %v10146_v17 = vld [vmem:[#allocation15 + $0x3ec0] sm:$0xff]  ;;  %v15255_v21 = vpack.c.bf16 %v10147_v7, %v10139_v12  ;;  %v10097_v12 = vld [vmem:[#allocation15 + $0x3d38] sm:$0xff] }
 0xb35   :  { %15236 = vmatprep.subr.bf16.mxu1 %v15235_v31  ;;  %15268 = vmatprep.subr.bf16.mxu0 %v15267_v20  ;;  %v10148_v31 = vld [vmem:[#allocation15 + $0x3ed0] sm:$0xff]  ;;  %v10155_v20 = vld [vmem:[#allocation15 + $0x3f08] sm:$0xff]  ;;  %v15257_v24 = vpack.c.bf16 %v10146_v17, %v10138_v25  ;;  %v10105_v7 = vld [vmem:[#allocation15 + $0x3d78] sm:$0xff]  ;;  %v15307_v25 = vpack.c.bf16 %v10103_v11, %v10095_v16 }
 0xb36   :  { %v15289_v28 = vpack.c.bf16 %v10148_v31, %v10140_v19  ;;  %v15339_v17 = vpack.c.bf16 %v10105_v7, %v10097_v12  ;;  %v10111_v19 = vld [vmem:[#allocation15 + $0x3da8] sm:$0xff]  ;;  %v10185_v16 = vld [vmem:[#allocation15 + $0x3ff8] sm:$0xff]  ;;  %v10174_v7 = vld [vmem:[#allocation15 + $0x3fa0] sm:$0xff] }
 0xb37   :  { %9971 = vmatmul.mubr.f32.vlgmr.msra.gmra.mrb[22].mxu1 %v16762_v59  ;;  %10042 = vmatmul.mubr.f32.vlgmr.msra.gmra.mrb[66].mxu0 %v16762_v59  ;;  %v15245_v59 = vpack.c.bf16 %v10098_v49, %v10090_v52  ;;  %v15295_v52 = vpack.c.bf16 %v10181_v40, %v10173_v39  ;;  %v10172_v49 = vld [vmem:[#allocation15 + $0x3f90] sm:$0xff]  ;;  %v10119_v31 = vld [vmem:[#allocation15 + $0x3de8] sm:$0xff]  ;;  %v10126_v40 = vld [vmem:[#allocation15 + $0x3e20] sm:$0xff] }
 0xb38   :  { %15238 = vmatpush1.bf16.msra.mxu1 %v15237_v30  ;;  %15270 = vmatpush1.bf16.msra.mxu0 %v15269_v32  ;;  %v10162_v30 = vld [vmem:[#allocation15 + $0x3f40] sm:$0xff]  ;;  %v15259_v32 = vpack.c.bf16 %v10163_v29, %v10155_v20  ;;  %v10113_v20 = vld [vmem:[#allocation15 + $0x3db8] sm:$0xff] }
 0xb39   :  { %15240 = vmatprep.subr.bf16.mxu1 %v15239_v42  ;;  %15272 = vmatprep.subr.bf16.mxu0 %v15271_v37  ;;  %v10164_v42 = vld [vmem:[#allocation15 + $0x3f50] sm:$0xff]  ;;  %v10171_v37 = vld [vmem:[#allocation15 + $0x3f88] sm:$0xff]  ;;  %v15261_v48 = vpack.c.bf16 %v10162_v30, %v10154_v36  ;;  %v10121_v29 = vld [vmem:[#allocation15 + $0x3df8] sm:$0xff]  ;;  %v15311_v36 = vpack.c.bf16 %v10119_v31, %v10111_v19 }
 0xb3a   :  { %10250 = vmatprep.mubr.f32.mxu1 %v15872_v41  ;;  %10321 = vmatprep.mubr.f32.mxu0 %v15872_v41  ;;  %v15293_v43 = vpack.c.bf16 %v10164_v42, %v10156_v34  ;;  %v15343_v30 = vpack.c.bf16 %v10121_v29, %v10113_v20  ;;  %v10127_v34 = vld [vmem:[#allocation15 + $0x3e28] sm:$0xff]  ;;  %v16788_v29 = vld [vmem:[#allocation17] sm:$0xff] }
 0xb3b   :  { %v10135_v42 = vld [vmem:[#allocation15 + $0x3e68] sm:$0xff] }
 0xb3c   :  { %15242 = vmatpush1.bf16.msra.mxu1 %v15241_v46  ;;  %15274 = vmatpush1.bf16.msra.mxu0 %v15273_v47  ;;  %v10178_v46 = vld [vmem:[#allocation15 + $0x3fc0] sm:$0xff]  ;;  %v15263_v47 = vpack.c.bf16 %v10179_v38, %v10171_v37  ;;  %v10129_v37 = vld [vmem:[#allocation15 + $0x3e38] sm:$0xff] }
 0xb3d   :  { %15244 = vmatprep.subr.bf16.mxu1 %v15243_v50  ;;  %15276 = vmatprep.subr.bf16.mxu0 %v15275_v51  ;;  %v10180_v50 = vld [vmem:[#allocation15 + $0x3fd0] sm:$0xff]  ;;  %v10063_v51 = vld [vmem:[#allocation15 + $0x3c28] sm:$0xff]  ;;  %v15265_v55 = vpack.c.bf16 %v10178_v46, %v10170_v45  ;;  %v10137_v38 = vld [vmem:[#allocation15 + $0x3e78] sm:$0xff] }
 0xb3e   :  { %v15297_v8 = vpack.c.bf16 %v10180_v50, %v10172_v49  ;;  %v15347_v45 = vpack.c.bf16 %v10137_v38, %v10129_v37  ;;  %v10128_v46 = vld [vmem:[#allocation15 + $0x3e30] sm:$0xff]  ;;  %v10151_v49 = vld [vmem:[#allocation15 + $0x3ee8] sm:$0xff]  ;;  %v10145_v50 = vld [vmem:[#allocation15 + $0x3eb8] sm:$0xff] }
 0xb40   :  { %15246 = vmatpush1.bf16.msra.mxu1 %v15245_v59  ;;  %15278 = vmatpush1.bf16.msra.mxu0 %v15277_v57  ;;  %v10070_v59 = vld [vmem:[#allocation15 + $0x3c60] sm:$0xff]  ;;  %v15299_v57 = vpack.c.bf16 %v10071_v26, %v10063_v51  ;;  %v10153_v51 = vld [vmem:[#allocation15 + $0x3ef8] sm:$0xff] }
 0xb41   :  { %15248 = vmatprep.subr.bf16.mxu1 %v15247_v63  ;;  %15280 = vmatprep.subr.bf16.mxu0 %v15279_v60  ;;  %v10072_v63 = vld [vmem:[#allocation15 + $0x3c70] sm:$0xff]  ;;  %v10079_v60 = vld [vmem:[#allocation15 + $0x3ca8] sm:$0xff]  ;;  %v15301_v1 = vpack.c.bf16 %v10070_v59, %v10062_v5  ;;  %v15351_v5 = vpack.c.bf16 %v10153_v51, %v10145_v50 }
 0xb42   :  { %v15333_v2 = vpack.c.bf16 %v10072_v63, %v10064_v27  ;;  %v15303_v9 = vpack.c.bf16 %v10087_v6, %v10079_v60  ;;  %v10144_v59 = vld [vmem:[#allocation15 + $0x3eb0] sm:$0xff]  ;;  %v10167_v27 = vld [vmem:[#allocation15 + $0x3f68] sm:$0xff]  ;;  %v10161_v63 = vld [vmem:[#allocation15 + $0x3f38] sm:$0xff] }
 0xb43   :  { %v10169_v60 = vld [vmem:[#allocation15 + $0x3f78] sm:$0xff] }
 0xb44   :  { %15250 = vmatpush1.bf16.msra.mxu1 %v15249_v3  ;;  %15282 = vmatpush1.bf16.msra.mxu0 %v15281_v62  ;;  %v10078_v3 = vld [vmem:[#allocation15 + $0x3ca0] sm:$0xff] }
 0xb45   :  { %15252 = vmatprep.subr.bf16.mxu1 %v15251_v44  ;;  %15284 = vmatprep.subr.bf16.mxu0 %v15283_v53  ;;  %v10086_v62 = vld [vmem:[#allocation15 + $0x3ce0] sm:$0xff]  ;;  %v10080_v44 = vld [vmem:[#allocation15 + $0x3cb0] sm:$0xff] }
 0xb46   :  { %v10088_v53 = vld [vmem:[#allocation15 + $0x3cf0] sm:$0xff]  ;;  %v15305_v13 = vpack.c.bf16 %v10086_v62, %v10078_v3  ;;  %v15355_v3 = vpack.c.bf16 %v10169_v60, %v10161_v63 }
 0xb47   :  { %v15337_v35 = vpack.c.bf16 %v10088_v53, %v10080_v44  ;;  %v10160_v62 = vld [vmem:[#allocation15 + $0x3f30] sm:$0xff]  ;;  %v10183_v44 = vld [vmem:[#allocation15 + $0x3fe8] sm:$0xff]  ;;  %v10177_v53 = vld [vmem:[#allocation15 + $0x3fb8] sm:$0xff] }
 0xb48   :  { %15254 = vmatpush1.bf16.msra.mxu1 %v15253_v14  ;;  %15286 = vmatpush1.bf16.msra.mxu0 %v15285_v15  ;;  %v10094_v14 = vld [vmem:[#allocation15 + $0x3d20] sm:$0xff] }
 0xb49   :  { %15256 = vmatprep.subr.bf16.mxu1 %v15255_v21  ;;  %15288 = vmatprep.subr.bf16.mxu0 %v15287_v18  ;;  %v10102_v15 = vld [vmem:[#allocation15 + $0x3d60] sm:$0xff]  ;;  %v10096_v21 = vld [vmem:[#allocation15 + $0x3d30] sm:$0xff] }
 0xb4a   :  { %v10104_v18 = vld [vmem:[#allocation15 + $0x3d70] sm:$0xff]  ;;  %v15309_v22 = vpack.c.bf16 %v10102_v15, %v10094_v14  ;;  %v10182_v14 = vld [vmem:[#allocation15 + $0x3fe0] sm:$0xff] }
 0xb4b   :  { %v15341_v23 = vpack.c.bf16 %v10104_v18, %v10096_v21  ;;  %v10176_v15 = vld [vmem:[#allocation15 + $0x3fb0] sm:$0xff]  ;;  %v10480_v18 = vlaneseq }
 0xb4c   :  { %15258 = vmatpush1.bf16.msra.mxu1 %v15257_v24  ;;  %15290 = vmatpush1.bf16.msra.mxu0 %v15289_v28  ;;  %v10110_v24 = vld [vmem:[#allocation15 + $0x3da0] sm:$0xff] }
 0xb4d   :  { %15260 = vmatprep.subr.bf16.mxu1 %v15259_v32  ;;  %15292 = vmatprep.subr.bf16.mxu0 %v15291_v33  ;;  %v10118_v28 = vld [vmem:[#allocation15 + $0x3de0] sm:$0xff]  ;;  %v10112_v32 = vld [vmem:[#allocation15 + $0x3db0] sm:$0xff]  ;;  %v16780_v19 = vshrl.u32 %v10480_v18, 7 }
 0xb4e   :  { %v10120_v33 = vld [vmem:[#allocation15 + $0x3df0] sm:$0xff]  ;;  %v15313_v39 = vpack.c.bf16 %v10118_v28, %v10110_v24 }
 0xb4f   :  { %v16783_v31 = vsub.s32 0, %v16780_v19  ;;  %v16786_v20 = vsub.s32 2, %v16780_v19 }
 0xb50   :  { %15262 = vmatpush1.bf16.msra.mxu1 %v15261_v48  ;;  %15294 = vmatpush1.bf16.msra.mxu0 %v15293_v43  ;;  %v10134_v48 = vld [vmem:[#allocation15 + $0x3e60] sm:$0xff]  ;;  %v15315_v43 = vpack.c.bf16 %v10135_v42, %v10127_v34 }
 0xb51   :  { %15264 = vmatprep.subr.bf16.mxu1 %v15263_v47  ;;  %15296 = vmatprep.subr.bf16.mxu0 %v15295_v52  ;;  %v10136_v47 = vld [vmem:[#allocation15 + $0x3e70] sm:$0xff]  ;;  %v10143_v52 = vld [vmem:[#allocation15 + $0x3ea8] sm:$0xff]  ;;  %v15317_v26 = vpack.c.bf16 %v10134_v48, %v10126_v40  ;;  %v10491_v24 = vrot.slane %v16788_v29, %v16786_v20 }
 0xb52   :  { %v15349_v56 = vpack.c.bf16 %v10136_v47, %v10128_v46 }
 0xb54   :  { %15266 = vmatpush1.bf16.msra.mxu1 %v15265_v55  ;;  %15298 = vmatpush1.bf16.msra.mxu0 %v15297_v8  ;;  %v10150_v55 = vld [vmem:[#allocation15 + $0x3ee0] sm:$0xff]  ;;  %v15319_v8 = vpack.c.bf16 %v10151_v49, %v10143_v52 }
 0xb55   :  { %15300 = vmatprep.subr.bf16.mxu1 %v15299_v57  ;;  %15332 = vmatprep.subr.bf16.mxu0 %v15331_v58  ;;  %v10152_v57 = vld [vmem:[#allocation15 + $0x3ef0] sm:$0xff]  ;;  %v10159_v58 = vld [vmem:[#allocation15 + $0x3f28] sm:$0xff]  ;;  %v15321_v6 = vpack.c.bf16 %v10150_v55, %v10142_v54 }
 0xb56   :  { %v15353_v61 = vpack.c.bf16 %v10152_v57, %v10144_v59 }
 0xb57   :  { %10251 = vmatmul.mubr.f32.vlgmr.msra.gmra.mrb[20].mxu1 %v16772_v0  ;;  %10322 = vmatmul.mubr.f32.vlgmr.msra.gmra.mrb[64].mxu0 %v16772_v0 }
 0xb58   :  { %15302 = vmatpush1.bf16.msra.mxu1 %v15301_v1  ;;  %15334 = vmatpush1.bf16.msra.mxu0 %v15333_v2  ;;  %v10166_v1 = vld [vmem:[#allocation15 + $0x3f60] sm:$0xff]  ;;  %v15323_v2 = vpack.c.bf16 %v10167_v27, %v10159_v58 }
 0xb59   :  { %15304 = vmatprep.subr.bf16.mxu1 %v15303_v9  ;;  %15336 = vmatprep.subr.bf16.mxu0 %v15335_v10  ;;  %v10168_v9 = vld [vmem:[#allocation15 + $0x3f70] sm:$0xff]  ;;  %v10175_v10 = vld [vmem:[#allocation15 + $0x3fa8] sm:$0xff]  ;;  %v15325_v11 = vpack.c.bf16 %v10166_v1, %v10158_v4 }
 0xb5a   :  { %10392 = vmatprep.mubr.f32.mxu1 %v15872_v41  ;;  %10463 = vmatprep.mubr.f32.mxu0 %v15872_v41  ;;  %v15345_v41 = vpack.c.bf16 %v10120_v33, %v10112_v32  ;;  %v15357_v12 = vpack.c.bf16 %v10168_v9, %v10160_v62 }
 0xb5c   :  { %15306 = vmatpush1.bf16.msra.mxu1 %v15305_v13  ;;  %15338 = vmatpush1.bf16.msra.mxu0 %v15337_v35  ;;  %v15327_v13 = vpack.c.bf16 %v10183_v44, %v10175_v10  ;;  %v15359_v35 = vpack.c.bf16 %v10185_v16, %v10177_v53 }
 0xb5d   :  { %15308 = vmatprep.subr.bf16.mxu1 %v15307_v25  ;;  %15340 = vmatprep.subr.bf16.mxu0 %v15339_v17  ;;  %v10184_v25 = vld [vmem:[#allocation15 + $0x3ff0] sm:$0xff]  ;;  %v15329_v17 = vpack.c.bf16 %v10182_v14, %v10174_v7 }
 0xb5e   :  { %v15361_v21 = vpack.c.bf16 %v10184_v25, %v10176_v15 }
 0xb60   :  { %15310 = vmatpush1.bf16.msra.mxu1 %v15309_v22  ;;  %15342 = vmatpush1.bf16.msra.mxu0 %v15341_v23  ;;  %v16791_v22 = vsub.s32 1, %v16780_v19  ;;  %v16794_v23 = vsub.s32 3, %v16780_v19 }
 0xb61   :  { %15312 = vmatprep.subr.bf16.mxu1 %v15311_v36  ;;  %15344 = vmatprep.subr.bf16.mxu0 %v15343_v30 }
 0xb62   :  { %v10487_v28 = vrot.slane %v16788_v29, %v16791_v22  ;;  %v10495_v36 = vrot.slane %v16788_v29, %v16794_v23 }
 0xb64   :  { %15314 = vmatpush1.bf16.msra.mxu1 %v15313_v39  ;;  %15346 = vmatpush1.bf16.msra.mxu0 %v15345_v41 }
 0xb65   :  { %15316 = vmatprep.subr.bf16.mxu1 %v15315_v43  ;;  %15348 = vmatprep.subr.bf16.mxu0 %v15347_v45 }
 0xb68   :  { %15318 = vmatpush1.bf16.msra.mxu1 %v15317_v26  ;;  %15350 = vmatpush1.bf16.msra.mxu0 %v15349_v56 }
 0xb69   :  { %15320 = vmatprep.subr.bf16.mxu1 %v15319_v8  ;;  %15352 = vmatprep.subr.bf16.mxu0 %v15351_v5 }
 0xb6c   :  { %15322 = vmatpush1.bf16.msra.mxu1 %v15321_v6  ;;  %15354 = vmatpush1.bf16.msra.mxu0 %v15353_v61 }
 0xb6d   :  { %15324 = vmatprep.subr.bf16.mxu1 %v15323_v2  ;;  %15356 = vmatprep.subr.bf16.mxu0 %v15355_v3 }
 0xb70   :  { %15326 = vmatpush1.bf16.msra.mxu1 %v15325_v11  ;;  %15358 = vmatpush1.bf16.msra.mxu0 %v15357_v12 }
 0xb71   :  { %15328 = vmatprep.subr.bf16.mxu1 %v15327_v13  ;;  %15360 = vmatprep.subr.bf16.mxu0 %v15359_v35 }
 0xb74   :  { %15330 = vmatpush1.bf16.msra.mxu1 %v15329_v17  ;;  %15362 = vmatpush1.bf16.msra.mxu0 %v15361_v21 }
 0xb77   :  { %10393 = vmatmul.mubr.f32.vlgmr.msra.gmra.mrb[22].mxu1 %v16772_v0  ;;  %10464 = vmatmul.mubr.f32.vlgmr.msra.gmra.mrb[66].mxu0 %v16772_v0  ;;  %v10483_v0 = vrot.slane %v16788_v29, %v16783_v31 }
 0xc2a   :  { %v10252_v30 = vpop.f32.mrb[20].mxu1  ;;  %v10323_v32 = vpop.f32.mrb[64].mxu0 }
 0xc2b   :  { %v10520_v33 = vadd.f32 %v10483_v0, %v10252_v30  ;;  %v10522_v34 = vadd.f32 %v10491_v24, %v10323_v32  ;;  %v10254_v42 = vpop.f32.mrb[21].mxu1  ;;  %v10325_v37 = vpop.f32.mrb[65].mxu0  ;;  %v16829_v30 = vsub.s32 4, %v16780_v19  ;;  %v16832_v32 = vsub.s32 6, %v16780_v19 }
 0xc2c   :  { %v10521_v38 = vadd.f32 %v10487_v28, %v10254_v42  ;;  %v10523_v39 = vadd.f32 %v10495_v36, %v10325_v37  ;;  %v16835_v42 = vsub.s32 5, %v16780_v19  ;;  %v16838_v37 = vsub.s32 7, %v16780_v19 }
 0xc2d   :  { %v10529_v41 = vsel %vm10528_vm5, %v10520_v33, 0.0  ;;  %v10543_v40 = vsel %vm10528_vm5, %v10522_v34, 0.0 }
 0xc2e   :  { %v10530_v48 = vrot.slane %v10529_v41, 4  ;;  %v10544_v43 = vrot.slane %v10543_v40, 4  ;;  %v10536_v45 = vsel %vm10528_vm5, %v10521_v38, 0.0  ;;  %v10550_v46 = vsel %vm10528_vm5, %v10523_v39, 0.0 }
 0xc2f   :  { %v10537_v47 = vrot.slane %v10536_v45, 4  ;;  %v10551_v52 = vrot.slane %v10550_v46, 4  ;;  %v10511_v19 = vrot.slane %v16788_v29, %v16838_v37 }
 0xc30   :  { %v10531_v49 = vadd.f32 %v10530_v48, %v10529_v41  ;;  %v10545_v50 = vadd.f32 %v10544_v43, %v10543_v40 }
 0xc31   :  { %v10538_v51 = vadd.f32 %v10537_v47, %v10536_v45  ;;  %v10552_v26 = vadd.f32 %v10551_v52, %v10550_v46  ;;  %v10499_v45 = vrot.slane %v16788_v29, %v16829_v30  ;;  %v10507_v46 = vrot.slane %v16788_v29, %v16832_v32 }
 0xc32   :  { %v10532_v56 = vrot.slane %v10531_v49, 2  ;;  %v10546_v54 = vrot.slane %v10545_v50, 2 }
 0xc33   :  { %v10539_v55 = vrot.slane %v10538_v51, 2  ;;  %v10553_v8 = vrot.slane %v10552_v26, 2 }
 0xc34   :  { %v10533_v5 = vadd.f32 %v10532_v56, %v10531_v49  ;;  %v10547_v59 = vadd.f32 %v10546_v54, %v10545_v50  ;;  %v10503_v49 = vrot.slane %v16788_v29, %v16835_v42 }
 0xc35   :  { %v10540_v57 = vadd.f32 %v10539_v55, %v10538_v51  ;;  %v10554_v58 = vadd.f32 %v10553_v8, %v10552_v26 }
 0xc36   :  { %v10534_v27 = vrot.slane %v10533_v5, 1  ;;  %v10548_v63 = vrot.slane %v10547_v59, 1 }
 0xc37   :  { %v10541_v60 = vrot.slane %v10540_v57, 1  ;;  %v10555_v6 = vrot.slane %v10554_v58, 1 }
 0xc38   :  { %v10535_v61 = vadd.f32 %v10534_v27, %v10533_v5  ;;  %v10549_v4 = vadd.f32 %v10548_v63, %v10547_v59 }
 0xc39   :  { %v10542_v1 = vadd.f32 %v10541_v60, %v10540_v57  ;;  %v10556_v2 = vadd.f32 %v10555_v6, %v10554_v58 }
 0xc3a   :  { %v10586_v3 = vmul.f32 0.5, %v10535_v61  ;;  %v10588_v62 = vmul.f32 0.5, %v10549_v4 }
 0xc3b   :  { %v10587_v9 = vmul.f32 0.5, %v10542_v1  ;;  %v10589_v10 = vmul.f32 0.5, %v10556_v2 }
 0xc3c   :  { %v16808_v44 = vsub.f32 %v10520_v33, %v10586_v3  ;;  %v16810_v53 = vsub.f32 %v10522_v34, %v10588_v62 }
 0xc3d   :  { %v16812_v16 = vsub.f32 %v10521_v38, %v10587_v9  ;;  %v16814_v11 = vsub.f32 %v10523_v39, %v10589_v10 }
 0xc3e   :  { %v10602_v12 = vmul.f32 %v16808_v44, %v16808_v44  ;;  %v10604_v7 = vmul.f32 %v16810_v53, %v16810_v53 }
 0xc3f   :  { %v10603_v13 = vmul.f32 %v16812_v16, %v16812_v16  ;;  %v10605_v35 = vmul.f32 %v16814_v11, %v16814_v11 }
 0xc40   :  { %v10610_v14 = vsel %vm10528_vm5, %v10602_v12, 0.0  ;;  %v10624_v15 = vsel %vm10528_vm5, %v10604_v7, 0.0 }
 0xc41   :  { %v10611_v25 = vrot.slane %v10610_v14, 4  ;;  %v10625_v17 = vrot.slane %v10624_v15, 4  ;;  %v10617_v21 = vsel %vm10528_vm5, %v10603_v13, 0.0  ;;  %v10631_v18 = vsel %vm10528_vm5, %v10605_v35, 0.0 }
 0xc42   :  { %v10618_v0 = vrot.slane %v10617_v21, 4  ;;  %v10632_v24 = vrot.slane %v10631_v18, 4 }
 0xc43   :  { %v10612_v28 = vadd.f32 %v10611_v25, %v10610_v14  ;;  %v10626_v36 = vadd.f32 %v10625_v17, %v10624_v15 }
 0xc44   :  { %v10619_v33 = vadd.f32 %v10618_v0, %v10617_v21  ;;  %v10633_v34 = vadd.f32 %v10632_v24, %v10631_v18 }
 0xc45   :  { %v10613_v38 = vrot.slane %v10612_v28, 2  ;;  %v10627_v39 = vrot.slane %v10626_v36, 2 }
 0xc46   :  { %v10620_v41 = vrot.slane %v10619_v33, 2  ;;  %v10634_v40 = vrot.slane %v10633_v34, 2 }
 0xc47   :  { %v10614_v48 = vadd.f32 %v10613_v38, %v10612_v28  ;;  %v10628_v43 = vadd.f32 %v10627_v39, %v10626_v36 }
 0xc48   :  { %v10621_v47 = vadd.f32 %v10620_v41, %v10619_v33  ;;  %v10635_v52 = vadd.f32 %v10634_v40, %v10633_v34  ;;  %v16864_v33 = vld [vmem:[#allocation18] sm:$0xff]  ;;  %v16866_v34 = vld [vmem:[#allocation20] sm:$0xff]  ;;  %v16868_v41 = vld [vmem:[#allocation21] sm:$0xff] }
 0xc49   :  { %v10615_v50 = vrot.slane %v10614_v48, 1  ;;  %v10629_v51 = vrot.slane %v10628_v43, 1 }
 0xc4a   :  { %v10622_v26 = vrot.slane %v10621_v47, 1  ;;  %v10636_v56 = vrot.slane %v10635_v52, 1  ;;  %v10394_v54 = vpop.f32.mrb[22].mxu1  ;;  %v10465_v55 = vpop.f32.mrb[66].mxu0 }
 0xc4b   :  { %v10616_v8 = vadd.f32 %v10615_v50, %v10614_v48  ;;  %v10630_v5 = vadd.f32 %v10629_v51, %v10628_v43  ;;  %v16848_v59 = vadd.f32 %v10499_v45, %v10394_v54  ;;  %v16850_v57 = vadd.f32 %v10507_v46, %v10465_v55  ;;  %v10396_v58 = vpop.f32.mrb[23].mxu1  ;;  %v10467_v27 = vpop.f32.mrb[67].mxu0 }
 0xc4c   :  { %v10623_v63 = vadd.f32 %v10622_v26, %v10621_v47  ;;  %v10637_v60 = vadd.f32 %v10636_v56, %v10635_v52  ;;  %v16852_v6 = vadd.f32 %v10503_v49, %v10396_v58  ;;  %v16854_v61 = vadd.f32 %v10511_v19, %v10467_v27 }
 0xc4d   :  { %v10666_v29 = vmul.f32 0.5, %v10616_v8  ;;  %v10668_v4 = vmul.f32 0.5, %v10630_v5  ;;  %v10557_v1 = vsel %vm10528_vm5, %v16848_v59, 0.0  ;;  %v10571_v2 = vsel %vm10528_vm5, %v16850_v57, 0.0 }
 0xc4e   :  { %v10667_v3 = vmul.f32 0.5, %v10623_v63  ;;  %v10669_v62 = vmul.f32 0.5, %v10637_v60  ;;  %v10558_v9 = vrot.slane %v10557_v1, 4  ;;  %v10572_v10 = vrot.slane %v10571_v2, 4 }
 0xc4f   :  { %v10674_v12 = vadd.f32 1e-05, %v10666_v29  ;;  %v10676_v7 = vadd.f32 1e-05, %v10668_v4  ;;  %v10564_v13 = vsel %vm10528_vm5, %v16852_v6, 0.0  ;;  %v10578_v35 = vsel %vm10528_vm5, %v16854_v61, 0.0 }
 0xc50   :  { %v10675_v14 = vadd.f32 1e-05, %v10667_v3  ;;  %v10677_v15 = vadd.f32 1e-05, %v10669_v62  ;;  %v10559_v25 = vadd.f32 %v10558_v9, %v10557_v1  ;;  %v10573_v17 = vadd.f32 %v10572_v10, %v10571_v2 }
 0xc51   :  { %15562 = vrsqrt.f32 %v10674_v12  ;;  %v10565_v21 = vrot.slane %v10564_v13, 4  ;;  %v10579_v18 = vrot.slane %v10578_v35, 4  ;;  %v10703_v46 = vrot.slane %v16864_v33, %v16783_v31 }
 0xc52   :  { %15564 = vrsqrt.f32 %v10676_v7  ;;  %v10560_v0 = vrot.slane %v10559_v25, 2  ;;  %v10574_v24 = vrot.slane %v10573_v17, 2  ;;  %v10753_v47 = vrot.slane %v16866_v34, %v16783_v31 }
 0xc53   :  { %15566 = vrsqrt.f32 %v10675_v14  ;;  %v10566_v28 = vadd.f32 %v10565_v21, %v10564_v13  ;;  %v10580_v36 = vadd.f32 %v10579_v18, %v10578_v35  ;;  %v10827_v19 = vrot.slane %v16868_v41, %v16783_v31 }
 0xc54   :  { %15568 = vrsqrt.f32 %v10677_v15  ;;  %v10561_v38 = vadd.f32 %v10560_v0, %v10559_v25  ;;  %v10575_v39 = vadd.f32 %v10574_v24, %v10573_v17  ;;  %v10711_v50 = vrot.slane %v16864_v33, %v16786_v20 }
 0xc55   :  { %v10567_v40 = vrot.slane %v10566_v28, 2  ;;  %v10581_v48 = vrot.slane %v10580_v36, 2  ;;  %v10761_v56 = vrot.slane %v16866_v34, %v16786_v20  ;;  %v10707_v54 = vrot.slane %v16864_v33, %v16791_v22 }
 0xc56   :  { %v10562_v43 = vrot.slane %v10561_v38, 1  ;;  %v10576_v45 = vrot.slane %v10575_v39, 1  ;;  %v10757_v5 = vrot.slane %v16866_v34, %v16791_v22  ;;  %v10831_v58 = vrot.slane %v16868_v41, %v16791_v22 }
 0xc57   :  { %v10568_v52 = vadd.f32 %v10567_v40, %v10566_v28  ;;  %v10582_v49 = vadd.f32 %v10581_v48, %v10580_v36  ;;  %v10715_v60 = vrot.slane %v16864_v33, %v16794_v23  ;;  %v10765_v29 = vrot.slane %v16866_v34, %v16794_v23 }
 0xc58   :  { %v10563_v51 = vadd.f32 %v10562_v43, %v10561_v38  ;;  %v10577_v26 = vadd.f32 %v10576_v45, %v10575_v39  ;;  %v10835_v22 = vrot.slane %v16868_v41, %v16786_v20  ;;  %v10839_v35 = vrot.slane %v16868_v41, %v16794_v23 }
 0xc59   :  { %v10569_v55 = vrot.slane %v10568_v52, 1  ;;  %v10583_v8 = vrot.slane %v10582_v49, 1 }
 0xc5a   :  { %v10590_v31 = vmul.f32 0.5, %v10563_v51  ;;  %v10592_v27 = vmul.f32 0.5, %v10577_v26 }
 0xc5b   :  { %v15563_v63 = vpop.eup %15562  ;;  %v10570_v4 = vadd.f32 %v10569_v55, %v10568_v52  ;;  %v10584_v1 = vadd.f32 %v10583_v8, %v10582_v49 }
 0xc5c   :  { %v15565_v2 = vpop.eup %15564  ;;  %v10690_v3 = vmul.f32 %v15563_v63, %v16808_v44  ;;  %v16892_v62 = vsub.f32 %v16848_v59, %v10590_v31  ;;  %v16895_v9 = vsub.f32 %v16850_v57, %v10592_v27 }
 0xc5d   :  { %v15567_v10 = vpop.eup %15566  ;;  %v10692_v12 = vmul.f32 %v15565_v2, %v16810_v53  ;;  %v10591_v7 = vmul.f32 0.5, %v10570_v4  ;;  %v10593_v13 = vmul.f32 0.5, %v10584_v1 }
 0xc5e   :  { %v15569_v14 = vpop.eup %15568  ;;  %v10740_v15 = vmul.f32 %v10703_v46, %v10690_v3  ;;  %v10691_v44 = vmul.f32 %v15567_v10, %v16812_v16  ;;  %v10606_v59 = vmul.f32 %v16892_v62, %v16892_v62  ;;  %v10608_v57 = vmul.f32 %v16895_v9, %v16895_v9 }
 0xc5f   :  { %v10742_v25 = vmul.f32 %v10711_v50, %v10692_v12  ;;  %v10693_v20 = vmul.f32 %v15569_v14, %v16814_v11  ;;  %v16909_v53 = vsub.f32 %v16852_v6, %v10591_v7  ;;  %v16912_v17 = vsub.f32 %v16854_v61, %v10593_v13 }
 0xc60   :  { %v10790_v23 = vadd.f32 %v10753_v47, %v10740_v15  ;;  %v10741_v21 = vmul.f32 %v10707_v54, %v10691_v44  ;;  %v10638_v18 = vsel %vm10528_vm5, %v10606_v59, 0.0  ;;  %v10652_v16 = vsel %vm10528_vm5, %v10608_v57, 0.0 }
 0xc61   :  { %v10792_v0 = vadd.f32 %v10761_v56, %v10742_v25  ;;  %v10743_v24 = vmul.f32 %v10715_v60, %v10693_v20  ;;  %v10639_v28 = vrot.slane %v10638_v18, 4  ;;  %v10653_v36 = vrot.slane %v10652_v16, 4 }
 0xc62   :  { %vm10798_vm6 = vcmp.ge.f32.partialorder %v10790_v23, 0.0  ;;  %v10806_v38 = vmul.f32 0.2, %v10790_v23  ;;  %v10791_v39 = vadd.f32 %v10757_v5, %v10741_v21  ;;  %v10607_v11 = vmul.f32 %v16909_v53, %v16909_v53 }
 0xc63   :  { %vm10800_vm7 = vcmp.ge.f32.partialorder %v10792_v0, 0.0  ;;  %v10808_v6 = vmul.f32 0.2, %v10792_v0  ;;  %v10793_v61 = vadd.f32 %v10765_v29, %v10743_v24  ;;  %v10640_v40 = vadd.f32 %v10639_v28, %v10638_v18 }
 0xc64   :  { %v10814_v48 = vsel %vm10798_vm6, %v10790_v23, %v10806_v38  ;;  %vm10799_vm8 = vcmp.ge.f32.partialorder %v10791_v39, 0.0  ;;  %v10807_v43 = vmul.f32 0.2, %v10791_v39  ;;  %v10654_v45 = vadd.f32 %v10653_v36, %v10652_v16 }
 0xc65   :  { %v10864_v46 = vmul.f32 %v10827_v19, %v10814_v48  ;;  %v10816_v47 = vsel %vm10800_vm7, %v10792_v0, %v10808_v6  ;;  %vm10801_vm9 = vcmp.ge.f32.partialorder %v10793_v61, 0.0  ;;  %v10809_v52 = vmul.f32 0.2, %v10793_v61 }
 0xc66   :  { %v10815_v49 = vsel %vm10799_vm8, %v10791_v39, %v10807_v43  ;;  %v10641_v50 = vrot.slane %v10640_v40, 2  ;;  %v10655_v51 = vrot.slane %v10654_v45, 2  ;;  %v10645_v26 = vsel %vm10528_vm5, %v10607_v11, 0.0 }
 0xc67   :  { %v10865_v56 = vmul.f32 %v10831_v58, %v10815_v49  ;;  %v10646_v54 = vrot.slane %v10645_v26, 4  ;;  %v10609_v55 = vmul.f32 %v16912_v17, %v16912_v17  ;;  %v10817_v8 = vsel %vm10801_vm9, %v10793_v61, %v10809_v52 }
 0xc68   :  { %v10642_v5 = vadd.f32 %v10641_v50, %v10640_v40  ;;  %v10656_v31 = vadd.f32 %v10655_v51, %v10654_v45  ;;  %v10866_v27 = vmul.f32 %v10835_v22, %v10816_v47  ;;  %v10867_v63 = vmul.f32 %v10839_v35, %v10817_v8 }
 0xc69   :  { %v10647_v60 = vadd.f32 %v10646_v54, %v10645_v26  ;;  %v10659_v19 = vsel %vm10528_vm5, %v10609_v55, 0.0  ;;  %v10872_v29 = vsel %vm10528_vm5, %v10864_v46, 0.0  ;;  %v10873_v4 = vsel %vm10528_vm5, %v10865_v56, 0.0 }
 0xc6a   :  { %v10643_v1 = vrot.slane %v10642_v5, 1  ;;  %v10657_v2 = vrot.slane %v10656_v31, 1  ;;  %v10660_v3 = vrot.slane %v10659_v19, 4  ;;  %v10874_v58 = vadd.f32 %v10873_v4, %v10872_v29 }
 0xc6b   :  { %v10648_v10 = vrot.slane %v10647_v60, 2  ;;  %v10875_v12 = vsel %vm10528_vm5, %v10866_v27, 0.0  ;;  %v10877_v35 = vsel %vm10528_vm5, %v10867_v63, 0.0  ;;  %v10719_v11 = vrot.slane %v16864_v33, %v16829_v30 }
 0xc6c   :  { %v10644_v7 = vadd.f32 %v10643_v1, %v10642_v5  ;;  %v10658_v13 = vadd.f32 %v10657_v2, %v10656_v31  ;;  %v10661_v14 = vadd.f32 %v10660_v3, %v10659_v19  ;;  %v10876_v15 = vadd.f32 %v10875_v12, %v10874_v58 }
 0xc6d   :  { %v10649_v22 = vadd.f32 %v10648_v10, %v10647_v60  ;;  %v10727_v61 = vrot.slane %v16864_v33, %v16832_v32  ;;  %v10769_v43 = vrot.slane %v16866_v34, %v16829_v30  ;;  %v10777_v46 = vrot.slane %v16866_v34, %v16832_v32 }
 0xc6e   :  { %v10670_v44 = vmul.f32 0.5, %v10644_v7  ;;  %v10672_v59 = vmul.f32 0.5, %v10658_v13  ;;  %v10662_v57 = vrot.slane %v10661_v14, 2  ;;  %v10878_v25 = vadd.f32 %v10877_v35, %v10876_v15 }
 0xc6f   :  { %v10650_v20 = vrot.slane %v10649_v22, 1  ;;  %v10723_v49 = vrot.slane %v16864_v33, %v16835_v42  ;;  %v10843_v54 = vrot.slane %v16868_v41, %v16829_v30  ;;  %v10731_v55 = vrot.slane %v16864_v33, %v16838_v37 }
 0xc70   :  { %v10678_v23 = vadd.f32 1e-05, %v10670_v44  ;;  %v10680_v21 = vadd.f32 1e-05, %v10672_v59  ;;  %v10663_v18 = vadd.f32 %v10662_v57, %v10661_v14  ;;  %v10781_v63 = vrot.slane %v16866_v34, %v16838_v37  ;;  %v10994_v59 = vld [vmem:[#allocation3] ss:$0 sm:$0xff] }
 0xc71   :  { %v10651_v16 = vadd.f32 %v10650_v20, %v10649_v22  ;;  %v10847_v30 = vrot.slane %v16868_v41, %v16835_v42  ;;  %v10851_v33 = vrot.slane %v16868_v41, %v16832_v32 }
 0xc72   :  { %15570 = vrsqrt.f32 %v10678_v23  ;;  %v10664_v0 = vrot.slane %v10663_v18, 1 }
 0xc73   :  { %15572 = vrsqrt.f32 %v10680_v21  ;;  %v10671_v24 = vmul.f32 0.5, %v10651_v16 }
 0xc74   :  { %v10665_v28 = vadd.f32 %v10664_v0, %v10663_v18 }
 0xc75   :  { %v10679_v36 = vadd.f32 1e-05, %v10671_v24 }
 0xc76   :  { %v10673_v38 = vmul.f32 0.5, %v10665_v28 }
 0xc77   :  { %15574 = vrsqrt.f32 %v10679_v36 }
 0xc78   :  { %v10681_v39 = vadd.f32 1e-05, %v10673_v38 }
 0xc7a   :  { %15576 = vrsqrt.f32 %v10681_v39 }
 0xc7c   :  { %v15571_v6 = vpop.eup %15570 }
 0xc7d   :  { %v15573_v40 = vpop.eup %15572  ;;  %v10694_v48 = vmul.f32 %v15571_v6, %v16892_v62  ;;  %v10773_v62 = vrot.slane %v16866_v34, %v16835_v42  ;;  %v10855_v34 = vrot.slane %v16868_v41, %v16838_v37 }
 0xc7e   :  { %v10696_v45 = vmul.f32 %v15573_v40, %v16895_v9 }
 0xc7f   :  { %v10744_v47 = vmul.f32 %v10719_v11, %v10694_v48 }
 0xc80   :  { %v10746_v52 = vmul.f32 %v10727_v61, %v10696_v45 }
 0xc81   :  { %v15575_v50 = vpop.eup %15574  ;;  %v10794_v51 = vadd.f32 %v10769_v43, %v10744_v47 }
 0xc82   :  { %v10796_v26 = vadd.f32 %v10777_v46, %v10746_v52  ;;  %v10695_v56 = vmul.f32 %v15575_v50, %v16909_v53 }
 0xc83   :  { %v10810_v9 = vmul.f32 0.2, %v10794_v51  ;;  %vm10802_vm10 = vcmp.ge.f32.partialorder %v10794_v51, 0.0 }
 0xc84   :  { %v15577_v8 = vpop.eup %15576  ;;  %v10745_v5 = vmul.f32 %v10723_v49, %v10695_v56  ;;  %v10812_v31 = vmul.f32 0.2, %v10796_v26  ;;  %vm10804_vm11 = vcmp.ge.f32.partialorder %v10796_v26, 0.0 }
 0xc85   :  { %v10697_v27 = vmul.f32 %v15577_v8, %v16912_v17  ;;  %v10818_v53 = vsel %vm10802_vm10, %v10794_v51, %v10810_v9 }
 0xc86   :  { %v10795_v60 = vadd.f32 %v10773_v62, %v10745_v5  ;;  %v10868_v19 = vmul.f32 %v10843_v54, %v10818_v53  ;;  %v10820_v1 = vsel %vm10804_vm11, %v10796_v26, %v10812_v31 }
 0xc87   :  { %v10747_v29 = vmul.f32 %v10731_v55, %v10697_v27  ;;  %v10870_v7 = vmul.f32 %v10851_v33, %v10820_v1 }
 0xc88   :  { %vm10803_vm12 = vcmp.ge.f32.partialorder %v10795_v60, 0.0  ;;  %v10811_v4 = vmul.f32 0.2, %v10795_v60  ;;  %v10879_v2 = vsel %vm10528_vm5, %v10868_v19, 0.0 }
 0xc89   :  { %v10797_v17 = vadd.f32 %v10781_v63, %v10747_v29  ;;  %v10880_v3 = vadd.f32 %v10879_v2, %v10878_v25  ;;  %v10883_v15 = vsel %vm10528_vm5, %v10870_v7, 0.0 }
 0xc8a   :  { %v10819_v58 = vsel %vm10803_vm12, %v10795_v60, %v10811_v4 }
 0xc8b   :  { %vm10805_vm13 = vcmp.ge.f32.partialorder %v10797_v17, 0.0  ;;  %v10813_v10 = vmul.f32 0.2, %v10797_v17  ;;  %v10869_v12 = vmul.f32 %v10847_v30, %v10819_v58 }
 0xc8d   :  { %v10821_v13 = vsel %vm10805_vm13, %v10797_v17, %v10813_v10  ;;  %v10881_v42 = vsel %vm10528_vm5, %v10869_v12, 0.0 }
 0xc8e   :  { %v10871_v14 = vmul.f32 %v10855_v34, %v10821_v13  ;;  %v10882_v32 = vadd.f32 %v10881_v42, %v10880_v3 }
 0xc90   :  { %v10884_v22 = vadd.f32 %v10883_v15, %v10882_v32  ;;  %v10885_v35 = vsel %vm10528_vm5, %v10871_v14, 0.0 }
 0xc92   :  { %v10886_v44 = vadd.f32 %v10885_v35, %v10884_v22 }
 0xc94   :  { %10887 = vadd.xlane.f32.xlu0 %v10886_v44 }
 0xd21   :  { %v10888_v57 = vpop.xlane.xlu0 %10887 }
 0xd22   :  { %v10896_v37 = vadd.f32 %v10994_v59, %v10888_v57 }
 0xd24   :  { %10898 = vst.msk [vmem:[%s16975_s14] sm:$0x3] %vm10897_vm14, %v10896_v37 }
 0xd25   :  { %10903 = vsyncpa [#allocation5], 1 }
 0xd26   :  { %10904 = vsyncpa [#allocation7], 1 }
 0xd27   :  { %10905 = vsyncpa [#allocation10], 1 }
 0xd28   :  { %10906 = vsyncpa [#allocation13], 1 }
 0xd29   :  { %10907 = vsyncpa [#allocation16], 1 }
 0xd2a   :  { %10908 = vsyncpa [#allocation19], 1 }
 0xd2b   :  { %10909 = vsyncpa [#allocation22], 1 }

</bundles_post_ra>
